<compile_context>
chip_gen: v7x
topology: tpu7x:2x2x1
jax: 0.10.0
libtpu: 0.0.40
codegen_flags: <defaults>
</compile_context>

<pallas_src>
import jax
import jax.numpy as jnp
from jax import lax
from jax.experimental import pallas as pl
from jax.experimental.pallas import tpu as pltpu

BN_EPS = 1e-5


def _vmem_limit_bytes():
    # ~half of physical VMEM: 64 MiB on v5e/v6e (128 MiB phys), 32 MiB on v7x (64 MiB).
    try:
        cap = int(pltpu.get_tpu_info().vmem_capacity_bytes)
        if cap > 0:
            return min(cap // 2, 100 * 1024 * 1024)
    except Exception:
        pass
    return 32 * 1024 * 1024


VMEM_LIMIT_BYTES = _vmem_limit_bytes()
_MAX_TM = 2048 if VMEM_LIMIT_BYTES >= 48 * 1024 * 1024 else 1024


def _compiler_params(*semantics):
    return pltpu.CompilerParams(dimension_semantics=tuple(semantics),
                                vmem_limit_bytes=VMEM_LIMIT_BYTES)


def _largest_divisor(n, limit, multiple_of=1):
    """Largest divisor of n that is <= limit and a multiple of `multiple_of`."""
    limit = max(1, min(n, limit))
    for d in range(limit, 0, -1):
        if n % d == 0 and d % multiple_of == 0:
            return d
    return None


# ---------------------------------------------------------------------------
# Kernel A: NCHW->NHWC fused 1x1 conv (matmul) + per-tile BN partial stats.
# ---------------------------------------------------------------------------
def _t_mm_stats_kernel(x_ref, w_ref, y_ref, s0_ref, s1_ref):
    # x_ref : (1, Cin, TM) f32  -- untransposed NCHW pixels, Cin on sublanes
    # w_ref : (Cin, Cout) bf16
    # y_ref : (1, TM, Cout) bf16 pre-BN conv1 output (channels-last)
    # s*_ref: (1, 1, 1, Cout) f32 per-tile (sum, sum-of-squares) over pixels
    xt = x_ref[0].astype(jnp.bfloat16)                               # (Cin, TM)
    y = lax.dot_general(xt, w_ref[...],
                        dimension_numbers=(((0,), (0,)), ((), ())),
                        preferred_element_type=jnp.float32)          # (TM, Cout)
    y_ref[0] = y.astype(jnp.bfloat16)
    s0_ref[...] = jnp.sum(y, axis=0, keepdims=True).reshape(s0_ref.shape)
    s1_ref[...] = jnp.sum(y * y, axis=0, keepdims=True).reshape(s1_ref.shape)


def conv1_fused_transpose(x_nc_hw, w_bf16, *, tm):
    n, cin, hw = x_nc_hw.shape
    cout = w_bf16.shape[1]
    g = hw // tm
    return pl.pallas_call(
        _t_mm_stats_kernel,
        out_shape=(jax.ShapeDtypeStruct((n, hw, cout), jnp.bfloat16),
                   jax.ShapeDtypeStruct((n, g, 1, cout), jnp.float32),
                   jax.ShapeDtypeStruct((n, g, 1, cout), jnp.float32)),
        grid=(n, g),
        in_specs=[pl.BlockSpec((1, cin, tm), lambda b, i: (b, 0, i)),
                  pl.BlockSpec((cin, cout), lambda b, i: (0, 0))],
        out_specs=(pl.BlockSpec((1, tm, cout), lambda b, i: (b, i, 0)),
                   pl.BlockSpec((1, 1, 1, cout), lambda b, i: (b, i, 0, 0)),
                   pl.BlockSpec((1, 1, 1, cout), lambda b, i: (b, i, 0, 0))),
        compiler_params=_compiler_params("parallel", "parallel"),
    )(x_nc_hw, w_bf16)


# ---------------------------------------------------------------------------
# Kernel B: fused [BN + ReLU] -> ConvTranspose2d(3, s=2, p=1, op=1) as a
# polyphase decomposition (9 MXU matmuls on the un-dilated input) + partials.
# ---------------------------------------------------------------------------
def _deconv_bn_relu_stats_kernel(y_ref, yh_ref, wf_ref, sc_ref, sh_ref,
                                 z_ref, s0_ref, s1_ref, buf_ref):
    # y_ref : (1, TH, W, C) bf16  pre-BN conv1 rows [t*TH, (t+1)*TH)
    # yh_ref: (1, 1,  W, C) bf16  one-row bottom halo (clamped at the image edge)
    # wf_ref: (3, 3, C, C) bf16   spatially flipped deconv weight (HWIO)
    # z_ref : (1, 2, 2, TH, W, C) bf16 phase-separated pre-BN output:
    #         z[0, r, s, i, j] == deconv_out[2*(t*TH+i)+r, 2*j+s]
    # s*_ref: (1, 1, 1, C) f32    per-tile (sum, sum-of-squares)
    # buf_ref: (TH+1, W+1, C) bf16 scratch: BN'd tile + halo row + zero column
    _, th, w, c = y_ref.shape
    t = pl.program_id(1)
    is_last = t == pl.num_programs(1) - 1

    sc = sc_ref[...]                                        # (1, C) f32
    sh = sh_ref[...]
    # Stage-1 BatchNorm + ReLU fused here (scale/shift folded from batch stats;
    # elementwise math kept in f32 -- v5e VPU has no bf16 ALU).
    a = jnp.maximum(y_ref[0].astype(jnp.float32) * sc + sh, 0.0)       # (TH, W, C)
    halo = jnp.maximum(yh_ref[0].astype(jnp.float32) * sc + sh, 0.0)   # (1, W, C)
    halo = jnp.where(is_last, 0.0, halo)    # no row below the image -> zeros

    # Pre-padded scratch so the shifted (i+1, j+1) taps are plain slices.
    buf_ref[0:th, 0:w, :] = a.astype(jnp.bfloat16)
    buf_ref[th:th + 1, 0:w, :] = halo.astype(jnp.bfloat16)
    buf_ref[:, w:w + 1, :] = jnp.zeros((th + 1, 1, c), jnp.bfloat16)

    x00 = buf_ref[0:th, 0:w, :].reshape(th * w, c)        # x[i  , j  ]
    x01 = buf_ref[0:th, 1:w + 1, :].reshape(th * w, c)    # x[i  , j+1]
    x10 = buf_ref[1:th + 1, 0:w, :].reshape(th * w, c)    # x[i+1, j  ]
    x11 = buf_ref[1:th + 1, 1:w + 1, :].reshape(th * w, c)  # x[i+1, j+1]

    def tap(xs, kh, kw):
        return jnp.dot(xs, wf_ref[kh, kw], preferred_element_type=jnp.float32)

    # Output parity (r, s): only taps landing on real (odd) dilated rows/cols
    # contribute -- 9 matmuls total, no zero-dilated input ever materialized.
    p00 = tap(x00, 1, 1)
    p01 = tap(x00, 1, 0) + tap(x01, 1, 2)
    p10 = tap(x00, 0, 1) + tap(x10, 2, 1)
    p11 = tap(x00, 0, 0) + tap(x01, 0, 2) + tap(x10, 2, 0) + tap(x11, 2, 2)

    z_ref[0, 0, 0] = p00.astype(jnp.bfloat16).reshape(th, w, c)
    z_ref[0, 0, 1] = p01.astype(jnp.bfloat16).reshape(th, w, c)
    z_ref[0, 1, 0] = p10.astype(jnp.bfloat16).reshape(th, w, c)
    z_ref[0, 1, 1] = p11.astype(jnp.bfloat16).reshape(th, w, c)

    s0 = (jnp.sum(p00, axis=0, keepdims=True)
          + jnp.sum(p01, axis=0, keepdims=True)
          + jnp.sum(p10, axis=0, keepdims=True)
          + jnp.sum(p11, axis=0, keepdims=True))
    s1 = (jnp.sum(p00 * p00, axis=0, keepdims=True)
          + jnp.sum(p01 * p01, axis=0, keepdims=True)
          + jnp.sum(p10 * p10, axis=0, keepdims=True)
          + jnp.sum(p11 * p11, axis=0, keepdims=True))
    s0_ref[...] = s0.reshape(s0_ref.shape)
    s1_ref[...] = s1.reshape(s1_ref.shape)


def deconv_bn_relu_stats(y_nhwc, scale, shift, wf_bf16, *, th):
    n, h, w, c = y_nhwc.shape
    t = h // th
    return pl.pallas_call(
        _deconv_bn_relu_stats_kernel,
        out_shape=(jax.ShapeDtypeStruct((n, 2, 2, h, w, c), jnp.bfloat16),
                   jax.ShapeDtypeStruct((n, t, 1, c), jnp.float32),
                   jax.ShapeDtypeStruct((n, t, 1, c), jnp.float32)),
        grid=(n, t),
        in_specs=[
            pl.BlockSpec((1, th, w, c), lambda b, i: (b, i, 0, 0)),
            # one-row bottom halo; clamped at the image edge, zeroed in-kernel
            pl.BlockSpec((1, 1, w, c),
                         lambda b, i: (b, jnp.minimum((i + 1) * th, h - 1), 0, 0)),
            pl.BlockSpec((3, 3, c, c), lambda b, i: (0, 0, 0, 0)),
            pl.BlockSpec((1, c), lambda b, i: (0, 0)),
            pl.BlockSpec((1, c), lambda b, i: (0, 0)),
        ],
        out_specs=(
            pl.BlockSpec((1, 2, 2, th, w, c), lambda b, i: (b, 0, 0, i, 0, 0)),
            pl.BlockSpec((1, 1, 1, c), lambda b, i: (b, i, 0, 0)),
            pl.BlockSpec((1, 1, 1, c), lambda b, i: (b, i, 0, 0)),
        ),
        scratch_shapes=[pltpu.VMEM((th + 1, w + 1, c), jnp.bfloat16)],
        compiler_params=_compiler_params("parallel", "parallel"),
    )(y_nhwc, y_nhwc, wf_bf16, scale, shift)


# ---------------------------------------------------------------------------
# Kernel C: fused [BN + ReLU] -> 1x1 conv matmul -> BN partials.
# ---------------------------------------------------------------------------
def _bn_relu_mm_stats_kernel(x_ref, sc_ref, sh_ref, w_ref, y_ref, s0_ref, s1_ref):
    a = jnp.maximum(x_ref[...].astype(jnp.float32) * sc_ref[...] + sh_ref[...], 0.0)
    y = jnp.dot(a.astype(jnp.bfloat16), w_ref[...],
                preferred_element_type=jnp.float32)
    y_ref[...] = y
    s0_ref[...] = jnp.sum(y, axis=0, keepdims=True).reshape(s0_ref.shape)
    s1_ref[...] = jnp.sum(y * y, axis=0, keepdims=True).reshape(s1_ref.shape)


def bn_relu_matmul_stats(x2d, scale, shift, w_bf16, *, tm):
    m, cin = x2d.shape
    cout = w_bf16.shape[1]
    g = m // tm
    return pl.pallas_call(
        _bn_relu_mm_stats_kernel,
        out_shape=(jax.ShapeDtypeStruct((m, cout), jnp.float32),
                   jax.ShapeDtypeStruct((g, 1, cout), jnp.float32),
                   jax.ShapeDtypeStruct((g, 1, cout), jnp.float32)),
        grid=(g,),
        in_specs=[pl.BlockSpec((tm, cin), lambda i: (i, 0)),
                  pl.BlockSpec((1, cin), lambda i: (0, 0)),
                  pl.BlockSpec((1, cin), lambda i: (0, 0)),
                  pl.BlockSpec((cin, cout), lambda i: (0, 0))],
        out_specs=(pl.BlockSpec((tm, cout), lambda i: (i, 0)),
                   pl.BlockSpec((1, 1, cout), lambda i: (i, 0, 0)),
                   pl.BlockSpec((1, 1, cout), lambda i: (i, 0, 0))),
        compiler_params=_compiler_params("parallel"),
    )(x2d, scale, shift, w_bf16)


# ---------------------------------------------------------------------------
# Kernel D: final BN(scale/shift) + ReLU.
# ---------------------------------------------------------------------------
def _bn_relu_kernel(x_ref, sc_ref, sh_ref, o_ref):
    o_ref[...] = jnp.maximum(x_ref[...] * sc_ref[...] + sh_ref[...], 0.0)


def bn_relu(x2d, scale, shift, *, tm):
    m, c = x2d.shape
    g = m // tm
    return pl.pallas_call(
        _bn_relu_kernel,
        out_shape=jax.ShapeDtypeStruct((m, c), jnp.float32),
        grid=(g,),
        in_specs=[pl.BlockSpec((tm, c), lambda i: (i, 0)),
                  pl.BlockSpec((1, c), lambda i: (0, 0)),
                  pl.BlockSpec((1, c), lambda i: (0, 0))],
        out_specs=pl.BlockSpec((tm, c), lambda i: (i, 0)),
        compiler_params=_compiler_params("parallel"),
    )(x2d, scale, shift)


# ---------------------------------------------------------------------------
# BatchNorm (train-mode) folding + DecoderBlock forward.
# ---------------------------------------------------------------------------
def _bn_fold(s0, s1, count, gamma, beta):
    """Fold per-tile (sum, sum-sq) partials + affine params into scale/shift.

    Biased variance over all N*H*W pixels per channel -- matches a freshly
    constructed (train-mode) PyTorch BatchNorm2d forward.
    """
    c = s0.shape[-1]
    ssum = jnp.sum(s0.reshape(-1, c), axis=0)
    ssq = jnp.sum(s1.reshape(-1, c), axis=0)
    mean = ssum / count
    var = jnp.maximum(ssq / count - mean * mean, 0.0)
    scale = gamma * lax.rsqrt(var + BN_EPS)
    shift = beta - mean * scale
    return scale.reshape(1, c), shift.reshape(1, c)


def init_params(key, in_channels, n_filters):
    """Parameters in kernel-friendly layouts.

    Conv/deconv biases are intentionally omitted: under train-mode BatchNorm a
    per-channel constant bias cancels exactly, so the forward output is
    numerically unchanged and carrying them would be pure wasted work.
    """
    # TODO(synk): BatchNorm running-stats buffer updates (training-only side
    # effect) are not reproduced; they do not affect the forward output.
    cmid = in_channels // 4
    ks = jax.random.split(key, 9)
    rnd = lambda k, s: 0.1 * jax.random.normal(k, s, jnp.float32)
    return {
        # conv1: torch weight (cmid, Cin, 1, 1) stored transposed as (Cin, cmid)
        "w1": rnd(ks[0], (in_channels, cmid)),
        "g1": 1.0 + rnd(ks[1], (cmid,)), "be1": rnd(ks[2], (cmid,)),
        # deconv2: torch ConvTranspose2d weight layout (Cin, Cout, 3, 3)
        "w2": rnd(ks[3], (cmid, cmid, 3, 3)),
        "g2": 1.0 + rnd(ks[4], (cmid,)), "be2": rnd(ks[5], (cmid,)),
        # conv3: torch weight (n_filters, cmid, 1, 1) stored as (cmid, n_filters)
        "w3": rnd(ks[6], (cmid, n_filters)),
        "g3": 1.0 + rnd(ks[7], (n_filters,)), "be3": rnd(ks[8], (n_filters,)),
    }


def decoder_block(x_nchw, params):
    n, cin, h, w = x_nchw.shape
    cmid = params["w1"].shape[1]
    cout = params["w3"].shape[1]
    hw = h * w
    m2 = n * 4 * hw

    # --- tile selection ---------------------------------------------------
    # Kernel A contracts Cin with the pixel tile on the lane dim, so the tile
    # must be a multiple of 128 (or the full pixel extent).
    tm1 = _largest_divisor(hw, _MAX_TM, multiple_of=128) or hw
    # Kernels C/D tile pixels on the sublane dim (multiple of 8); cap at m2//2
    # so the "parallel" grid has >=2 points (keeps both v7x TensorCores busy).
    tm2_limit = min(_MAX_TM, max(8, m2 // 2))
    tm2 = (_largest_divisor(m2, tm2_limit, multiple_of=8)
           or _largest_divisor(m2, tm2_limit) or m2)
    # Deconv row tile: as many whole rows as fit a VMEM budget (whole image for
    # real LinkNet50 decoder sizes) so each polyphase matmul has M = TH*W large.
    max_rows = max(1, (6 * 1024 * 1024) // max(1, w * cmid * 40))
    th = _largest_divisor(h, min(h, max_rows)) or h

    # --- weight prep (tiny, one-off) ---------------------------------------
    # bf16 matmul operands; ConvTranspose2d weight (Cin, Cout, kh, kw) ->
    # spatially flipped HWIO so the transposed conv becomes polyphase matmuls.
    w1 = params["w1"].astype(jnp.bfloat16)
    w3 = params["w3"].astype(jnp.bfloat16)
    wf = jnp.transpose(jnp.flip(params["w2"], axis=(2, 3)),
                       (2, 3, 0, 1)).astype(jnp.bfloat16)

    # conv1 (1x1) with the NCHW->NHWC transpose fused into the kernel.
    x3d = x_nchw.reshape(n, cin, hw)                      # free view of NCHW
    y, ps10, ps11 = conv1_fused_transpose(x3d, w1, tm=tm1)
    sc1, sh1 = _bn_fold(ps10, ps11, n * hw, params["g1"], params["be1"])

    # norm1+relu1 fused into deconv2 (polyphase transposed conv) + stats.
    z, ps20, ps21 = deconv_bn_relu_stats(y.reshape(n, h, w, cmid),
                                         sc1, sh1, wf, th=th)
    sc2, sh2 = _bn_fold(ps20, ps21, m2, params["g2"], params["be2"])

    # norm2+relu2 fused into conv3 (1x1) matmul + stats (pixel order agnostic).
    o_pre, ps30, ps31 = bn_relu_matmul_stats(z.reshape(m2, cmid),
                                             sc2, sh2, w3, tm=tm2)
    sc3, sh3 = _bn_fold(ps30, ps31, m2, params["g3"], params["be3"])

    # norm3 + relu3 (kept f32 so the module output carries full precision).
    out2d = bn_relu(o_pre, sc3, sh3, tm=tm2)

    # Phase-separated pixels -> NCHW: out[n, c, 2i+r, 2j+s] = o6[n, r, s, i, j, c].
    # TODO(synk): fuse this sub-pixel interleave + channels-first transpose into
    # the final Pallas pass to save one more HBM round trip; left in XLA to avoid
    # risky in-kernel lane/sublane relayouts at small channel counts.
    o6 = out2d.reshape(n, 2, 2, h, w, cout)
    return jnp.transpose(o6, (0, 5, 3, 1, 4, 2)).reshape(n, cout, 2 * h, 2 * w)


# ---------------------------------------------------------------------------
# Pure-JAX f32 reference (same math as the PyTorch module in train mode).
# ---------------------------------------------------------------------------
def _reference(x_nchw, params):
    hi = jax.lax.Precision.HIGHEST

    def bn_relu_ref(v, g, b):
        mean = jnp.mean(v, axis=(0, 1, 2))
        var = jnp.mean(jnp.square(v - mean), axis=(0, 1, 2))
        return jnp.maximum((v - mean) * jax.lax.rsqrt(var + BN_EPS) * g + b, 0.0)

    x = jnp.transpose(x_nchw, (0, 2, 3, 1))
    y = bn_relu_ref(jnp.einsum("nhwc,cd->nhwd", x, params["w1"], precision=hi),
                    params["g1"], params["be1"])
    n, h, w, c = y.shape
    xp = jnp.zeros((n, 2 * h + 2, 2 * w + 2, c), y.dtype)
    xp = xp.at[:, 1:2 * h:2, 1:2 * w:2, :].set(y)
    w_conv = jnp.transpose(jnp.flip(params["w2"], axis=(2, 3)), (2, 3, 0, 1))
    z = jax.lax.conv_general_dilated(
        xp, w_conv, window_strides=(1, 1), padding="VALID",
        dimension_numbers=("NHWC", "HWIO", "NHWC"), precision=hi)
    z = bn_relu_ref(z, params["g2"], params["be2"])
    o = bn_relu_ref(jnp.einsum("nhwc,cd->nhwd", z, params["w3"], precision=hi),
                    params["g3"], params["be3"])
    return jnp.transpose(o, (0, 3, 1, 2))


if __name__ == "__main__":
    key = jax.random.PRNGKey(0)
    kx, kp = jax.random.split(key)

    N, Cin, H, W = 2, 32, 16, 16
    n_filters = 16
    x = jax.random.normal(kx, (N, Cin, H, W), jnp.float32)
    params = init_params(kp, Cin, n_filters)

    out = jax.block_until_ready(jax.jit(decoder_block)(x, params))

    assert out.shape == (N, n_filters, 2 * H, 2 * W), out.shape
    assert bool(jnp.all(jnp.isfinite(out)))
    assert bool(jnp.all(out >= 0.0))          # trailing ReLU

    # Correctness vs. a pure-JAX f32 reference (kernel matmul operands and the
    # two inter-stage activations are bf16, so tolerate small rounding drift on
    # the O(1) post-BN outputs).
    ref = _reference(x, params)
    max_err = float(jnp.max(jnp.abs(out - ref)))
    mean_err = float(jnp.mean(jnp.abs(out - ref)))
    assert max_err < 0.25, f"max |err| vs reference = {max_err}"
    assert mean_err < 0.02, f"mean |err| vs reference = {mean_err}"

    print("KERNEL_OK")
</pallas_src>

<mosaic_0001>
module attributes {stable_mosaic.version = 11 : i64} {
  func.func @_t_mm_stats_kernel(%arg0: i32, %arg1: i32, %arg2: memref<1x32x256xf32, #tpu.memory_space<vmem>>, %arg3: memref<32x8xbf16, #tpu.memory_space<vmem>>, %arg4: memref<1x256x8xbf16, #tpu.memory_space<vmem>>, %arg5: memref<1x1x1x8xf32, #tpu.memory_space<vmem>>, %arg6: memref<1x1x1x8xf32, #tpu.memory_space<vmem>>) attributes {dimension_semantics = [#tpu.dimension_semantics<parallel>, #tpu.dimension_semantics<parallel>], iteration_bounds = array<i64: 2, 1>, scalar_prefetch = 0 : i64, scratch_operands = 0 : i64, tpu.core_type = #tpu.core_type<tc>, window_params = [{transform_indices = @transform_0, window_bounds = array<i64: 1, 32, 256>}, {pipeline_mode = #tpu.pipeline_mode<synchronous>, transform_indices = @transform_1, window_bounds = array<i64: 32, 8>}, {transform_indices = @transform_2, window_bounds = array<i64: 1, 256, 8>}, {transform_indices = @transform_3, window_bounds = array<i64: 1, 1, 1, 8>}, {transform_indices = @transform_4, window_bounds = array<i64: 1, 1, 1, 8>}]} {
    %c0 = arith.constant 0 : index
    %c0_0 = arith.constant 0 : index
    %c0_1 = arith.constant 0 : index
    %0 = vector.load %arg2[%c0, %c0_0, %c0_1] : memref<1x32x256xf32, #tpu.memory_space<vmem>>, vector<1x32x256xf32>
    %1 = vector.shape_cast %0 : vector<1x32x256xf32> to vector<32x256xf32>
    %2 = arith.truncf %1 : vector<32x256xf32> to vector<32x256xbf16>
    %c0_2 = arith.constant 0 : index
    %c0_3 = arith.constant 0 : index
    %3 = vector.load %arg3[%c0_2, %c0_3] : memref<32x8xbf16, #tpu.memory_space<vmem>>, vector<32x8xbf16>
    %cst = arith.constant dense<0.000000e+00> : vector<256x8xf32>
    %4 = tpu.matmul %2, %3, %cst {dimension_numbers = #tpu.dot_dimension_numbers<[0], [0], [1], [1], [0, 1, 1, 1], [], []>} : vector<32x256xbf16>, vector<32x8xbf16>, vector<256x8xf32> -> vector<256x8xf32>
    %5 = arith.truncf %4 : vector<256x8xf32> to vector<256x8xbf16>
    %c0_4 = arith.constant 0 : index
    %c0_5 = arith.constant 0 : index
    %c0_6 = arith.constant 0 : index
    %6 = vector.load %arg4[%c0_4, %c0_5, %c0_6] : memref<1x256x8xbf16, #tpu.memory_space<vmem>>, vector<1x256x8xbf16>
    %7 = vector.shape_cast %6 : vector<1x256x8xbf16> to vector<256x8xbf16>
    %8 = vector.shape_cast %5 : vector<256x8xbf16> to vector<1x256x8xbf16>
    tpu.vector_store %arg4[%c0_4, %c0_5, %c0_6], %8 {strides = array<i32>} : memref<1x256x8xbf16, #tpu.memory_space<vmem>>, vector<1x256x8xbf16>,
    %cst_7 = arith.constant dense<0.000000e+00> : vector<8xf32>
    %9 = vector.multi_reduction <add>, %4, %cst_7 [0] : vector<256x8xf32> to vector<8xf32>
    %10 = vector.shape_cast %9 : vector<8xf32> to vector<1x8xf32>
    %11 = vector.shape_cast %10 : vector<1x8xf32> to vector<1x1x1x8xf32>
    %c0_8 = arith.constant 0 : index
    %c0_9 = arith.constant 0 : index
    %c0_10 = arith.constant 0 : index
    %c0_11 = arith.constant 0 : index
    %12 = vector.load %arg5[%c0_8, %c0_9, %c0_10, %c0_11] : memref<1x1x1x8xf32, #tpu.memory_space<vmem>>, vector<1x1x1x8xf32>
    tpu.vector_store %arg5[%c0_8, %c0_9, %c0_10, %c0_11], %11 {strides = array<i32>} : memref<1x1x1x8xf32, #tpu.memory_space<vmem>>, vector<1x1x1x8xf32>,
    %13 = arith.mulf %4, %4 : vector<256x8xf32>
    %cst_12 = arith.constant dense<0.000000e+00> : vector<8xf32>
    %14 = vector.multi_reduction <add>, %13, %cst_12 [0] : vector<256x8xf32> to vector<8xf32>
    %15 = vector.shape_cast %14 : vector<8xf32> to vector<1x8xf32>
    %16 = vector.shape_cast %15 : vector<1x8xf32> to vector<1x1x1x8xf32>
    %c0_13 = arith.constant 0 : index
    %c0_14 = arith.constant 0 : index
    %c0_15 = arith.constant 0 : index
    %c0_16 = arith.constant 0 : index
    %17 = vector.load %arg6[%c0_13, %c0_14, %c0_15, %c0_16] : memref<1x1x1x8xf32, #tpu.memory_space<vmem>>, vector<1x1x1x8xf32>
    tpu.vector_store %arg6[%c0_13, %c0_14, %c0_15, %c0_16], %16 {strides = array<i32>} : memref<1x1x1x8xf32, #tpu.memory_space<vmem>>, vector<1x1x1x8xf32>,
    return
  }
  func.func @transform_0(%arg0: i32, %arg1: i32) -> (i32, i32, i32) {
    %c0_i32 = arith.constant 0 : i32
    %c0_i32_0 = arith.constant 0 : i32
    return %arg0, %c0_i32, %arg1 : i32, i32, i32
  }
  func.func @transform_1(%arg0: i32, %arg1: i32) -> (i32, i32) {
    %c0_i32 = arith.constant 0 : i32
    %c0_i32_0 = arith.constant 0 : i32
    %c0_i32_1 = arith.constant 0 : i32
    return %c0_i32, %c0_i32_0 : i32, i32
  }
  func.func @transform_2(%arg0: i32, %arg1: i32) -> (i32, i32, i32) {
    %c0_i32 = arith.constant 0 : i32
    %c0_i32_0 = arith.constant 0 : i32
    return %arg0, %arg1, %c0_i32 : i32, i32, i32
  }
  func.func @transform_3(%arg0: i32, %arg1: i32) -> (i32, i32, i32, i32) {
    %c0_i32 = arith.constant 0 : i32
    %c0_i32_0 = arith.constant 0 : i32
    %c0_i32_1 = arith.constant 0 : i32
    return %arg0, %arg1, %c0_i32, %c0_i32_0 : i32, i32, i32, i32
  }
  func.func @transform_4(%arg0: i32, %arg1: i32) -> (i32, i32, i32, i32) {
    %c0_i32 = arith.constant 0 : i32
    %c0_i32_0 = arith.constant 0 : i32
    %c0_i32_1 = arith.constant 0 : i32
    return %arg0, %arg1, %c0_i32, %c0_i32_0 : i32, i32, i32, i32
  }
}

module attributes {stable_mosaic.version = 11 : i64} {
  func.func @_deconv_bn_relu_stats_kernel(%arg0: i32, %arg1: i32, %arg2: memref<1x16x16x8xbf16, #tpu.memory_space<vmem>>, %arg3: memref<1x1x16x8xbf16, #tpu.memory_space<vmem>>, %arg4: memref<3x3x8x8xbf16, #tpu.memory_space<vmem>>, %arg5: memref<1x8xf32, #tpu.memory_space<vmem>>, %arg6: memref<1x8xf32, #tpu.memory_space<vmem>>, %arg7: memref<1x2x2x16x16x8xbf16, #tpu.memory_space<vmem>>, %arg8: memref<1x1x1x8xf32, #tpu.memory_space<vmem>>, %arg9: memref<1x1x1x8xf32, #tpu.memory_space<vmem>>, %arg10: memref<17x17x8xbf16, #tpu.memory_space<vmem>>) attributes {dimension_semantics = [#tpu.dimension_semantics<parallel>, #tpu.dimension_semantics<parallel>], iteration_bounds = array<i64: 2, 1>, scalar_prefetch = 0 : i64, scratch_operands = 1 : i64, tpu.core_type = #tpu.core_type<tc>, window_params = [{transform_indices = @transform_0, window_bounds = array<i64: 1, 16, 16, 8>}, {transform_indices = @transform_1, window_bounds = array<i64: 1, 1, 16, 8>}, {pipeline_mode = #tpu.pipeline_mode<synchronous>, transform_indices = @transform_2, window_bounds = array<i64: 3, 3, 8, 8>}, {pipeline_mode = #tpu.pipeline_mode<synchronous>, transform_indices = @transform_3, window_bounds = array<i64: 1, 8>}, {pipeline_mode = #tpu.pipeline_mode<synchronous>, transform_indices = @transform_4, window_bounds = array<i64: 1, 8>}, {transform_indices = @transform_5, window_bounds = array<i64: 1, 2, 2, 16, 16, 8>}, {transform_indices = @transform_6, window_bounds = array<i64: 1, 1, 1, 8>}, {transform_indices = @transform_7, window_bounds = array<i64: 1, 1, 1, 8>}]} {
    %c0_i32 = arith.constant 0 : i32
    %0 = arith.cmpi eq, %arg1, %c0_i32 : i32
    %c0 = arith.constant 0 : index
    %c0_0 = arith.constant 0 : index
    %1 = vector.load %arg5[%c0, %c0_0] : memref<1x8xf32, #tpu.memory_space<vmem>>, vector<1x8xf32>
    %c0_1 = arith.constant 0 : index
    %c0_2 = arith.constant 0 : index
    %2 = vector.load %arg6[%c0_1, %c0_2] : memref<1x8xf32, #tpu.memory_space<vmem>>, vector<1x8xf32>
    %c0_3 = arith.constant 0 : index
    %c0_4 = arith.constant 0 : index
    %c0_5 = arith.constant 0 : index
    %c0_6 = arith.constant 0 : index
    %3 = vector.load %arg2[%c0_3, %c0_4, %c0_5, %c0_6] : memref<1x16x16x8xbf16, #tpu.memory_space<vmem>>, vector<1x16x16x8xbf16>
    %4 = vector.shape_cast %3 : vector<1x16x16x8xbf16> to vector<16x16x8xbf16>
    %5 = arith.extf %4 : vector<16x16x8xbf16> to vector<16x16x8xf32>
    %6 = vector.shape_cast %1 : vector<1x8xf32> to vector<1x1x8xf32>
    %7 = vector.broadcast %6 : vector<1x1x8xf32> to vector<16x16x8xf32>
    %8 = arith.mulf %5, %7 : vector<16x16x8xf32>
    %9 = vector.shape_cast %2 : vector<1x8xf32> to vector<1x1x8xf32>
    %10 = vector.broadcast %9 : vector<1x1x8xf32> to vector<16x16x8xf32>
    %11 = arith.addf %8, %10 : vector<16x16x8xf32>
    %cst = arith.constant 0.000000e+00 : f32
    %12 = vector.broadcast %cst : f32 to vector<16x16x8xf32>
    %13 = arith.maximumf %11, %12 : vector<16x16x8xf32>
    %c0_7 = arith.constant 0 : index
    %c0_8 = arith.constant 0 : index
    %c0_9 = arith.constant 0 : index
    %c0_10 = arith.constant 0 : index
    %14 = vector.load %arg3[%c0_7, %c0_8, %c0_9, %c0_10] : memref<1x1x16x8xbf16, #tpu.memory_space<vmem>>, vector<1x1x16x8xbf16>
    %15 = vector.shape_cast %14 : vector<1x1x16x8xbf16> to vector<1x16x8xbf16>
    %16 = arith.extf %15 : vector<1x16x8xbf16> to vector<1x16x8xf32>
    %17 = vector.shape_cast %1 : vector<1x8xf32> to vector<1x1x8xf32>
    %18 = vector.broadcast %17 : vector<1x1x8xf32> to vector<1x16x8xf32>
    %19 = arith.mulf %16, %18 : vector<1x16x8xf32>
    %20 = vector.shape_cast %2 : vector<1x8xf32> to vector<1x1x8xf32>
    %21 = vector.broadcast %20 : vector<1x1x8xf32> to vector<1x16x8xf32>
    %22 = arith.addf %19, %21 : vector<1x16x8xf32>
    %cst_11 = arith.constant 0.000000e+00 : f32
    %23 = vector.broadcast %cst_11 : f32 to vector<1x16x8xf32>
    %24 = arith.maximumf %22, %23 : vector<1x16x8xf32>
    %cst_12 = arith.constant 0.000000e+00 : f32
    %25 = vector.broadcast %cst_12 : f32 to vector<1x16x8xf32>
    %26 = arith.select %0, %25, %24 : vector<1x16x8xf32>
    %27 = arith.truncf %13 : vector<16x16x8xf32> to vector<16x16x8xbf16>
    %c0_13 = arith.constant 0 : index
    %c0_14 = arith.constant 0 : index
    %c0_15 = arith.constant 0 : index
    %28 = vector.load %arg10[%c0_13, %c0_14, %c0_15] : memref<17x17x8xbf16, #tpu.memory_space<vmem>>, vector<16x16x8xbf16>
    tpu.vector_store %arg10[%c0_13, %c0_14, %c0_15], %27 {strides = array<i32>} : memref<17x17x8xbf16, #tpu.memory_space<vmem>>, vector<16x16x8xbf16>,
    %29 = arith.truncf %26 : vector<1x16x8xf32> to vector<1x16x8xbf16>
    %c16 = arith.constant 16 : index
    %c0_16 = arith.constant 0 : index
    %c0_17 = arith.constant 0 : index
    %30 = vector.load %arg10[%c16, %c0_16, %c0_17] : memref<17x17x8xbf16, #tpu.memory_space<vmem>>, vector<1x16x8xbf16>
    tpu.vector_store %arg10[%c16, %c0_16, %c0_17], %29 {strides = array<i32>} : memref<17x17x8xbf16, #tpu.memory_space<vmem>>, vector<1x16x8xbf16>,
    %cst_18 = arith.constant 0.000000e+00 : bf16
    %31 = vector.broadcast %cst_18 : bf16 to vector<17x1x8xbf16>
    %c0_19 = arith.constant 0 : index
    %c16_20 = arith.constant 16 : index
    %c0_21 = arith.constant 0 : index
    %32 = vector.load %arg10[%c0_19, %c16_20, %c0_21] : memref<17x17x8xbf16, #tpu.memory_space<vmem>>, vector<17x1x8xbf16>
    tpu.vector_store %arg10[%c0_19, %c16_20, %c0_21], %31 {strides = array<i32>} : memref<17x17x8xbf16, #tpu.memory_space<vmem>>, vector<17x1x8xbf16>,
    %c0_22 = arith.constant 0 : index
    %c0_23 = arith.constant 0 : index
    %c0_24 = arith.constant 0 : index
    %33 = vector.load %arg10[%c0_22, %c0_23, %c0_24] : memref<17x17x8xbf16, #tpu.memory_space<vmem>>, vector<16x16x8xbf16>
    %34 = vector.shape_cast %33 : vector<16x16x8xbf16> to vector<256x8xbf16>
    %c0_25 = arith.constant 0 : index
    %c1 = arith.constant 1 : index
    %c0_26 = arith.constant 0 : index
    %35 = vector.load %arg10[%c0_25, %c1, %c0_26] : memref<17x17x8xbf16, #tpu.memory_space<vmem>>, vector<16x16x8xbf16>
    %36 = vector.shape_cast %35 : vector<16x16x8xbf16> to vector<256x8xbf16>
    %c1_27 = arith.constant 1 : index
    %c0_28 = arith.constant 0 : index
    %c0_29 = arith.constant 0 : index
    %37 = vector.load %arg10[%c1_27, %c0_28, %c0_29] : memref<17x17x8xbf16, #tpu.memory_space<vmem>>, vector<16x16x8xbf16>
    %38 = vector.shape_cast %37 : vector<16x16x8xbf16> to vector<256x8xbf16>
    %c1_30 = arith.constant 1 : index
    %c1_31 = arith.constant 1 : index
    %c0_32 = arith.constant 0 : index
    %39 = vector.load %arg10[%c1_30, %c1_31, %c0_32] : memref<17x17x8xbf16, #tpu.memory_space<vmem>>, vector<16x16x8xbf16>
    %40 = vector.shape_cast %39 : vector<16x16x8xbf16> to vector<256x8xbf16>
    %c1_33 = arith.constant 1 : index
    %c1_34 = arith.constant 1 : index
    %c0_35 = arith.constant 0 : index
    %c0_36 = arith.constant 0 : index
    %41 = vector.load %arg4[%c1_33, %c1_34, %c0_35, %c0_36] : memref<3x3x8x8xbf16, #tpu.memory_space<vmem>>, vector<1x1x8x8xbf16>
    %42 = vector.shape_cast %41 : vector<1x1x8x8xbf16> to vector<8x8xbf16>
    %cst_37 = arith.constant dense<0.000000e+00> : vector<256x8xf32>
    %43 = tpu.matmul %34, %42, %cst_37 {dimension_numbers = #tpu.dot_dimension_numbers<[1], [0], [0], [1], [0, 0, 1, 1], [], []>} : vector<256x8xbf16>, vector<8x8xbf16>, vector<256x8xf32> -> vector<256x8xf32>
    %c1_38 = arith.constant 1 : index
    %c0_39 = arith.constant 0 : index
    %c0_40 = arith.constant 0 : index
    %c0_41 = arith.constant 0 : index
    %44 = vector.load %arg4[%c1_38, %c0_39, %c0_40, %c0_41] : memref<3x3x8x8xbf16, #tpu.memory_space<vmem>>, vector<1x1x8x8xbf16>
    %45 = vector.shape_cast %44 : vector<1x1x8x8xbf16> to vector<8x8xbf16>
    %cst_42 = arith.constant dense<0.000000e+00> : vector<256x8xf32>
    %46 = tpu.matmul %34, %45, %cst_42 {dimension_numbers = #tpu.dot_dimension_numbers<[1], [0], [0], [1], [0, 0, 1, 1], [], []>} : vector<256x8xbf16>, vector<8x8xbf16>, vector<256x8xf32> -> vector<256x8xf32>
    %c1_43 = arith.constant 1 : index
    %c2 = arith.constant 2 : index
    %c0_44 = arith.constant 0 : index
    %c0_45 = arith.constant 0 : index
    %47 = vector.load %arg4[%c1_43, %c2, %c0_44, %c0_45] : memref<3x3x8x8xbf16, #tpu.memory_space<vmem>>, vector<1x1x8x8xbf16>
    %48 = vector.shape_cast %47 : vector<1x1x8x8xbf16> to vector<8x8xbf16>
    %cst_46 = arith.constant dense<0.000000e+00> : vector<256x8xf32>
    %49 = tpu.matmul %36, %48, %cst_46 {dimension_numbers = #tpu.dot_dimension_numbers<[1], [0], [0], [1], [0, 0, 1, 1], [], []>} : vector<256x8xbf16>, vector<8x8xbf16>, vector<256x8xf32> -> vector<256x8xf32>
    %50 = arith.addf %46, %49 : vector<256x8xf32>
    %c0_47 = arith.constant 0 : index
    %c1_48 = arith.constant 1 : index
    %c0_49 = arith.constant 0 : index
    %c0_50 = arith.constant 0 : index
    %51 = vector.load %arg4[%c0_47, %c1_48, %c0_49, %c0_50] : memref<3x3x8x8xbf16, #tpu.memory_space<vmem>>, vector<1x1x8x8xbf16>
    %52 = vector.shape_cast %51 : vector<1x1x8x8xbf16> to vector<8x8xbf16>
    %cst_51 = arith.constant dense<0.000000e+00> : vector<256x8xf32>
    %53 = tpu.matmul %34, %52, %cst_51 {dimension_numbers = #tpu.dot_dimension_numbers<[1], [0], [0], [1], [0, 0, 1, 1], [], []>} : vector<256x8xbf16>, vector<8x8xbf16>, vector<256x8xf32> -> vector<256x8xf32>
    %c2_52 = arith.constant 2 : index
    %c1_53 = arith.constant 1 : index
    %c0_54 = arith.constant 0 : index
    %c0_55 = arith.constant 0 : index
    %54 = vector.load %arg4[%c2_52, %c1_53, %c0_54, %c0_55] : memref<3x3x8x8xbf16, #tpu.memory_space<vmem>>, vector<1x1x8x8xbf16>
    %55 = vector.shape_cast %54 : vector<1x1x8x8xbf16> to vector<8x8xbf16>
    %cst_56 = arith.constant dense<0.000000e+00> : vector<256x8xf32>
    %56 = tpu.matmul %38, %55, %cst_56 {dimension_numbers = #tpu.dot_dimension_numbers<[1], [0], [0], [1], [0, 0, 1, 1], [], []>} : vector<256x8xbf16>, vector<8x8xbf16>, vector<256x8xf32> -> vector<256x8xf32>
    %57 = arith.addf %53, %56 : vector<256x8xf32>
    %c0_57 = arith.constant 0 : index
    %c0_58 = arith.constant 0 : index
    %c0_59 = arith.constant 0 : index
    %c0_60 = arith.constant 0 : index
    %58 = vector.load %arg4[%c0_57, %c0_58, %c0_59, %c0_60] : memref<3x3x8x8xbf16, #tpu.memory_space<vmem>>, vector<1x1x8x8xbf16>
    %59 = vector.shape_cast %58 : vector<1x1x8x8xbf16> to vector<8x8xbf16>
    %cst_61 = arith.constant dense<0.000000e+00> : vector<256x8xf32>
    %60 = tpu.matmul %34, %59, %cst_61 {dimension_numbers = #tpu.dot_dimension_numbers<[1], [0], [0], [1], [0, 0, 1, 1], [], []>} : vector<256x8xbf16>, vector<8x8xbf16>, vector<256x8xf32> -> vector<256x8xf32>
    %c0_62 = arith.constant 0 : index
    %c2_63 = arith.constant 2 : index
    %c0_64 = arith.constant 0 : index
    %c0_65 = arith.constant 0 : index
    %61 = vector.load %arg4[%c0_62, %c2_63, %c0_64, %c0_65] : memref<3x3x8x8xbf16, #tpu.memory_space<vmem>>, vector<1x1x8x8xbf16>
    %62 = vector.shape_cast %61 : vector<1x1x8x8xbf16> to vector<8x8xbf16>
    %cst_66 = arith.constant dense<0.000000e+00> : vector<256x8xf32>
    %63 = tpu.matmul %36, %62, %cst_66 {dimension_numbers = #tpu.dot_dimension_numbers<[1], [0], [0], [1], [0, 0, 1, 1], [], []>} : vector<256x8xbf16>, vector<8x8xbf16>, vector<256x8xf32> -> vector<256x8xf32>
    %64 = arith.addf %60, %63 : vector<256x8xf32>
    %c2_67 = arith.constant 2 : index
    %c0_68 = arith.constant 0 : index
    %c0_69 = arith.constant 0 : index
    %c0_70 = arith.constant 0 : index
    %65 = vector.load %arg4[%c2_67, %c0_68, %c0_69, %c0_70] : memref<3x3x8x8xbf16, #tpu.memory_space<vmem>>, vector<1x1x8x8xbf16>
    %66 = vector.shape_cast %65 : vector<1x1x8x8xbf16> to vector<8x8xbf16>
    %cst_71 = arith.constant dense<0.000000e+00> : vector<256x8xf32>
    %67 = tpu.matmul %38, %66, %cst_71 {dimension_numbers = #tpu.dot_dimension_numbers<[1], [0], [0], [1], [0, 0, 1, 1], [], []>} : vector<256x8xbf16>, vector<8x8xbf16>, vector<256x8xf32> -> vector<256x8xf32>
    %68 = arith.addf %64, %67 : vector<256x8xf32>
    %c2_72 = arith.constant 2 : index
    %c2_73 = arith.constant 2 : index
    %c0_74 = arith.constant 0 : index
    %c0_75 = arith.constant 0 : index
    %69 = vector.load %arg4[%c2_72, %c2_73, %c0_74, %c0_75] : memref<3x3x8x8xbf16, #tpu.memory_space<vmem>>, vector<1x1x8x8xbf16>
    %70 = vector.shape_cast %69 : vector<1x1x8x8xbf16> to vector<8x8xbf16>
    %cst_76 = arith.constant dense<0.000000e+00> : vector<256x8xf32>
    %71 = tpu.matmul %40, %70, %cst_76 {dimension_numbers = #tpu.dot_dimension_numbers<[1], [0], [0], [1], [0, 0, 1, 1], [], []>} : vector<256x8xbf16>, vector<8x8xbf16>, vector<256x8xf32> -> vector<256x8xf32>
    %72 = arith.addf %68, %71 : vector<256x8xf32>
    %73 = arith.truncf %43 : vector<256x8xf32> to vector<256x8xbf16>
    %74 = vector.shape_cast %73 : vector<256x8xbf16> to vector<16x16x8xbf16>
    %c0_77 = arith.constant 0 : index
    %c0_78 = arith.constant 0 : index
    %c0_79 = arith.constant 0 : index
    %c0_80 = arith.constant 0 : index
    %c0_81 = arith.constant 0 : index
    %c0_82 = arith.constant 0 : index
    %75 = vector.load %arg7[%c0_77, %c0_78, %c0_79, %c0_80, %c0_81, %c0_82] : memref<1x2x2x16x16x8xbf16, #tpu.memory_space<vmem>>, vector<1x1x1x16x16x8xbf16>
    %76 = vector.shape_cast %75 : vector<1x1x1x16x16x8xbf16> to vector<16x16x8xbf16>
    %77 = vector.shape_cast %74 : vector<16x16x8xbf16> to vector<1x1x1x16x16x8xbf16>
    tpu.vector_store %arg7[%c0_77, %c0_78, %c0_79, %c0_80, %c0_81, %c0_82], %77 {strides = array<i32>} : memref<1x2x2x16x16x8xbf16, #tpu.memory_space<vmem>>, vector<1x1x1x16x16x8xbf16>,
    %78 = arith.truncf %50 : vector<256x8xf32> to vector<256x8xbf16>
    %79 = vector.shape_cast %78 : vector<256x8xbf16> to vector<16x16x8xbf16>
    %c0_83 = arith.constant 0 : index
    %c0_84 = arith.constant 0 : index
    %c1_85 = arith.constant 1 : index
    %c0_86 = arith.constant 0 : index
    %c0_87 = arith.constant 0 : index
    %c0_88 = arith.constant 0 : index
    %80 = vector.load %arg7[%c0_83, %c0_84, %c1_85, %c0_86, %c0_87, %c0_88] : memref<1x2x2x16x16x8xbf16, #tpu.memory_space<vmem>>, vector<1x1x1x16x16x8xbf16>
    %81 = vector.shape_cast %80 : vector<1x1x1x16x16x8xbf16> to vector<16x16x8xbf16>
    %82 = vector.shape_cast %79 : vector<16x16x8xbf16> to vector<1x1x1x16x16x8xbf16>
    tpu.vector_store %arg7[%c0_83, %c0_84, %c1_85, %c0_86, %c0_87, %c0_88], %82 {strides = array<i32>} : memref<1x2x2x16x16x8xbf16, #tpu.memory_space<vmem>>, vector<1x1x1x16x16x8xbf16>,
    %83 = arith.truncf %57 : vector<256x8xf32> to vector<256x8xbf16>
    %84 = vector.shape_cast %83 : vector<256x8xbf16> to vector<16x16x8xbf16>
    %c0_89 = arith.constant 0 : index
    %c1_90 = arith.constant 1 : index
    %c0_91 = arith.constant 0 : index
    %c0_92 = arith.constant 0 : index
    %c0_93 = arith.constant 0 : index
    %c0_94 = arith.constant 0 : index
    %85 = vector.load %arg7[%c0_89, %c1_90, %c0_91, %c0_92, %c0_93, %c0_94] : memref<1x2x2x16x16x8xbf16, #tpu.memory_space<vmem>>, vector<1x1x1x16x16x8xbf16>
    %86 = vector.shape_cast %85 : vector<1x1x1x16x16x8xbf16> to vector<16x16x8xbf16>
    %87 = vector.shape_cast %84 : vector<16x16x8xbf16> to vector<1x1x1x16x16x8xbf16>
    tpu.vector_store %arg7[%c0_89, %c1_90, %c0_91, %c0_92, %c0_93, %c0_94], %87 {strides = array<i32>} : memref<1x2x2x16x16x8xbf16, #tpu.memory_space<vmem>>, vector<1x1x1x16x16x8xbf16>,
    %88 = arith.truncf %72 : vector<256x8xf32> to vector<256x8xbf16>
    %89 = vector.shape_cast %88 : vector<256x8xbf16> to vector<16x16x8xbf16>
    %c0_95 = arith.constant 0 : index
    %c1_96 = arith.constant 1 : index
    %c1_97 = arith.constant 1 : index
    %c0_98 = arith.constant 0 : index
    %c0_99 = arith.constant 0 : index
    %c0_100 = arith.constant 0 : index
    %90 = vector.load %arg7[%c0_95, %c1_96, %c1_97, %c0_98, %c0_99, %c0_100] : memref<1x2x2x16x16x8xbf16, #tpu.memory_space<vmem>>, vector<1x1x1x16x16x8xbf16>
    %91 = vector.shape_cast %90 : vector<1x1x1x16x16x8xbf16> to vector<16x16x8xbf16>
    %92 = vector.shape_cast %89 : vector<16x16x8xbf16> to vector<1x1x1x16x16x8xbf16>
    tpu.vector_store %arg7[%c0_95, %c1_96, %c1_97, %c0_98, %c0_99, %c0_100], %92 {strides = array<i32>} : memref<1x2x2x16x16x8xbf16, #tpu.memory_space<vmem>>, vector<1x1x1x16x16x8xbf16>,
    %cst_101 = arith.constant dense<0.000000e+00> : vector<8xf32>
    %93 = vector.multi_reduction <add>, %43, %cst_101 [0] : vector<256x8xf32> to vector<8xf32>
    %94 = vector.shape_cast %93 : vector<8xf32> to vector<1x8xf32>
    %cst_102 = arith.constant dense<0.000000e+00> : vector<8xf32>
    %95 = vector.multi_reduction <add>, %50, %cst_102 [0] : vector<256x8xf32> to vector<8xf32>
    %96 = vector.shape_cast %95 : vector<8xf32> to vector<1x8xf32>
    %97 = arith.addf %94, %96 : vector<1x8xf32>
    %cst_103 = arith.constant dense<0.000000e+00> : vector<8xf32>
    %98 = vector.multi_reduction <add>, %57, %cst_103 [0] : vector<256x8xf32> to vector<8xf32>
    %99 = vector.shape_cast %98 : vector<8xf32> to vector<1x8xf32>
    %100 = arith.addf %97, %99 : vector<1x8xf32>
    %cst_104 = arith.constant dense<0.000000e+00> : vector<8xf32>
    %101 = vector.multi_reduction <add>, %72, %cst_104 [0] : vector<256x8xf32> to vector<8xf32>
    %102 = vector.shape_cast %101 : vector<8xf32> to vector<1x8xf32>
    %103 = arith.addf %100, %102 : vector<1x8xf32>
    %104 = arith.mulf %43, %43 : vector<256x8xf32>
    %cst_105 = arith.constant dense<0.000000e+00> : vector<8xf32>
    %105 = vector.multi_reduction <add>, %104, %cst_105 [0] : vector<256x8xf32> to vector<8xf32>
    %106 = vector.shape_cast %105 : vector<8xf32> to vector<1x8xf32>
    %107 = arith.mulf %50, %50 : vector<256x8xf32>
    %cst_106 = arith.constant dense<0.000000e+00> : vector<8xf32>
    %108 = vector.multi_reduction <add>, %107, %cst_106 [0] : vector<256x8xf32> to vector<8xf32>
    %109 = vector.shape_cast %108 : vector<8xf32> to vector<1x8xf32>
    %110 = arith.addf %106, %109 : vector<1x8xf32>
    %111 = arith.mulf %57, %57 : vector<256x8xf32>
    %cst_107 = arith.constant dense<0.000000e+00> : vector<8xf32>
    %112 = vector.multi_reduction <add>, %111, %cst_107 [0] : vector<256x8xf32> to vector<8xf32>
    %113 = vector.shape_cast %112 : vector<8xf32> to vector<1x8xf32>
    %114 = arith.addf %110, %113 : vector<1x8xf32>
    %115 = arith.mulf %72, %72 : vector<256x8xf32>
    %cst_108 = arith.constant dense<0.000000e+00> : vector<8xf32>
    %116 = vector.multi_reduction <add>, %115, %cst_108 [0] : vector<256x8xf32> to vector<8xf32>
    %117 = vector.shape_cast %116 : vector<8xf32> to vector<1x8xf32>
    %118 = arith.addf %114, %117 : vector<1x8xf32>
    %119 = vector.shape_cast %103 : vector<1x8xf32> to vector<1x1x1x8xf32>
    %c0_109 = arith.constant 0 : index
    %c0_110 = arith.constant 0 : index
    %c0_111 = arith.constant 0 : index
    %c0_112 = arith.constant 0 : index
    %120 = vector.load %arg8[%c0_109, %c0_110, %c0_111, %c0_112] : memref<1x1x1x8xf32, #tpu.memory_space<vmem>>, vector<1x1x1x8xf32>
    tpu.vector_store %arg8[%c0_109, %c0_110, %c0_111, %c0_112], %119 {strides = array<i32>} : memref<1x1x1x8xf32, #tpu.memory_space<vmem>>, vector<1x1x1x8xf32>,
    %121 = vector.shape_cast %118 : vector<1x8xf32> to vector<1x1x1x8xf32>
    %c0_113 = arith.constant 0 : index
    %c0_114 = arith.constant 0 : index
    %c0_115 = arith.constant 0 : index
    %c0_116 = arith.constant 0 : index
    %122 = vector.load %arg9[%c0_113, %c0_114, %c0_115, %c0_116] : memref<1x1x1x8xf32, #tpu.memory_space<vmem>>, vector<1x1x1x8xf32>
    tpu.vector_store %arg9[%c0_113, %c0_114, %c0_115, %c0_116], %121 {strides = array<i32>} : memref<1x1x1x8xf32, #tpu.memory_space<vmem>>, vector<1x1x1x8xf32>,
    return
  }
  func.func @transform_0(%arg0: i32, %arg1: i32) -> (i32, i32, i32, i32) {
    %c0_i32 = arith.constant 0 : i32
    %c0_i32_0 = arith.constant 0 : i32
    %c0_i32_1 = arith.constant 0 : i32
    return %arg0, %arg1, %c0_i32, %c0_i32_0 : i32, i32, i32, i32
  }
  func.func @transform_1(%arg0: i32, %arg1: i32) -> (i32, i32, i32, i32) {
    %c1_i32 = arith.constant 1 : i32
    %0 = arith.addi %arg1, %c1_i32 : i32
    %c16_i32 = arith.constant 16 : i32
    %1 = arith.muli %0, %c16_i32 : i32
    %c15_i32 = arith.constant 15 : i32
    %2 = arith.minsi %1, %c15_i32 : i32
    %c0_i32 = arith.constant 0 : i32
    %c0_i32_0 = arith.constant 0 : i32
    %c0_i32_1 = arith.constant 0 : i32
    return %arg0, %2, %c0_i32, %c0_i32_0 : i32, i32, i32, i32
  }
  func.func @transform_2(%arg0: i32, %arg1: i32) -> (i32, i32, i32, i32) {
    %c0_i32 = arith.constant 0 : i32
    %c0_i32_0 = arith.constant 0 : i32
    %c0_i32_1 = arith.constant 0 : i32
    %c0_i32_2 = arith.constant 0 : i32
    %c0_i32_3 = arith.constant 0 : i32
    return %c0_i32, %c0_i32_0, %c0_i32_1, %c0_i32_2 : i32, i32, i32, i32
  }
  func.func @transform_3(%arg0: i32, %arg1: i32) -> (i32, i32) {
    %c0_i32 = arith.constant 0 : i32
    %c0_i32_0 = arith.constant 0 : i32
    %c0_i32_1 = arith.constant 0 : i32
    return %c0_i32, %c0_i32_0 : i32, i32
  }
  func.func @transform_4(%arg0: i32, %arg1: i32) -> (i32, i32) {
    %c0_i32 = arith.constant 0 : i32
    %c0_i32_0 = arith.constant 0 : i32
    %c0_i32_1 = arith.constant 0 : i32
    return %c0_i32, %c0_i32_0 : i32, i32
  }
  func.func @transform_5(%arg0: i32, %arg1: i32) -> (i32, i32, i32, i32, i32, i32) {
    %c0_i32 = arith.constant 0 : i32
    %c0_i32_0 = arith.constant 0 : i32
    %c0_i32_1 = arith.constant 0 : i32
    %c0_i32_2 = arith.constant 0 : i32
    %c0_i32_3 = arith.constant 0 : i32
    return %arg0, %c0_i32, %c0_i32_0, %arg1, %c0_i32_1, %c0_i32_2 : i32, i32, i32, i32, i32, i32
  }
  func.func @transform_6(%arg0: i32, %arg1: i32) -> (i32, i32, i32, i32) {
    %c0_i32 = arith.constant 0 : i32
    %c0_i32_0 = arith.constant 0 : i32
    %c0_i32_1 = arith.constant 0 : i32
    return %arg0, %arg1, %c0_i32, %c0_i32_0 : i32, i32, i32, i32
  }
  func.func @transform_7(%arg0: i32, %arg1: i32) -> (i32, i32, i32, i32) {
    %c0_i32 = arith.constant 0 : i32
    %c0_i32_0 = arith.constant 0 : i32
    %c0_i32_1 = arith.constant 0 : i32
    return %arg0, %arg1, %c0_i32, %c0_i32_0 : i32, i32, i32, i32
  }
}

module attributes {stable_mosaic.version = 11 : i64} {
  func.func @_bn_relu_mm_stats_kernel(%arg0: i32, %arg1: memref<1024x8xbf16, #tpu.memory_space<vmem>>, %arg2: memref<1x8xf32, #tpu.memory_space<vmem>>, %arg3: memref<1x8xf32, #tpu.memory_space<vmem>>, %arg4: memref<8x16xbf16, #tpu.memory_space<vmem>>, %arg5: memref<1024x16xf32, #tpu.memory_space<vmem>>, %arg6: memref<1x1x16xf32, #tpu.memory_space<vmem>>, %arg7: memref<1x1x16xf32, #tpu.memory_space<vmem>>) attributes {dimension_semantics = [#tpu.dimension_semantics<parallel>], iteration_bounds = array<i64: 2>, scalar_prefetch = 0 : i64, scratch_operands = 0 : i64, tpu.core_type = #tpu.core_type<tc>, window_params = [{transform_indices = @transform_0, window_bounds = array<i64: 1024, 8>}, {pipeline_mode = #tpu.pipeline_mode<synchronous>, transform_indices = @transform_1, window_bounds = array<i64: 1, 8>}, {pipeline_mode = #tpu.pipeline_mode<synchronous>, transform_indices = @transform_2, window_bounds = array<i64: 1, 8>}, {pipeline_mode = #tpu.pipeline_mode<synchronous>, transform_indices = @transform_3, window_bounds = array<i64: 8, 16>}, {transform_indices = @transform_4, window_bounds = array<i64: 1024, 16>}, {transform_indices = @transform_5, window_bounds = array<i64: 1, 1, 16>}, {transform_indices = @transform_6, window_bounds = array<i64: 1, 1, 16>}]} {
    %c0 = arith.constant 0 : index
    %c0_0 = arith.constant 0 : index
    %0 = vector.load %arg1[%c0, %c0_0] : memref<1024x8xbf16, #tpu.memory_space<vmem>>, vector<1024x8xbf16>
    %1 = arith.extf %0 : vector<1024x8xbf16> to vector<1024x8xf32>
    %c0_1 = arith.constant 0 : index
    %c0_2 = arith.constant 0 : index
    %2 = vector.load %arg2[%c0_1, %c0_2] : memref<1x8xf32, #tpu.memory_space<vmem>>, vector<1x8xf32>
    %3 = vector.broadcast %2 : vector<1x8xf32> to vector<1024x8xf32>
    %4 = arith.mulf %1, %3 : vector<1024x8xf32>
    %c0_3 = arith.constant 0 : index
    %c0_4 = arith.constant 0 : index
    %5 = vector.load %arg3[%c0_3, %c0_4] : memref<1x8xf32, #tpu.memory_space<vmem>>, vector<1x8xf32>
    %6 = vector.broadcast %5 : vector<1x8xf32> to vector<1024x8xf32>
    %7 = arith.addf %4, %6 : vector<1024x8xf32>
    %cst = arith.constant 0.000000e+00 : f32
    %8 = vector.broadcast %cst : f32 to vector<1024x8xf32>
    %9 = arith.maximumf %7, %8 : vector<1024x8xf32>
    %10 = arith.truncf %9 : vector<1024x8xf32> to vector<1024x8xbf16>
    %c0_5 = arith.constant 0 : index
    %c0_6 = arith.constant 0 : index
    %11 = vector.load %arg4[%c0_5, %c0_6] : memref<8x16xbf16, #tpu.memory_space<vmem>>, vector<8x16xbf16>
    %cst_7 = arith.constant dense<0.000000e+00> : vector<1024x16xf32>
    %12 = tpu.matmul %10, %11, %cst_7 {dimension_numbers = #tpu.dot_dimension_numbers<[1], [0], [0], [1], [0, 0, 1, 1], [], []>} : vector<1024x8xbf16>, vector<8x16xbf16>, vector<1024x16xf32> -> vector<1024x16xf32>
    %c0_8 = arith.constant 0 : index
    %c0_9 = arith.constant 0 : index
    %13 = vector.load %arg5[%c0_8, %c0_9] : memref<1024x16xf32, #tpu.memory_space<vmem>>, vector<1024x16xf32>
    tpu.vector_store %arg5[%c0_8, %c0_9], %12 {strides = array<i32>} : memref<1024x16xf32, #tpu.memory_space<vmem>>, vector<1024x16xf32>,
    %cst_10 = arith.constant dense<0.000000e+00> : vector<16xf32>
    %14 = vector.multi_reduction <add>, %12, %cst_10 [0] : vector<1024x16xf32> to vector<16xf32>
    %15 = vector.shape_cast %14 : vector<16xf32> to vector<1x16xf32>
    %16 = vector.shape_cast %15 : vector<1x16xf32> to vector<1x1x16xf32>
    %c0_11 = arith.constant 0 : index
    %c0_12 = arith.constant 0 : index
    %c0_13 = arith.constant 0 : index
    %17 = vector.load %arg6[%c0_11, %c0_12, %c0_13] : memref<1x1x16xf32, #tpu.memory_space<vmem>>, vector<1x1x16xf32>
    tpu.vector_store %arg6[%c0_11, %c0_12, %c0_13], %16 {strides = array<i32>} : memref<1x1x16xf32, #tpu.memory_space<vmem>>, vector<1x1x16xf32>,
    %18 = arith.mulf %12, %12 : vector<1024x16xf32>
    %cst_14 = arith.constant dense<0.000000e+00> : vector<16xf32>
    %19 = vector.multi_reduction <add>, %18, %cst_14 [0] : vector<1024x16xf32> to vector<16xf32>
    %20 = vector.shape_cast %19 : vector<16xf32> to vector<1x16xf32>
    %21 = vector.shape_cast %20 : vector<1x16xf32> to vector<1x1x16xf32>
    %c0_15 = arith.constant 0 : index
    %c0_16 = arith.constant 0 : index
    %c0_17 = arith.constant 0 : index
    %22 = vector.load %arg7[%c0_15, %c0_16, %c0_17] : memref<1x1x16xf32, #tpu.memory_space<vmem>>, vector<1x1x16xf32>
    tpu.vector_store %arg7[%c0_15, %c0_16, %c0_17], %21 {strides = array<i32>} : memref<1x1x16xf32, #tpu.memory_space<vmem>>, vector<1x1x16xf32>,
    return
  }
  func.func @transform_0(%arg0: i32) -> (i32, i32) {
    %c0_i32 = arith.constant 0 : i32
    %c0_i32_0 = arith.constant 0 : i32
    return %arg0, %c0_i32 : i32, i32
  }
  func.func @transform_1(%arg0: i32) -> (i32, i32) {
    %c0_i32 = arith.constant 0 : i32
    %c0_i32_0 = arith.constant 0 : i32
    %c0_i32_1 = arith.constant 0 : i32
    return %c0_i32, %c0_i32_0 : i32, i32
  }
  func.func @transform_2(%arg0: i32) -> (i32, i32) {
    %c0_i32 = arith.constant 0 : i32
    %c0_i32_0 = arith.constant 0 : i32
    %c0_i32_1 = arith.constant 0 : i32
    return %c0_i32, %c0_i32_0 : i32, i32
  }
  func.func @transform_3(%arg0: i32) -> (i32, i32) {
    %c0_i32 = arith.constant 0 : i32
    %c0_i32_0 = arith.constant 0 : i32
    %c0_i32_1 = arith.constant 0 : i32
    return %c0_i32, %c0_i32_0 : i32, i32
  }
  func.func @transform_4(%arg0: i32) -> (i32, i32) {
    %c0_i32 = arith.constant 0 : i32
    %c0_i32_0 = arith.constant 0 : i32
    return %arg0, %c0_i32 : i32, i32
  }
  func.func @transform_5(%arg0: i32) -> (i32, i32, i32) {
    %c0_i32 = arith.constant 0 : i32
    %c0_i32_0 = arith.constant 0 : i32
    %c0_i32_1 = arith.constant 0 : i32
    return %arg0, %c0_i32, %c0_i32_0 : i32, i32, i32
  }
  func.func @transform_6(%arg0: i32) -> (i32, i32, i32) {
    %c0_i32 = arith.constant 0 : i32
    %c0_i32_0 = arith.constant 0 : i32
    %c0_i32_1 = arith.constant 0 : i32
    return %arg0, %c0_i32, %c0_i32_0 : i32, i32, i32
  }
}

module attributes {stable_mosaic.version = 11 : i64} {
  func.func @_bn_relu_kernel(%arg0: i32, %arg1: memref<1024x16xf32, #tpu.memory_space<vmem>>, %arg2: memref<1x16xf32, #tpu.memory_space<vmem>>, %arg3: memref<1x16xf32, #tpu.memory_space<vmem>>, %arg4: memref<1024x16xf32, #tpu.memory_space<vmem>>) attributes {dimension_semantics = [#tpu.dimension_semantics<parallel>], iteration_bounds = array<i64: 2>, scalar_prefetch = 0 : i64, scratch_operands = 0 : i64, tpu.core_type = #tpu.core_type<tc>, window_params = [{transform_indices = @transform_0, window_bounds = array<i64: 1024, 16>}, {pipeline_mode = #tpu.pipeline_mode<synchronous>, transform_indices = @transform_1, window_bounds = array<i64: 1, 16>}, {pipeline_mode = #tpu.pipeline_mode<synchronous>, transform_indices = @transform_2, window_bounds = array<i64: 1, 16>}, {transform_indices = @transform_3, window_bounds = array<i64: 1024, 16>}]} {
    %c0 = arith.constant 0 : index
    %c0_0 = arith.constant 0 : index
    %0 = vector.load %arg1[%c0, %c0_0] : memref<1024x16xf32, #tpu.memory_space<vmem>>, vector<1024x16xf32>
    %c0_1 = arith.constant 0 : index
    %c0_2 = arith.constant 0 : index
    %1 = vector.load %arg2[%c0_1, %c0_2] : memref<1x16xf32, #tpu.memory_space<vmem>>, vector<1x16xf32>
    %2 = vector.broadcast %1 : vector<1x16xf32> to vector<1024x16xf32>
    %3 = arith.mulf %0, %2 : vector<1024x16xf32>
    %c0_3 = arith.constant 0 : index
    %c0_4 = arith.constant 0 : index
    %4 = vector.load %arg3[%c0_3, %c0_4] : memref<1x16xf32, #tpu.memory_space<vmem>>, vector<1x16xf32>
    %5 = vector.broadcast %4 : vector<1x16xf32> to vector<1024x16xf32>
    %6 = arith.addf %3, %5 : vector<1024x16xf32>
    %cst = arith.constant 0.000000e+00 : f32
    %7 = vector.broadcast %cst : f32 to vector<1024x16xf32>
    %8 = arith.maximumf %6, %7 : vector<1024x16xf32>
    %c0_5 = arith.constant 0 : index
    %c0_6 = arith.constant 0 : index
    %9 = vector.load %arg4[%c0_5, %c0_6] : memref<1024x16xf32, #tpu.memory_space<vmem>>, vector<1024x16xf32>
    tpu.vector_store %arg4[%c0_5, %c0_6], %8 {strides = array<i32>} : memref<1024x16xf32, #tpu.memory_space<vmem>>, vector<1024x16xf32>,
    return
  }
  func.func @transform_0(%arg0: i32) -> (i32, i32) {
    %c0_i32 = arith.constant 0 : i32
    %c0_i32_0 = arith.constant 0 : i32
    return %arg0, %c0_i32 : i32, i32
  }
  func.func @transform_1(%arg0: i32) -> (i32, i32) {
    %c0_i32 = arith.constant 0 : i32
    %c0_i32_0 = arith.constant 0 : i32
    %c0_i32_1 = arith.constant 0 : i32
    return %c0_i32, %c0_i32_0 : i32, i32
  }
  func.func @transform_2(%arg0: i32) -> (i32, i32) {
    %c0_i32 = arith.constant 0 : i32
    %c0_i32_0 = arith.constant 0 : i32
    %c0_i32_1 = arith.constant 0 : i32
    return %c0_i32, %c0_i32_0 : i32, i32
  }
  func.func @transform_3(%arg0: i32) -> (i32, i32) {
    %c0_i32 = arith.constant 0 : i32
    %c0_i32_0 = arith.constant 0 : i32
    return %arg0, %c0_i32 : i32, i32
  }
}

</mosaic_0001>

<bundles_post_ra>
// kernel: decoder_block.4
= control target key start
LH: loop header
LB: loop body
LE: loop exit
PB: predicated region body
PF: predicated region fallthrough
CT: control target
= control target key end

     0   :  { %s1262_s15 = smov 0   ;;  %s1264_s16 = smov 0   ;;  %s1571_s0 = inlined_call_operand.vmem [shape: f32[2,32,256], index: 0, kind: input, shape index: {}]   ;;  %s1572_s1 = inlined_call_operand.vmem [shape: bf16[32,8], index: 1, kind: input, shape index: {}]   ;;  %s1573_s2 = inlined_call_operand.vmem [shape: bf16[2,256,8], index: 2, kind: output, shape index: {0}]   ;;  %s1574_s3 = inlined_call_operand.vmem [shape: f32[2,1,1,8], index: 3, kind: output, shape index: {1}]   ;;  %s1575_s4 = inlined_call_operand.vmem [shape: f32[2,1,1,8], index: 4, kind: output, shape index: {2}]  }
   0x1   :  { %s1266_s17 = smov 0  }
   0x2 LB: > { %s27_s18 = sadd.s32 1, %s1231_s16  ;;  %p1037_p0 = scmp.ge.s32.totalorder %s1235_s17, 1  ;;  %s1235_s17 = sphi %s1266_s17, %s15_s17   ;;  %s1231_s16 = sphi %s1264_s16, %s1577_s16   ;;  %s1227_s15 = sphi %s1262_s15, %s1576_s15  }
   0x3   : > { %p29_p1 = scmp.ge.s32.totalorder %s27_s18, 2  ;;  %p192_p2 = scmp.lt.s32.totalorder %s1235_s17, 3 }
   0x5   : > { %s1579_s18 = smov (%p29_p1, %s27_s18), 0  ;;  %p193_p3 = pnand %p1037_p0, %p192_p2 }
   0x6   : > { %p239_p4 = scmp.lt.s32.totalorder (!%p193_p3), %s1227_s15, 1  ;;  %v1211_v0 = vld [vmem:[%s1572_s1] sm:$0xff] (!%p193_p3)   ;;  %v1212_v1 = vld [vmem:[%s1572_s1 + $0x8] sm:$0xff] (!%p193_p3)   ;;  %vm331_vm0 = vcmask (!%p193_p3), 261120   ;;  %vm669_vm1 = vcmask (!%p193_p3), 60416   ;;  %vm702_vm2 = vcmask (!%p193_p3), 64512  }
   0x7   : > { %196 = sbr.rel (%p193_p3) target bundleno = 420 (0x1a4), region = 28  ;;  %1146 = vmatprep.subr.bf16.mxu0 (!%p193_p3), %v1211_v0  ;;  %1182 = vmatprep.subr.bf16.mxu1 (!%p193_p3), %v1211_v0  ;;  %vm772_vm3 = vcmask (!%p193_p3), 57344  }
   0x8   : > { %1147 = vmatpush3.bf16.msra.mxu0 (!%p193_p3), %v1211_v0  ;;  %1184 = vmatpush3.bf16.msra.mxu1 (!%p193_p3), %v1211_v0 }
   0x9   : > { %1148 = vmatprep.subr.bf16.mxu0 (!%p193_p3), %v1212_v1  ;;  %1183 = vmatprep.subr.bf16.mxu1 (!%p193_p3), %v1212_v1 }
   0xc   : > { %1149 = vmatpush3.bf16.msra.mxu0 (!%p193_p3), %v1212_v1  ;;  %1185 = vmatpush3.bf16.msra.mxu1 (!%p193_p3), %v1212_v1 }
   0xe   : > { %s1581_s15 = smov (!%p239_p4, %s1227_s15), 1 }
   0xf   : > { %s1094_s23 = sshll.u32 %s1581_s15, 6  ;;  %s1095_s27 = sshll.u32 %s1581_s15, 7 }
  0x10   : > { %s246_s26 = scalar_lea.vmem %s1571_s0, %s1094_s23  ;;  %s1312_s30 = scalar_lea.vmem %s1573_s2, %s1095_s27 }
  0x11   : > { %v271_v2 = vld [vmem:[%s246_s26] sm:$0xff]  ;;  %v273_v3 = vld [vmem:[%s246_s26 + $0x10] sm:$0xff]  ;;  %v272_v7 = vld [vmem:[%s246_s26 + $0x8] sm:$0xff]  ;;  %s263_s7 = scalar_lea.vmem %s1574_s3, %s1581_s15  ;;  %s269_s10 = scalar_lea.vmem %s1575_s4, %s1581_s15 }
  0x12   : > { %v275_v4 = vld [vmem:[%s246_s26 + $0x20] sm:$0xff]  ;;  %v279_v5 = vpack.c.bf16 %v273_v3, %v271_v2  ;;  %v277_v6 = vld [vmem:[%s246_s26 + $0x30] sm:$0xff]  ;;  %v274_v8 = vld [vmem:[%s246_s26 + $0x18] sm:$0xff] }
  0x13   : > { %v280_v9 = vpack.c.bf16 %v274_v8, %v272_v7  ;;  %v276_v10 = vld [vmem:[%s246_s26 + $0x28] sm:$0xff]  ;;  %v278_v11 = vld [vmem:[%s246_s26 + $0x38] sm:$0xff]  ;;  %v281_v12 = vpack.c.bf16 %v277_v6, %v275_v4 }
  0x14   : > { %287 = vxpose.xlu0.c.b16.start [1/2] (short) %v279_v5, 128  ;;  %v282_v13 = vpack.c.bf16 %v278_v11, %v276_v10 }
  0x15   : > { %303 = vxpose.xlu1.c.b16.start [1/2] (short) %v280_v9, 128 }
  0x18   : > { %288 = vxpose.xlu0.c.b16.end [2/2] (short) %v281_v12, 128 }
  0x19   : > { %304 = vxpose.xlu1.c.b16.end [2/2] (short) %v282_v13, 128 }
  0x7a   : > { %v295_v14 = vpop.trf.xlu0 }
  0x7b   : > { %1150 = vmatprep.mubr.msk.bf16.mxu0 %vm331_vm0, %v295_v14  ;;  %v311_v15 = vpop.trf.xlu1 }
  0x7c   : > { %1166 = vmatprep.mubr.msk.bf16.mxu1 %vm331_vm0, %v311_v15 }
  0x7e   : > { %v296_v16 = vpop.trf.xlu0 }
  0x7f   : > { %1151 = vmatmul.mubr.msk.bf16.vlgmr.msra.gmra.mrb[0].mxu0 %vm331_vm0, %v296_v16  ;;  %v312_v17 = vpop.trf.xlu1 }
  0x80   : > { %1167 = vmatmul.mubr.msk.bf16.vlgmr.msra.gmra.mrb[0].mxu1 %vm331_vm0, %v312_v17 }
  0x82   : > { %v297_v18 = vpop.trf.xlu0 }
  0x83   : > { %1154 = vmatprep.mubr.msk.bf16.mxu0 %vm331_vm0, %v297_v18  ;;  %v313_v19 = vpop.trf.xlu1 }
  0x84   : > { %1170 = vmatprep.mubr.msk.bf16.mxu1 %vm331_vm0, %v313_v19 }
  0x86   : > { %v298_v20 = vpop.trf.xlu0 }
  0x87   : > { %1155 = vmatmul.mubr.msk.bf16.gmra.mrb[4].mxu0 %vm331_vm0, %v298_v20  ;;  %v314_v21 = vpop.trf.xlu1 }
  0x88   : > { %1171 = vmatmul.mubr.msk.bf16.gmra.mrb[4].mxu1 %vm331_vm0, %v314_v21 }
  0x8a   : > { %v299_v22 = vpop.trf.xlu0 }
  0x8b   : > { %1158 = vmatprep.mubr.msk.bf16.mxu0 %vm331_vm0, %v299_v22  ;;  %v315_v23 = vpop.trf.xlu1 }
  0x8c   : > { %1174 = vmatprep.mubr.msk.bf16.mxu1 %vm331_vm0, %v315_v23 }
  0x8e   : > { %v300_v24 = vpop.trf.xlu0 }
  0x8f   : > { %1159 = vmatmul.mubr.msk.bf16.gmra.mrb[8].mxu0 %vm331_vm0, %v300_v24  ;;  %v316_v25 = vpop.trf.xlu1 }
  0x90   : > { %1175 = vmatmul.mubr.msk.bf16.gmra.mrb[8].mxu1 %vm331_vm0, %v316_v25 }
  0x92   : > { %v301_v26 = vpop.trf.xlu0 }
  0x93   : > { %1162 = vmatprep.mubr.msk.bf16.mxu0 %vm331_vm0, %v301_v26  ;;  %v317_v27 = vpop.trf.xlu1 }
  0x94   : > { %1178 = vmatprep.mubr.msk.bf16.mxu1 %vm331_vm0, %v317_v27 }
  0x96   : > { %v302_v28 = vpop.trf.xlu0 }
  0x97   : > { %1163 = vmatmul.mubr.msk.bf16.gmra.mrb[12].mxu0 %vm331_vm0, %v302_v28  ;;  %v318_v29 = vpop.trf.xlu1 }
  0x98   : > { %1179 = vmatmul.mubr.msk.bf16.gmra.mrb[12].mxu1 %vm331_vm0, %v318_v29 }
 0x152   : > { %v1152_v30 = vpop.f32.mrb[0].mxu0 }
 0x153   : > { %v1098_v31 = vpack.c.bf16 %v1152_v30, %v1152_v30  ;;  %v414_v32 = vpop.f32.mrb[1].mxu0  ;;  %v1314_v33 = vpop.f32.mrb[0].mxu1  ;;  %v776_v39 = vmul.f32 %v1152_v30, %v1152_v30  ;;  %v706_v50 = vsel %vm702_vm2, %v1152_v30, 0.0 }
 0x154   : > { %v1096_v34 = vpack.c.bf16 %v414_v32, %v414_v32  ;;  %v774_v35 = vmul.f32 %v414_v32, %v414_v32  ;;  %v1153_v36 = vpop.f32.mrb[2].mxu0  ;;  %v1114_v37 = vpack.c.bf16 %v1314_v33, %v1314_v33  ;;  %v1318_v38 = vpop.f32.mrb[1].mxu1  ;;  %v703_v43 = vsel %vm702_vm2, %v414_v32, 0.0 }
 0x155   : > { %672 = vst.msk [vmem:[%s1312_s30 + $0x8] sm:$0xf] %vm669_vm1, %v1098_v31  ;;  %v1099_v40 = vpack.c.bf16 %v1153_v36, %v1153_v36  ;;  %v417_v41 = vpop.f32.mrb[3].mxu0  ;;  %v1322_v42 = vpop.f32.mrb[2].mxu1  ;;  %v777_v48 = vmul.f32 %v1153_v36, %v1153_v36  ;;  %v1112_v53 = vpack.c.bf16 %v1318_v38, %v1318_v38  ;;  %v809_v57 = vsel %vm702_vm2, %v776_v39, 0.0 }
 0x156   : > { %670 = vst.msk [vmem:[%s1312_s30] sm:$0xf] %vm669_vm1, %v1096_v34  ;;  %v1097_v44 = vpack.c.bf16 %v417_v41, %v417_v41  ;;  %v704_v45 = vsel %vm702_vm2, %v417_v41, 0.0  ;;  %v775_v46 = vmul.f32 %v417_v41, %v417_v41  ;;  %688 = vst.msk [vmem:[%s1312_s30 + $0x48] sm:$0xf] %vm669_vm1, %v1114_v37  ;;  %v1330_v47 = vpop.f32.mrb[3].mxu1  ;;  %v1115_v56 = vpack.c.bf16 %v1322_v42, %v1322_v42 }
 0x157   : > { %673 = vst.msk [vmem:[%s1312_s30 + $0xc] sm:$0xf] %vm669_vm1, %v1099_v40  ;;  %v705_v49 = vadd.f32 %v704_v45, %v703_v43  ;;  %v806_v51 = vsel %vm702_vm2, %v774_v35, 0.0  ;;  %686 = vst.msk [vmem:[%s1312_s30 + $0x40] sm:$0xf] %vm669_vm1, %v1112_v53  ;;  %v1113_v59 = vpack.c.bf16 %v1330_v47, %v1330_v47  ;;  %v708_v60 = vsel %vm702_vm2, %v1153_v36, 0.0 }
 0x158   : > { %671 = vst.msk [vmem:[%s1312_s30 + $0x4] sm:$0xf] %vm669_vm1, %v1097_v44  ;;  %v807_v52 = vsel %vm702_vm2, %v775_v46, 0.0  ;;  %v811_v61 = vsel %vm702_vm2, %v777_v48, 0.0  ;;  %689 = vst.msk [vmem:[%s1312_s30 + $0x4c] sm:$0xf] %vm669_vm1, %v1115_v56 }
 0x159   : > { %v707_v54 = vadd.f32 %v706_v50, %v705_v49  ;;  %v808_v55 = vadd.f32 %v807_v52, %v806_v51  ;;  %687 = vst.msk [vmem:[%s1312_s30 + $0x44] sm:$0xf] %vm669_vm1, %v1113_v59 }
 0x15a   : > { %v1156_v58 = vpop.f32.mrb[4].mxu0 }
 0x15b   : > { %v810_v62 = vadd.f32 %v809_v57, %v808_v55  ;;  %v1102_v63 = vpack.c.bf16 %v1156_v58, %v1156_v58  ;;  %v430_v0 = vpop.f32.mrb[5].mxu0  ;;  %v1352_v1 = vpop.f32.mrb[4].mxu1  ;;  %v709_v3 = vadd.f32 %v708_v60, %v707_v54  ;;  %v780_v16 = vmul.f32 %v1156_v58, %v1156_v58 }
 0x15c   : > { %v1100_v2 = vpack.c.bf16 %v430_v0, %v430_v0  ;;  %v710_v4 = vsel %vm702_vm2, %v430_v0, 0.0  ;;  %v778_v5 = vmul.f32 %v430_v0, %v430_v0  ;;  %v1157_v6 = vpop.f32.mrb[6].mxu0  ;;  %v1357_v7 = vpop.f32.mrb[5].mxu1  ;;  %v714_v21 = vsel %vm702_vm2, %v1156_v58, 0.0 }
 0x15d   : > { %676 = vst.msk [vmem:[%s1312_s30 + $0x18] sm:$0xf] %vm669_vm1, %v1102_v63  ;;  %v812_v8 = vadd.f32 %v811_v61, %v810_v62  ;;  %v1103_v9 = vpack.c.bf16 %v1157_v6, %v1157_v6  ;;  %v433_v10 = vpop.f32.mrb[7].mxu0  ;;  %v1361_v11 = vpop.f32.mrb[6].mxu1  ;;  %v711_v12 = vadd.f32 %v710_v4, %v709_v3  ;;  %v781_v22 = vmul.f32 %v1157_v6, %v1157_v6 }
 0x15e   : > { %674 = vst.msk [vmem:[%s1312_s30 + $0x10] sm:$0xf] %vm669_vm1, %v1100_v2  ;;  %v813_v13 = vsel %vm702_vm2, %v778_v5, 0.0  ;;  %v1101_v14 = vpack.c.bf16 %v433_v10, %v433_v10  ;;  %v1366_v15 = vpop.f32.mrb[7].mxu1  ;;  %v712_v18 = vsel %vm702_vm2, %v433_v10, 0.0  ;;  %v779_v19 = vmul.f32 %v433_v10, %v433_v10 }
 0x15f   : > { %v814_v17 = vadd.f32 %v813_v13, %v812_v8  ;;  %677 = vst.msk [vmem:[%s1312_s30 + $0x1c] sm:$0xf] %vm669_vm1, %v1103_v9  ;;  %v713_v20 = vadd.f32 %v712_v18, %v711_v12  ;;  %v1118_v24 = vpack.c.bf16 %v1352_v1, %v1352_v1  ;;  %v1116_v28 = vpack.c.bf16 %v1357_v7, %v1357_v7 }
 0x160   : > { %675 = vst.msk [vmem:[%s1312_s30 + $0x14] sm:$0xf] %vm669_vm1, %v1101_v14  ;;  %v815_v23 = vsel %vm702_vm2, %v779_v19, 0.0  ;;  %v817_v29 = vsel %vm702_vm2, %v780_v16, 0.0  ;;  %v716_v30 = vsel %vm702_vm2, %v1157_v6, 0.0  ;;  %v819_v43 = vsel %vm702_vm2, %v781_v22, 0.0 }
 0x161   : > { %v715_v25 = vadd.f32 %v714_v21, %v713_v20  ;;  %v816_v26 = vadd.f32 %v815_v23, %v814_v17  ;;  %692 = vst.msk [vmem:[%s1312_s30 + $0x58] sm:$0xf] %vm669_vm1, %v1118_v24  ;;  %690 = vst.msk [vmem:[%s1312_s30 + $0x50] sm:$0xf] %vm669_vm1, %v1116_v28  ;;  %v1119_v62 = vpack.c.bf16 %v1361_v11, %v1361_v11 }
 0x162   : > { %v1160_v27 = vpop.f32.mrb[8].mxu0  ;;  %v1117_v3 = vpack.c.bf16 %v1366_v15, %v1366_v15 }
 0x163   : > { %v1106_v31 = vpack.c.bf16 %v1160_v27, %v1160_v27  ;;  %v446_v32 = vpop.f32.mrb[9].mxu0  ;;  %v1383_v34 = vpop.f32.mrb[8].mxu1  ;;  %v818_v35 = vadd.f32 %v817_v29, %v816_v26  ;;  %v717_v37 = vadd.f32 %v716_v30, %v715_v25  ;;  %v784_v53 = vmul.f32 %v1160_v27, %v1160_v27  ;;  %693 = vst.msk [vmem:[%s1312_s30 + $0x5c] sm:$0xf] %vm669_vm1, %v1119_v62 }
 0x164   : > { %v1104_v36 = vpack.c.bf16 %v446_v32, %v446_v32  ;;  %v718_v39 = vsel %vm702_vm2, %v446_v32, 0.0  ;;  %v1161_v40 = vpop.f32.mrb[10].mxu0  ;;  %v1388_v41 = vpop.f32.mrb[9].mxu1  ;;  %v782_v44 = vmul.f32 %v446_v32, %v446_v32  ;;  %v722_v59 = vsel %vm702_vm2, %v1160_v27, 0.0  ;;  %691 = vst.msk [vmem:[%s1312_s30 + $0x54] sm:$0xf] %vm669_vm1, %v1117_v3 }
 0x165   : > { %680 = vst.msk [vmem:[%s1312_s30 + $0x28] sm:$0xf] %vm669_vm1, %v1106_v31  ;;  %v1107_v45 = vpack.c.bf16 %v1161_v40, %v1161_v40  ;;  %v449_v46 = vpop.f32.mrb[11].mxu0  ;;  %v1393_v48 = vpop.f32.mrb[10].mxu1  ;;  %v719_v49 = vadd.f32 %v718_v39, %v717_v37  ;;  %v820_v50 = vadd.f32 %v819_v43, %v818_v35  ;;  %v785_v60 = vmul.f32 %v1161_v40, %v1161_v40 }
 0x166   : > { %678 = vst.msk [vmem:[%s1312_s30 + $0x20] sm:$0xf] %vm669_vm1, %v1104_v36  ;;  %v1105_v51 = vpack.c.bf16 %v449_v46, %v449_v46  ;;  %v1397_v52 = vpop.f32.mrb[11].mxu1  ;;  %v821_v54 = vsel %vm702_vm2, %v782_v44, 0.0  ;;  %v720_v55 = vsel %vm702_vm2, %v449_v46, 0.0  ;;  %v783_v56 = vmul.f32 %v449_v46, %v449_v46 }
 0x167   : > { %681 = vst.msk [vmem:[%s1312_s30 + $0x2c] sm:$0xf] %vm669_vm1, %v1107_v45  ;;  %v822_v57 = vadd.f32 %v821_v54, %v820_v50  ;;  %v721_v58 = vadd.f32 %v720_v55, %v719_v49  ;;  %v825_v4 = vsel %vm702_vm2, %v784_v53, 0.0  ;;  %v724_v5 = vsel %vm702_vm2, %v1161_v40, 0.0 }
 0x168   : > { %679 = vst.msk [vmem:[%s1312_s30 + $0x24] sm:$0xf] %vm669_vm1, %v1105_v51  ;;  %v823_v61 = vsel %vm702_vm2, %v783_v56, 0.0  ;;  %v827_v18 = vsel %vm702_vm2, %v785_v60, 0.0  ;;  %v790_v35 = vmul.f32 %v1318_v38, %v1318_v38  ;;  %v1122_v40 = vpack.c.bf16 %v1383_v34, %v1383_v34 }
 0x169   : > { %v723_v63 = vadd.f32 %v722_v59, %v721_v58  ;;  %v824_v0 = vadd.f32 %v823_v61, %v822_v57  ;;  %v1120_v45 = vpack.c.bf16 %v1388_v41, %v1388_v41  ;;  %v734_v50 = vsel %vm702_vm2, %v1318_v38, 0.0 }
 0x16a   : > { %v1164_v2 = vpop.f32.mrb[12].mxu0  ;;  %696 = vst.msk [vmem:[%s1312_s30 + $0x68] sm:$0xf] %vm669_vm1, %v1122_v40  ;;  %v1123_v51 = vpack.c.bf16 %v1393_v48, %v1393_v48  ;;  %v837_v56 = vsel %vm702_vm2, %v790_v35, 0.0  ;;  %v791_v57 = vmul.f32 %v1330_v47, %v1330_v47  ;;  %v1121_v38 = vpack.c.bf16 %v1397_v52, %v1397_v52 }
 0x16b   : > { %v1110_v6 = vpack.c.bf16 %v1164_v2, %v1164_v2  ;;  %v462_v8 = vpop.f32.mrb[13].mxu0  ;;  %v1415_v9 = vpop.f32.mrb[12].mxu1  ;;  %v826_v10 = vadd.f32 %v825_v4, %v824_v0  ;;  %v725_v13 = vadd.f32 %v724_v5, %v723_v63  ;;  %v788_v27 = vmul.f32 %v1164_v2, %v1164_v2  ;;  %694 = vst.msk [vmem:[%s1312_s30 + $0x60] sm:$0xf] %vm669_vm1, %v1120_v45 }
 0x16c   : > { %v1108_v12 = vpack.c.bf16 %v462_v8, %v462_v8  ;;  %v726_v14 = vsel %vm702_vm2, %v462_v8, 0.0  ;;  %v1165_v16 = vpop.f32.mrb[14].mxu0  ;;  %v1420_v17 = vpop.f32.mrb[13].mxu1  ;;  %v786_v19 = vmul.f32 %v462_v8, %v462_v8  ;;  %v730_v36 = vsel %vm702_vm2, %v1164_v2, 0.0  ;;  %697 = vst.msk [vmem:[%s1312_s30 + $0x6c] sm:$0xf] %vm669_vm1, %v1123_v51 }
 0x16d   : > { %684 = vst.msk [vmem:[%s1312_s30 + $0x38] sm:$0xf] %vm669_vm1, %v1110_v6  ;;  %v1111_v20 = vpack.c.bf16 %v1165_v16, %v1165_v16  ;;  %v465_v21 = vpop.f32.mrb[15].mxu0  ;;  %v1425_v22 = vpop.f32.mrb[14].mxu1  ;;  %v727_v23 = vadd.f32 %v726_v14, %v725_v13  ;;  %v828_v24 = vadd.f32 %v827_v18, %v826_v10  ;;  %v789_v37 = vmul.f32 %v1165_v16, %v1165_v16 }
 0x16e   : > { %682 = vst.msk [vmem:[%s1312_s30 + $0x30] sm:$0xf] %vm669_vm1, %v1108_v12  ;;  %v1109_v25 = vpack.c.bf16 %v465_v21, %v465_v21  ;;  %v1429_v26 = vpop.f32.mrb[15].mxu1  ;;  %v829_v28 = vsel %vm702_vm2, %v786_v19, 0.0  ;;  %v728_v29 = vsel %vm702_vm2, %v465_v21, 0.0  ;;  %v787_v30 = vmul.f32 %v465_v21, %v465_v21 }
 0x16f   : > { %685 = vst.msk [vmem:[%s1312_s30 + $0x3c] sm:$0xf] %vm669_vm1, %v1111_v20  ;;  %v830_v31 = vadd.f32 %v829_v28, %v828_v24  ;;  %v729_v32 = vadd.f32 %v728_v29, %v727_v23  ;;  %v833_v46 = vsel %vm702_vm2, %v788_v27, 0.0  ;;  %v732_v49 = vsel %vm702_vm2, %v1165_v16, 0.0  ;;  %695 = vst.msk [vmem:[%s1312_s30 + $0x64] sm:$0xf] %vm669_vm1, %v1121_v38 }
 0x170   : > { %683 = vst.msk [vmem:[%s1312_s30 + $0x34] sm:$0xf] %vm669_vm1, %v1109_v25  ;;  %v831_v39 = vsel %vm702_vm2, %v787_v30, 0.0  ;;  %v835_v55 = vsel %vm702_vm2, %v789_v37, 0.0  ;;  %v1126_v60 = vpack.c.bf16 %v1415_v9, %v1415_v9  ;;  %v792_v61 = vmul.f32 %v1314_v33, %v1314_v33 }
 0x171   : > { %v731_v43 = vadd.f32 %v730_v36, %v729_v32  ;;  %v832_v44 = vadd.f32 %v831_v39, %v830_v31  ;;  %v736_v62 = vsel %vm702_vm2, %v1330_v47, 0.0  ;;  %v1124_v63 = vpack.c.bf16 %v1420_v17, %v1420_v17 }
 0x172   : > { %v738_v0 = vsel %vm702_vm2, %v1314_v33, 0.0  ;;  %700 = vst.msk [vmem:[%s1312_s30 + $0x78] sm:$0xf] %vm669_vm1, %v1126_v60  ;;  %v793_v4 = vmul.f32 %v1322_v42, %v1322_v42  ;;  %v839_v5 = vsel %vm702_vm2, %v791_v57, 0.0  ;;  %v794_v47 = vmul.f32 %v1357_v7, %v1357_v7 }
 0x173   : > { %v834_v53 = vadd.f32 %v833_v46, %v832_v44  ;;  %v733_v54 = vadd.f32 %v732_v49, %v731_v43  ;;  %698 = vst.msk [vmem:[%s1312_s30 + $0x70] sm:$0xf] %vm669_vm1, %v1124_v63  ;;  %v1127_v6 = vpack.c.bf16 %v1425_v22, %v1425_v22  ;;  %v1125_v10 = vpack.c.bf16 %v1429_v26, %v1429_v26 }
 0x174   : > { %v841_v12 = vsel %vm702_vm2, %v792_v61, 0.0  ;;  %v740_v13 = vsel %vm702_vm2, %v1322_v42, 0.0  ;;  %v742_v14 = vsel %vm702_vm2, %v1357_v7, 0.0  ;;  %v843_v19 = vsel %vm702_vm2, %v793_v4, 0.0 }
 0x175   : > { %v735_v58 = vadd.f32 %v734_v50, %v733_v54  ;;  %v836_v59 = vadd.f32 %v835_v55, %v834_v53  ;;  %701 = vst.msk [vmem:[%s1312_s30 + $0x7c] sm:$0xf] %vm669_vm1, %v1127_v6  ;;  %699 = vst.msk [vmem:[%s1312_s30 + $0x74] sm:$0xf] %vm669_vm1, %v1125_v10  ;;  %v845_v20 = vsel %vm702_vm2, %v794_v47, 0.0  ;;  %v795_v21 = vmul.f32 %v1366_v15, %v1366_v15 }
 0x176   : > { %v796_v42 = vmul.f32 %v1352_v1, %v1352_v1  ;;  %v744_v7 = vsel %vm702_vm2, %v1366_v15, 0.0  ;;  %v746_v28 = vsel %vm702_vm2, %v1352_v1, 0.0  ;;  %v797_v29 = vmul.f32 %v1361_v11, %v1361_v11 }
 0x177   : > { %v838_v2 = vadd.f32 %v837_v56, %v836_v59  ;;  %v737_v3 = vadd.f32 %v736_v62, %v735_v58  ;;  %v847_v30 = vsel %vm702_vm2, %v795_v21, 0.0  ;;  %v798_v31 = vmul.f32 %v1388_v41, %v1388_v41 }
 0x178   : > { %v849_v36 = vsel %vm702_vm2, %v796_v42, 0.0  ;;  %v748_v15 = vsel %vm702_vm2, %v1361_v11, 0.0  ;;  %v750_v37 = vsel %vm702_vm2, %v1388_v41, 0.0  ;;  %v851_v40 = vsel %vm702_vm2, %v797_v29, 0.0 }
 0x179   : > { %v739_v8 = vadd.f32 %v738_v0, %v737_v3  ;;  %v840_v33 = vadd.f32 %v839_v5, %v838_v2  ;;  %v853_v43 = vsel %vm702_vm2, %v798_v31, 0.0  ;;  %v799_v44 = vmul.f32 %v1397_v52, %v1397_v52 }
 0x17a   : > { %v800_v49 = vmul.f32 %v1383_v34, %v1383_v34  ;;  %v752_v11 = vsel %vm702_vm2, %v1397_v52, 0.0  ;;  %v754_v41 = vsel %vm702_vm2, %v1383_v34, 0.0  ;;  %v801_v53 = vmul.f32 %v1393_v48, %v1393_v48 }
 0x17b   : > { %v842_v16 = vadd.f32 %v841_v12, %v840_v33  ;;  %v741_v18 = vadd.f32 %v740_v13, %v739_v8  ;;  %v855_v54 = vsel %vm702_vm2, %v799_v44, 0.0  ;;  %v802_v55 = vmul.f32 %v1420_v17, %v1420_v17 }
 0x17c   : > { %v857_v38 = vsel %vm702_vm2, %v800_v49, 0.0  ;;  %v756_v52 = vsel %vm702_vm2, %v1393_v48, 0.0  ;;  %v758_v58 = vsel %vm702_vm2, %v1420_v17, 0.0  ;;  %v859_v60 = vsel %vm702_vm2, %v801_v53, 0.0 }
 0x17d   : > { %v743_v23 = vadd.f32 %v742_v14, %v741_v18  ;;  %v844_v24 = vadd.f32 %v843_v19, %v842_v16  ;;  %v861_v61 = vsel %vm702_vm2, %v802_v55, 0.0  ;;  %v803_v62 = vmul.f32 %v1429_v26, %v1429_v26 }
 0x17e   : > { %v804_v2 = vmul.f32 %v1415_v9, %v1415_v9  ;;  %v760_v48 = vsel %vm702_vm2, %v1429_v26, 0.0  ;;  %v762_v17 = vsel %vm702_vm2, %v1415_v9, 0.0  ;;  %v805_v5 = vmul.f32 %v1425_v22, %v1425_v22 }
 0x17f   : > { %v846_v25 = vadd.f32 %v845_v20, %v844_v24  ;;  %v745_v27 = vadd.f32 %v744_v7, %v743_v23  ;;  %v863_v47 = vsel %vm702_vm2, %v803_v62, 0.0  ;;  %v764_v10 = vsel %vm702_vm2, %v1425_v22, 0.0 }
 0x180   : > { %v865_v33 = vsel %vm702_vm2, %v804_v2, 0.0  ;;  %v867_v13 = vsel %vm702_vm2, %v805_v5, 0.0 }
 0x181   : > { %v747_v32 = vadd.f32 %v746_v28, %v745_v27  ;;  %v848_v35 = vadd.f32 %v847_v30, %v846_v25 }
 0x183   : > { %v850_v39 = vadd.f32 %v849_v36, %v848_v35  ;;  %v749_v1 = vadd.f32 %v748_v15, %v747_v32 }
 0x185   : > { %v751_v45 = vadd.f32 %v750_v37, %v749_v1  ;;  %v852_v46 = vadd.f32 %v851_v40, %v850_v39 }
 0x187   : > { %v854_v50 = vadd.f32 %v853_v43, %v852_v46  ;;  %v753_v51 = vadd.f32 %v752_v11, %v751_v45 }
 0x189   : > { %v755_v56 = vadd.f32 %v754_v41, %v753_v51  ;;  %v856_v57 = vadd.f32 %v855_v54, %v854_v50 }
 0x18b   : > { %v858_v59 = vadd.f32 %v857_v38, %v856_v57  ;;  %v757_v34 = vadd.f32 %v756_v52, %v755_v56 }
 0x18d   : > { %v759_v63 = vadd.f32 %v758_v58, %v757_v34  ;;  %v860_v0 = vadd.f32 %v859_v60, %v858_v59 }
 0x18f   : > { %v862_v3 = vadd.f32 %v861_v61, %v860_v0  ;;  %v761_v4 = vadd.f32 %v760_v48, %v759_v63 }
 0x191   : > { %v763_v6 = vadd.f32 %v762_v17, %v761_v4  ;;  %v864_v8 = vadd.f32 %v863_v47, %v862_v3 }
 0x193   : > { %v765_v12 = vadd.f32 %v764_v10, %v763_v6  ;;  %v866_v26 = vadd.f32 %v865_v33, %v864_v8 }
 0x195   : > { %v766_v14 = vrot.slane %v765_v12, 4  ;;  %v868_v9 = vadd.f32 %v867_v13, %v866_v26 }
 0x197   : > { %v767_v16 = vadd.f32 %v766_v14, %v765_v12  ;;  %v869_v18 = vrot.slane %v868_v9, 4 }
 0x199   : > { %v768_v19 = vrot.slane %v767_v16, 2  ;;  %v870_v20 = vadd.f32 %v869_v18, %v868_v9 }
 0x19b   : > { %v769_v21 = vadd.f32 %v768_v19, %v767_v16  ;;  %v871_v23 = vrot.slane %v870_v20, 2 }
 0x19d   : > { %v770_v24 = vrot.slane %v769_v21, 1  ;;  %v872_v42 = vadd.f32 %v871_v23, %v870_v20 }
 0x19f   : > { %v771_v22 = vadd.f32 %v770_v24, %v769_v21  ;;  %v873_v7 = vrot.slane %v872_v42, 1 }
 0x1a1   : > { %773 = vst.msk [vmem:[%s263_s7] sm:$0x1] %vm772_vm3, %v771_v22  ;;  %v874_v25 = vadd.f32 %v873_v7, %v872_v42 }
 0x1a3   : > { %875 = vst.msk [vmem:[%s269_s10] sm:$0x1] %vm772_vm3, %v874_v25 }
 0x1a4 PF: > { %s15_s17 = sadd.s32 1, %s1235_s17   ;;  %s1576_s15 = smov %s1231_s16 }
 0x1a5   : > { %p12_p5 = scmp.ge.s32.totalorder %s15_s17, 4   ;;  %s1577_s16 = smov %s1579_s18 }
 0x1a7   :  { %14 = sbr.rel (!%p12_p5) target bundleno = 2 (0x2), region = 82 }

// kernel: decoder_block.7
= control target key start
LH: loop header
LB: loop body
LE: loop exit
PB: predicated region body
PF: predicated region fallthrough
CT: control target
= control target key end

     0   :  { %s936_s12 = smov 0   ;;  %s1617_s0 = inlined_call_operand.vmem [shape: f32[2048,16], index: 0, kind: input, shape index: {}]   ;;  %s1618_s1 = inlined_call_operand.vmem [shape: f32[1,16], index: 1, kind: input, shape index: {}]   ;;  %s1619_s2 = inlined_call_operand.vmem [shape: f32[1,16], index: 2, kind: input, shape index: {}]   ;;  %s1620_s3 = inlined_call_operand.vmem [shape: f32[2048,16], index: 3, kind: output, shape index: {}]  }
   0x1 LB: > { %s885_s13 = sadd.s32 4294967295, %s914_s12   ;;  %p889_p0 = scmp.ge.s32.totalorder %s914_s12, 1  ;;  %s914_s12 = sphi %s936_s12, %s13_s12  }
   0x2   : > { %p138_p1 = scmp.lt.s32.totalorder %s914_s12, 3 }
   0x4   : > { %p139_p2 = pnand %p889_p0, %p138_p1 }
   0x5   : > { %s890_s14 = sshll.u32 (!%p139_p2), %s885_s13, 7  ;;  %v947_v0 = vld [vmem:[%s1618_s1] ss:$0 sm:$0xff] (!%p139_p2)  ;;  %vm700_vm0 = vcmask (!%p139_p2), 130048  }
   0x6   : > { %142 = sbr.rel (%p139_p2) target bundleno = 118 (0x76), region = 32  ;;  %p163_p3 = scmp.lt.s32.totalorder (!%p139_p2), %s890_s14, 255  ;;  %v957_v1 = vld [vmem:[%s1619_s2] ss:$0 sm:$0xff] (!%p139_p2) }
   0xd   : > { %s1622_s14 = smov (!%p163_p3, %s890_s14), 255 }
   0xe   : > { %s891_s15 = sshll.u32 %s1622_s14, 3 }
   0xf   : > { %s952_s20 = scalar_lea.vmem %s1617_s0, %s891_s15  ;;  %s980_s25 = scalar_lea.vmem %s1620_s3, %s891_s15 }
  0x10   : > { %v174_v2 = vld [vmem:[%s952_s20] sm:$0xff]  ;;  %v175_v3 = vld [vmem:[%s952_s20 + $0x8] sm:$0xff]  ;;  %v176_v4 = vld [vmem:[%s952_s20 + $0x10] sm:$0xff] }
  0x11   : > { %v309_v5 = vmul.f32 %v947_v0, %v174_v2  ;;  %v310_v6 = vmul.f32 %v947_v0, %v175_v3  ;;  %v311_v7 = vmul.f32 %v947_v0, %v176_v4  ;;  %v177_v8 = vld [vmem:[%s952_s20 + $0x18] sm:$0xff]  ;;  %v178_v9 = vld [vmem:[%s952_s20 + $0x20] sm:$0xff]  ;;  %v179_v10 = vld [vmem:[%s952_s20 + $0x28] sm:$0xff] }
  0x12   : > { %v312_v11 = vmul.f32 %v947_v0, %v177_v8  ;;  %v313_v12 = vmul.f32 %v947_v0, %v178_v9  ;;  %v314_v13 = vmul.f32 %v947_v0, %v179_v10  ;;  %v180_v14 = vld [vmem:[%s952_s20 + $0x30] sm:$0xff]  ;;  %v181_v15 = vld [vmem:[%s952_s20 + $0x38] sm:$0xff]  ;;  %v182_v24 = vld [vmem:[%s952_s20 + $0x40] sm:$0xff] }
  0x13   : > { %v444_v16 = vadd.f32 %v957_v1, %v309_v5  ;;  %v445_v17 = vadd.f32 %v957_v1, %v310_v6  ;;  %v446_v18 = vadd.f32 %v957_v1, %v311_v7  ;;  %v315_v19 = vmul.f32 %v947_v0, %v180_v14  ;;  %v183_v25 = vld [vmem:[%s952_s20 + $0x48] sm:$0xff]  ;;  %v184_v26 = vld [vmem:[%s952_s20 + $0x50] sm:$0xff]  ;;  %v185_v31 = vld [vmem:[%s952_s20 + $0x58] sm:$0xff] }
  0x14   : > { %v447_v20 = vadd.f32 %v957_v1, %v312_v11  ;;  %v448_v21 = vadd.f32 %v957_v1, %v313_v12  ;;  %v449_v22 = vadd.f32 %v957_v1, %v314_v13  ;;  %v316_v23 = vmul.f32 %v947_v0, %v181_v15  ;;  %v186_v32 = vld [vmem:[%s952_s20 + $0x60] sm:$0xff]  ;;  %v187_v33 = vld [vmem:[%s952_s20 + $0x68] sm:$0xff]  ;;  %v188_v38 = vld [vmem:[%s952_s20 + $0x70] sm:$0xff] }
  0x15   : > { %v572_v27 = vmax.f32 %v444_v16, 0.0  ;;  %v573_v28 = vmax.f32 %v445_v17, 0.0  ;;  %v574_v29 = vmax.f32 %v446_v18, 0.0  ;;  %v450_v30 = vadd.f32 %v957_v1, %v315_v19  ;;  %v189_v43 = vld [vmem:[%s952_s20 + $0x78] sm:$0xff]  ;;  %v190_v56 = vld [vmem:[%s952_s20 + $0x80] sm:$0xff]  ;;  %v191_v57 = vld [vmem:[%s952_s20 + $0x88] sm:$0xff] }
  0x16   : > { %v575_v34 = vmax.f32 %v447_v20, 0.0  ;;  %v576_v35 = vmax.f32 %v448_v21, 0.0  ;;  %v577_v36 = vmax.f32 %v449_v22, 0.0  ;;  %v451_v37 = vadd.f32 %v957_v1, %v316_v23  ;;  %v192_v58 = vld [vmem:[%s952_s20 + $0x90] sm:$0xff]  ;;  %v193_v63 = vld [vmem:[%s952_s20 + $0x98] sm:$0xff]  ;;  %v194_v2 = vld [vmem:[%s952_s20 + $0xa0] sm:$0xff] }
  0x17   : > { %701 = vst.msk [vmem:[%s980_s25] sm:$0xff] %vm700_vm0, %v572_v27  ;;  %702 = vst.msk [vmem:[%s980_s25 + $0x8] sm:$0xff] %vm700_vm0, %v573_v28  ;;  %v578_v39 = vmax.f32 %v450_v30, 0.0  ;;  %v317_v40 = vmul.f32 %v947_v0, %v182_v24  ;;  %v318_v41 = vmul.f32 %v947_v0, %v183_v25  ;;  %v319_v42 = vmul.f32 %v947_v0, %v184_v26  ;;  %v195_v3 = vld [vmem:[%s952_s20 + $0xa8] sm:$0xff]  ;;  %v196_v8 = vld [vmem:[%s952_s20 + $0xb0] sm:$0xff] }
  0x18   : > { %703 = vst.msk [vmem:[%s980_s25 + $0x10] sm:$0xff] %vm700_vm0, %v574_v29  ;;  %704 = vst.msk [vmem:[%s980_s25 + $0x18] sm:$0xff] %vm700_vm0, %v575_v34  ;;  %v579_v44 = vmax.f32 %v451_v37, 0.0  ;;  %v320_v45 = vmul.f32 %v947_v0, %v185_v31  ;;  %v321_v46 = vmul.f32 %v947_v0, %v186_v32  ;;  %v322_v47 = vmul.f32 %v947_v0, %v187_v33  ;;  %v197_v13 = vld [vmem:[%s952_s20 + $0xb8] sm:$0xff]  ;;  %v198_v26 = vld [vmem:[%s952_s20 + $0xc0] sm:$0xff] }
  0x19   : > { %705 = vst.msk [vmem:[%s980_s25 + $0x20] sm:$0xff] %vm700_vm0, %v576_v35  ;;  %706 = vst.msk [vmem:[%s980_s25 + $0x28] sm:$0xff] %vm700_vm0, %v577_v36  ;;  %v452_v48 = vadd.f32 %v957_v1, %v317_v40  ;;  %v453_v49 = vadd.f32 %v957_v1, %v318_v41  ;;  %v454_v50 = vadd.f32 %v957_v1, %v319_v42  ;;  %v199_v27 = vld [vmem:[%s952_s20 + $0xc8] sm:$0xff]  ;;  %v200_v28 = vld [vmem:[%s952_s20 + $0xd0] sm:$0xff] }
  0x1a   : > { %707 = vst.msk [vmem:[%s980_s25 + $0x30] sm:$0xff] %vm700_vm0, %v578_v39  ;;  %v323_v51 = vmul.f32 %v947_v0, %v188_v38  ;;  %708 = vst.msk [vmem:[%s980_s25 + $0x38] sm:$0xff] %vm700_vm0, %v579_v44  ;;  %v455_v52 = vadd.f32 %v957_v1, %v320_v45  ;;  %v456_v53 = vadd.f32 %v957_v1, %v321_v46  ;;  %v201_v33 = vld [vmem:[%s952_s20 + $0xd8] sm:$0xff]  ;;  %v202_v34 = vld [vmem:[%s952_s20 + $0xe0] sm:$0xff] }
  0x1b   : > { %v457_v54 = vadd.f32 %v957_v1, %v322_v47  ;;  %v324_v55 = vmul.f32 %v947_v0, %v189_v43  ;;  %v580_v59 = vmax.f32 %v452_v48, 0.0  ;;  %v581_v60 = vmax.f32 %v453_v49, 0.0  ;;  %v203_v35 = vld [vmem:[%s952_s20 + $0xe8] sm:$0xff]  ;;  %v204_v40 = vld [vmem:[%s952_s20 + $0xf0] sm:$0xff]  ;;  %v205_v45 = vld [vmem:[%s952_s20 + $0xf8] sm:$0xff] }
  0x1c   : > { %v582_v61 = vmax.f32 %v454_v50, 0.0  ;;  %v458_v62 = vadd.f32 %v957_v1, %v323_v51  ;;  %v583_v4 = vmax.f32 %v455_v52, 0.0  ;;  %v584_v5 = vmax.f32 %v456_v53, 0.0 }
  0x1d   : > { %v585_v6 = vmax.f32 %v457_v54, 0.0  ;;  %v459_v7 = vadd.f32 %v957_v1, %v324_v55  ;;  %709 = vst.msk [vmem:[%s980_s25 + $0x40] sm:$0xff] %vm700_vm0, %v580_v59  ;;  %710 = vst.msk [vmem:[%s980_s25 + $0x48] sm:$0xff] %vm700_vm0, %v581_v60  ;;  %v325_v10 = vmul.f32 %v947_v0, %v190_v56  ;;  %v326_v11 = vmul.f32 %v947_v0, %v191_v57  ;;  %v207_v59 = vld [vmem:[%s952_s20 + $0x108] sm:$0xff]  ;;  %v208_v60 = vld [vmem:[%s952_s20 + $0x110] sm:$0xff] }
  0x1e   : > { %711 = vst.msk [vmem:[%s980_s25 + $0x50] sm:$0xff] %vm700_vm0, %v582_v61  ;;  %v586_v9 = vmax.f32 %v458_v62, 0.0  ;;  %v327_v12 = vmul.f32 %v947_v0, %v192_v58  ;;  %712 = vst.msk [vmem:[%s980_s25 + $0x58] sm:$0xff] %vm700_vm0, %v583_v4  ;;  %v328_v15 = vmul.f32 %v947_v0, %v193_v63  ;;  %v329_v16 = vmul.f32 %v947_v0, %v194_v2  ;;  %v206_v58 = vld [vmem:[%s952_s20 + $0x100] sm:$0xff] }
  0x1f   : > { %713 = vst.msk [vmem:[%s980_s25 + $0x60] sm:$0xff] %vm700_vm0, %v584_v5  ;;  %714 = vst.msk [vmem:[%s980_s25 + $0x68] sm:$0xff] %vm700_vm0, %v585_v6  ;;  %v587_v14 = vmax.f32 %v459_v7, 0.0  ;;  %v330_v17 = vmul.f32 %v947_v0, %v195_v3  ;;  %v460_v18 = vadd.f32 %v957_v1, %v325_v10  ;;  %v461_v19 = vadd.f32 %v957_v1, %v326_v11  ;;  %v209_v3 = vld [vmem:[%s952_s20 + $0x118] sm:$0xff]  ;;  %v210_v4 = vld [vmem:[%s952_s20 + $0x120] sm:$0xff] }
  0x20   : > { %715 = vst.msk [vmem:[%s980_s25 + $0x70] sm:$0xff] %vm700_vm0, %v586_v9  ;;  %v462_v20 = vadd.f32 %v957_v1, %v327_v12  ;;  %v331_v21 = vmul.f32 %v947_v0, %v196_v8  ;;  %v463_v22 = vadd.f32 %v957_v1, %v328_v15  ;;  %v464_v23 = vadd.f32 %v957_v1, %v329_v16  ;;  %v211_v5 = vld [vmem:[%s952_s20 + $0x128] sm:$0xff]  ;;  %v212_v10 = vld [vmem:[%s952_s20 + $0x130] sm:$0xff]  ;;  %v213_v15 = vld [vmem:[%s952_s20 + $0x138] sm:$0xff] }
  0x21   : > { %716 = vst.msk [vmem:[%s980_s25 + $0x78] sm:$0xff] %vm700_vm0, %v587_v14  ;;  %v465_v24 = vadd.f32 %v957_v1, %v330_v17  ;;  %v332_v25 = vmul.f32 %v947_v0, %v197_v13  ;;  %v588_v29 = vmax.f32 %v460_v18, 0.0  ;;  %v589_v30 = vmax.f32 %v461_v19, 0.0 }
  0x22   : > { %v590_v31 = vmax.f32 %v462_v20, 0.0  ;;  %v466_v32 = vadd.f32 %v957_v1, %v331_v21  ;;  %v591_v36 = vmax.f32 %v463_v22, 0.0  ;;  %v592_v37 = vmax.f32 %v464_v23, 0.0 }
  0x23   : > { %v593_v38 = vmax.f32 %v465_v24, 0.0  ;;  %v467_v39 = vadd.f32 %v957_v1, %v332_v25  ;;  %717 = vst.msk [vmem:[%s980_s25 + $0x80] sm:$0xff] %vm700_vm0, %v588_v29  ;;  %718 = vst.msk [vmem:[%s980_s25 + $0x88] sm:$0xff] %vm700_vm0, %v589_v30  ;;  %v333_v42 = vmul.f32 %v947_v0, %v198_v26  ;;  %v334_v43 = vmul.f32 %v947_v0, %v199_v27  ;;  %v215_v29 = vld [vmem:[%s952_s20 + $0x148] sm:$0xff]  ;;  %v216_v30 = vld [vmem:[%s952_s20 + $0x150] sm:$0xff] }
  0x24   : > { %719 = vst.msk [vmem:[%s980_s25 + $0x90] sm:$0xff] %vm700_vm0, %v590_v31  ;;  %v594_v41 = vmax.f32 %v466_v32, 0.0  ;;  %v335_v44 = vmul.f32 %v947_v0, %v200_v28  ;;  %720 = vst.msk [vmem:[%s980_s25 + $0x98] sm:$0xff] %vm700_vm0, %v591_v36  ;;  %v336_v47 = vmul.f32 %v947_v0, %v201_v33  ;;  %v337_v48 = vmul.f32 %v947_v0, %v202_v34  ;;  %v214_v28 = vld [vmem:[%s952_s20 + $0x140] sm:$0xff] }
  0x25   : > { %721 = vst.msk [vmem:[%s980_s25 + $0xa0] sm:$0xff] %vm700_vm0, %v592_v37  ;;  %722 = vst.msk [vmem:[%s980_s25 + $0xa8] sm:$0xff] %vm700_vm0, %v593_v38  ;;  %v595_v46 = vmax.f32 %v467_v39, 0.0  ;;  %v338_v49 = vmul.f32 %v947_v0, %v203_v35  ;;  %v468_v50 = vadd.f32 %v957_v1, %v333_v42  ;;  %v469_v51 = vadd.f32 %v957_v1, %v334_v43  ;;  %v217_v35 = vld [vmem:[%s952_s20 + $0x158] sm:$0xff]  ;;  %v218_v36 = vld [vmem:[%s952_s20 + $0x160] sm:$0xff] }
  0x26   : > { %723 = vst.msk [vmem:[%s980_s25 + $0xb0] sm:$0xff] %vm700_vm0, %v594_v41  ;;  %v470_v52 = vadd.f32 %v957_v1, %v335_v44  ;;  %v339_v53 = vmul.f32 %v947_v0, %v204_v40  ;;  %v471_v54 = vadd.f32 %v957_v1, %v336_v47  ;;  %v472_v55 = vadd.f32 %v957_v1, %v337_v48  ;;  %v219_v37 = vld [vmem:[%s952_s20 + $0x168] sm:$0xff]  ;;  %v220_v42 = vld [vmem:[%s952_s20 + $0x170] sm:$0xff]  ;;  %v221_v47 = vld [vmem:[%s952_s20 + $0x178] sm:$0xff] }
  0x27   : > { %724 = vst.msk [vmem:[%s980_s25 + $0xb8] sm:$0xff] %vm700_vm0, %v595_v46  ;;  %v473_v56 = vadd.f32 %v957_v1, %v338_v49  ;;  %v340_v57 = vmul.f32 %v947_v0, %v205_v45  ;;  %v596_v61 = vmax.f32 %v468_v50, 0.0  ;;  %v597_v62 = vmax.f32 %v469_v51, 0.0 }
  0x28   : > { %v598_v63 = vmax.f32 %v470_v52, 0.0  ;;  %v474_v2 = vadd.f32 %v957_v1, %v339_v53  ;;  %v599_v6 = vmax.f32 %v471_v54, 0.0  ;;  %v600_v7 = vmax.f32 %v472_v55, 0.0 }
  0x29   : > { %v601_v8 = vmax.f32 %v473_v56, 0.0  ;;  %v475_v9 = vadd.f32 %v957_v1, %v340_v57  ;;  %725 = vst.msk [vmem:[%s980_s25 + $0xc0] sm:$0xff] %vm700_vm0, %v596_v61  ;;  %726 = vst.msk [vmem:[%s980_s25 + $0xc8] sm:$0xff] %vm700_vm0, %v597_v62  ;;  %v341_v12 = vmul.f32 %v947_v0, %v206_v58  ;;  %v342_v13 = vmul.f32 %v947_v0, %v207_v59  ;;  %v223_v61 = vld [vmem:[%s952_s20 + $0x188] sm:$0xff]  ;;  %v224_v62 = vld [vmem:[%s952_s20 + $0x190] sm:$0xff] }
  0x2a   : > { %727 = vst.msk [vmem:[%s980_s25 + $0xd0] sm:$0xff] %vm700_vm0, %v598_v63  ;;  %v602_v11 = vmax.f32 %v474_v2, 0.0  ;;  %v343_v14 = vmul.f32 %v947_v0, %v208_v60  ;;  %728 = vst.msk [vmem:[%s980_s25 + $0xd8] sm:$0xff] %vm700_vm0, %v599_v6  ;;  %v344_v17 = vmul.f32 %v947_v0, %v209_v3  ;;  %v345_v18 = vmul.f32 %v947_v0, %v210_v4  ;;  %v222_v60 = vld [vmem:[%s952_s20 + $0x180] sm:$0xff] }
  0x2b   : > { %729 = vst.msk [vmem:[%s980_s25 + $0xe0] sm:$0xff] %vm700_vm0, %v600_v7  ;;  %730 = vst.msk [vmem:[%s980_s25 + $0xe8] sm:$0xff] %vm700_vm0, %v601_v8  ;;  %v603_v16 = vmax.f32 %v475_v9, 0.0  ;;  %v346_v19 = vmul.f32 %v947_v0, %v211_v5  ;;  %v476_v20 = vadd.f32 %v957_v1, %v341_v12  ;;  %v477_v21 = vadd.f32 %v957_v1, %v342_v13  ;;  %v225_v5 = vld [vmem:[%s952_s20 + $0x198] sm:$0xff]  ;;  %v226_v6 = vld [vmem:[%s952_s20 + $0x1a0] sm:$0xff] }
  0x2c   : > { %731 = vst.msk [vmem:[%s980_s25 + $0xf0] sm:$0xff] %vm700_vm0, %v602_v11  ;;  %v478_v22 = vadd.f32 %v957_v1, %v343_v14  ;;  %v347_v23 = vmul.f32 %v947_v0, %v212_v10  ;;  %v479_v24 = vadd.f32 %v957_v1, %v344_v17  ;;  %v480_v25 = vadd.f32 %v957_v1, %v345_v18  ;;  %v227_v7 = vld [vmem:[%s952_s20 + $0x1a8] sm:$0xff]  ;;  %v228_v12 = vld [vmem:[%s952_s20 + $0x1b0] sm:$0xff]  ;;  %v229_v17 = vld [vmem:[%s952_s20 + $0x1b8] sm:$0xff] }
  0x2d   : > { %732 = vst.msk [vmem:[%s980_s25 + $0xf8] sm:$0xff] %vm700_vm0, %v603_v16  ;;  %v481_v26 = vadd.f32 %v957_v1, %v346_v19  ;;  %v348_v27 = vmul.f32 %v947_v0, %v213_v15  ;;  %v604_v31 = vmax.f32 %v476_v20, 0.0  ;;  %v605_v32 = vmax.f32 %v477_v21, 0.0 }
  0x2e   : > { %v606_v33 = vmax.f32 %v478_v22, 0.0  ;;  %v482_v34 = vadd.f32 %v957_v1, %v347_v23  ;;  %v607_v38 = vmax.f32 %v479_v24, 0.0  ;;  %v608_v39 = vmax.f32 %v480_v25, 0.0 }
  0x2f   : > { %v609_v40 = vmax.f32 %v481_v26, 0.0  ;;  %v483_v41 = vadd.f32 %v957_v1, %v348_v27  ;;  %733 = vst.msk [vmem:[%s980_s25 + $0x100] sm:$0xff] %vm700_vm0, %v604_v31  ;;  %734 = vst.msk [vmem:[%s980_s25 + $0x108] sm:$0xff] %vm700_vm0, %v605_v32  ;;  %v349_v44 = vmul.f32 %v947_v0, %v214_v28  ;;  %v350_v45 = vmul.f32 %v947_v0, %v215_v29  ;;  %v231_v31 = vld [vmem:[%s952_s20 + $0x1c8] sm:$0xff]  ;;  %v232_v32 = vld [vmem:[%s952_s20 + $0x1d0] sm:$0xff] }
  0x30   : > { %735 = vst.msk [vmem:[%s980_s25 + $0x110] sm:$0xff] %vm700_vm0, %v606_v33  ;;  %v610_v43 = vmax.f32 %v482_v34, 0.0  ;;  %v351_v46 = vmul.f32 %v947_v0, %v216_v30  ;;  %736 = vst.msk [vmem:[%s980_s25 + $0x118] sm:$0xff] %vm700_vm0, %v607_v38  ;;  %v352_v49 = vmul.f32 %v947_v0, %v217_v35  ;;  %v353_v50 = vmul.f32 %v947_v0, %v218_v36  ;;  %v230_v30 = vld [vmem:[%s952_s20 + $0x1c0] sm:$0xff] }
  0x31   : > { %737 = vst.msk [vmem:[%s980_s25 + $0x120] sm:$0xff] %vm700_vm0, %v608_v39  ;;  %738 = vst.msk [vmem:[%s980_s25 + $0x128] sm:$0xff] %vm700_vm0, %v609_v40  ;;  %v611_v48 = vmax.f32 %v483_v41, 0.0  ;;  %v354_v51 = vmul.f32 %v947_v0, %v219_v37  ;;  %v484_v52 = vadd.f32 %v957_v1, %v349_v44  ;;  %v485_v53 = vadd.f32 %v957_v1, %v350_v45  ;;  %v233_v37 = vld [vmem:[%s952_s20 + $0x1d8] sm:$0xff]  ;;  %v234_v38 = vld [vmem:[%s952_s20 + $0x1e0] sm:$0xff] }
  0x32   : > { %739 = vst.msk [vmem:[%s980_s25 + $0x130] sm:$0xff] %vm700_vm0, %v610_v43  ;;  %v486_v54 = vadd.f32 %v957_v1, %v351_v46  ;;  %v355_v55 = vmul.f32 %v947_v0, %v220_v42  ;;  %v487_v56 = vadd.f32 %v957_v1, %v352_v49  ;;  %v488_v57 = vadd.f32 %v957_v1, %v353_v50  ;;  %v235_v39 = vld [vmem:[%s952_s20 + $0x1e8] sm:$0xff]  ;;  %v236_v44 = vld [vmem:[%s952_s20 + $0x1f0] sm:$0xff]  ;;  %v237_v49 = vld [vmem:[%s952_s20 + $0x1f8] sm:$0xff] }
  0x33   : > { %740 = vst.msk [vmem:[%s980_s25 + $0x138] sm:$0xff] %vm700_vm0, %v611_v48  ;;  %v489_v58 = vadd.f32 %v957_v1, %v354_v51  ;;  %v356_v59 = vmul.f32 %v947_v0, %v221_v47  ;;  %v612_v63 = vmax.f32 %v484_v52, 0.0  ;;  %v613_v2 = vmax.f32 %v485_v53, 0.0 }
  0x34   : > { %v614_v3 = vmax.f32 %v486_v54, 0.0  ;;  %v490_v4 = vadd.f32 %v957_v1, %v355_v55  ;;  %v615_v8 = vmax.f32 %v487_v56, 0.0  ;;  %v616_v9 = vmax.f32 %v488_v57, 0.0 }
  0x35   : > { %v617_v10 = vmax.f32 %v489_v58, 0.0  ;;  %v491_v11 = vadd.f32 %v957_v1, %v356_v59  ;;  %741 = vst.msk [vmem:[%s980_s25 + $0x140] sm:$0xff] %vm700_vm0, %v612_v63  ;;  %742 = vst.msk [vmem:[%s980_s25 + $0x148] sm:$0xff] %vm700_vm0, %v613_v2  ;;  %v357_v14 = vmul.f32 %v947_v0, %v222_v60  ;;  %v358_v15 = vmul.f32 %v947_v0, %v223_v61  ;;  %v239_v63 = vld [vmem:[%s952_s20 + $0x208] sm:$0xff]  ;;  %v240_v2 = vld [vmem:[%s952_s20 + $0x210] sm:$0xff] }
  0x36   : > { %743 = vst.msk [vmem:[%s980_s25 + $0x150] sm:$0xff] %vm700_vm0, %v614_v3  ;;  %v618_v13 = vmax.f32 %v490_v4, 0.0  ;;  %v359_v16 = vmul.f32 %v947_v0, %v224_v62  ;;  %744 = vst.msk [vmem:[%s980_s25 + $0x158] sm:$0xff] %vm700_vm0, %v615_v8  ;;  %v360_v19 = vmul.f32 %v947_v0, %v225_v5  ;;  %v361_v20 = vmul.f32 %v947_v0, %v226_v6  ;;  %v238_v62 = vld [vmem:[%s952_s20 + $0x200] sm:$0xff] }
  0x37   : > { %745 = vst.msk [vmem:[%s980_s25 + $0x160] sm:$0xff] %vm700_vm0, %v616_v9  ;;  %746 = vst.msk [vmem:[%s980_s25 + $0x168] sm:$0xff] %vm700_vm0, %v617_v10  ;;  %v619_v18 = vmax.f32 %v491_v11, 0.0  ;;  %v362_v21 = vmul.f32 %v947_v0, %v227_v7  ;;  %v492_v22 = vadd.f32 %v957_v1, %v357_v14  ;;  %v493_v23 = vadd.f32 %v957_v1, %v358_v15  ;;  %v241_v7 = vld [vmem:[%s952_s20 + $0x218] sm:$0xff]  ;;  %v242_v8 = vld [vmem:[%s952_s20 + $0x220] sm:$0xff] }
  0x38   : > { %747 = vst.msk [vmem:[%s980_s25 + $0x170] sm:$0xff] %vm700_vm0, %v618_v13  ;;  %v494_v24 = vadd.f32 %v957_v1, %v359_v16  ;;  %v363_v25 = vmul.f32 %v947_v0, %v228_v12  ;;  %v495_v26 = vadd.f32 %v957_v1, %v360_v19  ;;  %v496_v27 = vadd.f32 %v957_v1, %v361_v20  ;;  %v243_v9 = vld [vmem:[%s952_s20 + $0x228] sm:$0xff]  ;;  %v244_v14 = vld [vmem:[%s952_s20 + $0x230] sm:$0xff]  ;;  %v245_v19 = vld [vmem:[%s952_s20 + $0x238] sm:$0xff] }
  0x39   : > { %748 = vst.msk [vmem:[%s980_s25 + $0x178] sm:$0xff] %vm700_vm0, %v619_v18  ;;  %v497_v28 = vadd.f32 %v957_v1, %v362_v21  ;;  %v364_v29 = vmul.f32 %v947_v0, %v229_v17  ;;  %v620_v33 = vmax.f32 %v492_v22, 0.0  ;;  %v621_v34 = vmax.f32 %v493_v23, 0.0 }
  0x3a   : > { %v622_v35 = vmax.f32 %v494_v24, 0.0  ;;  %v498_v36 = vadd.f32 %v957_v1, %v363_v25  ;;  %v623_v40 = vmax.f32 %v495_v26, 0.0  ;;  %v624_v41 = vmax.f32 %v496_v27, 0.0 }
  0x3b   : > { %v625_v42 = vmax.f32 %v497_v28, 0.0  ;;  %v499_v43 = vadd.f32 %v957_v1, %v364_v29  ;;  %749 = vst.msk [vmem:[%s980_s25 + $0x180] sm:$0xff] %vm700_vm0, %v620_v33  ;;  %750 = vst.msk [vmem:[%s980_s25 + $0x188] sm:$0xff] %vm700_vm0, %v621_v34  ;;  %v365_v46 = vmul.f32 %v947_v0, %v230_v30  ;;  %v366_v47 = vmul.f32 %v947_v0, %v231_v31  ;;  %v247_v33 = vld [vmem:[%s952_s20 + $0x248] sm:$0xff]  ;;  %v248_v34 = vld [vmem:[%s952_s20 + $0x250] sm:$0xff] }
  0x3c   : > { %751 = vst.msk [vmem:[%s980_s25 + $0x190] sm:$0xff] %vm700_vm0, %v622_v35  ;;  %v626_v45 = vmax.f32 %v498_v36, 0.0  ;;  %v367_v48 = vmul.f32 %v947_v0, %v232_v32  ;;  %752 = vst.msk [vmem:[%s980_s25 + $0x198] sm:$0xff] %vm700_vm0, %v623_v40  ;;  %v368_v51 = vmul.f32 %v947_v0, %v233_v37  ;;  %v369_v52 = vmul.f32 %v947_v0, %v234_v38  ;;  %v246_v32 = vld [vmem:[%s952_s20 + $0x240] sm:$0xff] }
  0x3d   : > { %753 = vst.msk [vmem:[%s980_s25 + $0x1a0] sm:$0xff] %vm700_vm0, %v624_v41  ;;  %754 = vst.msk [vmem:[%s980_s25 + $0x1a8] sm:$0xff] %vm700_vm0, %v625_v42  ;;  %v627_v50 = vmax.f32 %v499_v43, 0.0  ;;  %v370_v53 = vmul.f32 %v947_v0, %v235_v39  ;;  %v500_v54 = vadd.f32 %v957_v1, %v365_v46  ;;  %v501_v55 = vadd.f32 %v957_v1, %v366_v47  ;;  %v249_v39 = vld [vmem:[%s952_s20 + $0x258] sm:$0xff]  ;;  %v250_v40 = vld [vmem:[%s952_s20 + $0x260] sm:$0xff] }
  0x3e   : > { %755 = vst.msk [vmem:[%s980_s25 + $0x1b0] sm:$0xff] %vm700_vm0, %v626_v45  ;;  %v502_v56 = vadd.f32 %v957_v1, %v367_v48  ;;  %v371_v57 = vmul.f32 %v947_v0, %v236_v44  ;;  %v503_v58 = vadd.f32 %v957_v1, %v368_v51  ;;  %v504_v59 = vadd.f32 %v957_v1, %v369_v52  ;;  %v251_v41 = vld [vmem:[%s952_s20 + $0x268] sm:$0xff]  ;;  %v252_v46 = vld [vmem:[%s952_s20 + $0x270] sm:$0xff]  ;;  %v253_v51 = vld [vmem:[%s952_s20 + $0x278] sm:$0xff] }
  0x3f   : > { %756 = vst.msk [vmem:[%s980_s25 + $0x1b8] sm:$0xff] %vm700_vm0, %v627_v50  ;;  %v505_v60 = vadd.f32 %v957_v1, %v370_v53  ;;  %v372_v61 = vmul.f32 %v947_v0, %v237_v49  ;;  %v628_v3 = vmax.f32 %v500_v54, 0.0  ;;  %v629_v4 = vmax.f32 %v501_v55, 0.0 }
  0x40   : > { %v630_v5 = vmax.f32 %v502_v56, 0.0  ;;  %v506_v6 = vadd.f32 %v957_v1, %v371_v57  ;;  %v631_v10 = vmax.f32 %v503_v58, 0.0  ;;  %v632_v11 = vmax.f32 %v504_v59, 0.0 }
  0x41   : > { %v633_v12 = vmax.f32 %v505_v60, 0.0  ;;  %v507_v13 = vadd.f32 %v957_v1, %v372_v61  ;;  %757 = vst.msk [vmem:[%s980_s25 + $0x1c0] sm:$0xff] %vm700_vm0, %v628_v3  ;;  %758 = vst.msk [vmem:[%s980_s25 + $0x1c8] sm:$0xff] %vm700_vm0, %v629_v4  ;;  %v373_v16 = vmul.f32 %v947_v0, %v238_v62  ;;  %v374_v17 = vmul.f32 %v947_v0, %v239_v63  ;;  %v255_v3 = vld [vmem:[%s952_s20 + $0x288] sm:$0xff]  ;;  %v256_v4 = vld [vmem:[%s952_s20 + $0x290] sm:$0xff] }
  0x42   : > { %759 = vst.msk [vmem:[%s980_s25 + $0x1d0] sm:$0xff] %vm700_vm0, %v630_v5  ;;  %v634_v15 = vmax.f32 %v506_v6, 0.0  ;;  %v375_v18 = vmul.f32 %v947_v0, %v240_v2  ;;  %760 = vst.msk [vmem:[%s980_s25 + $0x1d8] sm:$0xff] %vm700_vm0, %v631_v10  ;;  %v376_v21 = vmul.f32 %v947_v0, %v241_v7  ;;  %v377_v22 = vmul.f32 %v947_v0, %v242_v8  ;;  %v254_v2 = vld [vmem:[%s952_s20 + $0x280] sm:$0xff] }
  0x43   : > { %761 = vst.msk [vmem:[%s980_s25 + $0x1e0] sm:$0xff] %vm700_vm0, %v632_v11  ;;  %762 = vst.msk [vmem:[%s980_s25 + $0x1e8] sm:$0xff] %vm700_vm0, %v633_v12  ;;  %v635_v20 = vmax.f32 %v507_v13, 0.0  ;;  %v378_v23 = vmul.f32 %v947_v0, %v243_v9  ;;  %v508_v24 = vadd.f32 %v957_v1, %v373_v16  ;;  %v509_v25 = vadd.f32 %v957_v1, %v374_v17  ;;  %v257_v9 = vld [vmem:[%s952_s20 + $0x298] sm:$0xff]  ;;  %v258_v10 = vld [vmem:[%s952_s20 + $0x2a0] sm:$0xff] }
  0x44   : > { %763 = vst.msk [vmem:[%s980_s25 + $0x1f0] sm:$0xff] %vm700_vm0, %v634_v15  ;;  %v510_v26 = vadd.f32 %v957_v1, %v375_v18  ;;  %v379_v27 = vmul.f32 %v947_v0, %v244_v14  ;;  %v511_v28 = vadd.f32 %v957_v1, %v376_v21  ;;  %v512_v29 = vadd.f32 %v957_v1, %v377_v22  ;;  %v259_v11 = vld [vmem:[%s952_s20 + $0x2a8] sm:$0xff]  ;;  %v260_v16 = vld [vmem:[%s952_s20 + $0x2b0] sm:$0xff]  ;;  %v261_v21 = vld [vmem:[%s952_s20 + $0x2b8] sm:$0xff] }
  0x45   : > { %764 = vst.msk [vmem:[%s980_s25 + $0x1f8] sm:$0xff] %vm700_vm0, %v635_v20  ;;  %v513_v30 = vadd.f32 %v957_v1, %v378_v23  ;;  %v380_v31 = vmul.f32 %v947_v0, %v245_v19  ;;  %v636_v35 = vmax.f32 %v508_v24, 0.0  ;;  %v637_v36 = vmax.f32 %v509_v25, 0.0 }
  0x46   : > { %v638_v37 = vmax.f32 %v510_v26, 0.0  ;;  %v514_v38 = vadd.f32 %v957_v1, %v379_v27  ;;  %v639_v42 = vmax.f32 %v511_v28, 0.0  ;;  %v640_v43 = vmax.f32 %v512_v29, 0.0 }
  0x47   : > { %v641_v44 = vmax.f32 %v513_v30, 0.0  ;;  %v515_v45 = vadd.f32 %v957_v1, %v380_v31  ;;  %765 = vst.msk [vmem:[%s980_s25 + $0x200] sm:$0xff] %vm700_vm0, %v636_v35  ;;  %766 = vst.msk [vmem:[%s980_s25 + $0x208] sm:$0xff] %vm700_vm0, %v637_v36  ;;  %v381_v48 = vmul.f32 %v947_v0, %v246_v32  ;;  %v382_v49 = vmul.f32 %v947_v0, %v247_v33  ;;  %v263_v35 = vld [vmem:[%s952_s20 + $0x2c8] sm:$0xff]  ;;  %v264_v36 = vld [vmem:[%s952_s20 + $0x2d0] sm:$0xff] }
  0x48   : > { %767 = vst.msk [vmem:[%s980_s25 + $0x210] sm:$0xff] %vm700_vm0, %v638_v37  ;;  %v642_v47 = vmax.f32 %v514_v38, 0.0  ;;  %v383_v50 = vmul.f32 %v947_v0, %v248_v34  ;;  %768 = vst.msk [vmem:[%s980_s25 + $0x218] sm:$0xff] %vm700_vm0, %v639_v42  ;;  %v384_v53 = vmul.f32 %v947_v0, %v249_v39  ;;  %v385_v54 = vmul.f32 %v947_v0, %v250_v40  ;;  %v262_v34 = vld [vmem:[%s952_s20 + $0x2c0] sm:$0xff] }
  0x49   : > { %769 = vst.msk [vmem:[%s980_s25 + $0x220] sm:$0xff] %vm700_vm0, %v640_v43  ;;  %770 = vst.msk [vmem:[%s980_s25 + $0x228] sm:$0xff] %vm700_vm0, %v641_v44  ;;  %v643_v52 = vmax.f32 %v515_v45, 0.0  ;;  %v386_v55 = vmul.f32 %v947_v0, %v251_v41  ;;  %v516_v56 = vadd.f32 %v957_v1, %v381_v48  ;;  %v517_v57 = vadd.f32 %v957_v1, %v382_v49  ;;  %v265_v41 = vld [vmem:[%s952_s20 + $0x2d8] sm:$0xff]  ;;  %v266_v42 = vld [vmem:[%s952_s20 + $0x2e0] sm:$0xff] }
  0x4a   : > { %771 = vst.msk [vmem:[%s980_s25 + $0x230] sm:$0xff] %vm700_vm0, %v642_v47  ;;  %v518_v58 = vadd.f32 %v957_v1, %v383_v50  ;;  %v387_v59 = vmul.f32 %v947_v0, %v252_v46  ;;  %v519_v60 = vadd.f32 %v957_v1, %v384_v53  ;;  %v520_v61 = vadd.f32 %v957_v1, %v385_v54  ;;  %v267_v43 = vld [vmem:[%s952_s20 + $0x2e8] sm:$0xff]  ;;  %v268_v48 = vld [vmem:[%s952_s20 + $0x2f0] sm:$0xff]  ;;  %v269_v53 = vld [vmem:[%s952_s20 + $0x2f8] sm:$0xff] }
  0x4b   : > { %772 = vst.msk [vmem:[%s980_s25 + $0x238] sm:$0xff] %vm700_vm0, %v643_v52  ;;  %v521_v62 = vadd.f32 %v957_v1, %v386_v55  ;;  %v388_v63 = vmul.f32 %v947_v0, %v253_v51  ;;  %v644_v5 = vmax.f32 %v516_v56, 0.0  ;;  %v645_v6 = vmax.f32 %v517_v57, 0.0 }
  0x4c   : > { %v646_v7 = vmax.f32 %v518_v58, 0.0  ;;  %v522_v8 = vadd.f32 %v957_v1, %v387_v59  ;;  %v647_v12 = vmax.f32 %v519_v60, 0.0  ;;  %v648_v13 = vmax.f32 %v520_v61, 0.0 }
  0x4d   : > { %v649_v14 = vmax.f32 %v521_v62, 0.0  ;;  %v523_v15 = vadd.f32 %v957_v1, %v388_v63  ;;  %773 = vst.msk [vmem:[%s980_s25 + $0x240] sm:$0xff] %vm700_vm0, %v644_v5  ;;  %774 = vst.msk [vmem:[%s980_s25 + $0x248] sm:$0xff] %vm700_vm0, %v645_v6  ;;  %v389_v18 = vmul.f32 %v947_v0, %v254_v2  ;;  %v390_v19 = vmul.f32 %v947_v0, %v255_v3  ;;  %v271_v5 = vld [vmem:[%s952_s20 + $0x308] sm:$0xff]  ;;  %v272_v6 = vld [vmem:[%s952_s20 + $0x310] sm:$0xff] }
  0x4e   : > { %775 = vst.msk [vmem:[%s980_s25 + $0x250] sm:$0xff] %vm700_vm0, %v646_v7  ;;  %v650_v17 = vmax.f32 %v522_v8, 0.0  ;;  %v391_v20 = vmul.f32 %v947_v0, %v256_v4  ;;  %776 = vst.msk [vmem:[%s980_s25 + $0x258] sm:$0xff] %vm700_vm0, %v647_v12  ;;  %v392_v23 = vmul.f32 %v947_v0, %v257_v9  ;;  %v393_v24 = vmul.f32 %v947_v0, %v258_v10  ;;  %v270_v4 = vld [vmem:[%s952_s20 + $0x300] sm:$0xff] }
  0x4f   : > { %777 = vst.msk [vmem:[%s980_s25 + $0x260] sm:$0xff] %vm700_vm0, %v648_v13  ;;  %778 = vst.msk [vmem:[%s980_s25 + $0x268] sm:$0xff] %vm700_vm0, %v649_v14  ;;  %v651_v22 = vmax.f32 %v523_v15, 0.0  ;;  %v394_v25 = vmul.f32 %v947_v0, %v259_v11  ;;  %v524_v26 = vadd.f32 %v957_v1, %v389_v18  ;;  %v525_v27 = vadd.f32 %v957_v1, %v390_v19  ;;  %v273_v11 = vld [vmem:[%s952_s20 + $0x318] sm:$0xff]  ;;  %v274_v12 = vld [vmem:[%s952_s20 + $0x320] sm:$0xff] }
  0x50   : > { %779 = vst.msk [vmem:[%s980_s25 + $0x270] sm:$0xff] %vm700_vm0, %v650_v17  ;;  %v526_v28 = vadd.f32 %v957_v1, %v391_v20  ;;  %v395_v29 = vmul.f32 %v947_v0, %v260_v16  ;;  %v527_v30 = vadd.f32 %v957_v1, %v392_v23  ;;  %v528_v31 = vadd.f32 %v957_v1, %v393_v24  ;;  %v275_v13 = vld [vmem:[%s952_s20 + $0x328] sm:$0xff]  ;;  %v276_v18 = vld [vmem:[%s952_s20 + $0x330] sm:$0xff]  ;;  %v277_v23 = vld [vmem:[%s952_s20 + $0x338] sm:$0xff] }
  0x51   : > { %780 = vst.msk [vmem:[%s980_s25 + $0x278] sm:$0xff] %vm700_vm0, %v651_v22  ;;  %v529_v32 = vadd.f32 %v957_v1, %v394_v25  ;;  %v396_v33 = vmul.f32 %v947_v0, %v261_v21  ;;  %v652_v37 = vmax.f32 %v524_v26, 0.0  ;;  %v653_v38 = vmax.f32 %v525_v27, 0.0 }
  0x52   : > { %v654_v39 = vmax.f32 %v526_v28, 0.0  ;;  %v530_v40 = vadd.f32 %v957_v1, %v395_v29  ;;  %v655_v44 = vmax.f32 %v527_v30, 0.0  ;;  %v656_v45 = vmax.f32 %v528_v31, 0.0 }
  0x53   : > { %v657_v46 = vmax.f32 %v529_v32, 0.0  ;;  %v531_v47 = vadd.f32 %v957_v1, %v396_v33  ;;  %781 = vst.msk [vmem:[%s980_s25 + $0x280] sm:$0xff] %vm700_vm0, %v652_v37  ;;  %782 = vst.msk [vmem:[%s980_s25 + $0x288] sm:$0xff] %vm700_vm0, %v653_v38  ;;  %v397_v50 = vmul.f32 %v947_v0, %v262_v34  ;;  %v398_v51 = vmul.f32 %v947_v0, %v263_v35  ;;  %v279_v37 = vld [vmem:[%s952_s20 + $0x348] sm:$0xff]  ;;  %v280_v38 = vld [vmem:[%s952_s20 + $0x350] sm:$0xff] }
  0x54   : > { %783 = vst.msk [vmem:[%s980_s25 + $0x290] sm:$0xff] %vm700_vm0, %v654_v39  ;;  %v658_v49 = vmax.f32 %v530_v40, 0.0  ;;  %v399_v52 = vmul.f32 %v947_v0, %v264_v36  ;;  %784 = vst.msk [vmem:[%s980_s25 + $0x298] sm:$0xff] %vm700_vm0, %v655_v44  ;;  %v400_v55 = vmul.f32 %v947_v0, %v265_v41  ;;  %v401_v56 = vmul.f32 %v947_v0, %v266_v42  ;;  %v278_v36 = vld [vmem:[%s952_s20 + $0x340] sm:$0xff] }
  0x55   : > { %785 = vst.msk [vmem:[%s980_s25 + $0x2a0] sm:$0xff] %vm700_vm0, %v656_v45  ;;  %786 = vst.msk [vmem:[%s980_s25 + $0x2a8] sm:$0xff] %vm700_vm0, %v657_v46  ;;  %v659_v54 = vmax.f32 %v531_v47, 0.0  ;;  %v402_v57 = vmul.f32 %v947_v0, %v267_v43  ;;  %v532_v58 = vadd.f32 %v957_v1, %v397_v50  ;;  %v533_v59 = vadd.f32 %v957_v1, %v398_v51  ;;  %v281_v43 = vld [vmem:[%s952_s20 + $0x358] sm:$0xff]  ;;  %v282_v44 = vld [vmem:[%s952_s20 + $0x360] sm:$0xff] }
  0x56   : > { %787 = vst.msk [vmem:[%s980_s25 + $0x2b0] sm:$0xff] %vm700_vm0, %v658_v49  ;;  %v534_v60 = vadd.f32 %v957_v1, %v399_v52  ;;  %v403_v61 = vmul.f32 %v947_v0, %v268_v48  ;;  %v535_v62 = vadd.f32 %v957_v1, %v400_v55  ;;  %v536_v63 = vadd.f32 %v957_v1, %v401_v56  ;;  %v283_v45 = vld [vmem:[%s952_s20 + $0x368] sm:$0xff]  ;;  %v1476_v48 = vld [vmem:[%s1619_s2] ss:$0 sm:$0xff]  ;;  %v284_v50 = vld [vmem:[%s952_s20 + $0x370] sm:$0xff] }
  0x57   : > { %788 = vst.msk [vmem:[%s980_s25 + $0x2b8] sm:$0xff] %vm700_vm0, %v659_v54  ;;  %v537_v2 = vadd.f32 %v957_v1, %v402_v57  ;;  %v404_v3 = vmul.f32 %v947_v0, %v269_v53  ;;  %v660_v7 = vmax.f32 %v532_v58, 0.0  ;;  %v661_v8 = vmax.f32 %v533_v59, 0.0  ;;  %v1489_v51 = vld [vmem:[%s1618_s1] ss:$0 sm:$0xff]  ;;  %v285_v55 = vld [vmem:[%s952_s20 + $0x378] sm:$0xff] }
  0x58   : > { %v662_v9 = vmax.f32 %v534_v60, 0.0  ;;  %v538_v10 = vadd.f32 %v957_v1, %v403_v61  ;;  %v663_v14 = vmax.f32 %v535_v62, 0.0  ;;  %v664_v15 = vmax.f32 %v536_v63, 0.0 }
  0x59   : > { %v665_v16 = vmax.f32 %v537_v2, 0.0  ;;  %v539_v17 = vadd.f32 %v957_v1, %v404_v3  ;;  %789 = vst.msk [vmem:[%s980_s25 + $0x2c0] sm:$0xff] %vm700_vm0, %v660_v7  ;;  %790 = vst.msk [vmem:[%s980_s25 + $0x2c8] sm:$0xff] %vm700_vm0, %v661_v8  ;;  %v405_v20 = vmul.f32 %v947_v0, %v270_v4  ;;  %v406_v21 = vmul.f32 %v947_v0, %v271_v5  ;;  %v287_v7 = vld [vmem:[%s952_s20 + $0x388] sm:$0xff]  ;;  %v288_v8 = vld [vmem:[%s952_s20 + $0x390] sm:$0xff] }
  0x5a   : > { %791 = vst.msk [vmem:[%s980_s25 + $0x2d0] sm:$0xff] %vm700_vm0, %v662_v9  ;;  %v666_v19 = vmax.f32 %v538_v10, 0.0  ;;  %v407_v22 = vmul.f32 %v947_v0, %v272_v6  ;;  %792 = vst.msk [vmem:[%s980_s25 + $0x2d8] sm:$0xff] %vm700_vm0, %v663_v14  ;;  %v408_v25 = vmul.f32 %v947_v0, %v273_v11  ;;  %v409_v26 = vmul.f32 %v947_v0, %v274_v12  ;;  %v286_v6 = vld [vmem:[%s952_s20 + $0x380] sm:$0xff] }
  0x5b   : > { %793 = vst.msk [vmem:[%s980_s25 + $0x2e0] sm:$0xff] %vm700_vm0, %v664_v15  ;;  %794 = vst.msk [vmem:[%s980_s25 + $0x2e8] sm:$0xff] %vm700_vm0, %v665_v16  ;;  %v667_v24 = vmax.f32 %v539_v17, 0.0  ;;  %v410_v27 = vmul.f32 %v947_v0, %v275_v13  ;;  %v540_v28 = vadd.f32 %v957_v1, %v405_v20  ;;  %v541_v29 = vadd.f32 %v957_v1, %v406_v21  ;;  %v289_v13 = vld [vmem:[%s952_s20 + $0x398] sm:$0xff]  ;;  %v290_v14 = vld [vmem:[%s952_s20 + $0x3a0] sm:$0xff] }
  0x5c   : > { %795 = vst.msk [vmem:[%s980_s25 + $0x2f0] sm:$0xff] %vm700_vm0, %v666_v19  ;;  %v542_v30 = vadd.f32 %v957_v1, %v407_v22  ;;  %v411_v31 = vmul.f32 %v947_v0, %v276_v18  ;;  %v543_v32 = vadd.f32 %v957_v1, %v408_v25  ;;  %v544_v33 = vadd.f32 %v957_v1, %v409_v26  ;;  %v291_v15 = vld [vmem:[%s952_s20 + $0x3a8] sm:$0xff]  ;;  %v292_v20 = vld [vmem:[%s952_s20 + $0x3b0] sm:$0xff]  ;;  %v293_v25 = vld [vmem:[%s952_s20 + $0x3b8] sm:$0xff] }
  0x5d   : > { %796 = vst.msk [vmem:[%s980_s25 + $0x2f8] sm:$0xff] %vm700_vm0, %v667_v24  ;;  %v545_v34 = vadd.f32 %v957_v1, %v410_v27  ;;  %v412_v35 = vmul.f32 %v947_v0, %v277_v23  ;;  %v668_v39 = vmax.f32 %v540_v28, 0.0  ;;  %v669_v40 = vmax.f32 %v541_v29, 0.0 }
  0x5e   : > { %v670_v41 = vmax.f32 %v542_v30, 0.0  ;;  %v546_v42 = vadd.f32 %v957_v1, %v411_v31  ;;  %v671_v46 = vmax.f32 %v543_v32, 0.0  ;;  %v672_v0 = vmax.f32 %v544_v33, 0.0 }
  0x5f   : > { %v673_v47 = vmax.f32 %v545_v34, 0.0  ;;  %v547_v49 = vadd.f32 %v1476_v48, %v412_v35  ;;  %797 = vst.msk [vmem:[%s980_s25 + $0x300] sm:$0xff] %vm700_vm0, %v668_v39  ;;  %798 = vst.msk [vmem:[%s980_s25 + $0x308] sm:$0xff] %vm700_vm0, %v669_v40  ;;  %v413_v52 = vmul.f32 %v1489_v51, %v278_v36  ;;  %v414_v53 = vmul.f32 %v1489_v51, %v279_v37  ;;  %v295_v39 = vld [vmem:[%s952_s20 + $0x3c8] sm:$0xff]  ;;  %v296_v40 = vld [vmem:[%s952_s20 + $0x3d0] sm:$0xff] }
  0x60   : > { %799 = vst.msk [vmem:[%s980_s25 + $0x310] sm:$0xff] %vm700_vm0, %v670_v41  ;;  %v674_v1 = vmax.f32 %v546_v42, 0.0  ;;  %v415_v54 = vmul.f32 %v1489_v51, %v280_v38  ;;  %800 = vst.msk [vmem:[%s980_s25 + $0x318] sm:$0xff] %vm700_vm0, %v671_v46  ;;  %v416_v57 = vmul.f32 %v1489_v51, %v281_v43  ;;  %v417_v58 = vmul.f32 %v1489_v51, %v282_v44  ;;  %v294_v38 = vld [vmem:[%s952_s20 + $0x3c0] sm:$0xff] }
  0x61   : > { %801 = vst.msk [vmem:[%s980_s25 + $0x320] sm:$0xff] %vm700_vm0, %v672_v0  ;;  %802 = vst.msk [vmem:[%s980_s25 + $0x328] sm:$0xff] %vm700_vm0, %v673_v47  ;;  %v675_v56 = vmax.f32 %v547_v49, 0.0  ;;  %v418_v59 = vmul.f32 %v1489_v51, %v283_v45  ;;  %v548_v60 = vadd.f32 %v1476_v48, %v413_v52  ;;  %v549_v61 = vadd.f32 %v1476_v48, %v414_v53  ;;  %v297_v45 = vld [vmem:[%s952_s20 + $0x3d8] sm:$0xff]  ;;  %v298_v46 = vld [vmem:[%s952_s20 + $0x3e0] sm:$0xff] }
  0x62   : > { %803 = vst.msk [vmem:[%s980_s25 + $0x330] sm:$0xff] %vm700_vm0, %v674_v1  ;;  %v550_v62 = vadd.f32 %v1476_v48, %v415_v54  ;;  %v419_v63 = vmul.f32 %v1489_v51, %v284_v50  ;;  %v551_v2 = vadd.f32 %v1476_v48, %v416_v57  ;;  %v552_v3 = vadd.f32 %v1476_v48, %v417_v58  ;;  %v299_v0 = vld [vmem:[%s952_s20 + $0x3e8] sm:$0xff]  ;;  %v300_v52 = vld [vmem:[%s952_s20 + $0x3f0] sm:$0xff]  ;;  %v301_v57 = vld [vmem:[%s952_s20 + $0x3f8] sm:$0xff] }
  0x63   : > { %804 = vst.msk [vmem:[%s980_s25 + $0x338] sm:$0xff] %vm700_vm0, %v675_v56  ;;  %v553_v4 = vadd.f32 %v1476_v48, %v418_v59  ;;  %v420_v5 = vmul.f32 %v1489_v51, %v285_v55  ;;  %v676_v9 = vmax.f32 %v548_v60, 0.0  ;;  %v677_v10 = vmax.f32 %v549_v61, 0.0 }
  0x64   : > { %v678_v11 = vmax.f32 %v550_v62, 0.0  ;;  %v554_v12 = vadd.f32 %v1476_v48, %v419_v63  ;;  %v679_v16 = vmax.f32 %v551_v2, 0.0  ;;  %v680_v17 = vmax.f32 %v552_v3, 0.0 }
  0x65   : > { %v681_v18 = vmax.f32 %v553_v4, 0.0  ;;  %v555_v19 = vadd.f32 %v1476_v48, %v420_v5  ;;  %805 = vst.msk [vmem:[%s980_s25 + $0x340] sm:$0xff] %vm700_vm0, %v676_v9  ;;  %806 = vst.msk [vmem:[%s980_s25 + $0x348] sm:$0xff] %vm700_vm0, %v677_v10  ;;  %v421_v22 = vmul.f32 %v1489_v51, %v286_v6  ;;  %v422_v23 = vmul.f32 %v1489_v51, %v287_v7 }
  0x66   : > { %807 = vst.msk [vmem:[%s980_s25 + $0x350] sm:$0xff] %vm700_vm0, %v678_v11  ;;  %v682_v21 = vmax.f32 %v554_v12, 0.0  ;;  %v423_v24 = vmul.f32 %v1489_v51, %v288_v8  ;;  %808 = vst.msk [vmem:[%s980_s25 + $0x358] sm:$0xff] %vm700_vm0, %v679_v16  ;;  %v424_v27 = vmul.f32 %v1489_v51, %v289_v13  ;;  %v425_v28 = vmul.f32 %v1489_v51, %v290_v14 }
  0x67   : > { %809 = vst.msk [vmem:[%s980_s25 + $0x360] sm:$0xff] %vm700_vm0, %v680_v17  ;;  %810 = vst.msk [vmem:[%s980_s25 + $0x368] sm:$0xff] %vm700_vm0, %v681_v18  ;;  %v683_v26 = vmax.f32 %v555_v19, 0.0  ;;  %v426_v29 = vmul.f32 %v1489_v51, %v291_v15  ;;  %v556_v30 = vadd.f32 %v1476_v48, %v421_v22  ;;  %v557_v31 = vadd.f32 %v1476_v48, %v422_v23 }
  0x68   : > { %811 = vst.msk [vmem:[%s980_s25 + $0x370] sm:$0xff] %vm700_vm0, %v682_v21  ;;  %v558_v32 = vadd.f32 %v1476_v48, %v423_v24  ;;  %v427_v33 = vmul.f32 %v1489_v51, %v292_v20  ;;  %v559_v34 = vadd.f32 %v1476_v48, %v424_v27  ;;  %v560_v35 = vadd.f32 %v1476_v48, %v425_v28 }
  0x69   : > { %812 = vst.msk [vmem:[%s980_s25 + $0x378] sm:$0xff] %vm700_vm0, %v683_v26  ;;  %v561_v36 = vadd.f32 %v1476_v48, %v426_v29  ;;  %v428_v37 = vmul.f32 %v1489_v51, %v293_v25  ;;  %v684_v41 = vmax.f32 %v556_v30, 0.0  ;;  %v685_v42 = vmax.f32 %v557_v31, 0.0 }
  0x6a   : > { %v686_v43 = vmax.f32 %v558_v32, 0.0  ;;  %v562_v44 = vadd.f32 %v1476_v48, %v427_v33  ;;  %v687_v47 = vmax.f32 %v559_v34, 0.0  ;;  %v688_v49 = vmax.f32 %v560_v35, 0.0 }
  0x6b   : > { %v689_v50 = vmax.f32 %v561_v36, 0.0  ;;  %v563_v1 = vadd.f32 %v1476_v48, %v428_v37  ;;  %813 = vst.msk [vmem:[%s980_s25 + $0x380] sm:$0xff] %vm700_vm0, %v684_v41  ;;  %814 = vst.msk [vmem:[%s980_s25 + $0x388] sm:$0xff] %vm700_vm0, %v685_v42  ;;  %v429_v54 = vmul.f32 %v1489_v51, %v294_v38  ;;  %v430_v55 = vmul.f32 %v1489_v51, %v295_v39 }
  0x6c   : > { %815 = vst.msk [vmem:[%s980_s25 + $0x390] sm:$0xff] %vm700_vm0, %v686_v43  ;;  %v690_v53 = vmax.f32 %v562_v44, 0.0  ;;  %v431_v56 = vmul.f32 %v1489_v51, %v296_v40  ;;  %816 = vst.msk [vmem:[%s980_s25 + $0x398] sm:$0xff] %vm700_vm0, %v687_v47  ;;  %v432_v59 = vmul.f32 %v1489_v51, %v297_v45  ;;  %v433_v60 = vmul.f32 %v1489_v51, %v298_v46 }
  0x6d   : > { %817 = vst.msk [vmem:[%s980_s25 + $0x3a0] sm:$0xff] %vm700_vm0, %v688_v49  ;;  %818 = vst.msk [vmem:[%s980_s25 + $0x3a8] sm:$0xff] %vm700_vm0, %v689_v50  ;;  %v691_v58 = vmax.f32 %v563_v1, 0.0  ;;  %v434_v61 = vmul.f32 %v1489_v51, %v299_v0  ;;  %v564_v62 = vadd.f32 %v1476_v48, %v429_v54  ;;  %v565_v63 = vadd.f32 %v1476_v48, %v430_v55 }
  0x6e   : > { %819 = vst.msk [vmem:[%s980_s25 + $0x3b0] sm:$0xff] %vm700_vm0, %v690_v53  ;;  %v566_v2 = vadd.f32 %v1476_v48, %v431_v56  ;;  %v435_v3 = vmul.f32 %v1489_v51, %v300_v52  ;;  %v567_v4 = vadd.f32 %v1476_v48, %v432_v59  ;;  %v568_v5 = vadd.f32 %v1476_v48, %v433_v60 }
  0x6f   : > { %820 = vst.msk [vmem:[%s980_s25 + $0x3b8] sm:$0xff] %vm700_vm0, %v691_v58  ;;  %v569_v6 = vadd.f32 %v1476_v48, %v434_v61  ;;  %v436_v7 = vmul.f32 %v1489_v51, %v301_v57  ;;  %v692_v8 = vmax.f32 %v564_v62, 0.0  ;;  %v693_v9 = vmax.f32 %v565_v63, 0.0 }
  0x70   : > { %v694_v10 = vmax.f32 %v566_v2, 0.0  ;;  %v570_v11 = vadd.f32 %v1476_v48, %v435_v3  ;;  %v695_v12 = vmax.f32 %v567_v4, 0.0  ;;  %v696_v13 = vmax.f32 %v568_v5, 0.0 }
  0x71   : > { %v697_v14 = vmax.f32 %v569_v6, 0.0  ;;  %v571_v15 = vadd.f32 %v1476_v48, %v436_v7  ;;  %821 = vst.msk [vmem:[%s980_s25 + $0x3c0] sm:$0xff] %vm700_vm0, %v692_v8  ;;  %822 = vst.msk [vmem:[%s980_s25 + $0x3c8] sm:$0xff] %vm700_vm0, %v693_v9 }
  0x72   : > { %823 = vst.msk [vmem:[%s980_s25 + $0x3d0] sm:$0xff] %vm700_vm0, %v694_v10  ;;  %v698_v16 = vmax.f32 %v570_v11, 0.0  ;;  %824 = vst.msk [vmem:[%s980_s25 + $0x3d8] sm:$0xff] %vm700_vm0, %v695_v12 }
  0x73   : > { %825 = vst.msk [vmem:[%s980_s25 + $0x3e0] sm:$0xff] %vm700_vm0, %v696_v13  ;;  %826 = vst.msk [vmem:[%s980_s25 + $0x3e8] sm:$0xff] %vm700_vm0, %v697_v14  ;;  %v699_v51 = vmax.f32 %v571_v15, 0.0 }
  0x74   : > { %827 = vst.msk [vmem:[%s980_s25 + $0x3f0] sm:$0xff] %vm700_vm0, %v698_v16 }
  0x75   : > { %828 = vst.msk [vmem:[%s980_s25 + $0x3f8] sm:$0xff] %vm700_vm0, %v699_v51 }
  0x76 PF: > { %s13_s12 = sadd.s32 1, %s914_s12  }
  0x77   : > { %p10_p4 = scmp.ge.s32.totalorder %s13_s12, 4  }
  0x79   :  { %12 = sbr.rel (!%p10_p4) target bundleno = 1 (0x1), region = 62 }

// kernel: decoder_block.6
= control target key start
LH: loop header
LB: loop body
LE: loop exit
PB: predicated region body
PF: predicated region fallthrough
CT: control target
= control target key end

     0   :  { %s3270_s21 = smov 0   ;;  %s4657_s0 = inlined_call_operand.vmem [shape: bf16[2048,8], index: 0, kind: input, shape index: {}]   ;;  %s4658_s1 = inlined_call_operand.vmem [shape: f32[1,8], index: 1, kind: input, shape index: {}]   ;;  %s4659_s2 = inlined_call_operand.vmem [shape: f32[1,8], index: 2, kind: input, shape index: {}]   ;;  %s4660_s3 = inlined_call_operand.vmem [shape: bf16[8,16], index: 3, kind: input, shape index: {}]   ;;  %s4661_s4 = inlined_call_operand.vmem [shape: f32[2048,16], index: 4, kind: output, shape index: {0}]   ;;  %s4662_s5 = inlined_call_operand.vmem [shape: f32[2,1,16], index: 5, kind: output, shape index: {1}]   ;;  %s4663_s6 = inlined_call_operand.vmem [shape: f32[2,1,16], index: 6, kind: output, shape index: {2}]  }
   0x1 LB: > { %s3276_s22 = sadd.s32 4294967295, %s3233_s21   ;;  %p2626_p0 = scmp.ge.s32.totalorder %s3233_s21, 1  ;;  %s3233_s21 = sphi %s3270_s21, %s17_s21  }
   0x2   : > { %p218_p1 = scmp.lt.s32.totalorder %s3233_s21, 3 }
   0x4   : > { %p219_p2 = pnand %p2626_p0, %p218_p1 }
   0x5   : > { %v991_v0 = vld [vmem:[%s4660_s3] sm:$0xf] (!%p219_p2)  ;;  %vm1185_vm0 = vcmask (!%p219_p2), 1043456   ;;  %s2627_s25 = sshll.u32 (!%p219_p2), %s3276_s22, 7  ;;  %vm992_vm1 = vcmask (!%p219_p2), 64512   ;;  %vm1734_vm2 = vcmask (!%p219_p2), 130048  }
   0x6   : > { %222 = sbr.rel (%p219_p2) target bundleno = 513 (0x201), region = 36  ;;  %3215 = vmatprep.subr.msk.bf16.mxu0 (!%p219_p2), %vm1185_vm0, %v991_v0  ;;  %v1187_v1 = vsel (!%p219_p2), %vm1185_vm0, %v991_v0, 0  ;;  %p255_p3 = scmp.lt.s32.totalorder (!%p219_p2), %s2627_s25, 255  ;;  %3216 = vmatprep.subr.msk.bf16.mxu1 (!%p219_p2), %vm1185_vm0, %v991_v0  ;;  %v3295_v2 = vld [vmem:[%s4658_s1] ss:$0 sm:$0xff] (!%p219_p2)  ;;  %vm2124_vm3 = vcmask (!%p219_p2), 122880  }
   0x7   : > { %3084 = vmatpush3.bf16.msra.mxu0 (!%p219_p2), %v1187_v1  ;;  %3214 = vmatpush3.bf16.msra.mxu1 (!%p219_p2), %v1187_v1  ;;  %v3304_v11 = vld [vmem:[%s4659_s2] ss:$0 sm:$0xff] (!%p219_p2)  ;;  %p266_p4 = scmp.lt.s32.totalorder (!%p219_p2), %s3276_s22, 1 }
   0xd   : > { %s4665_s25 = smov (!%p255_p3, %s2627_s25), 255  ;;  %s4667_s22 = smov (!%p266_p4, %s3276_s22), 1 }
   0xe   : > { %s2628_s26 = sshll.u32 %s4665_s25, 2  ;;  %s2630_s14 = sshll.u32 %s4665_s25, 3 }
   0xf   : > { %s3290_s29 = scalar_lea.vmem %s4657_s0, %s2628_s26  ;;  %s3748_s17 = scalar_lea.vmem %s4661_s4, %s2630_s14 }
  0x10   : > { %v2700_v3 = vld [vmem:[%s3290_s29] sm:$0xff]   ;;  %v2955_v4 = vld [vmem:[%s3290_s29 + $0x8] sm:$0xff]   ;;  %v2956_v5 = vld [vmem:[%s3290_s29 + $0x10] sm:$0xff]   ;;  %s268_s20 = scalar_lea.vmem %s4662_s5, %s4667_s22  ;;  %s271_s25 = scalar_lea.vmem %s4663_s6, %s4667_s22 }
  0x11   : > { %v2701_v6 = vunpack.c.l.bf16 %v2700_v3  ;;  %v2702_v7 = vunpack.c.h.bf16 %v2700_v3  ;;  %v2705_v8 = vunpack.c.l.bf16 %v2955_v4  ;;  %v2706_v9 = vunpack.c.h.bf16 %v2955_v4  ;;  %v2957_v10 = vld [vmem:[%s3290_s29 + $0x18] sm:$0xff]   ;;  %v2958_v32 = vld [vmem:[%s3290_s29 + $0x20] sm:$0xff]   ;;  %v2959_v37 = vld [vmem:[%s3290_s29 + $0x28] sm:$0xff]  }
  0x12   : > { %v2709_v12 = vunpack.c.l.bf16 %v2956_v5  ;;  %v2710_v13 = vunpack.c.h.bf16 %v2956_v5  ;;  %v2713_v14 = vunpack.c.l.bf16 %v2957_v10  ;;  %v2714_v15 = vunpack.c.h.bf16 %v2957_v10  ;;  %v2960_v41 = vld [vmem:[%s3290_s29 + $0x30] sm:$0xff]   ;;  %v2961_v60 = vld [vmem:[%s3290_s29 + $0x38] sm:$0xff]   ;;  %v2962_v61 = vld [vmem:[%s3290_s29 + $0x40] sm:$0xff]  }
  0x13   : > { %v536_v16 = vmul.f32 %v2701_v6, %v3295_v2  ;;  %v537_v17 = vmul.f32 %v2702_v7, %v3295_v2  ;;  %v538_v18 = vmul.f32 %v2705_v8, %v3295_v2  ;;  %v539_v19 = vmul.f32 %v2706_v9, %v3295_v2 }
  0x14   : > { %v540_v20 = vmul.f32 %v2709_v12, %v3295_v2  ;;  %v541_v21 = vmul.f32 %v2710_v13, %v3295_v2  ;;  %v542_v22 = vmul.f32 %v2713_v14, %v3295_v2  ;;  %v543_v23 = vmul.f32 %v2714_v15, %v3295_v2 }
  0x15   : > { %v671_v24 = vadd.f32 %v3304_v11, %v536_v16  ;;  %v672_v25 = vadd.f32 %v3304_v11, %v537_v17  ;;  %v673_v26 = vadd.f32 %v3304_v11, %v538_v18  ;;  %v674_v27 = vadd.f32 %v3304_v11, %v539_v19  ;;  %v2963_v16 = vld [vmem:[%s3290_s29 + $0x48] sm:$0xff]  }
  0x16   : > { %v675_v28 = vadd.f32 %v3304_v11, %v540_v20  ;;  %v676_v29 = vadd.f32 %v3304_v11, %v541_v21  ;;  %v677_v30 = vadd.f32 %v3304_v11, %v542_v22  ;;  %v678_v31 = vadd.f32 %v3304_v11, %v543_v23  ;;  %v2964_v21 = vld [vmem:[%s3290_s29 + $0x50] sm:$0xff]  }
  0x17   : > { %v799_v33 = vmax.f32 %v671_v24, 0.0  ;;  %v800_v34 = vmax.f32 %v672_v25, 0.0  ;;  %v801_v35 = vmax.f32 %v673_v26, 0.0  ;;  %v802_v36 = vmax.f32 %v674_v27, 0.0 }
  0x18   : > { %v803_v38 = vmax.f32 %v675_v28, 0.0  ;;  %v804_v39 = vmax.f32 %v676_v29, 0.0  ;;  %v805_v40 = vmax.f32 %v677_v30, 0.0  ;;  %v2717_v44 = vunpack.c.l.bf16 %v2958_v32 }
  0x19   : > { %v927_v42 = vpack.c.bf16 %v800_v34, %v799_v33  ;;  %v928_v43 = vpack.c.bf16 %v802_v36, %v801_v35  ;;  %v2718_v45 = vunpack.c.h.bf16 %v2958_v32  ;;  %v806_v47 = vmax.f32 %v678_v31, 0.0 }
  0x1a   : > { %v929_v46 = vpack.c.bf16 %v804_v39, %v803_v38  ;;  %v2721_v48 = vunpack.c.l.bf16 %v2959_v37  ;;  %v2722_v49 = vunpack.c.h.bf16 %v2959_v37  ;;  %v544_v50 = vmul.f32 %v2717_v44, %v3295_v2  ;;  %v2965_v37 = vld [vmem:[%s3290_s29 + $0x58] sm:$0xff]  }
  0x1b   : > { %3085 = vmatprep.mubr.msk.bf16.mxu0 %vm992_vm1, %v927_v42  ;;  %v545_v51 = vmul.f32 %v2718_v45, %v3295_v2  ;;  %v2725_v52 = vunpack.c.l.bf16 %v2960_v41  ;;  %v2726_v53 = vunpack.c.h.bf16 %v2960_v41  ;;  %v930_v62 = vpack.c.bf16 %v806_v47, %v805_v40  ;;  %v2966_v41 = vld [vmem:[%s3290_s29 + $0x60] sm:$0xff]  }
  0x1c   : > { %3086 = vmatmul.mubr.msk.bf16.vlgmr.msra.gmra.mrb[0].mxu0 %vm992_vm1, %v928_v43  ;;  %v546_v54 = vmul.f32 %v2721_v48, %v3295_v2  ;;  %v547_v55 = vmul.f32 %v2722_v49, %v3295_v2  ;;  %v679_v56 = vadd.f32 %v3304_v11, %v544_v50  ;;  %v2729_v4 = vunpack.c.l.bf16 %v2961_v60 }
  0x1d   : > { %3089 = vmatprep.mubr.msk.bf16.mxu0 %vm992_vm1, %v929_v46  ;;  %v680_v57 = vadd.f32 %v3304_v11, %v545_v51  ;;  %v548_v58 = vmul.f32 %v2725_v52, %v3295_v2  ;;  %v549_v59 = vmul.f32 %v2726_v53, %v3295_v2  ;;  %v2730_v5 = vunpack.c.h.bf16 %v2961_v60  ;;  %v2967_v52 = vld [vmem:[%s3290_s29 + $0x68] sm:$0xff]  }
  0x1e   : > { %v807_v63 = vmax.f32 %v679_v56, 0.0  ;;  %v681_v1 = vadd.f32 %v3304_v11, %v546_v54  ;;  %v682_v3 = vadd.f32 %v3304_v11, %v547_v55  ;;  %v2733_v9 = vunpack.c.l.bf16 %v2962_v61 }
  0x1f   : > { %v808_v0 = vmax.f32 %v680_v57, 0.0  ;;  %v683_v7 = vadd.f32 %v3304_v11, %v548_v58  ;;  %v684_v8 = vadd.f32 %v3304_v11, %v549_v59  ;;  %v2734_v10 = vunpack.c.h.bf16 %v2962_v61  ;;  %v2968_v57 = vld [vmem:[%s3290_s29 + $0x70] sm:$0xff]  }
  0x20   : > { %v809_v12 = vmax.f32 %v681_v1, 0.0  ;;  %v810_v13 = vmax.f32 %v682_v3, 0.0  ;;  %v550_v14 = vmul.f32 %v2729_v4, %v3295_v2  ;;  %v551_v15 = vmul.f32 %v2730_v5, %v3295_v2 }
  0x21   : > { %v931_v6 = vpack.c.bf16 %v808_v0, %v807_v63  ;;  %v811_v17 = vmax.f32 %v683_v7, 0.0  ;;  %v812_v18 = vmax.f32 %v684_v8, 0.0  ;;  %v552_v19 = vmul.f32 %v2733_v9, %v3295_v2  ;;  %v2969_v0 = vld [vmem:[%s3290_s29 + $0x78] sm:$0xff]  }
  0x22   : > { %v553_v20 = vmul.f32 %v2734_v10, %v3295_v2  ;;  %v2737_v22 = vunpack.c.l.bf16 %v2963_v16  ;;  %v2738_v23 = vunpack.c.h.bf16 %v2963_v16  ;;  %v932_v24 = vpack.c.bf16 %v810_v13, %v809_v12 }
  0x23   : > { %v685_v25 = vadd.f32 %v3304_v11, %v550_v14  ;;  %v686_v26 = vadd.f32 %v3304_v11, %v551_v15  ;;  %v2741_v27 = vunpack.c.l.bf16 %v2964_v21  ;;  %v933_v28 = vpack.c.bf16 %v812_v18, %v811_v17 }
  0x24   : > { %3090 = vmatmul.mubr.msk.bf16.gmra.mrb[4].mxu0 %vm992_vm1, %v930_v62  ;;  %v687_v29 = vadd.f32 %v3304_v11, %v552_v19  ;;  %v688_v30 = vadd.f32 %v3304_v11, %v553_v20  ;;  %v2742_v31 = vunpack.c.h.bf16 %v2964_v21  ;;  %v554_v32 = vmul.f32 %v2737_v22, %v3295_v2  ;;  %v2970_v19 = vld [vmem:[%s3290_s29 + $0x80] sm:$0xff]  }
  0x25   : > { %3093 = vmatprep.mubr.msk.bf16.mxu0 %vm992_vm1, %v931_v6  ;;  %v555_v33 = vmul.f32 %v2738_v23, %v3295_v2  ;;  %v813_v34 = vmax.f32 %v685_v25, 0.0  ;;  %v814_v35 = vmax.f32 %v686_v26, 0.0  ;;  %v556_v36 = vmul.f32 %v2741_v27, %v3295_v2 }
  0x26   : > { %v815_v38 = vmax.f32 %v687_v29, 0.0  ;;  %v816_v39 = vmax.f32 %v688_v30, 0.0  ;;  %v557_v40 = vmul.f32 %v2742_v31, %v3295_v2  ;;  %v689_v42 = vadd.f32 %v3304_v11, %v554_v32 }
  0x27   : > { %v690_v43 = vadd.f32 %v3304_v11, %v555_v33  ;;  %v2745_v44 = vunpack.c.l.bf16 %v2965_v37  ;;  %v2746_v45 = vunpack.c.h.bf16 %v2965_v37  ;;  %v934_v46 = vpack.c.bf16 %v814_v35, %v813_v34  ;;  %v2971_v35 = vld [vmem:[%s3290_s29 + $0x88] sm:$0xff]  }
  0x28   : > { %v691_v47 = vadd.f32 %v3304_v11, %v556_v36  ;;  %v935_v48 = vpack.c.bf16 %v816_v39, %v815_v38  ;;  %v692_v49 = vadd.f32 %v3304_v11, %v557_v40  ;;  %v2749_v50 = vunpack.c.l.bf16 %v2966_v41  ;;  %v2972_v36 = vld [vmem:[%s3290_s29 + $0x90] sm:$0xff]  }
  0x29   : > { %v2750_v51 = vunpack.c.h.bf16 %v2966_v41  ;;  %v817_v53 = vmax.f32 %v689_v42, 0.0  ;;  %v818_v54 = vmax.f32 %v690_v43, 0.0  ;;  %v558_v55 = vmul.f32 %v2745_v44, %v3295_v2  ;;  %v2973_v41 = vld [vmem:[%s3290_s29 + $0x98] sm:$0xff]   ;;  %v2974_v42 = vld [vmem:[%s3290_s29 + $0xa0] sm:$0xff]  }
  0x2a   : > { %v559_v56 = vmul.f32 %v2746_v45, %v3295_v2  ;;  %v2753_v58 = vunpack.c.l.bf16 %v2967_v52  ;;  %v2754_v59 = vunpack.c.h.bf16 %v2967_v52  ;;  %v819_v60 = vmax.f32 %v691_v47, 0.0  ;;  %v2975_v47 = vld [vmem:[%s3290_s29 + $0xa8] sm:$0xff]  }
  0x2b   : > { %v820_v61 = vmax.f32 %v692_v49, 0.0  ;;  %v560_v62 = vmul.f32 %v2749_v50, %v3295_v2  ;;  %v561_v63 = vmul.f32 %v2750_v51, %v3295_v2  ;;  %v2757_v1 = vunpack.c.l.bf16 %v2968_v57 }
  0x2c   : > { %3094 = vmatmul.mubr.msk.bf16.gmra.mrb[8].mxu0 %vm992_vm1, %v932_v24  ;;  %v936_v3 = vpack.c.bf16 %v818_v54, %v817_v53  ;;  %v693_v4 = vadd.f32 %v3304_v11, %v558_v55  ;;  %v694_v5 = vadd.f32 %v3304_v11, %v559_v56  ;;  %v2758_v6 = vunpack.c.h.bf16 %v2968_v57  ;;  %v2976_v56 = vld [vmem:[%s3290_s29 + $0xb0] sm:$0xff]  }
  0x2d   : > { %3097 = vmatprep.mubr.msk.bf16.mxu0 %vm992_vm1, %v933_v28  ;;  %v562_v7 = vmul.f32 %v2753_v58, %v3295_v2  ;;  %v563_v8 = vmul.f32 %v2754_v59, %v3295_v2  ;;  %v2761_v9 = vunpack.c.l.bf16 %v2969_v0  ;;  %v2762_v10 = vunpack.c.h.bf16 %v2969_v0 }
  0x2e   : > { %v937_v12 = vpack.c.bf16 %v820_v61, %v819_v60  ;;  %v695_v13 = vadd.f32 %v3304_v11, %v560_v62  ;;  %v696_v14 = vadd.f32 %v3304_v11, %v561_v63  ;;  %v564_v15 = vmul.f32 %v2757_v1, %v3295_v2 }
  0x2f   : > { %v821_v16 = vmax.f32 %v693_v4, 0.0  ;;  %v822_v17 = vmax.f32 %v694_v5, 0.0  ;;  %v565_v18 = vmul.f32 %v2758_v6, %v3295_v2  ;;  %v697_v20 = vadd.f32 %v3304_v11, %v562_v7  ;;  %v2977_v6 = vld [vmem:[%s3290_s29 + $0xb8] sm:$0xff]  }
  0x30   : > { %v698_v21 = vadd.f32 %v3304_v11, %v563_v8  ;;  %v566_v22 = vmul.f32 %v2761_v9, %v3295_v2  ;;  %v567_v23 = vmul.f32 %v2762_v10, %v3295_v2  ;;  %v823_v24 = vmax.f32 %v695_v13, 0.0 }
  0x31   : > { %v824_v25 = vmax.f32 %v696_v14, 0.0  ;;  %v699_v26 = vadd.f32 %v3304_v11, %v564_v15  ;;  %v2765_v27 = vunpack.c.l.bf16 %v2970_v19  ;;  %v2766_v28 = vunpack.c.h.bf16 %v2970_v19 }
  0x32   : > { %v938_v29 = vpack.c.bf16 %v822_v17, %v821_v16  ;;  %v700_v30 = vadd.f32 %v3304_v11, %v565_v18  ;;  %v825_v31 = vmax.f32 %v697_v20, 0.0  ;;  %v826_v32 = vmax.f32 %v698_v21, 0.0  ;;  %v2978_v20 = vld [vmem:[%s3290_s29 + $0xc0] sm:$0xff]  }
  0x33   : > { %v701_v33 = vadd.f32 %v3304_v11, %v566_v22  ;;  %v702_v34 = vadd.f32 %v3304_v11, %v567_v23  ;;  %v939_v37 = vpack.c.bf16 %v824_v25, %v823_v24  ;;  %v827_v38 = vmax.f32 %v699_v26, 0.0 }
  0x34   : > { %3098 = vmatmul.mubr.msk.bf16.gmra.mrb[12].mxu0 %vm992_vm1, %v934_v46  ;;  %v568_v39 = vmul.f32 %v2765_v27, %v3295_v2  ;;  %v569_v40 = vmul.f32 %v2766_v28, %v3295_v2  ;;  %v828_v43 = vmax.f32 %v700_v30, 0.0  ;;  %v2769_v44 = vunpack.c.l.bf16 %v2971_v35 }
  0x35   : > { %3101 = vmatprep.mubr.msk.bf16.mxu0 %vm992_vm1, %v935_v48  ;;  %v2770_v45 = vunpack.c.h.bf16 %v2971_v35  ;;  %v2773_v46 = vunpack.c.l.bf16 %v2972_v36  ;;  %v940_v48 = vpack.c.bf16 %v826_v32, %v825_v31  ;;  %v829_v49 = vmax.f32 %v701_v33, 0.0 }
  0x36   : > { %v830_v50 = vmax.f32 %v702_v34, 0.0  ;;  %v2774_v51 = vunpack.c.h.bf16 %v2972_v36  ;;  %v2777_v52 = vunpack.c.l.bf16 %v2973_v41  ;;  %v2778_v53 = vunpack.c.h.bf16 %v2973_v41 }
  0x37   : > { %v2781_v54 = vunpack.c.l.bf16 %v2974_v42  ;;  %v2782_v55 = vunpack.c.h.bf16 %v2974_v42  ;;  %v703_v57 = vadd.f32 %v3304_v11, %v568_v39  ;;  %v704_v58 = vadd.f32 %v3304_v11, %v569_v40 }
  0x38   : > { %v2785_v59 = vunpack.c.l.bf16 %v2975_v47  ;;  %v2786_v60 = vunpack.c.h.bf16 %v2975_v47  ;;  %v941_v61 = vpack.c.bf16 %v828_v43, %v827_v38  ;;  %v570_v62 = vmul.f32 %v2769_v44, %v3295_v2 }
  0x39   : > { %v571_v63 = vmul.f32 %v2770_v45, %v3295_v2  ;;  %v572_v0 = vmul.f32 %v2773_v46, %v3295_v2  ;;  %v942_v1 = vpack.c.bf16 %v830_v50, %v829_v49  ;;  %v2789_v4 = vunpack.c.l.bf16 %v2976_v56  ;;  %v2979_v45 = vld [vmem:[%s3290_s29 + $0xc8] sm:$0xff]   ;;  %v2986_v50 = vld [vmem:[%s3290_s29 + $0x100] sm:$0xff]  }
  0x3a   : > { %v2790_v5 = vunpack.c.h.bf16 %v2976_v56  ;;  %v574_v7 = vmul.f32 %v2777_v52, %v3295_v2  ;;  %v575_v8 = vmul.f32 %v2778_v53, %v3295_v2  ;;  %v576_v9 = vmul.f32 %v2781_v54, %v3295_v2 }
  0x3b   : > { %v577_v10 = vmul.f32 %v2782_v55, %v3295_v2  ;;  %v832_v13 = vmax.f32 %v704_v58, 0.0  ;;  %v578_v14 = vmul.f32 %v2785_v59, %v3295_v2  ;;  %v579_v15 = vmul.f32 %v2786_v60, %v3295_v2  ;;  %v2987_v60 = vld [vmem:[%s3290_s29 + $0x108] sm:$0xff]  }
  0x3c   : > { %3102 = vmatmul.mubr.msk.bf16.gmra.mrb[16].mxu0 %vm992_vm1, %v936_v3  ;;  %v573_v3 = vmul.f32 %v2774_v51, %v3295_v2  ;;  %v705_v16 = vadd.f32 %v3304_v11, %v570_v62  ;;  %v706_v17 = vadd.f32 %v3304_v11, %v571_v63  ;;  %v707_v18 = vadd.f32 %v3304_v11, %v572_v0 }
  0x3d   : > { %3105 = vmatprep.mubr.msk.bf16.mxu0 %vm992_vm1, %v937_v12  ;;  %v831_v12 = vmax.f32 %v703_v57, 0.0  ;;  %v2793_v19 = vunpack.c.l.bf16 %v2977_v6  ;;  %v580_v22 = vmul.f32 %v2789_v4, %v3295_v2  ;;  %v581_v23 = vmul.f32 %v2790_v5, %v3295_v2 }
  0x3e   : > { %v708_v21 = vadd.f32 %v3304_v11, %v573_v3  ;;  %v2794_v24 = vunpack.c.h.bf16 %v2977_v6  ;;  %v709_v25 = vadd.f32 %v3304_v11, %v574_v7  ;;  %v710_v26 = vadd.f32 %v3304_v11, %v575_v8  ;;  %v2988_v7 = vld [vmem:[%s3290_s29 + $0x110] sm:$0xff]  }
  0x3f   : > { %v711_v27 = vadd.f32 %v3304_v11, %v576_v9  ;;  %v712_v28 = vadd.f32 %v3304_v11, %v577_v10  ;;  %v713_v30 = vadd.f32 %v3304_v11, %v578_v14  ;;  %v714_v31 = vadd.f32 %v3304_v11, %v579_v15 }
  0x40   : > { %v2797_v32 = vunpack.c.l.bf16 %v2978_v20  ;;  %v833_v33 = vmax.f32 %v705_v16, 0.0  ;;  %v834_v34 = vmax.f32 %v706_v17, 0.0  ;;  %v835_v35 = vmax.f32 %v707_v18, 0.0  ;;  %v2989_v17 = vld [vmem:[%s3290_s29 + $0x118] sm:$0xff]  }
  0x41   : > { %v582_v36 = vmul.f32 %v2793_v19, %v3295_v2  ;;  %v715_v38 = vadd.f32 %v3304_v11, %v580_v22  ;;  %v716_v39 = vadd.f32 %v3304_v11, %v581_v23  ;;  %v583_v40 = vmul.f32 %v2794_v24, %v3295_v2 }
  0x42   : > { %v837_v41 = vmax.f32 %v709_v25, 0.0  ;;  %v838_v42 = vmax.f32 %v710_v26, 0.0  ;;  %v839_v43 = vmax.f32 %v711_v27, 0.0  ;;  %v840_v44 = vmax.f32 %v712_v28, 0.0  ;;  %v2990_v26 = vld [vmem:[%s3290_s29 + $0x120] sm:$0xff]  }
  0x43   : > { %v841_v46 = vmax.f32 %v713_v30, 0.0  ;;  %v842_v47 = vmax.f32 %v714_v31, 0.0  ;;  %v584_v49 = vmul.f32 %v2797_v32, %v3295_v2  ;;  %v3440_v51 = vadd.f32 %v3304_v11, %v582_v36 }
  0x44   : > { %3106 = vmatmul.mubr.msk.bf16.gmra.mrb[20].mxu0 %vm992_vm1, %v938_v29  ;;  %v943_v29 = vpack.c.bf16 %v832_v13, %v831_v12  ;;  %v843_v52 = vmax.f32 %v715_v38, 0.0  ;;  %v844_v53 = vmax.f32 %v716_v39, 0.0  ;;  %v3444_v54 = vadd.f32 %v3304_v11, %v583_v40  ;;  %v2991_v39 = vld [vmem:[%s3290_s29 + $0x128] sm:$0xff]  }
  0x45   : > { %3109 = vmatprep.mubr.msk.bf16.mxu0 %vm992_vm1, %v939_v37  ;;  %v836_v37 = vmax.f32 %v708_v21, 0.0  ;;  %v2801_v55 = vunpack.c.l.bf16 %v2979_v45  ;;  %v944_v56 = vpack.c.bf16 %v834_v34, %v833_v33  ;;  %v3447_v58 = vpack.c.bf16 %v838_v42, %v837_v41 }
  0x46   : > { %v2829_v59 = vunpack.c.l.bf16 %v2986_v50  ;;  %v3452_v62 = vpack.c.bf16 %v842_v47, %v841_v46  ;;  %v3456_v0 = vadd.f32 %v3304_v11, %v584_v49  ;;  %v845_v3 = vmax.f32 %v3440_v51, 0.0 }
  0x47   : > { %v945_v57 = vpack.c.bf16 %v836_v37, %v835_v35  ;;  %v2802_v4 = vunpack.c.h.bf16 %v2979_v45  ;;  %v2830_v5 = vunpack.c.h.bf16 %v2986_v50  ;;  %v3464_v8 = vpack.c.bf16 %v844_v53, %v843_v52 }
  0x48   : > { %v600_v6 = vmul.f32 %v2829_v59, %v3295_v2  ;;  %v846_v9 = vmax.f32 %v3444_v54, 0.0  ;;  %v3468_v10 = vmul.f32 %v2801_v55, %v3295_v2  ;;  %v2833_v12 = vunpack.c.l.bf16 %v2987_v60 }
  0x49   : > { %v601_v14 = vmul.f32 %v2830_v5, %v3295_v2  ;;  %v2834_v16 = vunpack.c.h.bf16 %v2987_v60  ;;  %v847_v19 = vmax.f32 %v3456_v0, 0.0  ;;  %v2837_v21 = vunpack.c.l.bf16 %v2988_v7  ;;  %v2983_v0 = vld [vmem:[%s3290_s29 + $0xe8] sm:$0xff]  }
  0x4a   : > { %v735_v15 = vadd.f32 %v3304_v11, %v600_v6  ;;  %v2838_v25 = vunpack.c.h.bf16 %v2988_v7  ;;  %v3484_v27 = vmul.f32 %v2802_v4, %v3295_v2  ;;  %v2841_v30 = vunpack.c.l.bf16 %v2989_v17 }
  0x4b   : > { %v736_v22 = vadd.f32 %v3304_v11, %v601_v14  ;;  %v603_v24 = vmul.f32 %v2834_v16, %v3295_v2  ;;  %v2842_v34 = vunpack.c.h.bf16 %v2989_v17  ;;  %v2845_v38 = vunpack.c.l.bf16 %v2990_v26  ;;  %v2994_v16 = vld [vmem:[%s3290_s29 + $0x140] sm:$0xff]  }
  0x4c   : > { %3110 = vmatmul.mubr.msk.bf16.gmra.mrb[24].mxu0 %vm992_vm1, %v940_v48  ;;  %v2798_v48 = vunpack.c.h.bf16 %v2978_v20  ;;  %v602_v20 = vmul.f32 %v2833_v12, %v3295_v2  ;;  %v863_v23 = vmax.f32 %v735_v15, 0.0  ;;  %v605_v33 = vmul.f32 %v2838_v25, %v3295_v2  ;;  %v2993_v15 = vld [vmem:[%s3290_s29 + $0x138] sm:$0xff]  }
  0x4d   : > { %3113 = vmatprep.mubr.msk.bf16.mxu0 %vm992_vm1, %v941_v61  ;;  %v3450_v61 = vpack.c.bf16 %v840_v44, %v839_v43  ;;  %v864_v31 = vmax.f32 %v736_v22, 0.0  ;;  %v738_v32 = vadd.f32 %v3304_v11, %v603_v24  ;;  %v606_v37 = vmul.f32 %v2841_v30, %v3295_v2  ;;  %v2981_v22 = vld [vmem:[%s3290_s29 + $0xd8] sm:$0xff]  }
  0x4e   : > { %v585_v63 = vmul.f32 %v2798_v48, %v3295_v2  ;;  %v737_v28 = vadd.f32 %v3304_v11, %v602_v20  ;;  %v740_v42 = vadd.f32 %v3304_v11, %v605_v33  ;;  %v607_v43 = vmul.f32 %v2842_v34, %v3295_v2  ;;  %v2992_v48 = vld [vmem:[%s3290_s29 + $0x130] sm:$0xff]  }
  0x4f   : > { %v959_v40 = vpack.c.bf16 %v864_v31, %v863_v23  ;;  %v866_v41 = vmax.f32 %v738_v32, 0.0  ;;  %v741_v45 = vadd.f32 %v3304_v11, %v606_v37  ;;  %v2846_v46 = vunpack.c.h.bf16 %v2990_v26  ;;  %v2982_v37 = vld [vmem:[%s3290_s29 + $0xe0] sm:$0xff]  }
  0x50   : > { %v3475_v18 = vadd.f32 %v3304_v11, %v585_v63  ;;  %v865_v35 = vmax.f32 %v737_v28, 0.0  ;;  %v608_v47 = vmul.f32 %v2845_v38, %v3295_v2  ;;  %v868_v50 = vmax.f32 %v740_v42, 0.0 }
  0x51   : > { %3149 = vmatprep.mubr.msk.bf16.mxu1 %vm992_vm1, %v959_v40  ;;  %v742_v52 = vadd.f32 %v3304_v11, %v607_v43  ;;  %v2849_v53 = vunpack.c.l.bf16 %v2991_v39  ;;  %v869_v55 = vmax.f32 %v741_v45, 0.0  ;;  %v2850_v59 = vunpack.c.h.bf16 %v2991_v39  ;;  %v2995_v40 = vld [vmem:[%s3290_s29 + $0x148] sm:$0xff]  }
  0x52   : > { %v960_v49 = vpack.c.bf16 %v866_v41, %v865_v35  ;;  %v2853_v5 = vunpack.c.l.bf16 %v2992_v48  ;;  %v2854_v14 = vunpack.c.h.bf16 %v2992_v48  ;;  %v3517_v17 = vpack.c.bf16 %v846_v9, %v845_v3 }
  0x53   : > { %v870_v63 = vmax.f32 %v742_v52, 0.0  ;;  %v610_v4 = vmul.f32 %v2849_v53, %v3295_v2  ;;  %v611_v12 = vmul.f32 %v2850_v59, %v3295_v2  ;;  %v2857_v3 = vunpack.c.l.bf16 %v2993_v15 }
  0x54   : > { %3114 = vmatmul.mubr.msk.bf16.gmra.mrb[28].mxu0 %vm992_vm1, %v942_v1  ;;  %v3459_v1 = vld [vmem:[%s3290_s29 + $0xd0] sm:$0xff]   ;;  %3150 = vmatmul.mubr.msk.bf16.vlgmr.msra.gmra.mrb[0].mxu1 %vm992_vm1, %v960_v49  ;;  %v613_v51 = vmul.f32 %v2854_v14, %v3295_v2  ;;  %v2858_v9 = vunpack.c.h.bf16 %v2993_v15  ;;  %v2861_v25 = vunpack.c.l.bf16 %v2994_v16  ;;  %v848_v30 = vmax.f32 %v3475_v18, 0.0 }
  0x55   : > { %3117 = vmatprep.mubr.msk.bf16.mxu0 %vm992_vm1, %v943_v29  ;;  %v2805_v13 = vunpack.c.l.bf16 %v3459_v1  ;;  %v604_v29 = vmul.f32 %v2837_v21, %v3295_v2  ;;  %v2806_v20 = vunpack.c.h.bf16 %v3459_v1  ;;  %v612_v21 = vmul.f32 %v2853_v5, %v3295_v2 }
  0x56   : > { %v962_v23 = vpack.c.bf16 %v870_v63, %v869_v55  ;;  %v746_v54 = vadd.f32 %v3304_v11, %v611_v12  ;;  %v722_v31 = vadd.f32 %v3304_v11, %v3484_v27  ;;  %v2809_v32 = vunpack.c.l.bf16 %v2981_v22 }
  0x57   : > { %v739_v36 = vadd.f32 %v3304_v11, %v604_v29  ;;  %v747_v28 = vadd.f32 %v3304_v11, %v612_v21  ;;  %v748_v29 = vadd.f32 %v3304_v11, %v613_v51  ;;  %v2862_v33 = vunpack.c.h.bf16 %v2994_v16 }
  0x58   : > { %v589_v35 = vmul.f32 %v2806_v20, %v3295_v2  ;;  %v614_v38 = vmul.f32 %v2857_v3, %v3295_v2  ;;  %v615_v39 = vmul.f32 %v2858_v9, %v3295_v2  ;;  %v616_v18 = vmul.f32 %v2861_v25, %v3295_v2 }
  0x59   : > { %v867_v44 = vmax.f32 %v739_v36, 0.0  ;;  %v2810_v36 = vunpack.c.h.bf16 %v2981_v22  ;;  %v875_v41 = vmax.f32 %v747_v28, 0.0  ;;  %v876_v42 = vmax.f32 %v748_v29, 0.0  ;;  %v2997_v22 = vld [vmem:[%s3290_s29 + $0x158] sm:$0xff]   ;;  %v2984_v28 = vld [vmem:[%s3290_s29 + $0xf0] sm:$0xff]  }
  0x5a   : > { %v617_v43 = vmul.f32 %v2862_v33, %v3295_v2  ;;  %v850_v45 = vmax.f32 %v722_v31, 0.0  ;;  %v724_v48 = vadd.f32 %v3304_v11, %v589_v35  ;;  %v2866_v52 = vunpack.c.h.bf16 %v2995_v40 }
  0x5b   : > { %v961_v60 = vpack.c.bf16 %v868_v50, %v867_v44  ;;  %v951_v44 = vpack.c.bf16 %v848_v30, %v847_v19  ;;  %v591_v49 = vmul.f32 %v2810_v36, %v3295_v2  ;;  %v2865_v50 = vunpack.c.l.bf16 %v2995_v40 }
  0x5c   : > { %3118 = vmatmul.mubr.msk.bf16.gmra.mrb[32].mxu0 %vm992_vm1, %v944_v56  ;;  %v609_v56 = vmul.f32 %v2846_v46, %v3295_v2  ;;  %v590_v46 = vmul.f32 %v2809_v32, %v3295_v2  ;;  %v749_v55 = vadd.f32 %v3304_v11, %v614_v38  ;;  %v965_v19 = vpack.c.bf16 %v876_v42, %v875_v41 }
  0x5d   : > { %3121 = vmatprep.mubr.msk.bf16.mxu0 %vm992_vm1, %v945_v57  ;;  %v743_v57 = vadd.f32 %v3304_v11, %v608_v47  ;;  %3153 = vmatprep.mubr.msk.bf16.mxu1 %vm992_vm1, %v961_v60  ;;  %v2996_v47 = vld [vmem:[%s3290_s29 + $0x150] sm:$0xff]   ;;  %v2814_v5 = vunpack.c.h.bf16 %v2982_v37  ;;  %v726_v12 = vadd.f32 %v3304_v11, %v591_v49  ;;  %v618_v14 = vmul.f32 %v2865_v50, %v3295_v2 }
  0x5e   : > { %v744_v6 = vadd.f32 %v3304_v11, %v609_v56  ;;  %3154 = vmatmul.mubr.msk.bf16.gmra.mrb[4].mxu1 %vm992_vm1, %v962_v23  ;;  %v750_v56 = vadd.f32 %v3304_v11, %v615_v39  ;;  %v2869_v59 = vunpack.c.l.bf16 %v2996_v47  ;;  %v2870_v60 = vunpack.c.h.bf16 %v2996_v47 }
  0x5f   : > { %v871_v7 = vmax.f32 %v743_v57, 0.0  ;;  %v752_v57 = vadd.f32 %v3304_v11, %v617_v43  ;;  %v619_v15 = vmul.f32 %v2866_v52, %v3295_v2  ;;  %v852_v16 = vmax.f32 %v724_v48, 0.0  ;;  %v2999_v52 = vld [vmem:[%s3290_s29 + $0x168] sm:$0xff]  }
  0x60   : > { %v872_v24 = vmax.f32 %v744_v6, 0.0  ;;  %v877_v20 = vmax.f32 %v749_v55, 0.0  ;;  %v878_v21 = vmax.f32 %v750_v56, 0.0  ;;  %v621_v51 = vmul.f32 %v2870_v60, %v3295_v2 }
  0x61   : > { %v593_v9 = vmul.f32 %v2814_v5, %v3295_v2  ;;  %v754_v29 = vadd.f32 %v3304_v11, %v619_v15  ;;  %v2873_v30 = vunpack.c.l.bf16 %v2997_v22  ;;  %v2874_v33 = vunpack.c.h.bf16 %v2997_v22 }
  0x62   : > { %v963_v26 = vpack.c.bf16 %v872_v24, %v871_v7  ;;  %v880_v24 = vmax.f32 %v752_v57, 0.0  ;;  %v966_v32 = vpack.c.bf16 %v878_v21, %v877_v20  ;;  %v2821_v39 = vunpack.c.l.bf16 %v2984_v28 }
  0x63   : > { %v728_v38 = vadd.f32 %v3304_v11, %v593_v9  ;;  %v882_v42 = vmax.f32 %v754_v29, 0.0  ;;  %v622_v43 = vmul.f32 %v2873_v30, %v3295_v2  ;;  %v2881_v5 = vunpack.c.l.bf16 %v2999_v52  ;;  %v3001_v9 = vld [vmem:[%s3290_s29 + $0x178] sm:$0xff]  }
  0x64   : > { %3122 = vmatmul.mubr.msk.bf16.gmra.mrb[36].mxu0 %vm992_vm1, %v3447_v58  ;;  %v721_v58 = vadd.f32 %v3304_v11, %v3468_v10  ;;  %v588_v10 = vmul.f32 %v2805_v13, %v3295_v2  ;;  %v874_v13 = vmax.f32 %v746_v54, 0.0  ;;  %3157 = vmatprep.mubr.msk.bf16.mxu1 %vm992_vm1, %v963_v26  ;;  %v2998_v54 = vld [vmem:[%s3290_s29 + $0x160] sm:$0xff]   ;;  %v854_v26 = vmax.f32 %v726_v12, 0.0 }
  0x65   : > { %3125 = vmatprep.mubr.msk.bf16.mxu0 %vm992_vm1, %v3450_v61  ;;  %v745_v61 = vadd.f32 %v3304_v11, %v610_v4  ;;  %v725_v4 = vadd.f32 %v3304_v11, %v590_v46  ;;  %v623_v46 = vmul.f32 %v2874_v33, %v3295_v2  ;;  %v596_v55 = vmul.f32 %v2821_v39, %v3295_v2 }
  0x66   : > { %v849_v34 = vmax.f32 %v721_v58, 0.0  ;;  %v3546_v27 = vadd.f32 %v3304_v11, %v588_v10  ;;  %v2817_v58 = vunpack.c.l.bf16 %v2983_v0  ;;  %v2818_v10 = vunpack.c.h.bf16 %v2983_v0  ;;  %v3000_v0 = vld [vmem:[%s3290_s29 + $0x170] sm:$0xff]  }
  0x67   : > { %v873_v1 = vmax.f32 %v745_v61, 0.0  ;;  %v620_v61 = vmul.f32 %v2869_v59, %v3295_v2  ;;  %v853_v3 = vmax.f32 %v725_v4, 0.0  ;;  %v757_v60 = vadd.f32 %v3304_v11, %v622_v43  ;;  %v3631_v43 = vld [vmem:[%s4658_s1] ss:$0 sm:$0xff] }
  0x68   : > { %v851_v63 = vmax.f32 %v3546_v27, 0.0  ;;  %v952_v7 = vpack.c.bf16 %v850_v45, %v849_v34  ;;  %v594_v31 = vmul.f32 %v2817_v58, %v3295_v2  ;;  %v2877_v34 = vunpack.c.l.bf16 %v2998_v54  ;;  %v2985_v27 = vld [vmem:[%s3290_s29 + $0xf8] sm:$0xff]  }
  0x69   : > { %v964_v53 = vpack.c.bf16 %v874_v13, %v873_v1  ;;  %v755_v36 = vadd.f32 %v3304_v11, %v620_v61  ;;  %v2878_v1 = vunpack.c.h.bf16 %v2998_v54  ;;  %v595_v40 = vmul.f32 %v2818_v10, %v3295_v2 }
  0x6a   : > { %v953_v13 = vpack.c.bf16 %v852_v16, %v851_v63  ;;  %v729_v47 = vadd.f32 %v3304_v11, %v594_v31  ;;  %v2826_v57 = vunpack.c.h.bf16 %v2985_v27  ;;  %v758_v63 = vadd.f32 %v3304_v11, %v623_v46 }
  0x6b   : > { %3158 = vmatmul.mubr.msk.bf16.gmra.mrb[8].mxu1 %vm992_vm1, %v964_v53  ;;  %v883_v48 = vmax.f32 %v755_v36, 0.0  ;;  %v625_v50 = vmul.f32 %v2878_v1, %v3295_v2  ;;  %v856_v53 = vmax.f32 %v728_v38, 0.0  ;;  %v2886_v15 = vunpack.c.h.bf16 %v3000_v0 }
  0x6c   : > { %3126 = vmatmul.mubr.msk.bf16.gmra.mrb[40].mxu0 %vm992_vm1, %v3452_v62  ;;  %v2813_v62 = vunpack.c.l.bf16 %v2982_v37  ;;  %3161 = vmatprep.mubr.msk.bf16.mxu1 %vm992_vm1, %v965_v19  ;;  %v756_v37 = vadd.f32 %v3304_v11, %v621_v51  ;;  %v730_v19 = vadd.f32 %v3304_v11, %v595_v40  ;;  %v731_v58 = vadd.f32 %v3304_v11, %v596_v55 }
  0x6d   : > { %3129 = vmatprep.mubr.msk.bf16.mxu0 %vm992_vm1, %v3464_v8  ;;  %v751_v8 = vadd.f32 %v3304_v11, %v616_v18  ;;  %v2822_v18 = vunpack.c.h.bf16 %v2984_v28  ;;  %v760_v12 = vadd.f32 %v3304_v11, %v625_v50  ;;  %v857_v22 = vmax.f32 %v729_v47, 0.0  ;;  %v3003_v47 = vld [vmem:[%s3290_s29 + $0x188] sm:$0xff]   ;;  %v3004_v50 = vld [vmem:[%s3290_s29 + $0x190] sm:$0xff]  }
  0x6e   : > { %v592_v6 = vmul.f32 %v2813_v62, %v3295_v2  ;;  %v624_v62 = vmul.f32 %v2877_v34, %v3295_v2  ;;  %v884_v49 = vmax.f32 %v756_v37, 0.0  ;;  %v885_v61 = vmax.f32 %v757_v60, 0.0 }
  0x6f   : > { %v879_v23 = vmax.f32 %v751_v8, 0.0  ;;  %v597_v56 = vmul.f32 %v2822_v18, %v3295_v2  ;;  %v2825_v8 = vunpack.c.l.bf16 %v2985_v27  ;;  %v886_v51 = vmax.f32 %v758_v63, 0.0 }
  0x70   : > { %v727_v25 = vadd.f32 %v3304_v11, %v592_v6  ;;  %v759_v4 = vadd.f32 %v3304_v11, %v624_v62  ;;  %v2882_v6 = vunpack.c.h.bf16 %v2999_v52  ;;  %v626_v54 = vmul.f32 %v2881_v5, %v3295_v2  ;;  %v3645_v52 = vld [vmem:[%s4659_s2] ss:$0 sm:$0xff] }
  0x71   : > { %v967_v35 = vpack.c.bf16 %v880_v24, %v879_v23  ;;  %v732_v20 = vadd.f32 %v3304_v11, %v597_v56  ;;  %v598_v21 = vmul.f32 %v2825_v8, %v3295_v2  ;;  %v858_v23 = vmax.f32 %v730_v19, 0.0 }
  0x72   : > { %v855_v45 = vmax.f32 %v727_v25, 0.0  ;;  %v599_v24 = vmul.f32 %v2826_v57, %v3295_v2  ;;  %v887_v25 = vmax.f32 %v759_v4, 0.0  ;;  %v888_v10 = vmax.f32 %v760_v12, 0.0 }
  0x73   : > { %3162 = vmatmul.mubr.msk.bf16.gmra.mrb[12].mxu1 %vm992_vm1, %v966_v32  ;;  %v629_v28 = vmul.f32 %v2886_v15, %v3295_v2  ;;  %v859_v29 = vmax.f32 %v731_v58, 0.0  ;;  %v860_v30 = vmax.f32 %v732_v20, 0.0  ;;  %v733_v31 = vadd.f32 %v3304_v11, %v598_v21  ;;  %v3005_v20 = vld [vmem:[%s3290_s29 + $0x198] sm:$0xff]   ;;  %v3006_v21 = vld [vmem:[%s3290_s29 + $0x1a0] sm:$0xff]  }
  0x74   : > { %3130 = vmatmul.mubr.msk.bf16.gmra.mrb[44].mxu0 %vm992_vm1, %v3517_v17  ;;  %v753_v17 = vadd.f32 %v3304_v11, %v618_v14  ;;  %3165 = vmatprep.mubr.msk.bf16.mxu1 %vm992_vm1, %v967_v35  ;;  %v2885_v14 = vunpack.c.l.bf16 %v3000_v0  ;;  %v955_v16 = vpack.c.bf16 %v856_v53, %v855_v45  ;;  %v956_v32 = vpack.c.bf16 %v858_v23, %v857_v22 }
  0x75   : > { %3133 = vmatprep.mubr.msk.bf16.mxu0 %vm992_vm1, %v951_v44  ;;  %v954_v44 = vpack.c.bf16 %v854_v26, %v853_v3  ;;  %v627_v3 = vmul.f32 %v2882_v6, %v3295_v2  ;;  %v734_v33 = vadd.f32 %v3304_v11, %v599_v24  ;;  %v2889_v34 = vunpack.c.l.bf16 %v3001_v9 }
  0x76   : > { %v881_v41 = vmax.f32 %v753_v17, 0.0  ;;  %v628_v26 = vmul.f32 %v2885_v14, %v3295_v2  ;;  %v3002_v17 = vld [vmem:[%s3290_s29 + $0x180] sm:$0xff]   ;;  %v2890_v35 = vunpack.c.h.bf16 %v3001_v9  ;;  %v970_v36 = vpack.c.bf16 %v886_v51, %v885_v61 }
  0x77   : > { %v761_v37 = vadd.f32 %v3304_v11, %v626_v54  ;;  %v762_v1 = vadd.f32 %v3304_v11, %v627_v3  ;;  %v971_v38 = vpack.c.bf16 %v888_v10, %v887_v25  ;;  %v764_v18 = vadd.f32 %v3304_v11, %v629_v28 }
  0x78   : > { %v968_v59 = vpack.c.bf16 %v882_v42, %v881_v41  ;;  %v763_v39 = vadd.f32 %v3304_v11, %v628_v26  ;;  %v2894_v40 = vunpack.c.h.bf16 %v3002_v17  ;;  %v957_v27 = vpack.c.bf16 %v860_v30, %v859_v29 }
  0x79   : > { %v861_v41 = vmax.f32 %v733_v31, 0.0  ;;  %v630_v42 = vmul.f32 %v2889_v34, %v3295_v2  ;;  %v862_v45 = vmax.f32 %v734_v33, 0.0  ;;  %v889_v46 = vmax.f32 %v761_v37, 0.0  ;;  %v3007_v31 = vld [vmem:[%s3290_s29 + $0x1a8] sm:$0xff]  }
  0x7a   : > { %v890_v62 = vmax.f32 %v762_v1, 0.0  ;;  %v891_v2 = vmax.f32 %v763_v39, 0.0  ;;  %v2897_v56 = vunpack.c.l.bf16 %v3003_v47  ;;  %v2898_v57 = vunpack.c.h.bf16 %v3003_v47 }
  0x7b   : > { %3166 = vmatmul.mubr.msk.bf16.gmra.mrb[16].mxu1 %vm992_vm1, %v968_v59  ;;  %v765_v53 = vadd.f32 %v3645_v52, %v630_v42  ;;  %v958_v8 = vpack.c.bf16 %v862_v45, %v861_v41  ;;  %v2901_v63 = vunpack.c.l.bf16 %v3004_v50  ;;  %v2902_v4 = vunpack.c.h.bf16 %v3004_v50 }
  0x7c   : > { %3134 = vmatmul.mubr.msk.bf16.gmra.mrb[48].mxu0 %vm992_vm1, %v952_v7  ;;  %v969_v7 = vpack.c.bf16 %v884_v49, %v883_v48  ;;  %v892_v48 = vmax.f32 %v764_v18, 0.0  ;;  %v633_v49 = vmul.f32 %v3631_v43, %v2894_v40  ;;  %v972_v0 = vpack.c.bf16 %v890_v62, %v889_v46  ;;  %v3009_v62 = vld [vmem:[%s3290_s29 + $0x1b8] sm:$0xff]  }
  0x7d   : > { %3137 = vmatprep.mubr.msk.bf16.mxu0 %vm992_vm1, %v953_v13  ;;  %v2893_v13 = vunpack.c.l.bf16 %v3002_v17  ;;  %v893_v5 = vmax.f32 %v765_v53, 0.0  ;;  %v635_v12 = vmul.f32 %v3631_v43, %v2898_v57  ;;  %v637_v58 = vmul.f32 %v3631_v43, %v2902_v4 }
  0x7e   : > { %3169 = vmatprep.mubr.msk.bf16.mxu1 %vm992_vm1, %v969_v7  ;;  %v973_v59 = vpack.c.bf16 %v892_v48, %v891_v2  ;;  %v768_v60 = vadd.f32 %v3645_v52, %v633_v49  ;;  %v634_v7 = vmul.f32 %v3631_v43, %v2897_v56  ;;  %v2905_v61 = vunpack.c.l.bf16 %v3005_v20  ;;  %v3010_v49 = vld [vmem:[%s3290_s29 + $0x1c0] sm:$0xff]  }
  0x7f   : > { %v632_v11 = vmul.f32 %v3631_v43, %v2893_v13  ;;  %v770_v24 = vadd.f32 %v3645_v52, %v635_v12  ;;  %v2906_v51 = vunpack.c.h.bf16 %v3005_v20  ;;  %v2909_v54 = vunpack.c.l.bf16 %v3006_v21 }
  0x80   : > { %v896_v15 = vmax.f32 %v768_v60, 0.0  ;;  %v769_v23 = vadd.f32 %v3645_v52, %v634_v7  ;;  %v772_v25 = vadd.f32 %v3645_v52, %v637_v58  ;;  %v2910_v10 = vunpack.c.h.bf16 %v3006_v21  ;;  %v3012_v58 = vld [vmem:[%s3290_s29 + $0x1d0] sm:$0xff]  }
  0x81   : > { %v767_v19 = vadd.f32 %v3645_v52, %v632_v11  ;;  %v898_v28 = vmax.f32 %v770_v24, 0.0  ;;  %v638_v17 = vmul.f32 %v3631_v43, %v2905_v61  ;;  %v639_v29 = vmul.f32 %v3631_v43, %v2906_v51 }
  0x82   : > { %v897_v26 = vmax.f32 %v769_v23, 0.0  ;;  %v640_v30 = vmul.f32 %v3631_v43, %v2909_v54  ;;  %v900_v33 = vmax.f32 %v772_v25, 0.0  ;;  %v641_v34 = vmul.f32 %v3631_v43, %v2910_v10 }
  0x83   : > { %3170 = vmatmul.mubr.msk.bf16.gmra.mrb[20].mxu1 %vm992_vm1, %v970_v36  ;;  %v895_v14 = vmax.f32 %v767_v19, 0.0  ;;  %v2913_v36 = vunpack.c.l.bf16 %v3007_v31  ;;  %v2914_v37 = vunpack.c.h.bf16 %v3007_v31  ;;  %v773_v13 = vadd.f32 %v3645_v52, %v638_v17  ;;  %v3013_v17 = vld [vmem:[%s3290_s29 + $0x1d8] sm:$0xff]  }
  0x84   : > { %3138 = vmatmul.mubr.msk.bf16.gmra.mrb[52].mxu0 %vm992_vm1, %v954_v44  ;;  %v631_v44 = vmul.f32 %v3631_v43, %v2890_v35  ;;  %3173 = vmatprep.mubr.msk.bf16.mxu1 %vm992_vm1, %v971_v38  ;;  %v3008_v35 = vld [vmem:[%s3290_s29 + $0x1b0] sm:$0xff]   ;;  %v976_v1 = vpack.c.bf16 %v898_v28, %v897_v26  ;;  %v774_v38 = vadd.f32 %v3645_v52, %v639_v29  ;;  %v2926_v60 = vunpack.c.h.bf16 %v3010_v49 }
  0x85   : > { %3141 = vmatprep.mubr.msk.bf16.mxu0 %vm992_vm1, %v955_v16  ;;  %v636_v16 = vmul.f32 %v3631_v43, %v2901_v63  ;;  %v975_v3 = vpack.c.bf16 %v896_v15, %v895_v14  ;;  %v775_v39 = vadd.f32 %v3645_v52, %v640_v30  ;;  %v776_v40 = vadd.f32 %v3645_v52, %v641_v34 }
  0x86   : > { %v766_v55 = vadd.f32 %v3645_v52, %v631_v44  ;;  %v2918_v41 = vunpack.c.h.bf16 %v3008_v35  ;;  %v642_v42 = vmul.f32 %v3631_v43, %v2913_v36  ;;  %v643_v44 = vmul.f32 %v3631_v43, %v2914_v37 }
  0x87   : > { %v771_v9 = vadd.f32 %v3645_v52, %v636_v16  ;;  %v901_v45 = vmax.f32 %v773_v13, 0.0  ;;  %v902_v46 = vmax.f32 %v774_v38, 0.0  ;;  %v903_v11 = vmax.f32 %v775_v39, 0.0  ;;  %v3011_v16 = vld [vmem:[%s3290_s29 + $0x1c8] sm:$0xff]  }
  0x88   : > { %v894_v6 = vmax.f32 %v766_v55, 0.0  ;;  %v904_v47 = vmax.f32 %v776_v40, 0.0  ;;  %v645_v48 = vmul.f32 %v3631_v43, %v2918_v41  ;;  %v777_v50 = vadd.f32 %v3645_v52, %v642_v42 }
  0x89   : > { %v778_v53 = vadd.f32 %v3645_v52, %v643_v44  ;;  %v2921_v55 = vunpack.c.l.bf16 %v3009_v62  ;;  %v978_v56 = vpack.c.bf16 %v902_v46, %v901_v45  ;;  %v649_v15 = vmul.f32 %v3631_v43, %v2926_v60 }
  0x8a   : > { %v974_v22 = vpack.c.bf16 %v894_v6, %v893_v5  ;;  %v979_v19 = vpack.c.bf16 %v904_v47, %v903_v11  ;;  %v905_v63 = vmax.f32 %v777_v50, 0.0  ;;  %v2929_v24 = vunpack.c.l.bf16 %v3011_v16  ;;  %v3015_v47 = vld [vmem:[%s3290_s29 + $0x1e8] sm:$0xff]  }
  0x8b   : > { %3174 = vmatmul.mubr.msk.bf16.gmra.mrb[24].mxu1 %vm992_vm1, %v972_v0  ;;  %v2925_v0 = vunpack.c.l.bf16 %v3010_v49  ;;  %v906_v4 = vmax.f32 %v778_v53, 0.0  ;;  %v646_v5 = vmul.f32 %v3631_v43, %v2921_v55  ;;  %v2930_v61 = vunpack.c.h.bf16 %v3011_v16 }
  0x8c   : > { %3142 = vmatmul.mubr.msk.bf16.gmra.mrb[56].mxu0 %vm992_vm1, %v956_v32  ;;  %3177 = vmatprep.mubr.msk.bf16.mxu1 %vm992_vm1, %v973_v59  ;;  %v899_v32 = vmax.f32 %v771_v9, 0.0  ;;  %v780_v59 = vadd.f32 %v3645_v52, %v645_v48  ;;  %v784_v54 = vadd.f32 %v3645_v52, %v649_v15  ;;  %v2934_v9 = vunpack.c.h.bf16 %v3012_v58 }
  0x8d   : > { %3145 = vmatprep.mubr.msk.bf16.mxu0 %vm992_vm1, %v957_v27  ;;  %v2917_v27 = vunpack.c.l.bf16 %v3008_v35  ;;  %v648_v7 = vmul.f32 %v3631_v43, %v2925_v0  ;;  %v980_v20 = vpack.c.bf16 %v906_v4, %v905_v63  ;;  %v781_v21 = vadd.f32 %v3645_v52, %v646_v5 }
  0x8e   : > { %v977_v18 = vpack.c.bf16 %v900_v33, %v899_v32  ;;  %v908_v14 = vmax.f32 %v780_v59, 0.0  ;;  %v650_v26 = vmul.f32 %v3631_v43, %v2929_v24  ;;  %v651_v28 = vmul.f32 %v3631_v43, %v2930_v61  ;;  %v3014_v33 = vld [vmem:[%s3290_s29 + $0x1e0] sm:$0xff]  }
  0x8f   : > { %v644_v2 = vmul.f32 %v3631_v43, %v2917_v27  ;;  %v783_v23 = vadd.f32 %v3645_v52, %v648_v7  ;;  %v909_v25 = vmax.f32 %v781_v21, 0.0  ;;  %v912_v30 = vmax.f32 %v784_v54, 0.0 }
  0x90   : > { %v653_v32 = vmul.f32 %v3631_v43, %v2934_v9  ;;  %v2937_v34 = vunpack.c.l.bf16 %v3013_v17  ;;  %v2938_v35 = vunpack.c.h.bf16 %v3013_v17  ;;  %v785_v37 = vadd.f32 %v3645_v52, %v650_v26 }
  0x91   : > { %v779_v57 = vadd.f32 %v3645_v52, %v644_v2  ;;  %v911_v29 = vmax.f32 %v783_v23, 0.0  ;;  %v2941_v13 = vunpack.c.l.bf16 %v3014_v33  ;;  %v2942_v40 = vunpack.c.h.bf16 %v3014_v33  ;;  %v3016_v2 = vld [vmem:[%s3290_s29 + $0x1f0] sm:$0xff]  }
  0x92   : > { %v654_v27 = vmul.f32 %v3631_v43, %v2937_v34  ;;  %v655_v41 = vmul.f32 %v3631_v43, %v2938_v35  ;;  %v913_v42 = vmax.f32 %v785_v37, 0.0  ;;  %v2945_v55 = vunpack.c.l.bf16 %v3015_v47 }
  0x93   : > { %3178 = vmatmul.mubr.msk.bf16.gmra.mrb[28].mxu1 %vm992_vm1, %v974_v22  ;;  %v907_v12 = vmax.f32 %v779_v57, 0.0  ;;  %v983_v38 = vpack.c.bf16 %v912_v30, %v911_v29  ;;  %v656_v45 = vmul.f32 %v3631_v43, %v2941_v13  ;;  %v657_v11 = vmul.f32 %v3631_v43, %v2942_v40 }
  0x94   : > { %3146 = vmatmul.mubr.msk.bf16.gmra.mrb[60].mxu0 %vm992_vm1, %v958_v8  ;;  %3181 = vmatprep.mubr.msk.bf16.mxu1 %vm992_vm1, %v975_v3  ;;  %v2922_v8 = vunpack.c.h.bf16 %v3009_v62  ;;  %v2933_v3 = vunpack.c.l.bf16 %v3012_v58  ;;  %v789_v48 = vadd.f32 %v3645_v52, %v654_v27  ;;  %v790_v49 = vadd.f32 %v3645_v52, %v655_v41 }
  0x95   : > { %v981_v51 = vpack.c.bf16 %v908_v14, %v907_v12  ;;  %v791_v53 = vadd.f32 %v3645_v52, %v656_v45  ;;  %v792_v0 = vadd.f32 %v3645_v52, %v657_v11  ;;  %v2950_v57 = vunpack.c.h.bf16 %v3016_v2  ;;  %v3017_v14 = vld [vmem:[%s3290_s29 + $0x1f8] sm:$0xff]  }
  0x96   : > { %v647_v6 = vmul.f32 %v3631_v43, %v2922_v8  ;;  %v652_v31 = vmul.f32 %v3631_v43, %v2933_v3  ;;  %v917_v59 = vmax.f32 %v789_v48, 0.0  ;;  %v918_v60 = vmax.f32 %v790_v49, 0.0 }
  0x97   : > { %v658_v63 = vmul.f32 %v3631_v43, %v2945_v55  ;;  %v919_v5 = vmax.f32 %v791_v53, 0.0  ;;  %v661_v12 = vmul.f32 %v3631_v43, %v2950_v57  ;;  %v2954_v21 = vunpack.c.h.bf16 %v3017_v14 }
  0x98   : > { %v782_v22 = vadd.f32 %v3645_v52, %v647_v6  ;;  %v787_v39 = vadd.f32 %v3645_v52, %v652_v31  ;;  %v920_v6 = vmax.f32 %v792_v0, 0.0  ;;  %v986_v15 = vpack.c.bf16 %v918_v60, %v917_v59 }
  0x99   : > { %v793_v16 = vadd.f32 %v3645_v52, %v658_v63  ;;  %v796_v24 = vadd.f32 %v3645_v52, %v661_v12  ;;  %v663_v3 = vmul.f32 %v3631_v43, %v2954_v21 }
  0x9a   : > { %v910_v10 = vmax.f32 %v782_v22, 0.0  ;;  %v915_v46 = vmax.f32 %v787_v39, 0.0  ;;  %v987_v22 = vpack.c.bf16 %v920_v6, %v919_v5 }
  0x9b   : > { %3182 = vmatmul.mubr.msk.bf16.gmra.mrb[32].mxu1 %vm992_vm1, %v976_v1  ;;  %v786_v1 = vadd.f32 %v3645_v52, %v651_v28  ;;  %v921_v61 = vmax.f32 %v793_v16, 0.0  ;;  %v798_v28 = vadd.f32 %v3645_v52, %v663_v3 }
  0x9c   : > { %3185 = vmatprep.mubr.msk.bf16.mxu1 %vm992_vm1, %v977_v18  ;;  %v982_v36 = vpack.c.bf16 %v910_v10, %v909_v25  ;;  %v788_v18 = vadd.f32 %v3645_v52, %v653_v32  ;;  %v924_v25 = vmax.f32 %v796_v24, 0.0 }
  0x9d   : > { %v914_v44 = vmax.f32 %v786_v1, 0.0  ;;  %v926_v30 = vmax.f32 %v798_v28, 0.0 }
  0x9e   : > { %v916_v62 = vmax.f32 %v788_v18, 0.0 }
  0x9f   : > { %v984_v50 = vpack.c.bf16 %v914_v44, %v913_v42 }
  0xa0   : > { %v985_v8 = vpack.c.bf16 %v916_v62, %v915_v46 }
  0xa3   : > { %3186 = vmatmul.mubr.msk.bf16.gmra.mrb[36].mxu1 %vm992_vm1, %v978_v56  ;;  %v2946_v56 = vunpack.c.h.bf16 %v3015_v47 }
  0xa4   : > { %3189 = vmatprep.mubr.msk.bf16.mxu1 %vm992_vm1, %v979_v19  ;;  %v2949_v19 = vunpack.c.l.bf16 %v3016_v2 }
  0xa5   : > { %v659_v4 = vmul.f32 %v3631_v43, %v2946_v56 }
  0xa6   : > { %v660_v7 = vmul.f32 %v3631_v43, %v2949_v19 }
  0xa7   : > { %v794_v58 = vadd.f32 %v3645_v52, %v659_v4 }
  0xa8   : > { %v795_v23 = vadd.f32 %v3645_v52, %v660_v7 }
  0xaa   : > { %v923_v9 = vmax.f32 %v795_v23, 0.0 }
  0xab   : > { %3190 = vmatmul.mubr.msk.bf16.gmra.mrb[40].mxu1 %vm992_vm1, %v980_v20  ;;  %v2953_v20 = vunpack.c.l.bf16 %v3017_v14 }
  0xac   : > { %3193 = vmatprep.mubr.msk.bf16.mxu1 %vm992_vm1, %v981_v51  ;;  %v922_v51 = vmax.f32 %v794_v58, 0.0  ;;  %v989_v17 = vpack.c.bf16 %v924_v25, %v923_v9 }
  0xad   : > { %v662_v54 = vmul.f32 %v3631_v43, %v2953_v20 }
  0xae   : > { %v988_v10 = vpack.c.bf16 %v922_v51, %v921_v61 }
  0xaf   : > { %v797_v26 = vadd.f32 %v3645_v52, %v662_v54 }
  0xb1   : > { %v925_v29 = vmax.f32 %v797_v26, 0.0 }
  0xb3   : > { %3194 = vmatmul.mubr.msk.bf16.gmra.mrb[44].mxu1 %vm992_vm1, %v982_v36  ;;  %v990_v31 = vpack.c.bf16 %v926_v30, %v925_v29 }
  0xb4   : > { %3197 = vmatprep.mubr.msk.bf16.mxu1 %vm992_vm1, %v983_v38 }
  0xbb   : > { %3198 = vmatmul.mubr.msk.bf16.gmra.mrb[48].mxu1 %vm992_vm1, %v984_v50 }
  0xbc   : > { %3201 = vmatprep.mubr.msk.bf16.mxu1 %vm992_vm1, %v985_v8 }
  0xc3   : > { %3202 = vmatmul.mubr.msk.bf16.gmra.mrb[52].mxu1 %vm992_vm1, %v986_v15 }
  0xc4   : > { %3205 = vmatprep.mubr.msk.bf16.mxu1 %vm992_vm1, %v987_v22 }
  0xcb   : > { %3206 = vmatmul.mubr.msk.bf16.gmra.mrb[56].mxu1 %vm992_vm1, %v988_v10 }
  0xcc   : > { %3209 = vmatprep.mubr.msk.bf16.mxu1 %vm992_vm1, %v989_v17 }
  0xd3   : > { %3210 = vmatmul.mubr.msk.bf16.gmra.mrb[60].mxu1 %vm992_vm1, %v990_v31 }
  0xef   : > { %v3087_v43 = vpop.f32.mrb[0].mxu0 }
  0xf0   : > { %1737 = vst.msk [vmem:[%s3748_s17 + $0x10] sm:$0xff] %vm1734_vm2, %v3087_v43  ;;  %v1223_v52 = vpop.f32.mrb[1].mxu0  ;;  %v2128_v35 = vmul.f32 %v3087_v43, %v3087_v43  ;;  %v1866_v38 = vsel %vm1734_vm2, %v3087_v43, 0.0 }
  0xf1   : > { %1735 = vst.msk [vmem:[%s3748_s17] sm:$0xff] %vm1734_vm2, %v1223_v52  ;;  %v2126_v32 = vmul.f32 %v1223_v52, %v1223_v52  ;;  %v3088_v33 = vpop.f32.mrb[2].mxu0  ;;  %v1863_v36 = vsel %vm1734_vm2, %v1223_v52, 0.0 }
  0xf2   : > { %1738 = vst.msk [vmem:[%s3748_s17 + $0x18] sm:$0xff] %vm1734_vm2, %v3088_v33  ;;  %v1226_v34 = vpop.f32.mrb[3].mxu0  ;;  %v2129_v18 = vmul.f32 %v3088_v33, %v3088_v33  ;;  %v2257_v42 = vsel %vm1734_vm2, %v2128_v35, 0.0  ;;  %v1868_v44 = vsel %vm1734_vm2, %v3088_v33, 0.0 }
  0xf3   : > { %1736 = vst.msk [vmem:[%s3748_s17 + $0x8] sm:$0xff] %vm1734_vm2, %v1226_v34  ;;  %v1864_v37 = vsel %vm1734_vm2, %v1226_v34, 0.0  ;;  %v2127_v1 = vmul.f32 %v1226_v34, %v1226_v34  ;;  %v2254_v39 = vsel %vm1734_vm2, %v2126_v32, 0.0 }
  0xf4   : > { %v1865_v13 = vadd.f32 %v1864_v37, %v1863_v36  ;;  %v2259_v47 = vsel %vm1734_vm2, %v2129_v18, 0.0 }
  0xf5   : > { %v2255_v40 = vsel %vm1734_vm2, %v2127_v1, 0.0 }
  0xf6   : > { %v1867_v27 = vadd.f32 %v1866_v38, %v1865_v13  ;;  %v2256_v41 = vadd.f32 %v2255_v40, %v2254_v39 }
  0xf7   : > { %v3091_v45 = vpop.f32.mrb[4].mxu0 }
  0xf8   : > { %v2258_v46 = vadd.f32 %v2257_v42, %v2256_v41  ;;  %1741 = vst.msk [vmem:[%s3748_s17 + $0x30] sm:$0xff] %vm1734_vm2, %v3091_v45  ;;  %v1239_v62 = vpop.f32.mrb[5].mxu0  ;;  %v1869_v11 = vadd.f32 %v1868_v44, %v1867_v27  ;;  %v2132_v56 = vmul.f32 %v3091_v45, %v3091_v45  ;;  %v1874_v60 = vsel %vm1734_vm2, %v3091_v45, 0.0 }
  0xf9   : > { %1739 = vst.msk [vmem:[%s3748_s17 + $0x20] sm:$0xff] %vm1734_vm2, %v1239_v62  ;;  %v1870_v2 = vsel %vm1734_vm2, %v1239_v62, 0.0  ;;  %v2130_v48 = vmul.f32 %v1239_v62, %v1239_v62  ;;  %v3092_v49 = vpop.f32.mrb[6].mxu0 }
  0xfa   : > { %v1871_v50 = vadd.f32 %v1870_v2, %v1869_v11  ;;  %v2260_v53 = vadd.f32 %v2259_v47, %v2258_v46  ;;  %1742 = vst.msk [vmem:[%s3748_s17 + $0x38] sm:$0xff] %vm1734_vm2, %v3092_v49  ;;  %v1242_v55 = vpop.f32.mrb[7].mxu0  ;;  %v2133_v63 = vmul.f32 %v3092_v49, %v3092_v49  ;;  %v2265_v7 = vsel %vm1734_vm2, %v2132_v56, 0.0 }
  0xfb   : > { %v2261_v8 = vsel %vm1734_vm2, %v2130_v48, 0.0  ;;  %1740 = vst.msk [vmem:[%s3748_s17 + $0x28] sm:$0xff] %vm1734_vm2, %v1242_v55  ;;  %v1872_v0 = vsel %vm1734_vm2, %v1242_v55, 0.0  ;;  %v2131_v19 = vmul.f32 %v1242_v55, %v1242_v55  ;;  %v1876_v12 = vsel %vm1734_vm2, %v3092_v49, 0.0 }
  0xfc   : > { %v2262_v57 = vadd.f32 %v2261_v8, %v2260_v53  ;;  %v1873_v59 = vadd.f32 %v1872_v0, %v1871_v50  ;;  %v2267_v20 = vsel %vm1734_vm2, %v2133_v63, 0.0 }
  0xfd   : > { %v2263_v4 = vsel %vm1734_vm2, %v2131_v19, 0.0 }
  0xfe   : > { %v1875_v5 = vadd.f32 %v1874_v60, %v1873_v59  ;;  %v2264_v6 = vadd.f32 %v2263_v4, %v2262_v57 }
  0xff   : > { %v3095_v14 = vpop.f32.mrb[8].mxu0 }
 0x100   : > { %v2266_v15 = vadd.f32 %v2265_v7, %v2264_v6  ;;  %1745 = vst.msk [vmem:[%s3748_s17 + $0x50] sm:$0xff] %vm1734_vm2, %v3095_v14  ;;  %v1255_v16 = vpop.f32.mrb[9].mxu0  ;;  %v1877_v58 = vadd.f32 %v1876_v12, %v1875_v5  ;;  %v2136_v54 = vmul.f32 %v3095_v14, %v3095_v14  ;;  %v1882_v28 = vsel %vm1734_vm2, %v3095_v14, 0.0 }
 0x101   : > { %1743 = vst.msk [vmem:[%s3748_s17 + $0x40] sm:$0xff] %vm1734_vm2, %v1255_v16  ;;  %v1878_v21 = vsel %vm1734_vm2, %v1255_v16, 0.0  ;;  %v2134_v22 = vmul.f32 %v1255_v16, %v1255_v16  ;;  %v3096_v23 = vpop.f32.mrb[10].mxu0 }
 0x102   : > { %v1879_v24 = vadd.f32 %v1878_v21, %v1877_v58  ;;  %v2268_v61 = vadd.f32 %v2267_v20, %v2266_v15  ;;  %1746 = vst.msk [vmem:[%s3748_s17 + $0x58] sm:$0xff] %vm1734_vm2, %v3096_v23  ;;  %v1258_v51 = vpop.f32.mrb[11].mxu0  ;;  %v2137_v17 = vmul.f32 %v3096_v23, %v3096_v23  ;;  %v2273_v43 = vsel %vm1734_vm2, %v2136_v54, 0.0 }
 0x103   : > { %v2269_v3 = vsel %vm1734_vm2, %v2134_v22, 0.0  ;;  %1744 = vst.msk [vmem:[%s3748_s17 + $0x48] sm:$0xff] %vm1734_vm2, %v1258_v51  ;;  %v1880_v9 = vsel %vm1734_vm2, %v1258_v51, 0.0  ;;  %v2135_v25 = vmul.f32 %v1258_v51, %v1258_v51  ;;  %v1884_v52 = vsel %vm1734_vm2, %v3096_v23, 0.0 }
 0x104   : > { %v2270_v10 = vadd.f32 %v2269_v3, %v2268_v61  ;;  %v1881_v26 = vadd.f32 %v1880_v9, %v1879_v24  ;;  %v2275_v36 = vsel %vm1734_vm2, %v2137_v17, 0.0 }
 0x105   : > { %v2271_v29 = vsel %vm1734_vm2, %v2135_v25, 0.0 }
 0x106   : > { %v1883_v30 = vadd.f32 %v1882_v28, %v1881_v26  ;;  %v2272_v31 = vadd.f32 %v2271_v29, %v2270_v10 }
 0x107   : > { %v3099_v32 = vpop.f32.mrb[12].mxu0 }
 0x108   : > { %v2274_v33 = vadd.f32 %v2273_v43, %v2272_v31  ;;  %1749 = vst.msk [vmem:[%s3748_s17 + $0x70] sm:$0xff] %vm1734_vm2, %v3099_v32  ;;  %v1271_v34 = vpop.f32.mrb[13].mxu0  ;;  %v1885_v35 = vadd.f32 %v1884_v52, %v1883_v30  ;;  %v2140_v40 = vmul.f32 %v3099_v32, %v3099_v32  ;;  %v1890_v46 = vsel %vm1734_vm2, %v3099_v32, 0.0 }
 0x109   : > { %1747 = vst.msk [vmem:[%s3748_s17 + $0x60] sm:$0xff] %vm1734_vm2, %v1271_v34  ;;  %v1886_v37 = vsel %vm1734_vm2, %v1271_v34, 0.0  ;;  %v2138_v1 = vmul.f32 %v1271_v34, %v1271_v34  ;;  %v3100_v13 = vpop.f32.mrb[14].mxu0 }
 0x10a   : > { %v1887_v38 = vadd.f32 %v1886_v37, %v1885_v35  ;;  %v2276_v39 = vadd.f32 %v2275_v36, %v2274_v33  ;;  %1750 = vst.msk [vmem:[%s3748_s17 + $0x78] sm:$0xff] %vm1734_vm2, %v3100_v13  ;;  %v1274_v18 = vpop.f32.mrb[15].mxu0  ;;  %v2141_v62 = vmul.f32 %v3100_v13, %v3100_v13  ;;  %v2281_v48 = vsel %vm1734_vm2, %v2140_v40, 0.0 }
 0x10b   : > { %v2277_v27 = vsel %vm1734_vm2, %v2138_v1, 0.0  ;;  %1748 = vst.msk [vmem:[%s3748_s17 + $0x68] sm:$0xff] %vm1734_vm2, %v1274_v18  ;;  %v1888_v41 = vsel %vm1734_vm2, %v1274_v18, 0.0  ;;  %v2139_v42 = vmul.f32 %v1274_v18, %v1274_v18  ;;  %v1892_v49 = vsel %vm1734_vm2, %v3100_v13, 0.0 }
 0x10c   : > { %v2278_v44 = vadd.f32 %v2277_v27, %v2276_v39  ;;  %v1889_v45 = vadd.f32 %v1888_v41, %v1887_v38  ;;  %v2283_v8 = vsel %vm1734_vm2, %v2141_v62, 0.0 }
 0x10d   : > { %v2279_v11 = vsel %vm1734_vm2, %v2139_v42, 0.0 }
 0x10e   : > { %v1891_v47 = vadd.f32 %v1890_v46, %v1889_v45  ;;  %v2280_v2 = vadd.f32 %v2279_v11, %v2278_v44 }
 0x10f   : > { %v3103_v50 = vpop.f32.mrb[16].mxu0 }
 0x110   : > { %v2282_v53 = vadd.f32 %v2281_v48, %v2280_v2  ;;  %1753 = vst.msk [vmem:[%s3748_s17 + $0x90] sm:$0xff] %vm1734_vm2, %v3103_v50  ;;  %v1287_v55 = vpop.f32.mrb[17].mxu0  ;;  %v1893_v56 = vadd.f32 %v1892_v49, %v1891_v47  ;;  %v2144_v4 = vmul.f32 %v3103_v50, %v3103_v50  ;;  %v1898_v15 = vsel %vm1734_vm2, %v3103_v50, 0.0 }
 0x111   : > { %1751 = vst.msk [vmem:[%s3748_s17 + $0x80] sm:$0xff] %vm1734_vm2, %v1287_v55  ;;  %v1894_v0 = vsel %vm1734_vm2, %v1287_v55, 0.0  ;;  %v2142_v19 = vmul.f32 %v1287_v55, %v1287_v55  ;;  %v3104_v57 = vpop.f32.mrb[18].mxu0 }
 0x112   : > { %v1895_v59 = vadd.f32 %v1894_v0, %v1893_v56  ;;  %v2284_v60 = vadd.f32 %v2283_v8, %v2282_v53  ;;  %1754 = vst.msk [vmem:[%s3748_s17 + $0x98] sm:$0xff] %vm1734_vm2, %v3104_v57  ;;  %v1290_v63 = vpop.f32.mrb[19].mxu0  ;;  %v2145_v16 = vmul.f32 %v3104_v57, %v3104_v57  ;;  %v2289_v22 = vsel %vm1734_vm2, %v2144_v4, 0.0 }
 0x113   : > { %v2285_v5 = vsel %vm1734_vm2, %v2142_v19, 0.0  ;;  %1752 = vst.msk [vmem:[%s3748_s17 + $0x88] sm:$0xff] %vm1734_vm2, %v1290_v63  ;;  %v1896_v6 = vsel %vm1734_vm2, %v1290_v63, 0.0  ;;  %v2143_v7 = vmul.f32 %v1290_v63, %v1290_v63  ;;  %v1900_v23 = vsel %vm1734_vm2, %v3104_v57, 0.0 }
 0x114   : > { %v2286_v12 = vadd.f32 %v2285_v5, %v2284_v60  ;;  %v1897_v14 = vadd.f32 %v1896_v6, %v1895_v59  ;;  %v2291_v3 = vsel %vm1734_vm2, %v2145_v16, 0.0 }
 0x115   : > { %v2287_v58 = vsel %vm1734_vm2, %v2143_v7, 0.0 }
 0x116   : > { %v1899_v20 = vadd.f32 %v1898_v15, %v1897_v14  ;;  %v2288_v21 = vadd.f32 %v2287_v58, %v2286_v12 }
 0x117   : > { %v3107_v24 = vpop.f32.mrb[20].mxu0 }
 0x118   : > { %v2290_v61 = vadd.f32 %v2289_v22, %v2288_v21  ;;  %1757 = vst.msk [vmem:[%s3748_s17 + $0xb0] sm:$0xff] %vm1734_vm2, %v3107_v24  ;;  %v1303_v51 = vpop.f32.mrb[21].mxu0  ;;  %v1901_v54 = vadd.f32 %v1900_v23, %v1899_v20  ;;  %v2148_v29 = vmul.f32 %v3107_v24, %v3107_v24  ;;  %v1906_v33 = vsel %vm1734_vm2, %v3107_v24, 0.0 }
 0x119   : > { %1755 = vst.msk [vmem:[%s3748_s17 + $0xa0] sm:$0xff] %vm1734_vm2, %v1303_v51  ;;  %v1902_v9 = vsel %vm1734_vm2, %v1303_v51, 0.0  ;;  %v2146_v25 = vmul.f32 %v1303_v51, %v1303_v51  ;;  %v3108_v10 = vpop.f32.mrb[22].mxu0 }
 0x11a   : > { %v1903_v26 = vadd.f32 %v1902_v9, %v1901_v54  ;;  %v2292_v28 = vadd.f32 %v2291_v3, %v2290_v61  ;;  %1758 = vst.msk [vmem:[%s3748_s17 + $0xb8] sm:$0xff] %vm1734_vm2, %v3108_v10  ;;  %v1306_v17 = vpop.f32.mrb[23].mxu0  ;;  %v2149_v34 = vmul.f32 %v3108_v10, %v3108_v10  ;;  %v2297_v1 = vsel %vm1734_vm2, %v2148_v29, 0.0 }
 0x11b   : > { %v2293_v30 = vsel %vm1734_vm2, %v2146_v25, 0.0  ;;  %1756 = vst.msk [vmem:[%s3748_s17 + $0xa8] sm:$0xff] %vm1734_vm2, %v1306_v17  ;;  %v1904_v31 = vsel %vm1734_vm2, %v1306_v17, 0.0  ;;  %v2147_v43 = vmul.f32 %v1306_v17, %v1306_v17  ;;  %v1908_v13 = vsel %vm1734_vm2, %v3108_v10, 0.0 }
 0x11c   : > { %v2294_v52 = vadd.f32 %v2293_v30, %v2292_v28  ;;  %v1905_v32 = vadd.f32 %v1904_v31, %v1903_v26  ;;  %v2299_v27 = vsel %vm1734_vm2, %v2149_v34, 0.0 }
 0x11d   : > { %v2295_v35 = vsel %vm1734_vm2, %v2147_v43, 0.0 }
 0x11e   : > { %v1907_v36 = vadd.f32 %v1906_v33, %v1905_v32  ;;  %v2296_v37 = vadd.f32 %v2295_v35, %v2294_v52 }
 0x11f   : > { %v3111_v38 = vpop.f32.mrb[24].mxu0 }
 0x120   : > { %v2298_v39 = vadd.f32 %v2297_v1, %v2296_v37  ;;  %1761 = vst.msk [vmem:[%s3748_s17 + $0xd0] sm:$0xff] %vm1734_vm2, %v3111_v38  ;;  %v1319_v18 = vpop.f32.mrb[25].mxu0  ;;  %v1909_v40 = vadd.f32 %v1908_v13, %v1907_v36  ;;  %v2152_v11 = vmul.f32 %v3111_v38, %v3111_v38  ;;  %v1914_v53 = vsel %vm1734_vm2, %v3111_v38, 0.0 }
 0x121   : > { %1759 = vst.msk [vmem:[%s3748_s17 + $0xc0] sm:$0xff] %vm1734_vm2, %v1319_v18  ;;  %v1910_v41 = vsel %vm1734_vm2, %v1319_v18, 0.0  ;;  %v2150_v42 = vmul.f32 %v1319_v18, %v1319_v18  ;;  %v3112_v44 = vpop.f32.mrb[26].mxu0 }
 0x122   : > { %v1911_v45 = vadd.f32 %v1910_v41, %v1909_v40  ;;  %v2300_v46 = vadd.f32 %v2299_v27, %v2298_v39  ;;  %1762 = vst.msk [vmem:[%s3748_s17 + $0xd8] sm:$0xff] %vm1734_vm2, %v3112_v44  ;;  %v1322_v62 = vpop.f32.mrb[27].mxu0  ;;  %v2153_v55 = vmul.f32 %v3112_v44, %v3112_v44  ;;  %v2305_v19 = vsel %vm1734_vm2, %v2152_v11, 0.0 }
 0x123   : > { %v2301_v47 = vsel %vm1734_vm2, %v2150_v42, 0.0  ;;  %1760 = vst.msk [vmem:[%s3748_s17 + $0xc8] sm:$0xff] %vm1734_vm2, %v1322_v62  ;;  %v1912_v2 = vsel %vm1734_vm2, %v1322_v62, 0.0  ;;  %v2151_v48 = vmul.f32 %v1322_v62, %v1322_v62  ;;  %v1916_v57 = vsel %vm1734_vm2, %v3112_v44, 0.0 }
 0x124   : > { %v2302_v49 = vadd.f32 %v2301_v47, %v2300_v46  ;;  %v1913_v50 = vadd.f32 %v1912_v2, %v1911_v45  ;;  %v2307_v5 = vsel %vm1734_vm2, %v2153_v55, 0.0 }
 0x125   : > { %v2303_v56 = vsel %vm1734_vm2, %v2151_v48, 0.0 }
 0x126   : > { %v1915_v8 = vadd.f32 %v1914_v53, %v1913_v50  ;;  %v2304_v0 = vadd.f32 %v2303_v56, %v2302_v49 }
 0x127   : > { %v3115_v59 = vpop.f32.mrb[28].mxu0  ;;  %v3891_v42 = vpop.f32.mrb[0].mxu1 }
 0x128   : > { %v2306_v60 = vadd.f32 %v2305_v19, %v2304_v0  ;;  %1765 = vst.msk [vmem:[%s3748_s17 + $0xf0] sm:$0xff] %vm1734_vm2, %v3115_v59  ;;  %v1335_v63 = vpop.f32.mrb[29].mxu0  ;;  %v1917_v4 = vadd.f32 %v1916_v57, %v1915_v8  ;;  %v2156_v58 = vmul.f32 %v3115_v59, %v3115_v59  ;;  %v1922_v61 = vsel %vm1734_vm2, %v3115_v59, 0.0  ;;  %1801 = vst.msk [vmem:[%s3748_s17 + $0x210] sm:$0xff] %vm1734_vm2, %v3891_v42  ;;  %v3898_v62 = vpop.f32.mrb[1].mxu1 }
 0x129   : > { %1763 = vst.msk [vmem:[%s3748_s17 + $0xe0] sm:$0xff] %vm1734_vm2, %v1335_v63  ;;  %v1918_v6 = vsel %vm1734_vm2, %v1335_v63, 0.0  ;;  %v2154_v7 = vmul.f32 %v1335_v63, %v1335_v63  ;;  %v3116_v12 = vpop.f32.mrb[30].mxu0  ;;  %1799 = vst.msk [vmem:[%s3748_s17 + $0x200] sm:$0xff] %vm1734_vm2, %v3898_v62  ;;  %v3905_v48 = vpop.f32.mrb[2].mxu1 }
 0x12a   : > { %v1919_v14 = vadd.f32 %v1918_v6, %v1917_v4  ;;  %v2308_v15 = vadd.f32 %v2307_v5, %v2306_v60  ;;  %1766 = vst.msk [vmem:[%s3748_s17 + $0xf8] sm:$0xff] %vm1734_vm2, %v3116_v12  ;;  %v1338_v16 = vpop.f32.mrb[31].mxu0  ;;  %v2157_v51 = vmul.f32 %v3116_v12, %v3116_v12  ;;  %v2313_v25 = vsel %vm1734_vm2, %v2156_v58, 0.0  ;;  %1802 = vst.msk [vmem:[%s3748_s17 + $0x218] sm:$0xff] %vm1734_vm2, %v3905_v48  ;;  %v3914_v56 = vpop.f32.mrb[3].mxu1 }
 0x12b   : > { %v2309_v20 = vsel %vm1734_vm2, %v2154_v7, 0.0  ;;  %1764 = vst.msk [vmem:[%s3748_s17 + $0xe8] sm:$0xff] %vm1734_vm2, %v1338_v16  ;;  %v1920_v21 = vsel %vm1734_vm2, %v1338_v16, 0.0  ;;  %v2155_v22 = vmul.f32 %v1338_v16, %v1338_v16  ;;  %v1924_v10 = vsel %vm1734_vm2, %v3116_v12, 0.0  ;;  %1800 = vst.msk [vmem:[%s3748_s17 + $0x208] sm:$0xff] %vm1734_vm2, %v3914_v56 }
 0x12c   : > { %v2310_v23 = vadd.f32 %v2309_v20, %v2308_v15  ;;  %v1921_v24 = vadd.f32 %v1920_v21, %v1919_v14  ;;  %v2315_v30 = vsel %vm1734_vm2, %v2157_v51, 0.0 }
 0x12d   : > { %v2311_v54 = vsel %vm1734_vm2, %v2155_v22, 0.0 }
 0x12e   : > { %v1923_v3 = vadd.f32 %v1922_v61, %v1921_v24  ;;  %v2312_v9 = vadd.f32 %v2311_v54, %v2310_v23 }
 0x12f   : > { %v3119_v26 = vpop.f32.mrb[32].mxu0 }
 0x130   : > { %v2314_v28 = vadd.f32 %v2313_v25, %v2312_v9  ;;  %1769 = vst.msk [vmem:[%s3748_s17 + $0x110] sm:$0xff] %vm1734_vm2, %v3119_v26  ;;  %v1351_v17 = vpop.f32.mrb[33].mxu0  ;;  %v1925_v29 = vadd.f32 %v1924_v10, %v1923_v3  ;;  %v2160_v35 = vmul.f32 %v3119_v26, %v3119_v26  ;;  %v1930_v39 = vsel %vm1734_vm2, %v3119_v26, 0.0 }
 0x131   : > { %1767 = vst.msk [vmem:[%s3748_s17 + $0x100] sm:$0xff] %vm1734_vm2, %v1351_v17  ;;  %v1926_v31 = vsel %vm1734_vm2, %v1351_v17, 0.0  ;;  %v2158_v43 = vmul.f32 %v1351_v17, %v1351_v17  ;;  %v3120_v52 = vpop.f32.mrb[34].mxu0  ;;  %v3927_v16 = vpop.f32.mrb[4].mxu1 }
 0x132   : > { %v1927_v32 = vadd.f32 %v1926_v31, %v1925_v29  ;;  %v2316_v33 = vadd.f32 %v2315_v30, %v2314_v28  ;;  %1770 = vst.msk [vmem:[%s3748_s17 + $0x118] sm:$0xff] %vm1734_vm2, %v3120_v52  ;;  %v1354_v34 = vpop.f32.mrb[35].mxu0  ;;  %v2161_v18 = vmul.f32 %v3120_v52, %v3120_v52  ;;  %v2321_v44 = vsel %vm1734_vm2, %v2160_v35, 0.0  ;;  %1805 = vst.msk [vmem:[%s3748_s17 + $0x230] sm:$0xff] %vm1734_vm2, %v3927_v16  ;;  %v3934_v22 = vpop.f32.mrb[5].mxu1 }
 0x133   : > { %v2317_v36 = vsel %vm1734_vm2, %v2158_v43, 0.0  ;;  %1768 = vst.msk [vmem:[%s3748_s17 + $0x108] sm:$0xff] %vm1734_vm2, %v1354_v34  ;;  %v1928_v37 = vsel %vm1734_vm2, %v1354_v34, 0.0  ;;  %v2159_v1 = vmul.f32 %v1354_v34, %v1354_v34  ;;  %v1932_v45 = vsel %vm1734_vm2, %v3120_v52, 0.0  ;;  %1803 = vst.msk [vmem:[%s3748_s17 + $0x220] sm:$0xff] %vm1734_vm2, %v3934_v22  ;;  %v3941_v51 = vpop.f32.mrb[6].mxu1 }
 0x134   : > { %v2318_v13 = vadd.f32 %v2317_v36, %v2316_v33  ;;  %v1929_v38 = vadd.f32 %v1928_v37, %v1927_v32  ;;  %v2323_v49 = vsel %vm1734_vm2, %v2161_v18, 0.0  ;;  %1806 = vst.msk [vmem:[%s3748_s17 + $0x238] sm:$0xff] %vm1734_vm2, %v3941_v51  ;;  %v3950_v10 = vpop.f32.mrb[7].mxu1 }
 0x135   : > { %v2319_v40 = vsel %vm1734_vm2, %v2159_v1, 0.0  ;;  %1804 = vst.msk [vmem:[%s3748_s17 + $0x228] sm:$0xff] %vm1734_vm2, %v3950_v10 }
 0x136   : > { %v1931_v27 = vadd.f32 %v1930_v39, %v1929_v38  ;;  %v2320_v41 = vadd.f32 %v2319_v40, %v2318_v13 }
 0x137   : > { %v3123_v46 = vpop.f32.mrb[36].mxu0 }
 0x138   : > { %v2322_v11 = vadd.f32 %v2321_v44, %v2320_v41  ;;  %1773 = vst.msk [vmem:[%s3748_s17 + $0x130] sm:$0xff] %vm1734_vm2, %v3123_v46  ;;  %v1367_v47 = vpop.f32.mrb[37].mxu0  ;;  %v1933_v2 = vadd.f32 %v1932_v45, %v1931_v27  ;;  %v2164_v57 = vmul.f32 %v3123_v46, %v3123_v46  ;;  %v1938_v6 = vsel %vm1734_vm2, %v3123_v46, 0.0 }
 0x139   : > { %1771 = vst.msk [vmem:[%s3748_s17 + $0x120] sm:$0xff] %vm1734_vm2, %v1367_v47  ;;  %v1934_v50 = vsel %vm1734_vm2, %v1367_v47, 0.0  ;;  %v2162_v53 = vmul.f32 %v1367_v47, %v1367_v47  ;;  %v3124_v55 = vpop.f32.mrb[38].mxu0 }
 0x13a   : > { %v1935_v8 = vadd.f32 %v1934_v50, %v1933_v2  ;;  %v2324_v0 = vadd.f32 %v2323_v49, %v2322_v11  ;;  %1774 = vst.msk [vmem:[%s3748_s17 + $0x138] sm:$0xff] %vm1734_vm2, %v3124_v55  ;;  %v1370_v19 = vpop.f32.mrb[39].mxu0  ;;  %v2165_v7 = vmul.f32 %v3124_v55, %v3124_v55  ;;  %v2329_v58 = vsel %vm1734_vm2, %v2164_v57, 0.0 }
 0x13b   : > { %v2325_v59 = vsel %vm1734_vm2, %v2162_v53, 0.0  ;;  %1772 = vst.msk [vmem:[%s3748_s17 + $0x128] sm:$0xff] %vm1734_vm2, %v1370_v19  ;;  %v1936_v60 = vsel %vm1734_vm2, %v1370_v19, 0.0  ;;  %v2163_v63 = vmul.f32 %v1370_v19, %v1370_v19  ;;  %v1940_v20 = vsel %vm1734_vm2, %v3124_v55, 0.0 }
 0x13c   : > { %v2326_v4 = vadd.f32 %v2325_v59, %v2324_v0  ;;  %v1937_v5 = vadd.f32 %v1936_v60, %v1935_v8  ;;  %v2331_v54 = vsel %vm1734_vm2, %v2165_v7, 0.0 }
 0x13d   : > { %v2327_v12 = vsel %vm1734_vm2, %v2163_v63, 0.0 }
 0x13e   : > { %v1939_v14 = vadd.f32 %v1938_v6, %v1937_v5  ;;  %v2328_v15 = vadd.f32 %v2327_v12, %v2326_v4  ;;  %v3963_v1 = vpop.f32.mrb[8].mxu1 }
 0x13f   : > { %v3127_v21 = vpop.f32.mrb[40].mxu0  ;;  %1809 = vst.msk [vmem:[%s3748_s17 + $0x250] sm:$0xff] %vm1734_vm2, %v3963_v1  ;;  %v3970_v18 = vpop.f32.mrb[9].mxu1 }
 0x140   : > { %v2330_v23 = vadd.f32 %v2329_v58, %v2328_v15  ;;  %1777 = vst.msk [vmem:[%s3748_s17 + $0x150] sm:$0xff] %vm1734_vm2, %v3127_v21  ;;  %v1383_v24 = vpop.f32.mrb[41].mxu0  ;;  %v1941_v61 = vadd.f32 %v1940_v20, %v1939_v14  ;;  %v2168_v29 = vmul.f32 %v3127_v21, %v3127_v21  ;;  %v1946_v33 = vsel %vm1734_vm2, %v3127_v21, 0.0  ;;  %1807 = vst.msk [vmem:[%s3748_s17 + $0x240] sm:$0xff] %vm1734_vm2, %v3970_v18  ;;  %v3977_v44 = vpop.f32.mrb[10].mxu1 }
 0x141   : > { %1775 = vst.msk [vmem:[%s3748_s17 + $0x140] sm:$0xff] %vm1734_vm2, %v1383_v24  ;;  %v1942_v3 = vsel %vm1734_vm2, %v1383_v24, 0.0  ;;  %v2166_v9 = vmul.f32 %v1383_v24, %v1383_v24  ;;  %v3128_v25 = vpop.f32.mrb[42].mxu0  ;;  %1810 = vst.msk [vmem:[%s3748_s17 + $0x258] sm:$0xff] %vm1734_vm2, %v3977_v44  ;;  %v3986_v2 = vpop.f32.mrb[11].mxu1 }
 0x142   : > { %v1943_v26 = vadd.f32 %v1942_v3, %v1941_v61  ;;  %v2332_v28 = vadd.f32 %v2331_v54, %v2330_v23  ;;  %1778 = vst.msk [vmem:[%s3748_s17 + $0x158] sm:$0xff] %vm1734_vm2, %v3128_v25  ;;  %v1386_v17 = vpop.f32.mrb[43].mxu0  ;;  %v2169_v34 = vmul.f32 %v3128_v25, %v3128_v25  ;;  %v2337_v13 = vsel %vm1734_vm2, %v2168_v29, 0.0  ;;  %1808 = vst.msk [vmem:[%s3748_s17 + $0x248] sm:$0xff] %vm1734_vm2, %v3986_v2 }
 0x143   : > { %v2333_v30 = vsel %vm1734_vm2, %v2166_v9, 0.0  ;;  %1776 = vst.msk [vmem:[%s3748_s17 + $0x148] sm:$0xff] %vm1734_vm2, %v1386_v17  ;;  %v1944_v31 = vsel %vm1734_vm2, %v1386_v17, 0.0  ;;  %v2167_v43 = vmul.f32 %v1386_v17, %v1386_v17  ;;  %v1948_v38 = vsel %vm1734_vm2, %v3128_v25, 0.0 }
 0x144   : > { %v2334_v52 = vadd.f32 %v2333_v30, %v2332_v28  ;;  %v1945_v32 = vadd.f32 %v1944_v31, %v1943_v26  ;;  %v2339_v45 = vsel %vm1734_vm2, %v2169_v34, 0.0 }
 0x145   : > { %v2335_v35 = vsel %vm1734_vm2, %v2167_v43, 0.0 }
 0x146   : > { %v1947_v36 = vadd.f32 %v1946_v33, %v1945_v32  ;;  %v2336_v37 = vadd.f32 %v2335_v35, %v2334_v52  ;;  %v3999_v7 = vpop.f32.mrb[12].mxu1 }
 0x147   : > { %v3131_v39 = vpop.f32.mrb[44].mxu0  ;;  %1813 = vst.msk [vmem:[%s3748_s17 + $0x270] sm:$0xff] %vm1734_vm2, %v3999_v7  ;;  %v4006_v58 = vpop.f32.mrb[13].mxu1 }
 0x148   : > { %v2338_v40 = vadd.f32 %v2337_v13, %v2336_v37  ;;  %1781 = vst.msk [vmem:[%s3748_s17 + $0x170] sm:$0xff] %vm1734_vm2, %v3131_v39  ;;  %v1399_v27 = vpop.f32.mrb[45].mxu0  ;;  %v1949_v41 = vadd.f32 %v1948_v38, %v1947_v36  ;;  %v2172_v55 = vmul.f32 %v3131_v39, %v3131_v39  ;;  %v1954_v60 = vsel %vm1734_vm2, %v3131_v39, 0.0  ;;  %1811 = vst.msk [vmem:[%s3748_s17 + $0x260] sm:$0xff] %vm1734_vm2, %v4006_v58  ;;  %v4013_v24 = vpop.f32.mrb[14].mxu1 }
 0x149   : > { %1779 = vst.msk [vmem:[%s3748_s17 + $0x160] sm:$0xff] %vm1734_vm2, %v1399_v27  ;;  %v1950_v46 = vsel %vm1734_vm2, %v1399_v27, 0.0  ;;  %v2170_v11 = vmul.f32 %v1399_v27, %v1399_v27  ;;  %v3132_v47 = vpop.f32.mrb[46].mxu0  ;;  %1814 = vst.msk [vmem:[%s3748_s17 + $0x278] sm:$0xff] %vm1734_vm2, %v4013_v24  ;;  %v4022_v25 = vpop.f32.mrb[15].mxu1 }
 0x14a   : > { %v1951_v49 = vadd.f32 %v1950_v46, %v1949_v41  ;;  %v2340_v50 = vadd.f32 %v2339_v45, %v2338_v40  ;;  %1782 = vst.msk [vmem:[%s3748_s17 + $0x178] sm:$0xff] %vm1734_vm2, %v3132_v47  ;;  %v1402_v53 = vpop.f32.mrb[47].mxu0  ;;  %v2173_v63 = vmul.f32 %v3132_v47, %v3132_v47  ;;  %v2345_v12 = vsel %vm1734_vm2, %v2172_v55, 0.0  ;;  %1812 = vst.msk [vmem:[%s3748_s17 + $0x268] sm:$0xff] %vm1734_vm2, %v4022_v25 }
 0x14b   : > { %v2341_v8 = vsel %vm1734_vm2, %v2170_v11, 0.0  ;;  %1780 = vst.msk [vmem:[%s3748_s17 + $0x168] sm:$0xff] %vm1734_vm2, %v1402_v53  ;;  %v1952_v0 = vsel %vm1734_vm2, %v1402_v53, 0.0  ;;  %v2171_v19 = vmul.f32 %v1402_v53, %v1402_v53  ;;  %v1956_v14 = vsel %vm1734_vm2, %v3132_v47, 0.0 }
 0x14c   : > { %v2342_v57 = vadd.f32 %v2341_v8, %v2340_v50  ;;  %v1953_v59 = vadd.f32 %v1952_v0, %v1951_v49  ;;  %v2347_v61 = vsel %vm1734_vm2, %v2173_v63, 0.0 }
 0x14d   : > { %v2343_v4 = vsel %vm1734_vm2, %v2171_v19, 0.0 }
 0x14e   : > { %v1955_v5 = vadd.f32 %v1954_v60, %v1953_v59  ;;  %v2344_v6 = vadd.f32 %v2343_v4, %v2342_v57  ;;  %v4035_v13 = vpop.f32.mrb[16].mxu1 }
 0x14f   : > { %v3135_v15 = vpop.f32.mrb[48].mxu0  ;;  %1817 = vst.msk [vmem:[%s3748_s17 + $0x290] sm:$0xff] %vm1734_vm2, %v4035_v13  ;;  %v4042_v27 = vpop.f32.mrb[17].mxu1 }
 0x150   : > { %v2346_v20 = vadd.f32 %v2345_v12, %v2344_v6  ;;  %1785 = vst.msk [vmem:[%s3748_s17 + $0x190] sm:$0xff] %vm1734_vm2, %v3135_v15  ;;  %v1415_v21 = vpop.f32.mrb[49].mxu0  ;;  %v1957_v23 = vadd.f32 %v1956_v14, %v1955_v5  ;;  %v2176_v29 = vmul.f32 %v3135_v15, %v3135_v15  ;;  %v1962_v33 = vsel %vm1734_vm2, %v3135_v15, 0.0  ;;  %1815 = vst.msk [vmem:[%s3748_s17 + $0x280] sm:$0xff] %vm1734_vm2, %v4042_v27  ;;  %v4049_v11 = vpop.f32.mrb[18].mxu1 }
 0x151   : > { %1783 = vst.msk [vmem:[%s3748_s17 + $0x180] sm:$0xff] %vm1734_vm2, %v1415_v21  ;;  %v1958_v54 = vsel %vm1734_vm2, %v1415_v21, 0.0  ;;  %v2174_v3 = vmul.f32 %v1415_v21, %v1415_v21  ;;  %v3136_v9 = vpop.f32.mrb[50].mxu0  ;;  %1818 = vst.msk [vmem:[%s3748_s17 + $0x298] sm:$0xff] %vm1734_vm2, %v4049_v11  ;;  %v4058_v55 = vpop.f32.mrb[19].mxu1 }
 0x152   : > { %v1959_v26 = vadd.f32 %v1958_v54, %v1957_v23  ;;  %v2348_v28 = vadd.f32 %v2347_v61, %v2346_v20  ;;  %1786 = vst.msk [vmem:[%s3748_s17 + $0x198] sm:$0xff] %vm1734_vm2, %v3136_v9  ;;  %v1418_v17 = vpop.f32.mrb[51].mxu0  ;;  %v2177_v34 = vmul.f32 %v3136_v9, %v3136_v9  ;;  %v2353_v38 = vsel %vm1734_vm2, %v2176_v29, 0.0  ;;  %1816 = vst.msk [vmem:[%s3748_s17 + $0x288] sm:$0xff] %vm1734_vm2, %v4058_v55 }
 0x153   : > { %v2349_v30 = vsel %vm1734_vm2, %v2174_v3, 0.0  ;;  %1784 = vst.msk [vmem:[%s3748_s17 + $0x188] sm:$0xff] %vm1734_vm2, %v1418_v17  ;;  %v1960_v31 = vsel %vm1734_vm2, %v1418_v17, 0.0  ;;  %v2175_v43 = vmul.f32 %v1418_v17, %v1418_v17  ;;  %v1964_v39 = vsel %vm1734_vm2, %v3136_v9, 0.0 }
 0x154   : > { %v2350_v52 = vadd.f32 %v2349_v30, %v2348_v28  ;;  %v1961_v32 = vadd.f32 %v1960_v31, %v1959_v26  ;;  %v2355_v47 = vsel %vm1734_vm2, %v2177_v34, 0.0 }
 0x155   : > { %v2351_v35 = vsel %vm1734_vm2, %v2175_v43, 0.0 }
 0x156   : > { %v1963_v36 = vadd.f32 %v1962_v33, %v1961_v32  ;;  %v2352_v37 = vadd.f32 %v2351_v35, %v2350_v52  ;;  %v4071_v21 = vpop.f32.mrb[20].mxu1 }
 0x157   : > { %v3139_v40 = vpop.f32.mrb[52].mxu0  ;;  %1821 = vst.msk [vmem:[%s3748_s17 + $0x2b0] sm:$0xff] %vm1734_vm2, %v4071_v21  ;;  %v4078_v3 = vpop.f32.mrb[21].mxu1 }
 0x158   : > { %v2354_v41 = vadd.f32 %v2353_v38, %v2352_v37  ;;  %1789 = vst.msk [vmem:[%s3748_s17 + $0x1b0] sm:$0xff] %vm1734_vm2, %v3139_v40  ;;  %v1431_v45 = vpop.f32.mrb[53].mxu0  ;;  %v1965_v46 = vadd.f32 %v1964_v39, %v1963_v36  ;;  %v2180_v57 = vmul.f32 %v3139_v40, %v3139_v40  ;;  %v1970_v6 = vsel %vm1734_vm2, %v3139_v40, 0.0  ;;  %1819 = vst.msk [vmem:[%s3748_s17 + $0x2a0] sm:$0xff] %vm1734_vm2, %v4078_v3  ;;  %v4085_v17 = vpop.f32.mrb[22].mxu1 }
 0x159   : > { %1787 = vst.msk [vmem:[%s3748_s17 + $0x1a0] sm:$0xff] %vm1734_vm2, %v1431_v45  ;;  %v1966_v49 = vsel %vm1734_vm2, %v1431_v45, 0.0  ;;  %v2178_v50 = vmul.f32 %v1431_v45, %v1431_v45  ;;  %v3140_v53 = vpop.f32.mrb[54].mxu0  ;;  %1822 = vst.msk [vmem:[%s3748_s17 + $0x2b8] sm:$0xff] %vm1734_vm2, %v4085_v17  ;;  %v4094_v52 = vpop.f32.mrb[23].mxu1 }
 0x15a   : > { %v1967_v8 = vadd.f32 %v1966_v49, %v1965_v46  ;;  %v2356_v0 = vadd.f32 %v2355_v47, %v2354_v41  ;;  %1790 = vst.msk [vmem:[%s3748_s17 + $0x1b8] sm:$0xff] %vm1734_vm2, %v3140_v53  ;;  %v1434_v19 = vpop.f32.mrb[55].mxu0  ;;  %v2181_v12 = vmul.f32 %v3140_v53, %v3140_v53  ;;  %v2361_v23 = vsel %vm1734_vm2, %v2180_v57, 0.0  ;;  %1820 = vst.msk [vmem:[%s3748_s17 + $0x2a8] sm:$0xff] %vm1734_vm2, %v4094_v52 }
 0x15b   : > { %v2357_v59 = vsel %vm1734_vm2, %v2178_v50, 0.0  ;;  %1788 = vst.msk [vmem:[%s3748_s17 + $0x1a8] sm:$0xff] %vm1734_vm2, %v1434_v19  ;;  %v1968_v60 = vsel %vm1734_vm2, %v1434_v19, 0.0  ;;  %v2179_v63 = vmul.f32 %v1434_v19, %v1434_v19  ;;  %v1972_v61 = vsel %vm1734_vm2, %v3140_v53, 0.0 }
 0x15c   : > { %v2358_v4 = vadd.f32 %v2357_v59, %v2356_v0  ;;  %v1969_v5 = vadd.f32 %v1968_v60, %v1967_v8  ;;  %v2363_v29 = vsel %vm1734_vm2, %v2181_v12, 0.0 }
 0x15d   : > { %v2359_v14 = vsel %vm1734_vm2, %v2179_v63, 0.0 }
 0x15e   : > { %v1971_v15 = vadd.f32 %v1970_v6, %v1969_v5  ;;  %v2360_v20 = vadd.f32 %v2359_v14, %v2358_v4  ;;  %v4107_v50 = vpop.f32.mrb[24].mxu1 }
 0x15f   : > { %v3143_v54 = vpop.f32.mrb[56].mxu0  ;;  %1825 = vst.msk [vmem:[%s3748_s17 + $0x2d0] sm:$0xff] %vm1734_vm2, %v4107_v50  ;;  %v4114_v19 = vpop.f32.mrb[25].mxu1 }
 0x160   : > { %v2362_v9 = vadd.f32 %v2361_v23, %v2360_v20  ;;  %1793 = vst.msk [vmem:[%s3748_s17 + $0x1d0] sm:$0xff] %vm1734_vm2, %v3143_v54  ;;  %v1447_v26 = vpop.f32.mrb[57].mxu0  ;;  %v1973_v28 = vadd.f32 %v1972_v61, %v1971_v15  ;;  %v2184_v35 = vmul.f32 %v3143_v54, %v3143_v54  ;;  %v1978_v41 = vsel %vm1734_vm2, %v3143_v54, 0.0  ;;  %1823 = vst.msk [vmem:[%s3748_s17 + $0x2c0] sm:$0xff] %vm1734_vm2, %v4114_v19  ;;  %v4121_v63 = vpop.f32.mrb[26].mxu1 }
 0x161   : > { %1791 = vst.msk [vmem:[%s3748_s17 + $0x1c0] sm:$0xff] %vm1734_vm2, %v1447_v26  ;;  %v1974_v30 = vsel %vm1734_vm2, %v1447_v26, 0.0  ;;  %v2182_v31 = vmul.f32 %v1447_v26, %v1447_v26  ;;  %v3144_v43 = vpop.f32.mrb[58].mxu0  ;;  %1826 = vst.msk [vmem:[%s3748_s17 + $0x2d8] sm:$0xff] %vm1734_vm2, %v4121_v63  ;;  %v4130_v14 = vpop.f32.mrb[27].mxu1 }
 0x162   : > { %v1975_v32 = vadd.f32 %v1974_v30, %v1973_v28  ;;  %v2364_v33 = vadd.f32 %v2363_v29, %v2362_v9  ;;  %1794 = vst.msk [vmem:[%s3748_s17 + $0x1d8] sm:$0xff] %vm1734_vm2, %v3144_v43  ;;  %v1450_v34 = vpop.f32.mrb[59].mxu0  ;;  %v2185_v45 = vmul.f32 %v3144_v43, %v3144_v43  ;;  %v2369_v53 = vsel %vm1734_vm2, %v2184_v35, 0.0  ;;  %1824 = vst.msk [vmem:[%s3748_s17 + $0x2c8] sm:$0xff] %vm1734_vm2, %v4130_v14 }
 0x163   : > { %v2365_v36 = vsel %vm1734_vm2, %v2182_v31, 0.0  ;;  %1792 = vst.msk [vmem:[%s3748_s17 + $0x1c8] sm:$0xff] %vm1734_vm2, %v1450_v34  ;;  %v1976_v37 = vsel %vm1734_vm2, %v1450_v34, 0.0  ;;  %v2183_v38 = vmul.f32 %v1450_v34, %v1450_v34  ;;  %v1980_v8 = vsel %vm1734_vm2, %v3144_v43, 0.0 }
 0x164   : > { %v2366_v39 = vadd.f32 %v2365_v36, %v2364_v33  ;;  %v1977_v40 = vadd.f32 %v1976_v37, %v1975_v32  ;;  %v2371_v4 = vsel %vm1734_vm2, %v2185_v45, 0.0  ;;  %v2190_v32 = vmul.f32 %v3898_v62, %v3898_v62 }
 0x165   : > { %v2367_v46 = vsel %vm1734_vm2, %v2183_v38, 0.0  ;;  %v1990_v38 = vsel %vm1734_vm2, %v3898_v62, 0.0 }
 0x166   : > { %v1979_v47 = vadd.f32 %v1978_v41, %v1977_v40  ;;  %v2368_v49 = vadd.f32 %v2367_v46, %v2366_v39  ;;  %v4145_v35 = vpop.f32.mrb[28].mxu1 }
 0x167   : > { %v3147_v0 = vpop.f32.mrb[60].mxu0  ;;  %1829 = vst.msk [vmem:[%s3748_s17 + $0x2f0] sm:$0xff] %vm1734_vm2, %v4145_v35  ;;  %v4154_v39 = vpop.f32.mrb[29].mxu1 }
 0x168   : > { %v2370_v57 = vadd.f32 %v2369_v53, %v2368_v49  ;;  %1797 = vst.msk [vmem:[%s3748_s17 + $0x1f0] sm:$0xff] %vm1734_vm2, %v3147_v0  ;;  %v1463_v59 = vpop.f32.mrb[61].mxu0  ;;  %v1981_v60 = vadd.f32 %v1980_v8, %v1979_v47  ;;  %v2188_v61 = vmul.f32 %v3147_v0, %v3147_v0  ;;  %v1986_v30 = vsel %vm1734_vm2, %v3147_v0, 0.0  ;;  %1827 = vst.msk [vmem:[%s3748_s17 + $0x2e0] sm:$0xff] %vm1734_vm2, %v4154_v39  ;;  %v4159_v45 = vpop.f32.mrb[30].mxu1 }
 0x169   : > { %1795 = vst.msk [vmem:[%s3748_s17 + $0x1e0] sm:$0xff] %vm1734_vm2, %v1463_v59  ;;  %v1982_v5 = vsel %vm1734_vm2, %v1463_v59, 0.0  ;;  %v2186_v6 = vmul.f32 %v1463_v59, %v1463_v59  ;;  %v3148_v12 = vpop.f32.mrb[62].mxu0  ;;  %v2381_v47 = vsel %vm1734_vm2, %v2190_v32, 0.0  ;;  %v2191_v49 = vmul.f32 %v3914_v56, %v3914_v56  ;;  %1830 = vst.msk [vmem:[%s3748_s17 + $0x2f8] sm:$0xff] %vm1734_vm2, %v4159_v45  ;;  %v4168_v62 = vpop.f32.mrb[31].mxu1 }
 0x16a   : > { %v1983_v15 = vadd.f32 %v1982_v5, %v1981_v60  ;;  %v2372_v20 = vadd.f32 %v2371_v4, %v2370_v57  ;;  %1798 = vst.msk [vmem:[%s3748_s17 + $0x1f8] sm:$0xff] %vm1734_vm2, %v3148_v12  ;;  %v1466_v23 = vpop.f32.mrb[63].mxu0  ;;  %v2189_v31 = vmul.f32 %v3148_v12, %v3148_v12  ;;  %v2377_v36 = vsel %vm1734_vm2, %v2188_v61, 0.0  ;;  %1828 = vst.msk [vmem:[%s3748_s17 + $0x2e8] sm:$0xff] %vm1734_vm2, %v4168_v62 }
 0x16b   : > { %v2373_v54 = vsel %vm1734_vm2, %v2186_v6, 0.0  ;;  %1796 = vst.msk [vmem:[%s3748_s17 + $0x1e8] sm:$0xff] %vm1734_vm2, %v1466_v23  ;;  %v1984_v9 = vsel %vm1734_vm2, %v1466_v23, 0.0  ;;  %v2187_v26 = vmul.f32 %v1466_v23, %v1466_v23  ;;  %v1988_v37 = vsel %vm1734_vm2, %v3148_v12, 0.0 }
 0x16c   : > { %v2374_v28 = vadd.f32 %v2373_v54, %v2372_v20  ;;  %v1985_v29 = vadd.f32 %v1984_v9, %v1983_v15  ;;  %v2379_v46 = vsel %vm1734_vm2, %v2189_v31, 0.0  ;;  %v2192_v0 = vmul.f32 %v3891_v42, %v3891_v42 }
 0x16d   : > { %v2375_v43 = vsel %vm1734_vm2, %v2187_v26, 0.0  ;;  %v1992_v57 = vsel %vm1734_vm2, %v3914_v56, 0.0  ;;  %v1994_v4 = vsel %vm1734_vm2, %v3891_v42, 0.0  ;;  %v2193_v5 = vmul.f32 %v3905_v48, %v3905_v48 }
 0x16e   : > { %v1987_v33 = vadd.f32 %v1986_v30, %v1985_v29  ;;  %v2376_v34 = vadd.f32 %v2375_v43, %v2374_v28  ;;  %v2383_v6 = vsel %vm1734_vm2, %v2191_v49, 0.0  ;;  %v2194_v12 = vmul.f32 %v3934_v22, %v3934_v22  ;;  %v4184_v23 = vpop.f32.mrb[32].mxu1 }
 0x16f   : > { %v2385_v56 = vsel %vm1734_vm2, %v2192_v0, 0.0  ;;  %v1996_v61 = vsel %vm1734_vm2, %v3905_v48, 0.0  ;;  %v1998_v42 = vsel %vm1734_vm2, %v3934_v22, 0.0  ;;  %1833 = vst.msk [vmem:[%s3748_s17 + $0x310] sm:$0xff] %vm1734_vm2, %v4184_v23  ;;  %v4194_v54 = vpop.f32.mrb[33].mxu1  ;;  %v2387_v29 = vsel %vm1734_vm2, %v2193_v5, 0.0 }
 0x170   : > { %v1989_v40 = vadd.f32 %v1988_v37, %v1987_v33  ;;  %v2378_v41 = vadd.f32 %v2377_v36, %v2376_v34  ;;  %1831 = vst.msk [vmem:[%s3748_s17 + $0x300] sm:$0xff] %vm1734_vm2, %v4194_v54  ;;  %v4199_v28 = vpop.f32.mrb[34].mxu1  ;;  %v2389_v30 = vsel %vm1734_vm2, %v2194_v12, 0.0  ;;  %v2195_v48 = vmul.f32 %v3950_v10, %v3950_v10 }
 0x171   : > { %1834 = vst.msk [vmem:[%s3748_s17 + $0x318] sm:$0xff] %vm1734_vm2, %v4199_v28  ;;  %v4208_v22 = vpop.f32.mrb[35].mxu1  ;;  %v2196_v32 = vmul.f32 %v3927_v16, %v3927_v16  ;;  %v2000_v33 = vsel %vm1734_vm2, %v3950_v10, 0.0  ;;  %v2002_v37 = vsel %vm1734_vm2, %v3927_v16, 0.0  ;;  %v2006_v16 = vsel %vm1734_vm2, %v3970_v18, 0.0 }
 0x172   : > { %v2380_v53 = vadd.f32 %v2379_v46, %v2378_v41  ;;  %v1991_v8 = vadd.f32 %v1990_v38, %v1989_v40  ;;  %1832 = vst.msk [vmem:[%s3748_s17 + $0x308] sm:$0xff] %vm1734_vm2, %v4208_v22  ;;  %v2197_v38 = vmul.f32 %v3941_v51, %v3941_v51  ;;  %v2391_v40 = vsel %vm1734_vm2, %v2195_v48, 0.0 }
 0x173   : > { %v2198_v41 = vmul.f32 %v3970_v18, %v3970_v18  ;;  %v2393_v10 = vsel %vm1734_vm2, %v2196_v32, 0.0  ;;  %v2200_v12 = vmul.f32 %v3963_v1, %v3963_v1 }
 0x174   : > { %v2382_v59 = vadd.f32 %v2381_v47, %v2380_v53  ;;  %v1993_v60 = vadd.f32 %v1992_v57, %v1991_v8  ;;  %v2004_v53 = vsel %vm1734_vm2, %v3941_v51, 0.0  ;;  %v2199_v51 = vmul.f32 %v3986_v2, %v3986_v2 }
 0x176   : > { %v1995_v15 = vadd.f32 %v1994_v4, %v1993_v60  ;;  %v2384_v20 = vadd.f32 %v2383_v6, %v2382_v59  ;;  %v4224_v49 = vpop.f32.mrb[36].mxu1  ;;  %v2395_v60 = vsel %vm1734_vm2, %v2197_v38, 0.0  ;;  %v2397_v4 = vsel %vm1734_vm2, %v2198_v41, 0.0 }
 0x177   : > { %1837 = vst.msk [vmem:[%s3748_s17 + $0x330] sm:$0xff] %vm1734_vm2, %v4224_v49  ;;  %v4234_v8 = vpop.f32.mrb[37].mxu1  ;;  %v2204_v41 = vmul.f32 %v3999_v7, %v3999_v7 }
 0x178   : > { %v2386_v9 = vadd.f32 %v2385_v56, %v2384_v20  ;;  %v1997_v26 = vadd.f32 %v1996_v61, %v1995_v15  ;;  %1835 = vst.msk [vmem:[%s3748_s17 + $0x320] sm:$0xff] %vm1734_vm2, %v4234_v8  ;;  %v4239_v59 = vpop.f32.mrb[38].mxu1  ;;  %v2008_v15 = vsel %vm1734_vm2, %v3986_v2, 0.0  ;;  %v2010_v61 = vsel %vm1734_vm2, %v3963_v1, 0.0 }
 0x179   : > { %1838 = vst.msk [vmem:[%s3748_s17 + $0x338] sm:$0xff] %vm1734_vm2, %v4239_v59  ;;  %v4248_v18 = vpop.f32.mrb[39].mxu1  ;;  %v2401_v2 = vsel %vm1734_vm2, %v2200_v12, 0.0  ;;  %v2014_v1 = vsel %vm1734_vm2, %v4006_v58, 0.0 }
 0x17a   : > { %v1999_v31 = vadd.f32 %v1998_v42, %v1997_v26  ;;  %v2388_v43 = vadd.f32 %v2387_v29, %v2386_v9  ;;  %1836 = vst.msk [vmem:[%s3748_s17 + $0x328] sm:$0xff] %vm1734_vm2, %v4248_v18  ;;  %v2201_v42 = vmul.f32 %v3977_v44, %v3977_v44  ;;  %v2399_v9 = vsel %vm1734_vm2, %v2199_v51, 0.0 }
 0x17b   : > { %v2202_v26 = vmul.f32 %v4006_v58, %v4006_v58 }
 0x17c   : > { %v2390_v34 = vadd.f32 %v2389_v30, %v2388_v43  ;;  %v2001_v36 = vadd.f32 %v2000_v33, %v1999_v31  ;;  %v2012_v31 = vsel %vm1734_vm2, %v3977_v44, 0.0  ;;  %v2203_v44 = vmul.f32 %v4022_v25, %v4022_v25 }
 0x17e   : > { %v2003_v46 = vadd.f32 %v2002_v37, %v2001_v36  ;;  %v2392_v47 = vadd.f32 %v2391_v40, %v2390_v34  ;;  %v4264_v48 = vpop.f32.mrb[40].mxu1  ;;  %v2403_v36 = vsel %vm1734_vm2, %v2201_v42, 0.0  ;;  %v2405_v37 = vsel %vm1734_vm2, %v2202_v26, 0.0 }
 0x17f   : > { %1841 = vst.msk [vmem:[%s3748_s17 + $0x350] sm:$0xff] %vm1734_vm2, %v4264_v48  ;;  %v4274_v43 = vpop.f32.mrb[41].mxu1  ;;  %v2208_v26 = vmul.f32 %v4035_v13, %v4035_v13 }
 0x180   : > { %v2394_v0 = vadd.f32 %v2393_v10, %v2392_v47  ;;  %v2005_v57 = vadd.f32 %v2004_v53, %v2003_v46  ;;  %1839 = vst.msk [vmem:[%s3748_s17 + $0x340] sm:$0xff] %vm1734_vm2, %v4274_v43  ;;  %v4279_v34 = vpop.f32.mrb[42].mxu1  ;;  %v2016_v46 = vsel %vm1734_vm2, %v4022_v25, 0.0  ;;  %v2018_v53 = vsel %vm1734_vm2, %v3999_v7, 0.0 }
 0x181   : > { %1842 = vst.msk [vmem:[%s3748_s17 + $0x358] sm:$0xff] %vm1734_vm2, %v4279_v34  ;;  %v4288_v58 = vpop.f32.mrb[43].mxu1  ;;  %v2409_v25 = vsel %vm1734_vm2, %v2204_v41, 0.0  ;;  %v2022_v7 = vsel %vm1734_vm2, %v4042_v27, 0.0 }
 0x182   : > { %v2007_v5 = vadd.f32 %v2006_v16, %v2005_v57  ;;  %v2396_v6 = vadd.f32 %v2395_v60, %v2394_v0  ;;  %1840 = vst.msk [vmem:[%s3748_s17 + $0x348] sm:$0xff] %vm1734_vm2, %v4288_v58  ;;  %v2205_v16 = vmul.f32 %v4013_v24, %v4013_v24  ;;  %v2407_v0 = vsel %vm1734_vm2, %v2203_v44, 0.0 }
 0x183   : > { %v2206_v57 = vmul.f32 %v4042_v27, %v4042_v27 }
 0x184   : > { %v2398_v20 = vadd.f32 %v2397_v4, %v2396_v6  ;;  %v2009_v56 = vadd.f32 %v2008_v15, %v2007_v5  ;;  %v2020_v5 = vsel %vm1734_vm2, %v4013_v24, 0.0  ;;  %v2207_v24 = vmul.f32 %v4058_v55, %v4058_v55 }
 0x186   : > { %v2011_v29 = vadd.f32 %v2010_v61, %v2009_v56  ;;  %v2400_v30 = vadd.f32 %v2399_v9, %v2398_v20  ;;  %v4304_v51 = vpop.f32.mrb[44].mxu1  ;;  %v2411_v56 = vsel %vm1734_vm2, %v2205_v16, 0.0  ;;  %v2413_v61 = vsel %vm1734_vm2, %v2206_v57, 0.0 }
 0x187   : > { %1845 = vst.msk [vmem:[%s3748_s17 + $0x370] sm:$0xff] %vm1734_vm2, %v4304_v51  ;;  %v4314_v6 = vpop.f32.mrb[45].mxu1  ;;  %v2212_v57 = vmul.f32 %v4071_v21, %v4071_v21 }
 0x188   : > { %v2402_v32 = vadd.f32 %v2401_v2, %v2400_v30  ;;  %v2013_v33 = vadd.f32 %v2012_v31, %v2011_v29  ;;  %1843 = vst.msk [vmem:[%s3748_s17 + $0x360] sm:$0xff] %vm1734_vm2, %v4314_v6  ;;  %v4319_v20 = vpop.f32.mrb[46].mxu1  ;;  %v2024_v29 = vsel %vm1734_vm2, %v4058_v55, 0.0  ;;  %v2026_v31 = vsel %vm1734_vm2, %v4035_v13, 0.0 }
 0x189   : > { %1846 = vst.msk [vmem:[%s3748_s17 + $0x378] sm:$0xff] %vm1734_vm2, %v4319_v20  ;;  %v4328_v27 = vpop.f32.mrb[47].mxu1  ;;  %v2417_v55 = vsel %vm1734_vm2, %v2208_v26, 0.0  ;;  %v2030_v13 = vsel %vm1734_vm2, %v4078_v3, 0.0 }
 0x18a   : > { %v2015_v38 = vadd.f32 %v2014_v1, %v2013_v33  ;;  %v2404_v40 = vadd.f32 %v2403_v36, %v2402_v32  ;;  %1844 = vst.msk [vmem:[%s3748_s17 + $0x368] sm:$0xff] %vm1734_vm2, %v4328_v27  ;;  %v2209_v1 = vmul.f32 %v4049_v11, %v4049_v11  ;;  %v2415_v32 = vsel %vm1734_vm2, %v2207_v24, 0.0 }
 0x18b   : > { %v2210_v33 = vmul.f32 %v4078_v3, %v4078_v3 }
 0x18c   : > { %v2406_v47 = vadd.f32 %v2405_v37, %v2404_v40  ;;  %v2017_v10 = vadd.f32 %v2016_v46, %v2015_v38  ;;  %v2028_v38 = vsel %vm1734_vm2, %v4049_v11, 0.0  ;;  %v2211_v11 = vmul.f32 %v4094_v52, %v4094_v52 }
 0x18e   : > { %v2019_v60 = vadd.f32 %v2018_v53, %v2017_v10  ;;  %v2408_v4 = vadd.f32 %v2407_v0, %v2406_v47  ;;  %v4344_v44 = vpop.f32.mrb[48].mxu1  ;;  %v2419_v10 = vsel %vm1734_vm2, %v2209_v1, 0.0  ;;  %v2421_v53 = vsel %vm1734_vm2, %v2210_v33, 0.0 }
 0x18f   : > { %1849 = vst.msk [vmem:[%s3748_s17 + $0x390] sm:$0xff] %vm1734_vm2, %v4344_v44  ;;  %v4354_v40 = vpop.f32.mrb[49].mxu1  ;;  %v2216_v33 = vmul.f32 %v4107_v50, %v4107_v50 }
 0x190   : > { %v2410_v12 = vadd.f32 %v2409_v25, %v2408_v4  ;;  %v2021_v15 = vadd.f32 %v2020_v5, %v2019_v60  ;;  %1847 = vst.msk [vmem:[%s3748_s17 + $0x380] sm:$0xff] %vm1734_vm2, %v4354_v40  ;;  %v4359_v47 = vpop.f32.mrb[50].mxu1  ;;  %v2032_v60 = vsel %vm1734_vm2, %v4094_v52, 0.0  ;;  %v2034_v5 = vsel %vm1734_vm2, %v4071_v21, 0.0 }
 0x191   : > { %1850 = vst.msk [vmem:[%s3748_s17 + $0x398] sm:$0xff] %vm1734_vm2, %v4359_v47  ;;  %v4368_v3 = vpop.f32.mrb[51].mxu1  ;;  %v2425_v52 = vsel %vm1734_vm2, %v2212_v57, 0.0  ;;  %v2038_v21 = vsel %vm1734_vm2, %v4114_v19, 0.0 }
 0x192   : > { %v2023_v42 = vadd.f32 %v2022_v7, %v2021_v15  ;;  %v2412_v9 = vadd.f32 %v2411_v56, %v2410_v12  ;;  %1848 = vst.msk [vmem:[%s3748_s17 + $0x388] sm:$0xff] %vm1734_vm2, %v4368_v3  ;;  %v2213_v7 = vmul.f32 %v4085_v17, %v4085_v17  ;;  %v2423_v12 = vsel %vm1734_vm2, %v2211_v11, 0.0 }
 0x193   : > { %v2214_v15 = vmul.f32 %v4114_v19, %v4114_v19 }
 0x194   : > { %v2414_v30 = vadd.f32 %v2413_v61, %v2412_v9  ;;  %v2025_v2 = vadd.f32 %v2024_v29, %v2023_v42  ;;  %v2036_v42 = vsel %vm1734_vm2, %v4085_v17, 0.0  ;;  %v2215_v17 = vmul.f32 %v4130_v14, %v4130_v14 }
 0x196   : > { %v2027_v36 = vadd.f32 %v2026_v31, %v2025_v2  ;;  %v2416_v37 = vadd.f32 %v2415_v32, %v2414_v30  ;;  %v4384_v24 = vpop.f32.mrb[52].mxu1  ;;  %v2427_v2 = vsel %vm1734_vm2, %v2213_v7, 0.0  ;;  %v2429_v31 = vsel %vm1734_vm2, %v2214_v15, 0.0 }
 0x197   : > { %1853 = vst.msk [vmem:[%s3748_s17 + $0x3b0] sm:$0xff] %vm1734_vm2, %v4384_v24  ;;  %v4394_v9 = vpop.f32.mrb[53].mxu1  ;;  %v2220_v15 = vmul.f32 %v4145_v35, %v4145_v35 }
 0x198   : > { %v2418_v41 = vadd.f32 %v2417_v55, %v2416_v37  ;;  %v2029_v46 = vadd.f32 %v2028_v38, %v2027_v36  ;;  %1851 = vst.msk [vmem:[%s3748_s17 + $0x3a0] sm:$0xff] %vm1734_vm2, %v4394_v9  ;;  %v4399_v30 = vpop.f32.mrb[54].mxu1  ;;  %v2040_v36 = vsel %vm1734_vm2, %v4130_v14, 0.0  ;;  %v2042_v38 = vsel %vm1734_vm2, %v4107_v50, 0.0 }
 0x199   : > { %1854 = vst.msk [vmem:[%s3748_s17 + $0x3b8] sm:$0xff] %vm1734_vm2, %v4399_v30  ;;  %v4408_v19 = vpop.f32.mrb[55].mxu1  ;;  %v2433_v14 = vsel %vm1734_vm2, %v2216_v33, 0.0  ;;  %v2046_v50 = vsel %vm1734_vm2, %v4154_v39, 0.0 }
 0x19a   : > { %v2031_v16 = vadd.f32 %v2030_v13, %v2029_v46  ;;  %v2420_v0 = vadd.f32 %v2419_v10, %v2418_v41  ;;  %1852 = vst.msk [vmem:[%s3748_s17 + $0x3a8] sm:$0xff] %vm1734_vm2, %v4408_v19  ;;  %v2217_v13 = vmul.f32 %v4121_v63, %v4121_v63  ;;  %v2431_v41 = vsel %vm1734_vm2, %v2215_v17, 0.0 }
 0x19b   : > { %v2218_v46 = vmul.f32 %v4154_v39, %v4154_v39 }
 0x19c   : > { %v2422_v4 = vadd.f32 %v2421_v53, %v2420_v0  ;;  %v2033_v25 = vadd.f32 %v2032_v60, %v2031_v16  ;;  %v2044_v16 = vsel %vm1734_vm2, %v4121_v63, 0.0  ;;  %v2219_v63 = vmul.f32 %v4168_v62, %v4168_v62 }
 0x19e   : > { %v2035_v56 = vadd.f32 %v2034_v5, %v2033_v25  ;;  %v2424_v61 = vadd.f32 %v2423_v12, %v2422_v4  ;;  %v4424_v11 = vpop.f32.mrb[56].mxu1  ;;  %v2435_v25 = vsel %vm1734_vm2, %v2217_v13, 0.0  ;;  %v2437_v5 = vsel %vm1734_vm2, %v2218_v46, 0.0 }
 0x19f   : > { %1857 = vst.msk [vmem:[%s3748_s17 + $0x3d0] sm:$0xff] %vm1734_vm2, %v4424_v11  ;;  %v4434_v0 = vpop.f32.mrb[57].mxu1  ;;  %v2224_v46 = vmul.f32 %v4184_v23, %v4184_v23 }
 0x1a0   : > { %v2426_v26 = vadd.f32 %v2425_v52, %v2424_v61  ;;  %v2037_v29 = vadd.f32 %v2036_v42, %v2035_v56  ;;  %1855 = vst.msk [vmem:[%s3748_s17 + $0x3c0] sm:$0xff] %vm1734_vm2, %v4434_v0  ;;  %v4439_v4 = vpop.f32.mrb[58].mxu1  ;;  %v2048_v56 = vsel %vm1734_vm2, %v4168_v62, 0.0  ;;  %v2050_v42 = vsel %vm1734_vm2, %v4145_v35, 0.0 }
 0x1a1   : > { %1858 = vst.msk [vmem:[%s3748_s17 + $0x3d8] sm:$0xff] %vm1734_vm2, %v4439_v4  ;;  %v4448_v39 = vpop.f32.mrb[59].mxu1  ;;  %v2441_v62 = vsel %vm1734_vm2, %v2220_v15, 0.0  ;;  %v2054_v35 = vsel %vm1734_vm2, %v4194_v54, 0.0 }
 0x1a2   : > { %v2039_v1 = vadd.f32 %v2038_v21, %v2037_v29  ;;  %v2428_v32 = vadd.f32 %v2427_v2, %v2426_v26  ;;  %1856 = vst.msk [vmem:[%s3748_s17 + $0x3c8] sm:$0xff] %vm1734_vm2, %v4448_v39  ;;  %v2221_v21 = vmul.f32 %v4159_v45, %v4159_v45  ;;  %v2439_v26 = vsel %vm1734_vm2, %v2219_v63, 0.0 }
 0x1a3   : > { %v2222_v29 = vmul.f32 %v4194_v54, %v4194_v54  ;;  %v2449_v63 = vsel %vm1734_vm2, %v2224_v46, 0.0 }
 0x1a4   : > { %v2430_v37 = vadd.f32 %v2429_v31, %v2428_v32  ;;  %v2041_v55 = vadd.f32 %v2040_v36, %v2039_v1  ;;  %v2052_v1 = vsel %vm1734_vm2, %v4159_v45, 0.0  ;;  %v2223_v45 = vmul.f32 %v4208_v22, %v4208_v22 }
 0x1a6   : > { %v2043_v10 = vadd.f32 %v2042_v38, %v2041_v55  ;;  %v2432_v53 = vadd.f32 %v2431_v41, %v2430_v37  ;;  %v4464_v17 = vpop.f32.mrb[60].mxu1  ;;  %v2443_v55 = vsel %vm1734_vm2, %v2221_v21, 0.0  ;;  %v2445_v38 = vsel %vm1734_vm2, %v2222_v29, 0.0 }
 0x1a7   : > { %1861 = vst.msk [vmem:[%s3748_s17 + $0x3f0] sm:$0xff] %vm1734_vm2, %v4464_v17  ;;  %v4474_v32 = vpop.f32.mrb[61].mxu1  ;;  %v2228_v21 = vmul.f32 %v4224_v49, %v4224_v49 }
 0x1a8   : > { %v2434_v57 = vadd.f32 %v2433_v14, %v2432_v53  ;;  %v2045_v60 = vadd.f32 %v2044_v16, %v2043_v10  ;;  %1859 = vst.msk [vmem:[%s3748_s17 + $0x3e0] sm:$0xff] %vm1734_vm2, %v4474_v32  ;;  %v4479_v37 = vpop.f32.mrb[62].mxu1  ;;  %v2056_v10 = vsel %vm1734_vm2, %v4208_v22, 0.0  ;;  %v2058_v16 = vsel %vm1734_vm2, %v4184_v23, 0.0 }
 0x1a9   : > { %1862 = vst.msk [vmem:[%s3748_s17 + $0x3f8] sm:$0xff] %vm1734_vm2, %v4479_v37  ;;  %v4488_v54 = vpop.f32.mrb[63].mxu1  ;;  %v2060_v22 = vsel %vm1734_vm2, %v4199_v28, 0.0 }
 0x1aa   : > { %v2047_v7 = vadd.f32 %v2046_v50, %v2045_v60  ;;  %v2436_v12 = vadd.f32 %v2435_v25, %v2434_v57  ;;  %1860 = vst.msk [vmem:[%s3748_s17 + $0x3e8] sm:$0xff] %vm1734_vm2, %v4488_v54  ;;  %v2225_v50 = vmul.f32 %v4199_v28, %v4199_v28  ;;  %v2447_v57 = vsel %vm1734_vm2, %v2223_v45, 0.0 }
 0x1ab   : > { %v2226_v60 = vmul.f32 %v4234_v8, %v4234_v8  ;;  %v2064_v28 = vsel %vm1734_vm2, %v4248_v18, 0.0 }
 0x1ac   : > { %v2438_v61 = vadd.f32 %v2437_v5, %v2436_v12  ;;  %v2049_v52 = vadd.f32 %v2048_v56, %v2047_v7  ;;  %v2062_v7 = vsel %vm1734_vm2, %v4234_v8, 0.0  ;;  %v2451_v15 = vsel %vm1734_vm2, %v2225_v50, 0.0 }
 0x1ad   : > { %v2453_v56 = vsel %vm1734_vm2, %v2226_v60, 0.0  ;;  %v2066_v8 = vsel %vm1734_vm2, %v4224_v49, 0.0 }
 0x1ae   : > { %v2051_v2 = vadd.f32 %v2050_v42, %v2049_v52  ;;  %v2440_v31 = vadd.f32 %v2439_v26, %v2438_v61  ;;  %v2227_v61 = vmul.f32 %v4248_v18, %v4248_v18  ;;  %v2068_v18 = vsel %vm1734_vm2, %v4239_v59, 0.0 }
 0x1b0   : > { %v2442_v33 = vadd.f32 %v2441_v62, %v2440_v31  ;;  %v2053_v36 = vadd.f32 %v2052_v1, %v2051_v2  ;;  %v2229_v2 = vmul.f32 %v4239_v59, %v4239_v59  ;;  %v2455_v31 = vsel %vm1734_vm2, %v2227_v61, 0.0 }
 0x1b1   : > { %v2230_v62 = vmul.f32 %v4274_v43, %v4274_v43  ;;  %v2072_v59 = vsel %vm1734_vm2, %v4288_v58, 0.0  ;;  %v2236_v61 = vmul.f32 %v4304_v51, %v4304_v51 }
 0x1b2   : > { %v2055_v13 = vadd.f32 %v2054_v35, %v2053_v36  ;;  %v2444_v41 = vadd.f32 %v2443_v55, %v2442_v33  ;;  %v2457_v33 = vsel %vm1734_vm2, %v2228_v21, 0.0  ;;  %v2070_v36 = vsel %vm1734_vm2, %v4274_v43, 0.0 }
 0x1b3   : > { %v2461_v45 = vsel %vm1734_vm2, %v2230_v62, 0.0  ;;  %v2074_v43 = vsel %vm1734_vm2, %v4264_v48, 0.0  ;;  %v2237_v21 = vmul.f32 %v4319_v20, %v4319_v20 }
 0x1b4   : > { %v2446_v53 = vadd.f32 %v2445_v38, %v2444_v41  ;;  %v2057_v14 = vadd.f32 %v2056_v10, %v2055_v13  ;;  %v2459_v38 = vsel %vm1734_vm2, %v2229_v2, 0.0  ;;  %v2231_v13 = vmul.f32 %v4288_v58, %v4288_v58 }
 0x1b5   : > { %v2232_v10 = vmul.f32 %v4264_v48, %v4264_v48  ;;  %v2076_v58 = vsel %vm1734_vm2, %v4279_v34, 0.0  ;;  %v2473_v2 = vsel %vm1734_vm2, %v2236_v61, 0.0 }
 0x1b6   : > { %v2059_v25 = vadd.f32 %v2058_v16, %v2057_v14  ;;  %v2448_v5 = vadd.f32 %v2447_v57, %v2446_v53  ;;  %v2233_v16 = vmul.f32 %v4279_v34, %v4279_v34  ;;  %v2463_v50 = vsel %vm1734_vm2, %v2231_v13, 0.0 }
 0x1b7   : > { %v2234_v57 = vmul.f32 %v4314_v6, %v4314_v6  ;;  %v2080_v34 = vsel %vm1734_vm2, %v4328_v27, 0.0 }
 0x1b8   : > { %v2450_v12 = vadd.f32 %v2449_v63, %v2448_v5  ;;  %v2061_v23 = vadd.f32 %v2060_v22, %v2059_v25  ;;  %v2465_v5 = vsel %vm1734_vm2, %v2232_v10, 0.0  ;;  %v2078_v63 = vsel %vm1734_vm2, %v4314_v6, 0.0 }
 0x1b9   : > { %v2082_v6 = vsel %vm1734_vm2, %v4304_v51, 0.0 }
 0x1ba   : > { %v2063_v52 = vadd.f32 %v2062_v7, %v2061_v23  ;;  %v2452_v42 = vadd.f32 %v2451_v15, %v2450_v12  ;;  %v2467_v7 = vsel %vm1734_vm2, %v2233_v16, 0.0  ;;  %v2469_v12 = vsel %vm1734_vm2, %v2234_v57, 0.0 }
 0x1bb   : > { %v2235_v23 = vmul.f32 %v4328_v27, %v4328_v27  ;;  %v2084_v27 = vsel %vm1734_vm2, %v4319_v20, 0.0  ;;  %v2088_v20 = vsel %vm1734_vm2, %v4368_v3, 0.0 }
 0x1bc   : > { %v2454_v26 = vadd.f32 %v2453_v56, %v2452_v42  ;;  %v2065_v29 = vadd.f32 %v2064_v28, %v2063_v52 }
 0x1bd   : > { %v2471_v28 = vsel %vm1734_vm2, %v2235_v23, 0.0 }
 0x1be   : > { %v2067_v1 = vadd.f32 %v2066_v8, %v2065_v29  ;;  %v2456_v35 = vadd.f32 %v2455_v31, %v2454_v26  ;;  %v2238_v26 = vmul.f32 %v4354_v40, %v4354_v40  ;;  %v2086_v31 = vsel %vm1734_vm2, %v4354_v40, 0.0 }
 0x1bf   : > { %v2090_v40 = vsel %vm1734_vm2, %v4344_v44, 0.0 }
 0x1c0   : > { %v2458_v55 = vadd.f32 %v2457_v33, %v2456_v35  ;;  %v2069_v49 = vadd.f32 %v2068_v18, %v2067_v1  ;;  %v2475_v1 = vsel %vm1734_vm2, %v2237_v21, 0.0  ;;  %v2477_v35 = vsel %vm1734_vm2, %v2238_v26, 0.0 }
 0x1c1   : > { %v2239_v33 = vmul.f32 %v4368_v3, %v4368_v3  ;;  %v2092_v3 = vsel %vm1734_vm2, %v4359_v47, 0.0  ;;  %v2248_v21 = vmul.f32 %v4424_v11, %v4424_v11 }
 0x1c2   : > { %v2071_v41 = vadd.f32 %v2070_v36, %v2069_v49  ;;  %v2460_v46 = vadd.f32 %v2459_v38, %v2458_v55  ;;  %v2240_v55 = vmul.f32 %v4344_v44, %v4344_v44 }
 0x1c3   : > { %v2479_v13 = vsel %vm1734_vm2, %v2239_v33, 0.0 }
 0x1c4   : > { %v2462_v53 = vadd.f32 %v2461_v45, %v2460_v46  ;;  %v2073_v14 = vadd.f32 %v2072_v59, %v2071_v41  ;;  %v2241_v45 = vmul.f32 %v4359_v47, %v4359_v47  ;;  %v2242_v41 = vmul.f32 %v4394_v9, %v4394_v9 }
 0x1c5   : > { %v2481_v59 = vsel %vm1734_vm2, %v2240_v55, 0.0  ;;  %v2096_v47 = vsel %vm1734_vm2, %v4408_v19, 0.0 }
 0x1c6   : > { %v2075_v60 = vadd.f32 %v2074_v43, %v2073_v14  ;;  %v2464_v25 = vadd.f32 %v2463_v50, %v2462_v53  ;;  %v2094_v53 = vsel %vm1734_vm2, %v4394_v9, 0.0  ;;  %v2483_v43 = vsel %vm1734_vm2, %v2241_v45, 0.0 }
 0x1c7   : > { %v2485_v16 = vsel %vm1734_vm2, %v2242_v41, 0.0  ;;  %v2243_v50 = vmul.f32 %v4408_v19, %v4408_v19  ;;  %v2098_v9 = vsel %vm1734_vm2, %v4384_v24, 0.0  ;;  %v2100_v19 = vsel %vm1734_vm2, %v4399_v30, 0.0 }
 0x1c8   : > { %v2466_v22 = vadd.f32 %v2465_v5, %v2464_v25  ;;  %v2077_v48 = vadd.f32 %v2076_v58, %v2075_v60  ;;  %v2244_v25 = vmul.f32 %v4384_v24, %v4384_v24 }
 0x1ca   : > { %v2079_v15 = vadd.f32 %v2078_v63, %v2077_v48  ;;  %v2468_v56 = vadd.f32 %v2467_v7, %v2466_v22  ;;  %v2245_v63 = vmul.f32 %v4399_v30, %v4399_v30  ;;  %v2487_v22 = vsel %vm1734_vm2, %v2243_v50, 0.0 }
 0x1cb   : > { %v2246_v48 = vmul.f32 %v4434_v0, %v4434_v0  ;;  %v2489_v23 = vsel %vm1734_vm2, %v2244_v25, 0.0  ;;  %v2104_v30 = vsel %vm1734_vm2, %v4448_v39, 0.0 }
 0x1cc   : > { %v2470_v52 = vadd.f32 %v2469_v12, %v2468_v56  ;;  %v2081_v42 = vadd.f32 %v2080_v34, %v2079_v15  ;;  %v2102_v15 = vsel %vm1734_vm2, %v4434_v0, 0.0  ;;  %v2491_v61 = vsel %vm1734_vm2, %v2245_v63, 0.0 }
 0x1cd   : > { %v2493_v34 = vsel %vm1734_vm2, %v2246_v48, 0.0  ;;  %v2106_v0 = vsel %vm1734_vm2, %v4424_v11, 0.0 }
 0x1ce   : > { %v2083_v29 = vadd.f32 %v2082_v6, %v2081_v42  ;;  %v2472_v8 = vadd.f32 %v2471_v28, %v2470_v52  ;;  %v2247_v52 = vmul.f32 %v4448_v39, %v4448_v39  ;;  %v2108_v39 = vsel %vm1734_vm2, %v4439_v4, 0.0 }
 0x1d0   : > { %v2474_v62 = vadd.f32 %v2473_v2, %v2472_v8  ;;  %v2085_v51 = vadd.f32 %v2084_v27, %v2083_v29  ;;  %v2249_v29 = vmul.f32 %v4439_v4, %v4439_v4  ;;  %v2495_v8 = vsel %vm1734_vm2, %v2247_v52, 0.0 }
 0x1d1   : > { %v2250_v2 = vmul.f32 %v4474_v32, %v4474_v32  ;;  %v2112_v4 = vsel %vm1734_vm2, %v4488_v54, 0.0 }
 0x1d2   : > { %v2087_v18 = vadd.f32 %v2086_v31, %v2085_v51  ;;  %v2476_v36 = vadd.f32 %v2475_v1, %v2474_v62  ;;  %v2497_v62 = vsel %vm1734_vm2, %v2248_v21, 0.0  ;;  %v2110_v51 = vsel %vm1734_vm2, %v4474_v32, 0.0 }
 0x1d3   : > { %v2501_v33 = vsel %vm1734_vm2, %v2250_v2, 0.0 }
 0x1d4   : > { %v2478_v49 = vadd.f32 %v2477_v35, %v2476_v36  ;;  %v2089_v38 = vadd.f32 %v2088_v20, %v2087_v18  ;;  %v2499_v35 = vsel %vm1734_vm2, %v2249_v29, 0.0  ;;  %v2251_v18 = vmul.f32 %v4488_v54, %v4488_v54 }
 0x1d5   : > { %v2252_v20 = vmul.f32 %v4464_v17, %v4464_v17 }
 0x1d6   : > { %v2091_v46 = vadd.f32 %v2090_v40, %v2089_v38  ;;  %v2480_v10 = vadd.f32 %v2479_v13, %v2478_v49  ;;  %v2114_v38 = vsel %vm1734_vm2, %v4464_v17, 0.0  ;;  %v2253_v40 = vmul.f32 %v4479_v37, %v4479_v37 }
 0x1d7   : > { %v2503_v45 = vsel %vm1734_vm2, %v2251_v18, 0.0 }
 0x1d8   : > { %v2482_v14 = vadd.f32 %v2481_v59, %v2480_v10  ;;  %v2093_v44 = vadd.f32 %v2092_v3, %v2091_v46  ;;  %v2505_v46 = vsel %vm1734_vm2, %v2252_v20, 0.0  ;;  %v2116_v10 = vsel %vm1734_vm2, %v4479_v37, 0.0 }
 0x1d9   : > { %v2507_v3 = vsel %vm1734_vm2, %v2253_v40, 0.0 }
 0x1da   : > { %v2095_v57 = vadd.f32 %v2094_v53, %v2093_v44  ;;  %v2484_v60 = vadd.f32 %v2483_v43, %v2482_v14 }
 0x1dc   : > { %v2486_v5 = vadd.f32 %v2485_v16, %v2484_v60  ;;  %v2097_v58 = vadd.f32 %v2096_v47, %v2095_v57 }
 0x1de   : > { %v2099_v7 = vadd.f32 %v2098_v9, %v2097_v58  ;;  %v2488_v12 = vadd.f32 %v2487_v22, %v2486_v5 }
 0x1e0   : > { %v2490_v56 = vadd.f32 %v2489_v23, %v2488_v12  ;;  %v2101_v24 = vadd.f32 %v2100_v19, %v2099_v7 }
 0x1e2   : > { %v2103_v42 = vadd.f32 %v2102_v15, %v2101_v24  ;;  %v2492_v6 = vadd.f32 %v2491_v61, %v2490_v56 }
 0x1e4   : > { %v2494_v28 = vadd.f32 %v2493_v34, %v2492_v6  ;;  %v2105_v26 = vadd.f32 %v2104_v30, %v2103_v42 }
 0x1e6   : > { %v2107_v27 = vadd.f32 %v2106_v0, %v2105_v26  ;;  %v2496_v31 = vadd.f32 %v2495_v8, %v2494_v28 }
 0x1e8   : > { %v2498_v1 = vadd.f32 %v2497_v62, %v2496_v31  ;;  %v2109_v11 = vadd.f32 %v2108_v39, %v2107_v27 }
 0x1ea   : > { %v2111_v36 = vadd.f32 %v2110_v51, %v2109_v11  ;;  %v2500_v55 = vadd.f32 %v2499_v35, %v2498_v1 }
 0x1ec   : > { %v2502_v49 = vadd.f32 %v2501_v33, %v2500_v55  ;;  %v2113_v32 = vadd.f32 %v2112_v4, %v2111_v36 }
 0x1ee   : > { %v2115_v13 = vadd.f32 %v2114_v38, %v2113_v32  ;;  %v2504_v41 = vadd.f32 %v2503_v45, %v2502_v49 }
 0x1f0   : > { %v2117_v59 = vadd.f32 %v2116_v10, %v2115_v13  ;;  %v2506_v54 = vadd.f32 %v2505_v46, %v2504_v41 }
 0x1f2   : > { %v2118_v53 = vrot.slane %v2117_v59, 4  ;;  %v2508_v14 = vadd.f32 %v2507_v3, %v2506_v54 }
 0x1f4   : > { %v2119_v17 = vadd.f32 %v2118_v53, %v2117_v59  ;;  %v2509_v44 = vrot.slane %v2508_v14, 4 }
 0x1f6   : > { %v2120_v43 = vrot.slane %v2119_v17, 2  ;;  %v2510_v16 = vadd.f32 %v2509_v44, %v2508_v14 }
 0x1f8   : > { %v2121_v50 = vadd.f32 %v2120_v43, %v2119_v17  ;;  %v2511_v57 = vrot.slane %v2510_v16, 2 }
 0x1fa   : > { %v2122_v60 = vrot.slane %v2121_v50, 1  ;;  %v2512_v25 = vadd.f32 %v2511_v57, %v2510_v16 }
 0x1fc   : > { %v2123_v37 = vadd.f32 %v2122_v60, %v2121_v50  ;;  %v2513_v47 = vrot.slane %v2512_v25, 1 }
 0x1fe   : > { %2125 = vst.msk [vmem:[%s268_s20] sm:$0x1] %vm2124_vm3, %v2123_v37  ;;  %v2514_v5 = vadd.f32 %v2513_v47, %v2512_v25 }
 0x200   : > { %2515 = vst.msk [vmem:[%s271_s25] sm:$0x1] %vm2124_vm3, %v2514_v5 }
 0x201 PF: > { %s17_s21 = sadd.s32 1, %s3233_s21  }
 0x202   : > { %p14_p5 = scmp.ge.s32.totalorder %s17_s21, 4  }
 0x204   :  { %16 = sbr.rel (!%p14_p5) target bundleno = 1 (0x1), region = 90 }

// kernel: decoder_block.5
= control target key start
LH: loop header
LB: loop body
LE: loop exit
PB: predicated region body
PF: predicated region fallthrough
CT: control target
= control target key end

     0   :  { %s6714_s24 = smov 0   ;;  %s6716_s1 = smov 0   ;;  %s9128_s0 = inlined_call_operand.vmem [shape: bf16[2,16,16,8], index: 0, kind: input, shape index: {}, may-alias: {0,1}]   ;;  %s9129_s1 = inlined_call_operand.vmem [shape: bf16[2,16,16,8], index: 1, kind: input, shape index: {}, may-alias: {0,1}]   ;;  %s9130_s2 = inlined_call_operand.vmem [shape: bf16[3,3,8,8], index: 2, kind: input, shape index: {}]   ;;  %s9131_s3 = inlined_call_operand.vmem [shape: f32[1,8], index: 3, kind: input, shape index: {}]   ;;  %s9132_s4 = inlined_call_operand.vmem [shape: f32[1,8], index: 4, kind: input, shape index: {}]   ;;  %s9133_s5 = inlined_call_operand.vmem [shape: bf16[2,2,2,16,16,8], index: 5, kind: output, shape index: {0}]   ;;  %s9134_s6 = inlined_call_operand.vmem [shape: f32[2,1,1,8], index: 6, kind: output, shape index: {1}]   ;;  %s9135_s7 = inlined_call_operand.vmem [shape: f32[2,1,1,8], index: 7, kind: output, shape index: {2}]  }
   0x1   :  { %s6718_s25 = smov 0  }
   0x2 LB: > { %s30_s26 = sadd.s32 1, %s6667_s1  ;;  %p5233_p0 = scmp.ge.s32.totalorder %s6671_s25, 1  ;;  %s6671_s25 = sphi %s6718_s25, %s18_s25   ;;  %s6667_s1 = sphi %s6716_s1, %s9293_s1   ;;  %s6663_s24 = sphi %s6714_s24, %s9292_s24  }
   0x3   : > { %p32_p1 = scmp.ge.s32.totalorder %s30_s26, 2  ;;  %p300_p2 = scmp.lt.s32.totalorder %s6671_s25, 3 }
   0x5   : > { %s9295_s26 = smov (%p32_p1, %s30_s26), 0  ;;  %p301_p3 = pnand %p5233_p0, %p300_p2 }
   0x7   : > { %304 = sbr.rel (%p301_p3) target bundleno = 622 (0x26e), region = 40 }
   0xe   : > { %v5276_v0 = vld [vmem:[%s9130_s2 + $0x10] sm:$0xf]  ;;  %vm1834_vm0 = vcmask 1043456   ;;  %v6738_v1 = vld [vmem:[%s9130_s2 + $0xc] sm:$0xf]  ;;  %p368_p4 = scmp.lt.s32.totalorder %s6663_s24, 1 }
   0xf   : > { %6582 = vmatprep.subr.msk.bf16.mxu0 %vm1834_vm0, %v5276_v0  ;;  %v1836_v2 = vsel %vm1834_vm0, %v5276_v0, 0  ;;  %6585 = vmatprep.subr.msk.bf16.mxu1 %vm1834_vm0, %v6738_v1  ;;  %v6746_v3 = vsel %vm1834_vm0, %v6738_v1, 0  ;;  %v6754_v4 = vld [vmem:[%s9130_s2 + $0x14] sm:$0xf]  ;;  %vm781_vm1 = vcmask 57344   ;;  %vm737_vm4 = vcmask 60416  }
  0x10   : > { %9183 = vst [vmem:[#allocation3_spill] sm:$0xff] %v6746_v3  ;;  %6115 = vmatpush3.bf16.msra.mxu0 %v1836_v2  ;;  %6421 = vmatpush3.bf16.msra.mxu1 %v6746_v3  ;;  %s9297_s24 = smov (!%p368_p4, %s6663_s24), 1  ;;  %v6762_v5 = vld [vmem:[%s9131_s3] ss:$0 sm:$0xff]  ;;  %v6767_v6 = vld [vmem:[%s9130_s2 + $0x8] sm:$0xf] }
  0x11   : > { %6583 = vmatprep.subr.msk.bf16.mxu0 %vm1834_vm0, %v6754_v4  ;;  %s5718_s10 = sshll.u32 %s9297_s24, 7  ;;  %vm782_vm2 = vsmask.f32 256  ;;  %6588 = vmatprep.subr.msk.bf16.mxu1 %vm1834_vm0, %v6767_v6  ;;  %v784_v8 = vld [vmem:[#allocation2 + $0x8] sm:$0x1]  ;;  %vm1785_vm5 = vcmask 64512   ;;  %s411_s16 = scalar_lea.vmem %s9134_s6, %s9297_s24 }
  0x12   : > { %s6772_s17 = scalar_lea.vmem %s9128_s0, %s5718_s10  ;;  %vm6777_vm3 = vmand %vm781_vm1, %vm782_vm2  ;;  %v787_v9 = vld [vmem:[#allocation2 + $0x14] sm:$0x1]  ;;  %v6792_v20 = vld [vmem:[%s9132_s4] ss:$0 sm:$0xff]  ;;  %vm883_vm6 = vsmask.f32 3328  ;;  %s417_s19 = scalar_lea.vmem %s9135_s7, %s9297_s24 }
  0x13   : > { %v5883_v10 = vld [vmem:[%s6772_s17] sm:$0xff]   ;;  %v5946_v12 = vld [vmem:[%s6772_s17 + $0x8] sm:$0xff]   ;;  %v785_v13 = vsel %vm6777_vm3, 0, %v784_v8  ;;  %v788_v14 = vsel %vm6777_vm3, 0, %v787_v9  ;;  %v5947_v49 = vld [vmem:[%s6772_s17 + $0x10] sm:$0xff]   ;;  %s5721_s10 = sshll.u32 %s9297_s24, 9 }
  0x14   : > { %v5953_v11 = vld [vmem:[%s6772_s17 + $0x40] sm:$0xff]   ;;  %v5884_v15 = vunpack.c.l.bf16 %v5883_v10  ;;  %v5885_v16 = vunpack.c.h.bf16 %v5883_v10  ;;  %v5954_v19 = vld [vmem:[%s6772_s17 + $0x48] sm:$0xff]   ;;  %786 = vst [vmem:[#allocation2 + $0x8] sm:$0x1] %v785_v13  ;;  %789 = vst [vmem:[#allocation2 + $0x14] sm:$0x1] %v788_v14  ;;  %v5888_v21 = vunpack.c.l.bf16 %v5946_v12  ;;  %v5889_v22 = vunpack.c.h.bf16 %v5946_v12  ;;  %s8005_s13 = scalar_lea.vmem %s9133_s5, %s5721_s10 }
  0x15   : > { %v5916_v17 = vunpack.c.l.bf16 %v5953_v11  ;;  %v5917_v18 = vunpack.c.h.bf16 %v5953_v11  ;;  %v5920_v23 = vunpack.c.l.bf16 %v5954_v19  ;;  %v5921_v24 = vunpack.c.h.bf16 %v5954_v19  ;;  %v5955_v54 = vld [vmem:[%s6772_s17 + $0x50] sm:$0xff]   ;;  %v5948_v61 = vld [vmem:[%s6772_s17 + $0x18] sm:$0xff]  }
  0x16   : > { %v492_v25 = vmul.f32 %v5884_v15, %v6762_v5  ;;  %v493_v26 = vmul.f32 %v5885_v16, %v6762_v5  ;;  %v494_v29 = vmul.f32 %v5888_v21, %v6762_v5  ;;  %v495_v30 = vmul.f32 %v5889_v22, %v6762_v5  ;;  %v5956_v63 = vld [vmem:[%s6772_s17 + $0x58] sm:$0xff]  }
  0x17   : > { %v508_v27 = vmul.f32 %v5916_v17, %v6762_v5  ;;  %v509_v28 = vmul.f32 %v5917_v18, %v6762_v5  ;;  %v510_v31 = vmul.f32 %v5920_v23, %v6762_v5  ;;  %v511_v32 = vmul.f32 %v5921_v24, %v6762_v5 }
  0x18   : > { %v530_v33 = vadd.f32 %v6792_v20, %v492_v25  ;;  %v531_v34 = vadd.f32 %v6792_v20, %v493_v26  ;;  %v532_v37 = vadd.f32 %v6792_v20, %v494_v29  ;;  %v533_v38 = vadd.f32 %v6792_v20, %v495_v30 }
  0x19   : > { %v546_v35 = vadd.f32 %v6792_v20, %v508_v27  ;;  %v547_v36 = vadd.f32 %v6792_v20, %v509_v28  ;;  %v548_v39 = vadd.f32 %v6792_v20, %v510_v31  ;;  %v549_v40 = vadd.f32 %v6792_v20, %v511_v32 }
  0x1a   : > { %v562_v41 = vmax.f32 %v530_v33, 0.0  ;;  %v563_v42 = vmax.f32 %v531_v34, 0.0  ;;  %v564_v45 = vmax.f32 %v532_v37, 0.0  ;;  %v565_v46 = vmax.f32 %v533_v38, 0.0 }
  0x1b   : > { %v578_v43 = vmax.f32 %v546_v35, 0.0  ;;  %v579_v44 = vmax.f32 %v547_v36, 0.0  ;;  %v580_v47 = vmax.f32 %v548_v39, 0.0  ;;  %v581_v48 = vmax.f32 %v549_v40, 0.0  ;;  %v5949_v35 = vld [vmem:[%s6772_s17 + $0x20] sm:$0xff]  }
  0x1c   : > { %v5722_v50 = vpack.c.bf16 %v562_v41, %v562_v41  ;;  %v5723_v51 = vpack.c.bf16 %v563_v42, %v563_v42  ;;  %v5724_v55 = vpack.c.bf16 %v564_v45, %v564_v45  ;;  %v5725_v56 = vpack.c.bf16 %v565_v46, %v565_v46  ;;  %v6860_v36 = vld [vmem:[%s6772_s17 + $0x60] sm:$0xff]  }
  0x1d   : > { %v5738_v52 = vpack.c.bf16 %v578_v43, %v578_v43  ;;  %v5739_v53 = vpack.c.bf16 %v579_v44, %v579_v44  ;;  %v5740_v57 = vpack.c.bf16 %v580_v47, %v580_v47  ;;  %v5741_v58 = vpack.c.bf16 %v581_v48, %v581_v48 }
  0x1e   : > { %738 = vst.msk [vmem:[#allocation2] sm:$0xf] %vm737_vm4, %v5722_v50  ;;  %739 = vst.msk [vmem:[#allocation2 + $0x4] sm:$0xf] %vm737_vm4, %v5723_v51  ;;  %v5892_v59 = vunpack.c.l.bf16 %v5947_v49  ;;  %v5893_v60 = vunpack.c.h.bf16 %v5947_v49  ;;  %v5924_v62 = vunpack.c.l.bf16 %v5955_v54  ;;  %v5925_v0 = vunpack.c.h.bf16 %v5955_v54 }
  0x1f   : > { %754 = vst.msk [vmem:[#allocation2 + $0x60] sm:$0xf] %vm737_vm4, %v5738_v52  ;;  %755 = vst.msk [vmem:[#allocation2 + $0x64] sm:$0xf] %vm737_vm4, %v5739_v53  ;;  %v5896_v2 = vunpack.c.l.bf16 %v5948_v61  ;;  %v5897_v8 = vunpack.c.h.bf16 %v5948_v61  ;;  %v5928_v11 = vunpack.c.l.bf16 %v5956_v63  ;;  %v5929_v13 = vunpack.c.h.bf16 %v5956_v63  ;;  %v6899_v61 = vld [vmem:[%s9130_s2] sm:$0xf] }
  0x20   : > { %740 = vst.msk [vmem:[#allocation2 + $0xc] sm:$0xf] %vm737_vm4, %v5724_v55  ;;  %741 = vst.msk [vmem:[#allocation2 + $0x10] sm:$0xf] %vm737_vm4, %v5725_v56  ;;  %v496_v9 = vmul.f32 %v5892_v59, %v6762_v5  ;;  %v497_v10 = vmul.f32 %v5893_v60, %v6762_v5  ;;  %v512_v12 = vmul.f32 %v5924_v62, %v6762_v5  ;;  %v2100_v31 = vsel %vm1834_vm0, %v6754_v4, 0 }
  0x21   : > { %756 = vst.msk [vmem:[#allocation2 + $0x6c] sm:$0xf] %vm737_vm4, %v5740_v57  ;;  %757 = vst.msk [vmem:[#allocation2 + $0x70] sm:$0xf] %vm737_vm4, %v5741_v58  ;;  %v513_v14 = vmul.f32 %v5925_v0, %v6762_v5  ;;  %v498_v17 = vmul.f32 %v5896_v2, %v6762_v5  ;;  %v499_v18 = vmul.f32 %v5897_v8, %v6762_v5  ;;  %v2891_v32 = vsel %vm1834_vm0, %v6767_v6, 0 }
  0x22   : > { %v534_v19 = vadd.f32 %v6792_v20, %v496_v9  ;;  %v535_v21 = vadd.f32 %v6792_v20, %v497_v10  ;;  %v514_v22 = vmul.f32 %v5928_v11, %v6762_v5  ;;  %v550_v26 = vadd.f32 %v6792_v20, %v512_v12 }
  0x23   : > { %v515_v27 = vmul.f32 %v5929_v13, %v6762_v5  ;;  %v551_v30 = vadd.f32 %v6792_v20, %v513_v14  ;;  %v536_v33 = vadd.f32 %v6792_v20, %v498_v17  ;;  %v537_v34 = vadd.f32 %v6792_v20, %v499_v18 }
  0x24   : > { %v566_v38 = vmax.f32 %v534_v19, 0.0  ;;  %v567_v39 = vmax.f32 %v535_v21, 0.0  ;;  %v552_v40 = vadd.f32 %v6792_v20, %v514_v22  ;;  %v582_v43 = vmax.f32 %v550_v26, 0.0 }
  0x25   : > { %v6826_v15 = vld [vmem:[#allocation2] sm:$0xf]  ;;  %v6828_v16 = vld [vmem:[#allocation2 + $0x4] sm:$0xf]  ;;  %v553_v44 = vadd.f32 %v6792_v20, %v515_v27  ;;  %v583_v45 = vmax.f32 %v551_v30, 0.0  ;;  %v5900_v46 = vunpack.c.l.bf16 %v5949_v35  ;;  %v5901_v47 = vunpack.c.h.bf16 %v5949_v35  ;;  %v5950_v35 = vld [vmem:[%s6772_s17 + $0x28] sm:$0xff]  }
  0x26   : > { %v6837_v23 = vcombine.low %v6826_v15, %v6828_v16  ;;  %v6839_v24 = vld [vmem:[#allocation2 + $0x60] sm:$0xf]  ;;  %v6841_v25 = vld [vmem:[#allocation2 + $0x64] sm:$0xf]  ;;  %v887_v4 = vshrl.u32 %v6826_v15, 16  ;;  %v5932_v48 = vunpack.c.l.bf16 %v6860_v36  ;;  %v890_v49 = vshll.u32 %v6826_v15, 16 }
  0x27   : > { %v6845_v28 = vld [vmem:[#allocation2 + $0xc] sm:$0xf]  ;;  %v6847_v29 = vld [vmem:[#allocation2 + $0x10] sm:$0xf]  ;;  %v6864_v37 = vcombine.low %v6839_v24, %v6841_v25  ;;  %v896_v50 = vshll.u32 %v6828_v16, 16  ;;  %v900_v51 = vshrl.u32 %v6828_v16, 16  ;;  %v5933_v52 = vunpack.c.h.bf16 %v6860_v36 }
  0x28   : > { %9186 = vst [vmem:[#allocation4_spill] sm:$0xff] %v6837_v23  ;;  %6116 = vmatprep.mubr.msk.bf16.mxu0 %vm1785_vm5, %v6837_v23  ;;  %v6870_v6 = vcombine.low %v6845_v28, %v6847_v29  ;;  %v6872_v41 = vld [vmem:[#allocation2 + $0x6c] sm:$0xf]  ;;  %v6874_v42 = vld [vmem:[#allocation2 + $0x70] sm:$0xf]  ;;  %v1079_v53 = vshrl.u32 %v6839_v24, 16  ;;  %v5726_v56 = vpack.c.bf16 %v566_v38, %v566_v38  ;;  %v5727_v60 = vpack.c.bf16 %v567_v39, %v567_v39 }
  0x29   : > { %9187 = vst [vmem:[#allocation5_spill] sm:$0xff] %v6864_v37  ;;  %6200 = vmatprep.mubr.msk.bf16.mxu1 %vm1785_vm5, %v6864_v37  ;;  %v1082_v54 = vshll.u32 %v6839_v24, 16  ;;  %v6890_v55 = vcombine.low %v6872_v41, %v6874_v42  ;;  %v6892_v57 = vrot.slane %v887_v4, 4  ;;  %v1088_v58 = vshll.u32 %v6841_v25, 16 }
  0x2a   : > { %9188 = vst [vmem:[#allocation6_spill] sm:$0xff] %v6870_v6  ;;  %6117 = vmatmul.mubr.msk.bf16.vlgmr.msra.gmra.mrb[0].mxu0 %vm1785_vm5, %v6870_v6  ;;  %v911_v59 = vshrl.u32 %v6845_v28, 16  ;;  %v914_v62 = vshll.u32 %v6845_v28, 16  ;;  %742 = vst.msk [vmem:[#allocation2 + $0x18] sm:$0xf] %vm737_vm4, %v5726_v56  ;;  %v5742_v63 = vpack.c.bf16 %v582_v43, %v582_v43  ;;  %v5743_v0 = vpack.c.bf16 %v583_v45, %v583_v45 }
  0x2b   : > { %6149 = vmatpush3.bf16.msra.mxu0 %v2100_v31  ;;  %9189 = vst [vmem:[#allocation7_spill] sm:$0xff] %v6890_v55  ;;  %6201 = vmatmul.mubr.msk.bf16.vlgmr.msra.gmra.mrb[0].mxu1 %vm1785_vm5, %v6890_v55  ;;  %v568_v2 = vmax.f32 %v536_v33, 0.0  ;;  %v920_v8 = vshll.u32 %v6847_v29, 16  ;;  %743 = vst.msk [vmem:[#allocation2 + $0x1c] sm:$0xf] %vm737_vm4, %v5727_v60  ;;  %v569_v9 = vmax.f32 %v537_v34, 0.0  ;;  %v500_v13 = vmul.f32 %v5900_v46, %v6762_v5 }
  0x2c   : > { %6584 = vmatprep.subr.msk.bf16.mxu0 %vm1834_vm0, %v6738_v1  ;;  %6285 = vmatpush3.bf16.msra.mxu1 %v2891_v32  ;;  %v584_v10 = vmax.f32 %v552_v40, 0.0  ;;  %v585_v11 = vmax.f32 %v553_v44, 0.0  ;;  %v924_v1 = vshrl.u32 %v6847_v29, 16  ;;  %758 = vst.msk [vmem:[#allocation2 + $0x78] sm:$0xf] %vm737_vm4, %v5742_v63  ;;  %v501_v14 = vmul.f32 %v5901_v47, %v6762_v5  ;;  %v5958_v63 = vld [vmem:[%s6772_s17 + $0x68] sm:$0xff]  }
  0x2d   : > { %759 = vst.msk [vmem:[#allocation2 + $0x7c] sm:$0xf] %vm737_vm4, %v5743_v0  ;;  %v5728_v12 = vpack.c.bf16 %v568_v2, %v568_v2  ;;  %6589 = vmatprep.subr.msk.bf16.mxu1 %vm1834_vm0, %v6899_v61  ;;  %v5729_v15 = vpack.c.bf16 %v569_v9, %v569_v9  ;;  %v516_v18 = vmul.f32 %v5932_v48, %v6762_v5  ;;  %v6917_v19 = vrot.slane %v890_v49, 5 }
  0x2e   : > { %v5744_v16 = vpack.c.bf16 %v584_v10, %v584_v10  ;;  %v5745_v17 = vpack.c.bf16 %v585_v11, %v585_v11  ;;  %v6919_v21 = vrot.slane %v896_v50, 5  ;;  %v538_v22 = vadd.f32 %v6792_v20, %v500_v13 }
  0x2f   : > { %744 = vst.msk [vmem:[#allocation2 + $0x24] sm:$0xf] %vm737_vm4, %v5728_v12  ;;  %v539_v26 = vadd.f32 %v6792_v20, %v501_v14  ;;  %v6924_v27 = vrot.slane %v900_v51, 4  ;;  %v1092_v28 = vshrl.u32 %v6841_v25, 16  ;;  %v1103_v29 = vshrl.u32 %v6872_v41, 16 }
  0x30   : > { %745 = vst.msk [vmem:[#allocation2 + $0x28] sm:$0xf] %vm737_vm4, %v5729_v15  ;;  %760 = vst.msk [vmem:[#allocation2 + $0x84] sm:$0xf] %vm737_vm4, %v5744_v16  ;;  %v554_v30 = vadd.f32 %v6792_v20, %v516_v18  ;;  %v913_v31 = vrot.slane %v911_v59, 4  ;;  %v916_v32 = vrot.slane %v914_v62, 5  ;;  %v5904_v56 = vunpack.c.l.bf16 %v5950_v35 }
  0x31   : > { %761 = vst.msk [vmem:[#allocation2 + $0x88] sm:$0xf] %vm737_vm4, %v5745_v17  ;;  %v570_v33 = vmax.f32 %v538_v22, 0.0  ;;  %v571_v34 = vmax.f32 %v539_v26, 0.0  ;;  %v6933_v38 = vrot.slane %v920_v8, 5  ;;  %v926_v39 = vrot.slane %v924_v1, 4 }
  0x32   : > { %v1106_v25 = vshll.u32 %v6872_v41, 16  ;;  %v839_v40 = vld [vmem:[#allocation2 + $0x18] sm:$0xf]  ;;  %v586_v4 = vmax.f32 %v554_v30, 0.0  ;;  %v1112_v43 = vshll.u32 %v6874_v42, 16  ;;  %v1116_v44 = vshrl.u32 %v6874_v42, 16 }
  0x33   : > { %v840_v45 = vld [vmem:[#allocation2 + $0x1c] sm:$0xf]  ;;  %v5730_v46 = vpack.c.bf16 %v570_v33, %v570_v33  ;;  %v5731_v47 = vpack.c.bf16 %v571_v34, %v571_v34  ;;  %v855_v49 = vld [vmem:[#allocation2 + $0x78] sm:$0xf]  ;;  %v5905_v59 = vunpack.c.h.bf16 %v5950_v35  ;;  %v6942_v41 = vrot.slane %v1079_v53, 4 }
  0x34   : > { %v6938_v48 = vcombine.low %v839_v40, %v840_v45  ;;  %v856_v50 = vld [vmem:[#allocation2 + $0x7c] sm:$0xf]  ;;  %v5746_v51 = vpack.c.bf16 %v586_v4, %v586_v4  ;;  %v6946_v60 = vrot.slane %v1082_v54, 5  ;;  %v6948_v42 = vrot.slane %v1088_v58, 5 }
  0x35   : > { %v6950_v62 = vrot.slane %v1092_v28, 4  ;;  %746 = vst.msk [vmem:[#allocation2 + $0x30] sm:$0xf] %vm737_vm4, %v5730_v46  ;;  %747 = vst.msk [vmem:[#allocation2 + $0x34] sm:$0xf] %vm737_vm4, %v5731_v47  ;;  %v917_v0 = vor.u32 %v916_v32, %v913_v31  ;;  %v6955_v2 = vrot.slane %v1103_v29, 4  ;;  %v517_v53 = vmul.f32 %v5933_v52, %v6762_v5 }
  0x36   : > { %9190 = vst [vmem:[#allocation8_spill] sm:$0xff] %v6938_v48  ;;  %v6957_v8 = vrot.slane %v1106_v25, 5  ;;  %6120 = vmatprep.mubr.msk.bf16.mxu0 %vm1785_vm5, %v6938_v48  ;;  %v6961_v24 = vld [vmem:[#allocation2 + $0x24] sm:$0xf]  ;;  %762 = vst.msk [vmem:[#allocation2 + $0x90] sm:$0xf] %vm737_vm4, %v5746_v51  ;;  %v927_v54 = vor.u32 %v926_v39, %v6933_v38  ;;  %v6972_v10 = vcombine.low %v855_v49, %v856_v50  ;;  %v5936_v36 = vunpack.c.l.bf16 %v5958_v63 }
  0x37   : > { %v6968_v58 = vrot.slane %v1112_v43, 5  ;;  %v6970_v9 = vrot.slane %v1116_v44, 4  ;;  %v6974_v11 = vld [vmem:[#allocation2 + $0x28] sm:$0xf]  ;;  %v6976_v1 = vld [vmem:[#allocation2 + $0x84] sm:$0xf]  ;;  %v502_v12 = vmul.f32 %v5904_v56, %v6762_v5  ;;  %v503_v13 = vmul.f32 %v5905_v59, %v6762_v5 }
  0x38   : > { %9191 = vst [vmem:[#allocation9_spill] sm:$0xff] %v6972_v10  ;;  %v5937_v52 = vunpack.c.h.bf16 %v5958_v63  ;;  %v935_v14 = vshrl.u32 %v839_v40, 16  ;;  %v938_v15 = vshll.u32 %v839_v40, 16  ;;  %v944_v16 = vshll.u32 %v840_v45, 16  ;;  %6204 = vmatprep.mubr.msk.bf16.mxu1 %vm1785_vm5, %v6972_v10  ;;  %v6986_v18 = vld [vmem:[#allocation2 + $0x88] sm:$0xf] }
  0x39   : > { %v6984_v17 = vcombine.low %v6961_v24, %v6974_v11  ;;  %v6988_v22 = vrot.slane %v917_v0, 4  ;;  %v948_v26 = vshrl.u32 %v840_v45, 16  ;;  %v1127_v28 = vshrl.u32 %v855_v49, 16 }
  0x3a   : > { %v555_v29 = vadd.f32 %v6792_v20, %v517_v53  ;;  %v1130_v30 = vshll.u32 %v855_v49, 16  ;;  %v1136_v31 = vshll.u32 %v856_v50, 16  ;;  %v1140_v32 = vshrl.u32 %v856_v50, 16  ;;  %v5951_v53 = vld [vmem:[%s6772_s17 + $0x30] sm:$0xff]  }
  0x3b   : > { %9192 = vst [vmem:[#allocation10_spill] sm:$0xff] %v6984_v17  ;;  %6121 = vmatmul.mubr.msk.bf16.gmra.mrb[4].mxu0 %vm1785_vm5, %v6984_v17  ;;  %v6995_v33 = vcombine.low %v6976_v1, %v6986_v18  ;;  %v6997_v34 = vrot.slane %v927_v54, 4  ;;  %v540_v25 = vadd.f32 %v6792_v20, %v502_v12  ;;  %v518_v40 = vmul.f32 %v5936_v36, %v6762_v5  ;;  %v5959_v54 = vld [vmem:[%s6772_s17 + $0x70] sm:$0xff]  }
  0x3c   : > { %v6999_v35 = vld [vmem:[#allocation2 + $0x30] sm:$0xf]  ;;  %v7001_v39 = vld [vmem:[#allocation2 + $0x34] sm:$0xf]  ;;  %v519_v4 = vmul.f32 %v5937_v52, %v6762_v5  ;;  %v7006_v43 = vrot.slane %v935_v14, 4  ;;  %v7008_v44 = vrot.slane %v938_v15, 5  ;;  %v541_v46 = vadd.f32 %v6792_v20, %v503_v13 }
  0x3d   : > { %v7010_v45 = vrot.slane %v944_v16, 5  ;;  %6205 = vmatmul.mubr.msk.bf16.gmra.mrb[4].mxu1 %vm1785_vm5, %v6995_v33  ;;  %v7015_v47 = vrot.slane %v948_v26, 4  ;;  %v7017_v49 = vrot.slane %v1127_v28, 4  ;;  %v7021_v50 = vcombine.low %v6999_v35, %v7001_v39  ;;  %v5952_v28 = vld [vmem:[%s6772_s17 + $0x38] sm:$0xff]  }
  0x3e   : > { %v587_v51 = vmax.f32 %v555_v29, 0.0  ;;  %v7023_v56 = vrot.slane %v1130_v30, 5  ;;  %v7025_v59 = vrot.slane %v1136_v31, 5  ;;  %v7027_v63 = vrot.slane %v1140_v32, 4  ;;  %v5960_v14 = vld [vmem:[%s6772_s17 + $0x78] sm:$0xff]  }
  0x3f   : > { %9193 = vst [vmem:[#allocation11_spill] sm:$0xff] %v7021_v50  ;;  %v962_v12 = vshll.u32 %v6961_v24, 16  ;;  %v968_v13 = vshll.u32 %v6974_v11, 16  ;;  %6124 = vmatprep.mubr.msk.bf16.mxu0 %vm1785_vm5, %v7021_v50  ;;  %v572_v52 = vmax.f32 %v540_v25, 0.0  ;;  %v573_v15 = vmax.f32 %v541_v46, 0.0 }
  0x40   : > { %9194 = vst [vmem:[#allocation12_spill] sm:$0xff] %v7025_v59  ;;  %9195 = vst [vmem:[#allocation13_spill] sm:$0xff] %v7027_v63  ;;  %v5747_v36 = vpack.c.bf16 %v587_v51, %v587_v51  ;;  %v556_v16 = vadd.f32 %v6792_v20, %v518_v40  ;;  %v557_v26 = vadd.f32 %v6792_v20, %v519_v4  ;;  %v5908_v30 = vunpack.c.l.bf16 %v5951_v53  ;;  %v868_v59 = vld [vmem:[#allocation2 + $0x14] sm:$0x1] }
  0x41   : > { %v5732_v29 = vpack.c.bf16 %v572_v52, %v572_v52  ;;  %v5909_v31 = vunpack.c.h.bf16 %v5951_v53  ;;  %v5940_v32 = vunpack.c.l.bf16 %v5959_v54  ;;  %v5733_v0 = vpack.c.bf16 %v573_v15, %v573_v15 }
  0x42   : > { %763 = vst.msk [vmem:[#allocation2 + $0x94] sm:$0xf] %vm737_vm4, %v5747_v36  ;;  %v588_v17 = vmax.f32 %v556_v16, 0.0  ;;  %v589_v50 = vmax.f32 %v557_v26, 0.0  ;;  %v5941_v51 = vunpack.c.h.bf16 %v5959_v54  ;;  %v504_v25 = vmul.f32 %v5908_v30, %v6762_v5 }
  0x43   : > { %748 = vst.msk [vmem:[#allocation2 + $0x3c] sm:$0xf] %vm737_vm4, %v5732_v29  ;;  %v505_v40 = vmul.f32 %v5909_v31, %v6762_v5  ;;  %v520_v4 = vmul.f32 %v5940_v32, %v6762_v5  ;;  %v5912_v46 = vunpack.c.l.bf16 %v5952_v28  ;;  %749 = vst.msk [vmem:[#allocation2 + $0x40] sm:$0xf] %vm737_vm4, %v5733_v0  ;;  %v5913_v15 = vunpack.c.h.bf16 %v5952_v28  ;;  %v7053_v31 = vld [vmem:[#allocation2 + $0x90] sm:$0xf] }
  0x44   : > { %v5748_v36 = vpack.c.bf16 %v588_v17, %v588_v17  ;;  %v5749_v52 = vpack.c.bf16 %v589_v50, %v589_v50  ;;  %v521_v53 = vmul.f32 %v5941_v51, %v6762_v5  ;;  %v542_v16 = vadd.f32 %v6792_v20, %v504_v25 }
  0x45   : > { %v543_v54 = vadd.f32 %v6792_v20, %v505_v40  ;;  %v558_v26 = vadd.f32 %v6792_v20, %v520_v4  ;;  %v506_v29 = vmul.f32 %v5912_v46, %v6762_v5  ;;  %vm884_vm7 = vsmask.f32 7440 }
  0x46   : > { %v1151_v30 = vshrl.u32 %v6976_v1, 16  ;;  %764 = vst.msk [vmem:[#allocation2 + $0x9c] sm:$0xf] %vm737_vm4, %v5748_v36  ;;  %765 = vst.msk [vmem:[#allocation2 + $0xa0] sm:$0xf] %vm737_vm4, %v5749_v52  ;;  %v559_v17 = vadd.f32 %v6792_v20, %v521_v53  ;;  %v507_v50 = vmul.f32 %v5913_v15, %v6762_v5  ;;  %v5944_v0 = vunpack.c.l.bf16 %v5960_v14 }
  0x47   : > { %v574_v28 = vmax.f32 %v542_v16, 0.0  ;;  %v575_v32 = vmax.f32 %v543_v54, 0.0  ;;  %v590_v51 = vmax.f32 %v558_v26, 0.0  ;;  %v544_v25 = vadd.f32 %v6792_v20, %v506_v29  ;;  %vm7128_vm8 = vmor %vm883_vm6, %vm884_vm7 }
  0x48   : > { %v1154_v40 = vshll.u32 %v6976_v1, 16  ;;  %v591_v46 = vmax.f32 %v559_v17, 0.0  ;;  %v545_v48 = vadd.f32 %v6792_v20, %v507_v50  ;;  %v5945_v36 = vunpack.c.h.bf16 %v5960_v14 }
  0x49   : > { %v7061_v4 = vld [vmem:[#allocation2 + $0x94] sm:$0xf]  ;;  %v1160_v52 = vshll.u32 %v6986_v18, 16  ;;  %v5734_v15 = vpack.c.bf16 %v574_v28, %v574_v28  ;;  %v522_v16 = vmul.f32 %v5944_v0, %v6762_v5  ;;  %v5735_v26 = vpack.c.bf16 %v575_v32, %v575_v32 }
  0x4a   : > { %v7067_v53 = vcombine.low %v7053_v31, %v7061_v4  ;;  %v7070_v54 = vld [vmem:[#allocation2 + $0x3c] sm:$0xf]  ;;  %v5750_v29 = vpack.c.bf16 %v590_v51, %v590_v51  ;;  %v5751_v1 = vpack.c.bf16 %v591_v46, %v591_v46  ;;  %v576_v6 = vmax.f32 %v544_v25, 0.0  ;;  %v7083_v0 = vld [vmem:[#allocation2 + $0x40] sm:$0xf] }
  0x4b   : > { %v9196_v17 = vshrl.u32 %v6961_v24, 16  ;;  %v7076_v14 = vrot.slane %v962_v12, 5  ;;  %v7078_v50 = vrot.slane %v968_v13, 5  ;;  %v1164_v3 = vshrl.u32 %v6986_v18, 16  ;;  %750 = vst.msk [vmem:[#allocation2 + $0x48] sm:$0xf] %vm737_vm4, %v5734_v15 }
  0x4c   : > { %6208 = vmatprep.mubr.msk.bf16.mxu1 %vm1785_vm5, %v7067_v53  ;;  %v983_v28 = vshrl.u32 %v6999_v35, 16  ;;  %v7089_v24 = vcombine.low %v7070_v54, %v7083_v0  ;;  %751 = vst.msk [vmem:[#allocation2 + $0x4c] sm:$0xf] %vm737_vm4, %v5735_v26  ;;  %766 = vst.msk [vmem:[#allocation2 + $0xa8] sm:$0xf] %vm737_vm4, %v5750_v29  ;;  %v577_v18 = vmax.f32 %v545_v48, 0.0  ;;  %v523_v12 = vmul.f32 %v5945_v36, %v6762_v5 }
  0x4d   : > { %v7074_v23 = vrot.slane %v9196_v17, 4  ;;  %767 = vst.msk [vmem:[#allocation2 + $0xac] sm:$0xf] %vm737_vm4, %v5751_v1  ;;  %v9198_v13 = vshrl.u32 %v6974_v11, 16  ;;  %v986_v51 = vshll.u32 %v6999_v35, 16  ;;  %v5736_v15 = vpack.c.bf16 %v576_v6, %v576_v6 }
  0x4e   : > { %9197 = vst [vmem:[#allocation14_spill] sm:$0xff] %v7089_v24  ;;  %v7100_v25 = vld [vmem:[#allocation2 + $0x9c] sm:$0xf]  ;;  %v7102_v46 = vld [vmem:[#allocation2 + $0xa0] sm:$0xf]  ;;  %v560_v26 = vadd.f32 %v6792_v20, %v522_v16  ;;  %v7105_v17 = vrot.slane %v1151_v30, 4  ;;  %6125 = vmatmul.mubr.msk.bf16.gmra.mrb[8].mxu0 %vm1785_vm5, %v7089_v24  ;;  %v5737_v36 = vpack.c.bf16 %v577_v18, %v577_v18 }
  0x4f   : > { %v7097_v32 = vrot.slane %v9198_v13, 4  ;;  %v7107_v29 = vrot.slane %v1154_v40, 5  ;;  %v7109_v48 = vrot.slane %v1160_v52, 5  ;;  %v992_v5 = vshll.u32 %v7001_v39, 16  ;;  %752 = vst.msk [vmem:[#allocation2 + $0x54] sm:$0xf] %vm737_vm4, %v5736_v15 }
  0x50   : > { %v996_v11 = vshrl.u32 %v7001_v39, 16  ;;  %v1175_v35 = vshrl.u32 %v7053_v31, 16  ;;  %v7118_v6 = vcombine.low %v7100_v25, %v7102_v46  ;;  %v7121_v30 = vrot.slane %v1164_v3, 4  ;;  %753 = vst.msk [vmem:[#allocation2 + $0x58] sm:$0xf] %vm737_vm4, %v5737_v36 }
  0x51   : > { %9199 = vst [vmem:[#allocation15_spill] sm:$0xff] %v7107_v29  ;;  %9200 = vst [vmem:[#allocation16_spill] sm:$0xff] %v7109_v48  ;;  %v7123_v40 = vrot.slane %v983_v28, 4  ;;  %v561_v52 = vadd.f32 %v6792_v20, %v523_v12  ;;  %v592_v16 = vmax.f32 %v560_v26, 0.0  ;;  %v7132_v1 = vrot.slane %v986_v51, 5 }
  0x52   : > { %9201 = vst [vmem:[#allocation17_spill] sm:$0xff] %v7118_v6  ;;  %9202 = vst [vmem:[#allocation18_spill] sm:$0xff] %v7121_v30  ;;  %v1178_v13 = vshll.u32 %v7053_v31, 16  ;;  %v1184_v18 = vshll.u32 %v7061_v4, 16  ;;  %v1188_v3 = vshrl.u32 %v7061_v4, 16  ;;  %6209 = vmatmul.mubr.msk.bf16.gmra.mrb[8].mxu1 %vm1785_vm5, %v7118_v6  ;;  %v7140_v28 = vrot.slane %v992_v5, 5 }
  0x53   : > { %v867_v20 = vld [vmem:[#allocation2 + $0x8] sm:$0x1]  ;;  %v1007_v12 = vshrl.u32 %v7070_v54, 16  ;;  %v1010_v15 = vshll.u32 %v7070_v54, 16  ;;  %v5752_v26 = vpack.c.bf16 %v592_v16, %v592_v16  ;;  %v7146_v31 = vrot.slane %v996_v11, 4 }
  0x54   : > { %v7144_v51 = vld [vmem:[#allocation2 + $0x48] sm:$0xf]  ;;  %v7148_v24 = vrot.slane %v1175_v35, 4  ;;  %v1016_v4 = vshll.u32 %v7083_v0, 16  ;;  %v1020_v30 = vshrl.u32 %v7083_v0, 16  ;;  %v1199_v36 = vshrl.u32 %v7100_v25, 16 }
  0x55   : > { %v848_v48 = vld [vmem:[#allocation2 + $0x4c] sm:$0xf]  ;;  %v7160_v16 = vld [vmem:[#allocation2 + $0xa8] sm:$0xf]  ;;  %v593_v35 = vmax.f32 %v561_v52, 0.0  ;;  %v7167_v0 = vrot.slane %v1184_v18, 5  ;;  %v893_v5 = vor.u32 %v6917_v19, %v6892_v57 }
  0x56   : > { %9205 = vst [vmem:[#allocation19_spill] sm:$0xff] %v7148_v24  ;;  %v7158_v54 = vcombine.low %v7144_v51, %v848_v48  ;;  %9207 = vst [vmem:[#allocation21_spill] sm:$0xff] %v7160_v16  ;;  %v7162_v11 = vld [vmem:[#allocation2 + $0xac] sm:$0xf]  ;;  %v7165_v24 = vrot.slane %v1178_v13, 5  ;;  %v7169_v63 = vrot.slane %v1188_v3, 4  ;;  %v903_v13 = vor.u32 %v6924_v27, %v6919_v21 }
  0x57   : > { %9208 = vst [vmem:[#allocation22_spill] sm:$0xff] %v7162_v11  ;;  %768 = vst.msk [vmem:[#allocation2 + $0xb4] sm:$0xf] %vm737_vm4, %v5752_v26  ;;  %v7173_v6 = vrot.slane %v1007_v12, 4  ;;  %v7175_v29 = vrot.slane %v1010_v15, 5  ;;  %v906_v18 = vshll.u32 %v867_v20, 16  ;;  %v7188_v19 = vcombine.low %v7160_v16, %v7162_v11 }
  0x58   : > { %9206 = vst [vmem:[#allocation20_spill] sm:$0xff] %v7158_v54  ;;  %9209 = vst [vmem:[#allocation23_spill] sm:$0xff] %v7165_v24  ;;  %6128 = vmatprep.mubr.msk.bf16.mxu0 %vm1785_vm5, %v7158_v54  ;;  %v7179_v52 = vld [vmem:[#allocation2 + $0x54] sm:$0xf]  ;;  %v1202_v3 = vshll.u32 %v7100_v25, 16  ;;  %v1208_v26 = vshll.u32 %v7102_v46, 16 }
  0x59   : > { %9210 = vst [vmem:[#allocation24_spill] sm:$0xff] %v7167_v0  ;;  %9211 = vst [vmem:[#allocation25_spill] sm:$0xff] %v7169_v63  ;;  %v1212_v57 = vshrl.u32 %v7102_v46, 16  ;;  %v7190_v12 = vrot.slane %v1016_v4, 5  ;;  %v7192_v15 = vrot.slane %v1020_v30, 4  ;;  %v7194_v54 = vrot.slane %v1199_v36, 4  ;;  %6212 = vmatprep.mubr.msk.bf16.mxu1 %vm1785_vm5, %v7188_v19 }
  0x5a   : > { %9212 = vst [vmem:[#allocation26_spill] sm:$0xff] %v7188_v19  ;;  %v850_v63 = vld [vmem:[#allocation2 + $0x58] sm:$0xf]  ;;  %v5753_v0 = vpack.c.bf16 %v593_v35, %v593_v35  ;;  %v1031_v27 = vshrl.u32 %v7144_v51, 16  ;;  %v894_v46 = vrot.slane %v893_v5, 4  ;;  %v930_v20 = vshll.u32 %v868_v59, 16 }
  0x5b   : > { %9213 = vst [vmem:[#allocation27_spill] sm:$0xff] %v7194_v54  ;;  %v7200_v25 = vcombine.low %v7179_v52, %v850_v63  ;;  %v790_v11 = vld [vmem:[#allocation2 + $0x20] sm:$0x1]  ;;  %v1034_v4 = vshll.u32 %v7144_v51, 16  ;;  %v1040_v16 = vshll.u32 %v848_v48, 16  ;;  %v904_v30 = vrot.slane %v903_v13, 4 }
  0x5c   : > { %769 = vst.msk [vmem:[#allocation2 + $0xb8] sm:$0xf] %vm737_vm4, %v5753_v0  ;;  %v908_v36 = vrot.slane %v906_v18, 5  ;;  %v7204_v54 = vrot.slane %v1202_v3, 5  ;;  %v7206_v35 = vrot.slane %v1208_v26, 5  ;;  %v7208_v24 = vrot.slane %v1212_v57, 4 }
  0x5d   : > { %9214 = vst [vmem:[#allocation28_spill] sm:$0xff] %v7200_v25  ;;  %v1044_v19 = vshrl.u32 %v848_v48, 16  ;;  %6129 = vmatmul.mubr.msk.bf16.gmra.mrb[12].mxu0 %vm1785_vm5, %v7200_v25  ;;  %v793_v5 = vld [vmem:[#allocation2 + $0x2c] sm:$0x1]  ;;  %v1055_v59 = vshrl.u32 %v7179_v52, 16  ;;  %v791_v51 = vsel %vm6777_vm3, 0, %v790_v11  ;;  %v941_v0 = vor.u32 %v7008_v44, %v7006_v43 }
  0x5e   : > { %9215 = vst [vmem:[#allocation29_spill] sm:$0xff] %v7206_v35  ;;  %9216 = vst [vmem:[#allocation30_spill] sm:$0xff] %v7208_v24  ;;  %6132 = vmatprep.mubr.msk.bf16.mxu0 %vm1785_vm5, %v6864_v37  ;;  %v951_v13 = vor.u32 %v7015_v47, %v7010_v45  ;;  %v796_v18 = vld [vmem:[#allocation2 + $0x38] sm:$0x1]  ;;  %v7221_v48 = vrot.slane %v1031_v27, 4  ;;  %v899_v3 = vsel %vm7128_vm8, %v894_v46, %v6919_v21  ;;  %v932_v57 = vrot.slane %v930_v20, 5 }
  0x5f   : > { %v909_v26 = vsel %vm7128_vm8, %v904_v30, %v908_v36  ;;  %792 = vst [vmem:[#allocation2 + $0x20] sm:$0x1] %v791_v51  ;;  %v799_v37 = vld [vmem:[#allocation2 + $0x44] sm:$0x1]  ;;  %v1036_v11 = vrot.slane %v1034_v4, 5  ;;  %v7228_v25 = vrot.slane %v1040_v16, 5  ;;  %v975_v36 = vor.u32 %v7097_v32, %v7078_v50 }
  0x60   : > { %v1058_v43 = vshll.u32 %v7179_v52, 16  ;;  %v794_v44 = vsel %vm6777_vm3, 0, %v793_v5  ;;  %v802_v47 = vld [vmem:[#allocation2 + $0x50] sm:$0x1]  ;;  %v7233_v27 = vrot.slane %v1044_v19, 4  ;;  %v1064_v24 = vshll.u32 %v850_v63, 16 }
  0x61   : > { %v1068_v35 = vshrl.u32 %v850_v63, 16  ;;  %v7235_v21 = vld [vmem:[#allocation2 + $0xb4] sm:$0xf]  ;;  %795 = vst [vmem:[#allocation2 + $0x2c] sm:$0x1] %v794_v44  ;;  %v797_v46 = vsel %vm6777_vm3, 0, %v796_v18  ;;  %v7241_v16 = vcombine.low %v899_v3, %v909_v26  ;;  %v933_v63 = vsel %vm7128_vm8, %v6997_v34, %v932_v57 }
  0x62   : > { %v7239_v20 = vrot.slane %v1055_v59, 4  ;;  %v942_v4 = vrot.slane %v941_v0, 4  ;;  %798 = vst [vmem:[#allocation2 + $0x38] sm:$0x1] %v797_v46  ;;  %v800_v52 = vsel %vm6777_vm3, 0, %v799_v37  ;;  %v965_v19 = vor.u32 %v7076_v14, %v7074_v23 }
  0x63   : > { %v7245_v30 = vld [vmem:[#allocation2 + $0xb8] sm:$0xf]  ;;  %801 = vst [vmem:[#allocation2 + $0x44] sm:$0x1] %v800_v52  ;;  %v803_v5 = vsel %vm6777_vm3, 0, %v802_v47  ;;  %v7256_v59 = vrot.slane %v1058_v43, 5  ;;  %v989_v51 = vor.u32 %v7132_v1, %v7123_v40  ;;  %v999_v34 = vor.u32 %v7146_v31, %v7140_v28 }
  0x64   : > { %v7260_v37 = vcombine.low %v7235_v21, %v7245_v30  ;;  %804 = vst [vmem:[#allocation2 + $0x50] sm:$0x1] %v803_v5  ;;  %v805_v23 = vld [vmem:[#allocation2 + $0x5c] sm:$0x1]  ;;  %v7266_v14 = vrot.slane %v1064_v24, 5  ;;  %v7268_v32 = vrot.slane %v1068_v35, 4  ;;  %v1013_v18 = vor.u32 %v7175_v29, %v7173_v6 }
  0x65   : > { %6133 = vmatmul.mubr.msk.bf16.gmra.mrb[16].mxu0 %vm1785_vm5, %v6890_v55  ;;  %v3055_v0 = vsel %vm1834_vm0, %v6899_v61, 0  ;;  %v808_v3 = vld [vmem:[#allocation2 + $0x68] sm:$0x1]  ;;  %v9217_v24 = vsel %vm7128_vm8, %v6988_v22, %v6933_v38  ;;  %v947_v61 = vsel %vm7128_vm8, %v942_v4, %v7010_v45  ;;  %v952_v29 = vrot.slane %v951_v13, 4 }
  0x66   : > { %6213 = vmatmul.mubr.msk.bf16.gmra.mrb[12].mxu1 %vm1785_vm5, %v7260_v37  ;;  %v7283_v40 = vcombine.low %v9217_v24, %v933_v63  ;;  %6136 = vmatprep.mubr.msk.bf16.mxu0 %vm1785_vm5, %v6972_v10  ;;  %v869_v1 = vld [vmem:[#allocation2 + $0x20] sm:$0x1]  ;;  %v1037_v6 = vor.u32 %v1036_v11, %v7221_v48  ;;  %v7293_v35 = vrot.slane %v965_v19, 4  ;;  %v976_v38 = vrot.slane %v975_v36, 4 }
  0x67   : > { %6286 = vmatprep.mubr.msk.bf16.mxu1 %vm1785_vm5, %v7241_v16  ;;  %v954_v31 = vshll.u32 %v869_v1, 16  ;;  %v806_v22 = vsel %vm6777_vm3, 0, %v805_v23  ;;  %v990_v57 = vrot.slane %v989_v51, 4  ;;  %v1000_v43 = vrot.slane %v999_v34, 4  ;;  %v7336_v1 = vld [vmem:[%s9130_s2 + $0x18] sm:$0xf] }
  0x68   : > { %v870_v26 = vld [vmem:[#allocation2 + $0x2c] sm:$0x1]  ;;  %v1023_v44 = vor.u32 %v7192_v15, %v7190_v12  ;;  %807 = vst [vmem:[#allocation2 + $0x5c] sm:$0x1] %v806_v22  ;;  %v809_v45 = vsel %vm6777_vm3, 0, %v808_v3  ;;  %v7301_v47 = vrot.slane %v1013_v18, 4  ;;  %v1085_v46 = vor.u32 %v6946_v60, %v6942_v41 }
  0x69   : > { %v956_v13 = vrot.slane %v954_v31, 5  ;;  %v978_v48 = vshll.u32 %v870_v26, 16  ;;  %v871_v11 = vld [vmem:[#allocation2 + $0x38] sm:$0x1]  ;;  %810 = vst [vmem:[#allocation2 + $0x68] sm:$0x1] %v809_v45  ;;  %v1047_v15 = vor.u32 %v7233_v27, %v7228_v25  ;;  %v1061_v19 = vor.u32 %v7256_v59, %v7239_v20 }
  0x6a   : > { %v1002_v4 = vshll.u32 %v871_v11, 16  ;;  %v872_v52 = vld [vmem:[#allocation2 + $0x44] sm:$0x1]  ;;  %v7305_v63 = vrot.slane %v1037_v6, 4  ;;  %v1071_v34 = vor.u32 %v7268_v32, %v7266_v14  ;;  %v7315_v23 = vrot.slane %v1085_v46, 4 }
  0x6b   : > { %v957_v36 = vsel %vm7128_vm8, %v952_v29, %v956_v13  ;;  %v980_v5 = vrot.slane %v978_v48, 5  ;;  %v873_v51 = vld [vmem:[#allocation2 + $0x50] sm:$0x1]  ;;  %v811_v41 = vld [vmem:[#allocation2 + $0x74] sm:$0x1]  ;;  %v1026_v3 = vshll.u32 %v872_v52, 16  ;;  %v971_v27 = vsel %vm7128_vm8, %v7293_v35, %v7078_v50 }
  0x6c   : > { %v7317_v60 = vcombine.low %v947_v61, %v957_v36  ;;  %v1004_v18 = vrot.slane %v1002_v4, 5  ;;  %v1050_v24 = vshll.u32 %v873_v51, 16  ;;  %v7325_v20 = vrot.slane %v1023_v44, 4  ;;  %v814_v29 = vld [vmem:[#allocation2 + $0x80] sm:$0x1] }
  0x6d   : > { %6137 = vmatmul.mubr.msk.bf16.gmra.mrb[20].mxu0 %vm1785_vm5, %v6995_v33  ;;  %v1091_v59 = vsel %vm7128_vm8, %v7315_v23, %v6948_v42  ;;  %v1095_v32 = vor.u32 %v6950_v62, %v6948_v42  ;;  %v995_v50 = vsel %vm7128_vm8, %v990_v57, %v7140_v28  ;;  %v1019_v42 = vsel %vm7128_vm8, %v7301_v47, %v7190_v12  ;;  %v817_v35 = vld [vmem:[#allocation2 + $0x8c] sm:$0x1]  ;;  %v820_v46 = vld [vmem:[#allocation2 + $0x98] sm:$0x1]  ;;  %v823_v51 = vld [vmem:[#allocation2 + $0xa4] sm:$0x1] }
  0x6e   : > { %6287 = vmatmul.mubr.msk.bf16.vlgmr.msra.gmra.mrb[16].mxu1 %vm1785_vm5, %v7283_v40  ;;  %6140 = vmatprep.mubr.msk.bf16.mxu0 %vm1785_vm5, %v7067_v53  ;;  %v1043_v62 = vsel %vm7128_vm8, %v7305_v63, %v7228_v25  ;;  %v812_v61 = vsel %vm6777_vm3, 0, %v811_v41  ;;  %v981_v28 = vsel %vm7128_vm8, %v976_v38, %v980_v5  ;;  %v1005_v6 = vsel %vm7128_vm8, %v1000_v43, %v1004_v18  ;;  %v9220_v23 = vld [vmem:[#allocation12_spill] sm:$0xff]  ;;  %v9221_v41 = vld [vmem:[#allocation13_spill] sm:$0xff] }
  0x6f   : > { %6319 = vmatpush3.bf16.msra.mxu1 %v3055_v0  ;;  %6290 = vmatprep.mubr.msk.bf16.mxu1 %vm1785_vm5, %v7317_v60  ;;  %v1048_v12 = vrot.slane %v1047_v15, 4  ;;  %813 = vst [vmem:[#allocation2 + $0x74] sm:$0x1] %v812_v61  ;;  %v1109_v31 = vor.u32 %v6957_v8, %v6955_v2  ;;  %v1028_v22 = vrot.slane %v1026_v3, 5  ;;  %v1052_v26 = vrot.slane %v1050_v24, 5 }
  0x70   : > { %v7363_v57 = vrot.slane %v1061_v19, 4  ;;  %v7365_v0 = vrot.slane %v1071_v34, 4  ;;  %v875_v44 = vld [vmem:[#allocation2 + $0x68] sm:$0x1]  ;;  %6590 = vmatprep.subr.msk.bf16.mxu1 %vm1834_vm0, %v7336_v1  ;;  %v874_v38 = vld [vmem:[#allocation2 + $0x5c] sm:$0x1]  ;;  %v7371_v11 = vcombine.low %v971_v27, %v981_v28  ;;  %v7373_v2 = vcombine.low %v995_v50, %v1005_v6 }
  0x71   : > { %v1096_v45 = vrot.slane %v1095_v32, 4  ;;  %v1098_v13 = vshll.u32 %v875_v44, 16  ;;  %v1110_v43 = vrot.slane %v1109_v31, 4  ;;  %v815_v48 = vsel %vm6777_vm3, 0, %v814_v29  ;;  %v9218_v19 = vld [vmem:[#allocation15_spill] sm:$0xff]  ;;  %v9219_v34 = vld [vmem:[#allocation17_spill] sm:$0xff] }
  0x72   : > { %v1119_v8 = vor.u32 %v6970_v9, %v6968_v58  ;;  %816 = vst [vmem:[#allocation2 + $0x80] sm:$0x1] %v815_v48  ;;  %v1133_v47 = vor.u32 %v7023_v56, %v7017_v49  ;;  %v818_v15 = vsel %vm6777_vm3, 0, %v817_v35  ;;  %v1157_v36 = vor.u32 %v9218_v19, %v7105_v17  ;;  %v826_v24 = vld [vmem:[#allocation2 + $0xb0] sm:$0x1]  ;;  %v9222_v27 = vld [vmem:[#allocation26_spill] sm:$0xff] }
  0x73   : > { %v1100_v4 = vrot.slane %v1098_v13, 5  ;;  %v1115_v52 = vsel %vm7128_vm8, %v1110_v43, %v6968_v58  ;;  %v1029_v9 = vsel %vm7128_vm8, %v7325_v20, %v1028_v22  ;;  %v1053_v5 = vsel %vm7128_vm8, %v1048_v12, %v1052_v26  ;;  %819 = vst [vmem:[#allocation2 + $0x8c] sm:$0x1] %v818_v15  ;;  %v9223_v29 = vld [vmem:[#allocation19_spill] sm:$0xff]  ;;  %v9225_v31 = vld [vmem:[#allocation16_spill] sm:$0xff] }
  0x74   : > { %v1074_v49 = vshll.u32 %v874_v38, 16  ;;  %v1134_v56 = vrot.slane %v1133_v47, 4  ;;  %v1143_v17 = vor.u32 %v9221_v41, %v9220_v23  ;;  %v1158_v18 = vrot.slane %v1157_v36, 4  ;;  %v9224_v28 = vld [vmem:[#allocation23_spill] sm:$0xff]  ;;  %v829_v48 = vld [vmem:[#allocation2 + $0xbc] sm:$0x1] }
  0x75   : > { %6141 = vmatmul.mubr.msk.bf16.gmra.mrb[24].mxu0 %vm1785_vm5, %v9219_v34  ;;  %v1101_v58 = vsel %vm7128_vm8, %v1096_v45, %v1100_v4  ;;  %v821_v3 = vsel %vm6777_vm3, 0, %v820_v46  ;;  %v1120_v50 = vrot.slane %v1119_v8, 4  ;;  %v1181_v6 = vor.u32 %v9224_v28, %v9223_v29  ;;  %v9227_v45 = vld [vmem:[#allocation27_spill] sm:$0xff]  ;;  %v9228_v19 = vld [vmem:[#allocation24_spill] sm:$0xff]  ;;  %v9229_v36 = vld [vmem:[#allocation25_spill] sm:$0xff] }
  0x76   : > { %6291 = vmatmul.mubr.msk.bf16.gmra.mrb[20].mxu1 %vm1785_vm5, %v7371_v11  ;;  %6144 = vmatprep.mubr.msk.bf16.mxu0 %vm1785_vm5, %v9222_v27  ;;  %v7403_v20 = vcombine.low %v1091_v59, %v1101_v58  ;;  %v876_v32 = vld [vmem:[#allocation2 + $0x74] sm:$0x1]  ;;  %v1139_v61 = vsel %vm7128_vm8, %v1134_v56, %v9220_v23  ;;  %822 = vst [vmem:[#allocation2 + $0x98] sm:$0x1] %v821_v3  ;;  %v9226_v59 = vld [vmem:[#allocation18_spill] sm:$0xff]  ;;  %v824_v26 = vsel %vm6777_vm3, 0, %v823_v51 }
  0x77   : > { %6294 = vmatprep.mubr.msk.bf16.mxu1 %vm1785_vm5, %v7373_v2  ;;  %v1122_v12 = vshll.u32 %v876_v32, 16  ;;  %v1163_v35 = vsel %vm7128_vm8, %v1158_v18, %v9225_v31  ;;  %v1167_v22 = vor.u32 %v9226_v59, %v9225_v31  ;;  %v7419_v44 = vcombine.low %v1019_v42, %v1029_v9  ;;  %825 = vst [vmem:[#allocation2 + $0xa4] sm:$0x1] %v824_v26 }
  0x78   : > { %v1182_v38 = vrot.slane %v1181_v6, 4  ;;  %v1205_v13 = vor.u32 %v7204_v54, %v9227_v45  ;;  %v827_v43 = vsel %vm6777_vm3, 0, %v826_v24  ;;  %v7430_v8 = vcombine.low %v1043_v62, %v1053_v5  ;;  %v9230_v62 = vld [vmem:[#allocation29_spill] sm:$0xff]  ;;  %v9231_v5 = vld [vmem:[#allocation30_spill] sm:$0xff] }
  0x79   : > { %v1076_v47 = vrot.slane %v1074_v49, 5  ;;  %v1124_v46 = vrot.slane %v1122_v12, 5  ;;  %v877_v42 = vld [vmem:[#allocation2 + $0x80] sm:$0x1]  ;;  %v1144_v4 = vrot.slane %v1143_v17, 4  ;;  %v1191_v9 = vor.u32 %v9229_v36, %v9228_v19 }
  0x7a   : > { %828 = vst [vmem:[#allocation2 + $0xb0] sm:$0x1] %v827_v43  ;;  %v1146_v15 = vshll.u32 %v877_v42, 16  ;;  %v1187_v54 = vsel %vm7128_vm8, %v1182_v38, %v9228_v19  ;;  %v1206_v56 = vrot.slane %v1205_v13, 4  ;;  %v878_v25 = vld [vmem:[#allocation2 + $0x8c] sm:$0x1]  ;;  %v1215_v49 = vor.u32 %v9231_v5, %v9230_v62 }
  0x7b   : > { %v1125_v51 = vsel %vm7128_vm8, %v1120_v50, %v1124_v46  ;;  %v1168_v63 = vrot.slane %v1167_v22, 4  ;;  %v830_v58 = vsel %vm6777_vm3, 0, %v829_v48  ;;  %v1170_v17 = vshll.u32 %v878_v25, 16  ;;  %v9232_v13 = vld [vmem:[#allocation3_spill] sm:$0xff]  ;;  %v9233_v43 = vld [vmem:[#allocation21_spill] sm:$0xff] }
  0x7c   : > { %v7443_v23 = vcombine.low %v1115_v52, %v1125_v51  ;;  %v1148_v41 = vrot.slane %v1146_v15, 5  ;;  %v1211_v18 = vsel %vm7128_vm8, %v1206_v56, %v9230_v62  ;;  %831 = vst [vmem:[#allocation2 + $0xbc] sm:$0x1] %v830_v58  ;;  %v1192_v32 = vrot.slane %v1191_v9, 4 }
  0x7d   : > { %6145 = vmatmul.mubr.msk.bf16.gmra.mrb[28].mxu0 %vm1785_vm5, %v7260_v37  ;;  %v879_v3 = vld [vmem:[#allocation2 + $0x98] sm:$0x1]  ;;  %v1172_v24 = vrot.slane %v1170_v17, 5  ;;  %v1067_v29 = vsel %vm7128_vm8, %v7363_v57, %v7266_v14  ;;  %v1077_v28 = vsel %vm7128_vm8, %v7365_v0, %v1076_v47  ;;  %v1216_v59 = vrot.slane %v1215_v49, 4  ;;  %v9234_v47 = vld [vmem:[#allocation22_spill] sm:$0xff] }
  0x7e   : > { %6295 = vmatmul.mubr.msk.bf16.gmra.mrb[24].mxu1 %vm1785_vm5, %v7419_v44  ;;  %6150 = vmatprep.mubr.msk.bf16.mxu0 %vm1785_vm5, %v7241_v16  ;;  %v1149_v52 = vsel %vm7128_vm8, %v1144_v4, %v1148_v41  ;;  %v1194_v50 = vshll.u32 %v879_v3, 16  ;;  %v880_v16 = vld [vmem:[#allocation2 + $0xa4] sm:$0x1]  ;;  %v5318_v38 = vcombine.low %v1067_v29, %v1077_v28  ;;  %v1223_v48 = vshrl.u32 %v9233_v43, 16  ;;  %v7527_v28 = vld [vmem:[#allocation2 + $0x10] sm:$0xf] }
  0x7f   : > { %6298 = vmatprep.mubr.msk.bf16.mxu1 %vm1785_vm5, %v7430_v8  ;;  %v7465_v6 = vcombine.low %v1139_v61, %v1149_v52  ;;  %v1173_v12 = vsel %vm7128_vm8, %v1168_v63, %v1172_v24  ;;  %v1218_v22 = vshll.u32 %v880_v16, 16  ;;  %v1232_v46 = vshll.u32 %v9234_v47, 16  ;;  %v7529_v16 = vld [vmem:[#allocation2 + $0x18] sm:$0xf] }
  0x80   : > { %v1196_v31 = vrot.slane %v1194_v50, 5  ;;  %v7469_v26 = vcombine.low %v1163_v35, %v1173_v12  ;;  %v7484_v35 = vld [vmem:[%s9130_s2 + $0x1c] sm:$0xf]  ;;  %v1236_v42 = vshrl.u32 %v9234_v47, 16  ;;  %v1225_v4 = vrot.slane %v1223_v48, 4 }
  0x81   : > { %v1220_v14 = vrot.slane %v1218_v22, 5  ;;  %v1234_v19 = vrot.slane %v1232_v46, 5  ;;  %v881_v36 = vld [vmem:[#allocation2 + $0xb0] sm:$0x1]  ;;  %v1250_v9 = vshll.u32 %v7235_v21, 16  ;;  %v1256_v56 = vshll.u32 %v7245_v30, 16 }
  0x82   : > { %v1197_v45 = vsel %vm7128_vm8, %v1192_v32, %v1196_v31  ;;  %v1260_v51 = vshrl.u32 %v7245_v30, 16  ;;  %v1242_v63 = vshll.u32 %v881_v36, 16  ;;  %v1329_v22 = vshll.u32 %v7527_v28, 16 }
  0x83   : > { %v7473_v57 = vcombine.low %v1187_v54, %v1197_v45  ;;  %v1221_v0 = vsel %vm7128_vm8, %v1216_v59, %v1220_v14  ;;  %v1238_v54 = vrot.slane %v1236_v42, 4  ;;  %v1252_v5 = vrot.slane %v1250_v9, 5 }
  0x84   : > { %v7479_v61 = vcombine.low %v1211_v18, %v1221_v0  ;;  %v1258_v49 = vrot.slane %v1256_v56, 5  ;;  %v1244_v17 = vrot.slane %v1242_v63, 5  ;;  %v882_v18 = vld [vmem:[#allocation2 + $0xbc] sm:$0x1]  ;;  %v1333_v14 = vshrl.u32 %v7527_v28, 16 }
  0x85   : > { %6151 = vmatmul.mubr.msk.bf16.vlgmr.msra.gmra.mrb[32].mxu0 %vm1785_vm5, %v7283_v40  ;;  %v1226_v40 = vshll.u32 %v9233_v43, 16  ;;  %v1266_v3 = vshll.u32 %v882_v18, 16  ;;  %v1344_v0 = vshrl.u32 %v7529_v16, 16  ;;  %v7558_v46 = vsel %vm1834_vm0, %v7336_v1, 0  ;;  %v7569_v1 = vld [vmem:[#allocation2 + $0x3c] sm:$0xf] }
  0x86   : > { %6299 = vmatmul.mubr.msk.bf16.gmra.mrb[28].mxu1 %vm1785_vm5, %v5318_v38  ;;  %6183 = vmatpush3.bf16.msra.mxu0 %v9232_v13  ;;  %v7549_v13 = vld [vmem:[#allocation2 + $0x30] sm:$0xf]  ;;  %v7562_v42 = vsel %vm1834_vm0, %v7484_v35, 0  ;;  %v1331_v9 = vrot.slane %v1329_v22, 5  ;;  %v1335_v56 = vrot.slane %v1333_v14, 4 }
  0x87   : > { %6302 = vmatprep.mubr.msk.bf16.mxu1 %vm1785_vm5, %v7403_v20  ;;  %6154 = vmatprep.mubr.msk.bf16.mxu0 %vm1785_vm5, %v7317_v60  ;;  %v1228_v15 = vrot.slane %v1226_v40, 5  ;;  %v1247_v60 = vshrl.u32 %v7235_v21, 16  ;;  %v1262_v21 = vrot.slane %v1260_v51, 4  ;;  %v1268_v29 = vrot.slane %v1266_v3, 5  ;;  %v7553_v40 = vld [vmem:[#allocation2 + $0x34] sm:$0xf] }
  0x88   : > { %6586 = vmatprep.subr.msk.bf16.mxu0 %vm1834_vm0, %v7484_v35  ;;  %v1392_v47 = vshrl.u32 %v7549_v13, 16  ;;  %v1346_v51 = vrot.slane %v1344_v0, 4  ;;  %v1304_v3 = vld [vmem:[#allocation2 + $0x20] sm:$0x1] }
  0x89   : > { %v1229_v25 = vor.u32 %v1228_v15, %v1225_v4  ;;  %v1249_v62 = vrot.slane %v1247_v60, 4  ;;  %v1395_v4 = vshll.u32 %v7549_v13, 16  ;;  %v1401_v15 = vshll.u32 %v7553_v40, 16 }
  0x8a   : > { %v1405_v60 = vshrl.u32 %v7553_v40, 16  ;;  %v7571_v35 = vrot.slane %v1392_v47, 4 }
  0x8b   : > { %v1230_v58 = vrot.slane %v1229_v25, 4  ;;  %v1253_v30 = vor.u32 %v1252_v5, %v1249_v62  ;;  %v7573_v62 = vld [vmem:[#allocation2 + $0x40] sm:$0xf]  ;;  %v1416_v5 = vshrl.u32 %v7569_v1, 16 }
  0x8c   : > { %v1425_v18 = vshll.u32 %v7573_v62, 16 }
  0x8d   : > { %6155 = vmatmul.mubr.msk.bf16.gmra.mrb[36].mxu0 %vm1785_vm5, %v7371_v11  ;;  %v1239_v11 = vor.u32 %v1238_v54, %v1234_v19  ;;  %v1235_v52 = vsel %vm7128_vm8, %v1230_v58, %v1234_v19  ;;  %v1254_v32 = vrot.slane %v1253_v30, 4  ;;  %v1419_v58 = vshll.u32 %v7569_v1, 16 }
  0x8e   : > { %6303 = vmatmul.mubr.msk.bf16.gmra.mrb[32].mxu1 %vm1785_vm5, %v7443_v23  ;;  %6158 = vmatprep.mubr.msk.bf16.mxu0 %vm1785_vm5, %v7373_v2  ;;  %v1263_v2 = vor.u32 %v1262_v21, %v1258_v49  ;;  %v7580_v21 = vrot.slane %v1401_v15, 5  ;;  %v6673_v30 = vmov 0.0|0.0   ;;  %v7605_v15 = vld [vmem:[%s9130_s2 + $0x20] sm:$0xf] }
  0x8f   : > { %6306 = vmatprep.mubr.msk.bf16.mxu1 %vm1785_vm5, %v7465_v6  ;;  %v1240_v41 = vrot.slane %v1239_v11, 4  ;;  %v1259_v12 = vsel %vm7128_vm8, %v1254_v32, %v1258_v49  ;;  %v7578_v49 = vrot.slane %v1395_v4, 5  ;;  %v7597_v22 = vrot.slane %v1419_v58, 5  ;;  %9237 = vst [vmem:[#allocation17_spill] sm:$0xff] %v7605_v15  ;;  %v7621_v58 = vld [vmem:[#allocation2 + $0x60] sm:$0xf] }
  0x90   : > { %v1264_v50 = vrot.slane %v1263_v2, 4  ;;  %v5274_v2 = vcombine.low %v6673_v30, %v6673_v30  ;;  %9241 = vst [vmem:[#allocation19_spill] sm:$0xff] %v7621_v58 }
  0x91   : > { %v1245_v24 = vsel %vm7128_vm8, %v1240_v41, %v1244_v17  ;;  %v1303_v41 = vld [vmem:[#allocation2 + $0x14] sm:$0x1]  ;;  %v7587_v17 = vrot.slane %v1405_v60, 4 }
  0x92   : > { %v1269_v45 = vsel %vm7128_vm8, %v1264_v50, %v1268_v29  ;;  %v1336_v50 = vor.u32 %v1335_v56, %v1331_v9  ;;  %v1339_v29 = vshll.u32 %v1303_v41, 16  ;;  %779 = vst.msk [vmem:[#allocation2 + $0xc0] sm:$0xf] %vm737_vm4, %v5274_v2  ;;  %v7612_v56 = vld [vmem:[#allocation2 + $0x54] sm:$0xf] }
  0x93   : > { %v7566_v19 = vcombine.low %v1259_v12, %v1269_v45  ;;  %v7593_v12 = vrot.slane %v1416_v5, 4  ;;  %v7599_v45 = vld [vmem:[#allocation2 + $0x48] sm:$0xf]  ;;  %9239 = vst [vmem:[#allocation13_spill] sm:$0xff] %v7612_v56  ;;  %v7619_v5 = vld [vmem:[#allocation2 + $0x58] sm:$0xf] }
  0x94   : > { %9236 = vst [vmem:[#allocation15_spill] sm:$0xff] %v7599_v45  ;;  %v1337_v0 = vrot.slane %v1336_v50, 4  ;;  %v1443_v60 = vshll.u32 %v7599_v45, 16  ;;  %9240 = vst [vmem:[#allocation26_spill] sm:$0xff] %v7619_v5  ;;  %v1464_v2 = vshrl.u32 %v7612_v56, 16  ;;  %v9245_v50 = vld [vmem:[#allocation6_spill] sm:$0xff] }
  0x95   : > { %6159 = vmatmul.mubr.msk.bf16.gmra.mrb[40].mxu0 %vm1785_vm5, %v7419_v44  ;;  %v7522_v44 = vcombine.low %v1235_v52, %v1245_v24  ;;  %v9235_v52 = vld [vmem:[#allocation4_spill] sm:$0xff]  ;;  %v1429_v24 = vshrl.u32 %v7573_v62, 16 }
  0x96   : > { %6307 = vmatmul.mubr.msk.bf16.gmra.mrb[36].mxu1 %vm1785_vm5, %v7469_v26  ;;  %6162 = vmatprep.mubr.msk.bf16.mxu0 %vm1785_vm5, %v7430_v8  ;;  %v7525_v8 = vld [vmem:[#allocation2 + $0xc] sm:$0xf] }
  0x97   : > { %6310 = vmatprep.mubr.msk.bf16.mxu1 %vm1785_vm5, %v7473_v57  ;;  %v1320_v31 = vshrl.u32 %v7525_v8, 16  ;;  %v1323_v59 = vshll.u32 %v7525_v8, 16 }
  0x99   : > { %v1322_v54 = vrot.slane %v1320_v31, 4  ;;  %v1325_v36 = vrot.slane %v1323_v59, 5  ;;  %v1363_v59 = vshll.u32 %v1304_v3, 16  ;;  %v7634_v3 = vld [vmem:[#allocation2 + $0x64] sm:$0xf] }
  0x9a   : > { %9243 = vst [vmem:[#allocation16_spill] sm:$0xff] %v7634_v3 }
  0x9b   : > { %v1326_v32 = vor.u32 %v1325_v36, %v1322_v54  ;;  %v1365_v4 = vrot.slane %v1363_v59, 5  ;;  %v7607_v54 = vrot.slane %v1425_v18, 5  ;;  %v7609_v36 = vld [vmem:[#allocation2 + $0x4c] sm:$0xf]  ;;  %v9246_v59 = vld [vmem:[#allocation8_spill] sm:$0xff] }
  0x9c   : > { %9238 = vst [vmem:[#allocation12_spill] sm:$0xff] %v7609_v36 }
  0x9d   : > { %6163 = vmatmul.mubr.msk.bf16.gmra.mrb[44].mxu0 %vm1785_vm5, %v5318_v38  ;;  %v7540_v38 = vld [vmem:[#allocation2 + $0x1c] sm:$0xf]  ;;  %v1327_v14 = vrot.slane %v1326_v32, 4 }
  0x9e   : > { %6311 = vmatmul.mubr.msk.bf16.gmra.mrb[40].mxu1 %vm1785_vm5, %v7479_v61  ;;  %6166 = vmatprep.mubr.msk.bf16.mxu0 %vm1785_vm5, %v7403_v20  ;;  %v1347_v20 = vshll.u32 %v7529_v16, 16  ;;  %v1353_v43 = vshll.u32 %v7540_v38, 16  ;;  %v1357_v48 = vshrl.u32 %v7540_v38, 16 }
  0x9f   : > { %6314 = vmatprep.mubr.msk.bf16.mxu1 %vm1785_vm5, %v7522_v44 }
  0xa0   : > { %v1349_v25 = vrot.slane %v1347_v20, 5  ;;  %v1355_v11 = vrot.slane %v1353_v43, 5  ;;  %v1359_v63 = vrot.slane %v1357_v48, 4  ;;  %v1341_v20 = vrot.slane %v1339_v29, 5 }
  0xa1   : > { %v1440_v43 = vshrl.u32 %v7599_v45, 16  ;;  %v1488_v29 = vshrl.u32 %v7621_v58, 16 }
  0xa2   : > { %v1360_v31 = vor.u32 %v1359_v63, %v1355_v11  ;;  %v1449_v63 = vshll.u32 %v7609_v36, 16 }
  0xa4   : > { %v1361_v47 = vrot.slane %v1360_v31, 4  ;;  %v1306_v31 = vld [vmem:[#allocation2 + $0x38] sm:$0x1] }
  0xa5   : > { %6167 = vmatmul.mubr.msk.bf16.gmra.mrb[48].mxu0 %vm1785_vm5, %v7443_v23  ;;  %v5275_v23 = vcombine.high %v6673_v30, %v6673_v30 }
  0xa6   : > { %6315 = vmatmul.mubr.msk.bf16.gmra.mrb[44].mxu1 %vm1785_vm5, %v7566_v19  ;;  %6170 = vmatprep.mubr.msk.bf16.mxu0 %vm1785_vm5, %v7465_v6  ;;  %v1350_v6 = vor.u32 %v1349_v25, %v1346_v51  ;;  %v1332_v51 = vsel %vm7128_vm8, %v1327_v14, %v1331_v9  ;;  %v1342_v25 = vsel %vm7128_vm8, %v1337_v0, %v1341_v20  ;;  %v1453_v9 = vshrl.u32 %v7609_v36, 16 }
  0xa7   : > { %6320 = vmatprep.mubr.msk.bf16.mxu1 %vm1785_vm5, %v9235_v52  ;;  %780 = vst.msk [vmem:[#allocation2 + $0xc4] sm:$0xf] %vm737_vm4, %v5275_v23  ;;  %v7623_v41 = vcombine.low %v1332_v51, %v1342_v25  ;;  %v1366_v30 = vsel %vm7128_vm8, %v1361_v47, %v1365_v4  ;;  %v1467_v23 = vshll.u32 %v7612_v56, 16  ;;  %v1431_v14 = vrot.slane %v1429_v24, 4 }
  0xa8   : > { %v1351_v48 = vrot.slane %v1350_v6, 4  ;;  %v1491_v6 = vshll.u32 %v7621_v58, 16  ;;  %v1497_v0 = vshll.u32 %v7634_v3, 16  ;;  %v1408_v20 = vor.u32 %v7587_v17, %v7580_v21  ;;  %v9251_v58 = vld [vmem:[#allocation11_spill] sm:$0xff] }
  0xa9   : > { %9242 = vst [vmem:[#allocation23_spill] sm:$0xff] %v7623_v41  ;;  %v1445_v47 = vrot.slane %v1443_v60, 5  ;;  %v1501_v4 = vshrl.u32 %v7634_v3, 16  ;;  %v1451_v51 = vrot.slane %v1449_v63, 5  ;;  %v1455_v25 = vrot.slane %v1453_v9, 4 }
  0xaa   : > { %v1356_v18 = vsel %vm7128_vm8, %v1351_v48, %v1355_v11  ;;  %v1473_v11 = vshll.u32 %v7619_v5, 16  ;;  %v1442_v48 = vrot.slane %v1440_v43, 4  ;;  %v7659_v24 = vrot.slane %v1467_v23, 5  ;;  %v7673_v60 = vld [vmem:[#allocation2 + $0x70] sm:$0xf] }
  0xab   : > { %v7636_v32 = vcombine.low %v1356_v18, %v1366_v30  ;;  %v7657_v18 = vrot.slane %v1464_v2, 4  ;;  %v7667_v17 = vrot.slane %v1491_v6, 5  ;;  %v7671_v43 = vrot.slane %v1497_v0, 5  ;;  %9248 = vst [vmem:[#allocation24_spill] sm:$0xff] %v7673_v60 }
  0xac   : > { %v7661_v30 = vrot.slane %v1473_v11, 5  ;;  %v1409_v2 = vrot.slane %v1408_v20, 4  ;;  %v7676_v23 = vrot.slane %v1501_v4, 4  ;;  %v1307_v20 = vld [vmem:[#allocation2 + $0x44] sm:$0x1]  ;;  %v1446_v3 = vor.u32 %v1445_v47, %v1442_v48 }
  0xad   : > { %6171 = vmatmul.mubr.msk.bf16.gmra.mrb[52].mxu0 %vm1785_vm5, %v7469_v26  ;;  %9244 = vst [vmem:[#allocation18_spill] sm:$0xff] %v7636_v32  ;;  %v1477_v26 = vshrl.u32 %v7619_v5, 16  ;;  %v7669_v32 = vld [vmem:[#allocation2 + $0x6c] sm:$0xf]  ;;  %v9250_v4 = vld [vmem:[#allocation10_spill] sm:$0xff]  ;;  %v1456_v56 = vor.u32 %v1455_v25, %v1451_v51 }
  0xae   : > { %6321 = vmatmul.mubr.msk.bf16.vlgmr.msra.gmra.mrb[16].mxu1 %vm1785_vm5, %v9245_v50  ;;  %6174 = vmatprep.mubr.msk.bf16.mxu0 %vm1785_vm5, %v7473_v57  ;;  %v1398_v57 = vor.u32 %v7578_v49, %v7571_v35  ;;  %v7665_v49 = vrot.slane %v1488_v29, 4  ;;  %9247 = vst [vmem:[#allocation27_spill] sm:$0xff] %v7669_v32  ;;  %v1512_v63 = vshrl.u32 %v7669_v32, 16  ;;  %v1515_v11 = vshll.u32 %v7669_v32, 16  ;;  %v7680_v29 = vld [vmem:[#allocation2 + $0x78] sm:$0xf] }
  0xaf   : > { %6353 = vmatpush3.bf16.msra.mxu1 %v7558_v46  ;;  %6324 = vmatprep.mubr.msk.bf16.mxu1 %vm1785_vm5, %v9246_v59  ;;  %v1411_v46 = vshll.u32 %v1306_v31, 16  ;;  %v7663_v35 = vrot.slane %v1477_v26, 4  ;;  %v1521_v26 = vshll.u32 %v7673_v60, 16  ;;  %9249 = vst [vmem:[#allocation25_spill] sm:$0xff] %v7680_v29  ;;  %v1525_v31 = vshrl.u32 %v7673_v60, 16 }
  0xb0   : > { %6591 = vmatprep.subr.msk.bf16.mxu1 %vm1834_vm0, %v7605_v15  ;;  %v1399_v9 = vrot.slane %v1398_v57, 4  ;;  %v1536_v0 = vshrl.u32 %v7680_v29, 16  ;;  %v1539_v41 = vshll.u32 %v7680_v29, 16  ;;  %v1432_v32 = vor.u32 %v1431_v14, %v7607_v54  ;;  %v1308_v60 = vld [vmem:[#allocation2 + $0x50] sm:$0x1] }
  0xb1   : > { %v1413_v6 = vrot.slane %v1411_v46, 5  ;;  %v1422_v46 = vor.u32 %v7597_v22, %v7593_v12  ;;  %v1435_v29 = vshll.u32 %v1307_v20, 16  ;;  %v1447_v22 = vrot.slane %v1446_v3, 4 }
  0xb2   : > { %v1404_v57 = vsel %vm7128_vm8, %v1399_v9, %v7580_v21  ;;  %v7701_v21 = vld [vmem:[#allocation2 + $0x7c] sm:$0xf]  ;;  %v1457_v14 = vrot.slane %v1456_v56, 4  ;;  %v7707_v36 = vrot.slane %v1512_v63, 4  ;;  %v7709_v15 = vrot.slane %v1515_v11, 5 }
  0xb3   : > { %v1545_v5 = vshll.u32 %v7701_v21, 16  ;;  %v1437_v45 = vrot.slane %v1435_v29, 5  ;;  %v1549_v12 = vshrl.u32 %v7701_v21, 16  ;;  %v7716_v25 = vrot.slane %v1521_v26, 5  ;;  %v7732_v29 = vld [vmem:[#allocation2 + $0x88] sm:$0xf] }
  0xb4   : > { %v1452_v56 = vsel %vm7128_vm8, %v1447_v22, %v1451_v51  ;;  %v7726_v63 = vrot.slane %v1525_v31, 4  ;;  %v7728_v11 = vrot.slane %v1536_v0, 4  ;;  %v9255_v0 = vld [vmem:[#allocation14_spill] sm:$0xff]  ;;  %v1494_v22 = vor.u32 %v7667_v17, %v7665_v49 }
  0xb5   : > { %6175 = vmatmul.mubr.msk.bf16.gmra.mrb[56].mxu0 %vm1785_vm5, %v7479_v61  ;;  %v1414_v61 = vsel %vm7128_vm8, %v1409_v2, %v1413_v6  ;;  %v1423_v2 = vrot.slane %v1422_v46, 4  ;;  %v1433_v6 = vrot.slane %v1432_v32, 4  ;;  %v7718_v32 = vld [vmem:[#allocation2 + $0x84] sm:$0xf]  ;;  %v7738_v26 = vrot.slane %v1545_v5, 5 }
  0xb6   : > { %6325 = vmatmul.mubr.msk.bf16.gmra.mrb[20].mxu1 %vm1785_vm5, %v9250_v4  ;;  %6178 = vmatprep.mubr.msk.bf16.mxu0 %vm1785_vm5, %v7522_v44  ;;  %v7703_v9 = vcombine.low %v1404_v57, %v1414_v61  ;;  %v1459_v44 = vshll.u32 %v1308_v60, 16  ;;  %v7740_v57 = vrot.slane %v1549_v12, 4  ;;  %v1560_v51 = vshrl.u32 %v7718_v32, 16  ;;  %v1309_v61 = vld [vmem:[#allocation2 + $0x5c] sm:$0x1] }
  0xb7   : > { %6328 = vmatprep.mubr.msk.bf16.mxu1 %vm1785_vm5, %v9251_v58  ;;  %v1428_v48 = vsel %vm7128_vm8, %v1423_v2, %v7607_v54  ;;  %v1438_v47 = vsel %vm7128_vm8, %v1433_v6, %v1437_v45  ;;  %v7730_v54 = vrot.slane %v1539_v41, 5  ;;  %v1563_v31 = vshll.u32 %v7718_v32, 16  ;;  %v9256_v2 = vld [vmem:[#allocation20_spill] sm:$0xff]  ;;  %v7756_v12 = vld [vmem:[#allocation2 + $0x90] sm:$0xf] }
  0xb8   : > { %9252 = vst [vmem:[#allocation29_spill] sm:$0xff] %v7703_v9  ;;  %v1461_v20 = vrot.slane %v1459_v44, 5  ;;  %v7720_v60 = vcombine.low %v1428_v48, %v1438_v47  ;;  %v1569_v41 = vshll.u32 %v7732_v29, 16  ;;  %v1480_v5 = vor.u32 %v7663_v35, %v7661_v30  ;;  %v1310_v44 = vld [vmem:[#allocation2 + $0x68] sm:$0x1] }
  0xb9   : > { %v1483_v46 = vshll.u32 %v1309_v61, 16  ;;  %v1573_v6 = vshrl.u32 %v7732_v29, 16  ;;  %v1587_v47 = vshll.u32 %v7756_v12, 16 }
  0xba   : > { %9253 = vst [vmem:[#allocation30_spill] sm:$0xff] %v7720_v60  ;;  %v1462_v3 = vsel %vm7128_vm8, %v1457_v14, %v1461_v20  ;;  %v1504_v14 = vor.u32 %v7676_v23, %v7671_v43  ;;  %v1507_v20 = vshll.u32 %v1310_v44, 16  ;;  %v1481_v35 = vrot.slane %v1480_v5, 4  ;;  %v7776_v23 = vld [vmem:[%s9130_s2 + $0x4] sm:$0xf] }
  0xbb   : > { %v7734_v45 = vcombine.low %v1452_v56, %v1462_v3  ;;  %v1485_v48 = vrot.slane %v1483_v46, 5  ;;  %v1495_v56 = vrot.slane %v1494_v22, 4  ;;  %v7766_v60 = vrot.slane %v1563_v31, 5  ;;  %v7780_v5 = vld [vmem:[#allocation2 + $0x94] sm:$0xf] }
  0xbc   : > { %v1505_v3 = vrot.slane %v1504_v14, 4  ;;  %v1509_v61 = vrot.slane %v1507_v20, 5  ;;  %v7791_v44 = vrot.slane %v1573_v6, 4  ;;  %v7796_v14 = vld [vmem:[#allocation2 + $0xa0] sm:$0xf] }
  0xbd   : > { %9254 = vst [vmem:[#allocation3_spill] sm:$0xff] %v7734_v45  ;;  %6179 = vmatmul.mubr.msk.bf16.gmra.mrb[60].mxu0 %vm1785_vm5, %v7566_v19  ;;  %v1470_v19 = vor.u32 %v7659_v24, %v7657_v18  ;;  %v1584_v18 = vshrl.u32 %v7756_v12, 16  ;;  %v7764_v45 = vrot.slane %v1560_v51, 4  ;;  %v1486_v17 = vsel %vm7128_vm8, %v1481_v35, %v1485_v48  ;;  %v7782_v51 = vld [vmem:[#allocation2 + $0x9c] sm:$0xf] }
  0xbe   : > { %6329 = vmatmul.mubr.msk.bf16.gmra.mrb[24].mxu1 %vm1785_vm5, %v9255_v0  ;;  %6184 = vmatprep.mubr.msk.bf16.mxu0 %vm1785_vm5, %v9235_v52  ;;  %9257 = vst [vmem:[#allocation21_spill] sm:$0xff] %v7782_v51  ;;  %v1510_v46 = vsel %vm7128_vm8, %v1505_v3, %v1509_v61  ;;  %v1608_v35 = vshrl.u32 %v7782_v51, 16  ;;  %v1611_v6 = vshll.u32 %v7782_v51, 16  ;;  %v1311_v48 = vld [vmem:[#allocation2 + $0x74] sm:$0x1]  ;;  %v1518_v3 = vor.u32 %v7709_v15, %v7707_v36 }
  0xbf   : > { %6332 = vmatprep.mubr.msk.bf16.mxu1 %vm1785_vm5, %v9256_v2  ;;  %v1471_v24 = vrot.slane %v1470_v19, 4  ;;  %v7778_v19 = vrot.slane %v1569_v41, 5  ;;  %v7793_v22 = vrot.slane %v1584_v18, 4  ;;  %v1593_v41 = vshll.u32 %v7780_v5, 16  ;;  %v9260_v18 = vld [vmem:[#allocation28_spill] sm:$0xff] }
  0xc0   : > { %v1531_v61 = vshll.u32 %v1311_v48, 16  ;;  %v1552_v15 = vor.u32 %v7740_v57, %v7738_v26  ;;  %v1519_v48 = vrot.slane %v1518_v3, 4  ;;  %v7835_v57 = vrot.slane %v1608_v35, 4 }
  0xc1   : > { %v1476_v49 = vsel %vm7128_vm8, %v1471_v24, %v7661_v30  ;;  %v1500_v30 = vsel %vm7128_vm8, %v1495_v56, %v7671_v43  ;;  %v7802_v24 = vrot.slane %v1587_v47, 5  ;;  %v1597_v43 = vshrl.u32 %v7780_v5, 16 }
  0xc2   : > { %v7784_v31 = vcombine.low %v1476_v49, %v1486_v17  ;;  %v7798_v20 = vcombine.low %v1500_v30, %v1510_v46  ;;  %v1617_v56 = vshll.u32 %v7796_v14, 16  ;;  %v1528_v47 = vor.u32 %v7726_v63, %v7716_v25  ;;  %v1312_v49 = vld [vmem:[#allocation2 + $0x80] sm:$0x1]  ;;  %v7820_v46 = vld [vmem:[#allocation2 + $0xa8] sm:$0xf] }
  0xc3   : > { %v9261_v17 = vld [vmem:[#allocation5_spill] sm:$0xff]  ;;  %v1621_v30 = vshrl.u32 %v7796_v14, 16  ;;  %v1555_v36 = vshll.u32 %v1312_v49, 16  ;;  %v1632_v63 = vshrl.u32 %v7820_v46, 16  ;;  %v1595_v52 = vrot.slane %v1593_v41, 5 }
  0xc4   : > { %9258 = vst [vmem:[#allocation22_spill] sm:$0xff] %v7784_v31  ;;  %9259 = vst [vmem:[#allocation10_spill] sm:$0xff] %v7798_v20  ;;  %v1529_v20 = vrot.slane %v1528_v47, 4  ;;  %v1533_v31 = vrot.slane %v1531_v61, 5  ;;  %v1599_v51 = vrot.slane %v1597_v43, 4  ;;  %v7846_v43 = vrot.slane %v1611_v6, 5 }
  0xc5   : > { %6185 = vmatmul.mubr.msk.bf16.vlgmr.msra.gmra.mrb[32].mxu0 %vm1785_vm5, %v9245_v50  ;;  %v1557_v50 = vrot.slane %v1555_v36, 5  ;;  %v7837_v49 = vld [vmem:[#allocation2 + $0xac] sm:$0xf]  ;;  %v7848_v61 = vrot.slane %v1617_v56, 5  ;;  %v7858_v35 = vrot.slane %v1632_v63, 4  ;;  %v1566_v6 = vor.u32 %v7766_v60, %v7764_v45 }
  0xc6   : > { %6333 = vmatmul.mubr.msk.bf16.gmra.mrb[28].mxu1 %vm1785_vm5, %v9260_v18  ;;  %6217 = vmatpush3.bf16.msra.mxu0 %v7562_v42  ;;  %v1542_v42 = vor.u32 %v7730_v54, %v7728_v11  ;;  %v1524_v11 = vsel %vm7128_vm8, %v1519_v48, %v7716_v25  ;;  %v1534_v54 = vsel %vm7128_vm8, %v1529_v20, %v1533_v31  ;;  %v7850_v25 = vrot.slane %v1621_v30, 4  ;;  %v7852_v31 = vld [vmem:[#allocation2 + $0xb4] sm:$0xf]  ;;  %v1314_v30 = vld [vmem:[#allocation2 + $0x98] sm:$0x1] }
  0xc7   : > { %6336 = vmatprep.mubr.msk.bf16.mxu1 %vm1785_vm5, %v9261_v17  ;;  %6188 = vmatprep.mubr.msk.bf16.mxu0 %vm1785_vm5, %v9246_v59  ;;  %v1635_v17 = vshll.u32 %v7820_v46, 16  ;;  %v1553_v59 = vrot.slane %v1552_v15, 4  ;;  %v7839_v3 = vcombine.low %v1524_v11, %v1534_v54  ;;  %v1576_v56 = vor.u32 %v7791_v44, %v7778_v19  ;;  %v7875_v15 = vld [vmem:[#allocation2 + $0xb8] sm:$0xf] }
  0xc8   : > { %6587 = vmatprep.subr.msk.bf16.mxu0 %vm1834_vm0, %v7776_v23  ;;  %v1543_v9 = vrot.slane %v1542_v42, 4  ;;  %v1659_v36 = vshll.u32 %v7852_v31, 16  ;;  %v1590_v63 = vor.u32 %v7802_v24, %v7793_v22  ;;  %v1600_v48 = vor.u32 %v1599_v51, %v1595_v52  ;;  %v7889_v24 = vld [vmem:[#allocation2 + $0xc0] sm:$0xf] }
  0xc9   : > { %9262 = vst [vmem:[#allocation11_spill] sm:$0xff] %v7839_v3  ;;  %v1558_v41 = vsel %vm7128_vm8, %v1553_v59, %v1557_v50  ;;  %v7860_v42 = vrot.slane %v1635_v17, 5  ;;  %v1645_v50 = vshrl.u32 %v7837_v49, 16  ;;  %v1313_v59 = vld [vmem:[#allocation2 + $0x8c] sm:$0x1]  ;;  %v1603_v11 = vshll.u32 %v1314_v30, 16 }
  0xca   : > { %v1548_v47 = vsel %vm7128_vm8, %v1543_v9, %v7738_v26  ;;  %v1641_v9 = vshll.u32 %v7837_v49, 16  ;;  %v1656_v26 = vshrl.u32 %v7852_v31, 16  ;;  %v1579_v17 = vshll.u32 %v1313_v59, 16 }
  0xcb   : > { %v7854_v20 = vcombine.low %v1548_v47, %v1558_v41  ;;  %v1665_v54 = vshll.u32 %v7875_v15, 16  ;;  %v1567_v60 = vrot.slane %v1566_v6, 4  ;;  %v1577_v45 = vrot.slane %v1576_v56, 4 }
  0xcc   : > { %v1581_v47 = vrot.slane %v1579_v17, 5  ;;  %v1643_v44 = vrot.slane %v1641_v9, 5  ;;  %v1591_v41 = vrot.slane %v1590_v63, 4  ;;  %v1601_v59 = vrot.slane %v1600_v48, 4  ;;  %v7899_v17 = vld [vmem:[#allocation2 + $0xc4] sm:$0xf] }
  0xcd   : > { %9263 = vst [vmem:[#allocation14_spill] sm:$0xff] %v7854_v20  ;;  %6189 = vmatmul.mubr.msk.bf16.gmra.mrb[36].mxu0 %vm1785_vm5, %v9250_v4  ;;  %v1605_v20 = vrot.slane %v1603_v11, 5  ;;  %v1647_v3 = vrot.slane %v1645_v50, 4  ;;  %v1669_v22 = vshrl.u32 %v7875_v15, 16  ;;  %v7897_v56 = vrot.slane %v1665_v54, 5 }
  0xce   : > { %6337 = vmatmul.mubr.msk.bf16.gmra.mrb[32].mxu1 %vm1785_vm5, %v6890_v55  ;;  %6192 = vmatprep.mubr.msk.bf16.mxu0 %vm1785_vm5, %v9251_v58  ;;  %v1572_v55 = vsel %vm7128_vm8, %v1567_v60, %v7778_v19  ;;  %v1582_v51 = vsel %vm7128_vm8, %v1577_v45, %v1581_v47  ;;  %v1596_v9 = vsel %vm7128_vm8, %v1591_v41, %v1595_v52  ;;  %v1680_v19 = vshrl.u32 %v7889_v24, 16  ;;  %v832_v63 = vld [vmem:[#allocation2 + $0xc8] sm:$0x1] }
  0xcf   : > { %6340 = vmatprep.mubr.msk.bf16.mxu1 %vm1785_vm5, %v6972_v10  ;;  %v7881_v10 = vrot.slane %v1656_v26, 4  ;;  %v7891_v6 = vcombine.low %v1572_v55, %v1582_v51  ;;  %v1606_v50 = vsel %vm7128_vm8, %v1601_v59, %v1605_v20  ;;  %v1661_v26 = vrot.slane %v1659_v36, 5  ;;  %v1315_v36 = vld [vmem:[#allocation2 + $0xa4] sm:$0x1] }
  0xd0   : > { %v7902_v30 = vcombine.low %v1596_v9, %v1606_v50  ;;  %v7908_v55 = vcombine.low %v7525_v8, %v7527_v28  ;;  %v1683_v52 = vshll.u32 %v7889_v24, 16  ;;  %v1689_v20 = vshll.u32 %v7899_v17, 16  ;;  %v1316_v28 = vld [vmem:[#allocation2 + $0xb0] sm:$0x1] }
  0xd1   : > { %v1614_v48 = vor.u32 %v7846_v43, %v7835_v57  ;;  %v1624_v11 = vor.u32 %v7850_v25, %v7848_v61  ;;  %v1627_v8 = vshll.u32 %v1315_v36, 16  ;;  %v833_v54 = vsel %vm6777_vm3, 0, %v832_v63 }
  0xd2   : > { %9264 = vst [vmem:[#allocation20_spill] sm:$0xff] %v7902_v30  ;;  %v1693_v60 = vshrl.u32 %v7899_v17, 16  ;;  %v1638_v45 = vor.u32 %v7860_v42, %v7858_v35  ;;  %v1648_v47 = vor.u32 %v1647_v3, %v1643_v44  ;;  %v1651_v41 = vshll.u32 %v1316_v28, 16  ;;  %834 = vst [vmem:[#allocation2 + $0xc8] sm:$0x1] %v833_v54 }
  0xd3   : > { %v1671_v57 = vrot.slane %v1669_v22, 4  ;;  %v1615_v43 = vrot.slane %v1614_v48, 4  ;;  %v1625_v59 = vrot.slane %v1624_v11, 4  ;;  %v1629_v25 = vrot.slane %v1627_v8, 5  ;;  %v7950_v11 = vld [vmem:[#allocation2 + $0x24] sm:$0xf] }
  0xd4   : > { %v1682_v51 = vrot.slane %v1680_v19, 4  ;;  %v1639_v9 = vrot.slane %v1638_v45, 4  ;;  %v1649_v50 = vrot.slane %v1648_v47, 4  ;;  %v1653_v7 = vrot.slane %v1651_v41, 5 }
  0xd5   : > { %6193 = vmatmul.mubr.msk.bf16.gmra.mrb[40].mxu0 %vm1785_vm5, %v9255_v0  ;;  %v1685_v36 = vrot.slane %v1683_v52, 5  ;;  %v1691_v63 = vrot.slane %v1689_v20, 5  ;;  %v1620_v30 = vsel %vm7128_vm8, %v1615_v43, %v7848_v61  ;;  %v1630_v35 = vsel %vm7128_vm8, %v1625_v59, %v1629_v25  ;;  %v1317_v52 = vld [vmem:[#allocation2 + $0xbc] sm:$0x1] }
  0xd6   : > { %6341 = vmatmul.mubr.msk.bf16.gmra.mrb[36].mxu1 %vm1785_vm5, %v6995_v33  ;;  %6196 = vmatprep.mubr.msk.bf16.mxu0 %vm1785_vm5, %v9256_v2  ;;  %v1695_v3 = vrot.slane %v1693_v60, 4  ;;  %v7932_v42 = vcombine.low %v1620_v30, %v1630_v35  ;;  %v1644_v22 = vsel %vm7128_vm8, %v1639_v9, %v1643_v44  ;;  %v1654_v19 = vsel %vm7128_vm8, %v1649_v50, %v1653_v7  ;;  %v7952_v60 = vld [vmem:[#allocation2 + $0x28] sm:$0xf]  ;;  %v9267_v35 = vld [vmem:[#allocation15_spill] sm:$0xff] }
  0xd7   : > { %6344 = vmatprep.mubr.msk.bf16.mxu1 %vm1785_vm5, %v7067_v53  ;;  %v7938_v48 = vcombine.low %v1644_v22, %v1654_v19  ;;  %v1662_v61 = vor.u32 %v1661_v26, %v7881_v10  ;;  %v1672_v30 = vor.u32 %v1671_v57, %v7897_v56  ;;  %v1675_v44 = vshll.u32 %v1317_v52, 16  ;;  %v9268_v22 = vld [vmem:[#allocation26_spill] sm:$0xff]  ;;  %v9272_v52 = vld [vmem:[#allocation24_spill] sm:$0xff] }
  0xd8   : > { %v1686_v8 = vor.u32 %v1685_v36, %v1682_v51  ;;  %v1696_v28 = vor.u32 %v1695_v3, %v1691_v63  ;;  %v5362_v10 = vcombine.low %v7529_v16, %v7540_v38  ;;  %v2724_v59 = vsel %vm1834_vm0, %v7776_v23, 0  ;;  %v9265_v36 = vld [vmem:[#allocation17_spill] sm:$0xff] }
  0xd9   : > { %v1318_v20 = vld [vmem:[#allocation2 + $0xc8] sm:$0x1]  ;;  %v1663_v45 = vrot.slane %v1662_v61, 4  ;;  %v1673_v47 = vrot.slane %v1672_v30, 4  ;;  %v1677_v41 = vrot.slane %v1675_v44, 5  ;;  %v5363_v9 = vcombine.low %v7950_v11, %v7952_v60  ;;  %v9273_v61 = vld [vmem:[#allocation27_spill] sm:$0xff] }
  0xda   : > { %v1699_v54 = vshll.u32 %v1318_v20, 16  ;;  %v1687_v26 = vrot.slane %v1686_v8, 4  ;;  %v1697_v57 = vrot.slane %v1696_v28, 4  ;;  %v5364_v23 = vcombine.low %v7549_v13, %v7553_v40  ;;  %v9269_v13 = vld [vmem:[#allocation13_spill] sm:$0xff] }
  0xdb   : > { %v1668_v25 = vsel %vm7128_vm8, %v1663_v45, %v7897_v56  ;;  %v1678_v51 = vsel %vm7128_vm8, %v1673_v47, %v1677_v41  ;;  %v5365_v56 = vcombine.low %v7569_v1, %v7573_v62  ;;  %v5367_v40 = vcombine.low %v9269_v13, %v9268_v22  ;;  %v9270_v1 = vld [vmem:[#allocation16_spill] sm:$0xff]  ;;  %v9271_v62 = vld [vmem:[#allocation19_spill] sm:$0xff] }
  0xdc   : > { %v1701_v43 = vrot.slane %v1699_v54, 5  ;;  %v7965_v50 = vcombine.low %v1668_v25, %v1678_v51  ;;  %v1692_v16 = vsel %vm7128_vm8, %v1687_v26, %v1691_v63  ;;  %v3515_v63 = vsel %vm1834_vm0, %v9265_v36, 0 }
  0xdd   : > { %6197 = vmatmul.mubr.msk.bf16.gmra.mrb[44].mxu0 %vm1785_vm5, %v9260_v18  ;;  %v5368_v19 = vcombine.low %v9271_v62, %v9270_v1  ;;  %v5369_v30 = vcombine.low %v9273_v61, %v9272_v52  ;;  %v5372_v52 = vcombine.low %v7756_v12, %v7780_v5  ;;  %v9275_v61 = vld [vmem:[#allocation21_spill] sm:$0xff] }
  0xde   : > { %6345 = vmatmul.mubr.msk.bf16.gmra.mrb[40].mxu1 %vm1785_vm5, %v9219_v34  ;;  %6218 = vmatprep.mubr.msk.bf16.mxu0 %vm1785_vm5, %v7908_v55  ;;  %v1702_v38 = vsel %vm7128_vm8, %v1697_v57, %v1701_v43 }
  0xdf   : > { %6348 = vmatprep.mubr.msk.bf16.mxu1 %vm1785_vm5, %v9222_v27  ;;  %v7971_v7 = vcombine.low %v1692_v16, %v1702_v38  ;;  %v5371_v38 = vcombine.low %v7718_v32, %v7732_v29 }
  0xe5   : > { %6219 = vmatmul.mubr.msk.bf16.vlgmr.msra.gmra.mrb[64].mxu0 %vm1785_vm5, %v5362_v10 }
  0xe6   : > { %6349 = vmatmul.mubr.msk.bf16.gmra.mrb[44].mxu1 %vm1785_vm5, %v7260_v37  ;;  %6251 = vmatpush3.bf16.msra.mxu0 %v2724_v59 }
  0xe7   : > { %6354 = vmatprep.mubr.msk.bf16.mxu1 %vm1785_vm5, %v7908_v55  ;;  %6222 = vmatprep.mubr.msk.bf16.mxu0 %vm1785_vm5, %v5363_v9  ;;  %v9266_v55 = vld [vmem:[#allocation12_spill] sm:$0xff] }
  0xe8   : > { %v5366_v3 = vcombine.low %v9267_v35, %v9266_v55 }
  0xed   : > { %6223 = vmatmul.mubr.msk.bf16.gmra.mrb[68].mxu0 %vm1785_vm5, %v5364_v23 }
  0xee   : > { %6355 = vmatmul.mubr.msk.bf16.vlgmr.msra.gmra.mrb[16].mxu1 %vm1785_vm5, %v5362_v10  ;;  %6226 = vmatprep.mubr.msk.bf16.mxu0 %vm1785_vm5, %v5365_v56 }
  0xef   : > { %6387 = vmatpush3.bf16.msra.mxu1 %v3515_v63  ;;  %6358 = vmatprep.mubr.msk.bf16.mxu1 %vm1785_vm5, %v5363_v9  ;;  %v9274_v9 = vld [vmem:[#allocation25_spill] sm:$0xff] }
  0xf0   : > { %v5370_v16 = vcombine.low %v9274_v9, %v7701_v21 }
  0xf5   : > { %6227 = vmatmul.mubr.msk.bf16.gmra.mrb[72].mxu0 %vm1785_vm5, %v5366_v3 }
  0xf6   : > { %6359 = vmatmul.mubr.msk.bf16.gmra.mrb[20].mxu1 %vm1785_vm5, %v5364_v23  ;;  %6230 = vmatprep.mubr.msk.bf16.mxu0 %vm1785_vm5, %v5367_v40 }
  0xf7   : > { %6362 = vmatprep.mubr.msk.bf16.mxu1 %vm1785_vm5, %v5365_v56 }
  0xfd   : > { %v6118_v44 = vpop.f32.mrb[0].mxu0  ;;  %6231 = vmatmul.mubr.msk.bf16.gmra.mrb[76].mxu0 %vm1785_vm5, %v5368_v19 }
  0xfe   : > { %v5756_v20 = vpack.c.bf16 %v6118_v44, %v6118_v44  ;;  %v1872_v8 = vpop.f32.mrb[1].mxu0  ;;  %6363 = vmatmul.mubr.msk.bf16.gmra.mrb[24].mxu1 %vm1785_vm5, %v5366_v3  ;;  %6234 = vmatprep.mubr.msk.bf16.mxu0 %vm1785_vm5, %v5369_v30  ;;  %v4634_v47 = vmul.f32 %v6118_v44, %v6118_v44  ;;  %v8013_v41 = vpop.f32.mrb[0].mxu1  ;;  %v4356_v36 = vsel %vm1785_vm5, %v6118_v44, 0.0  ;;  %v5373_v44 = vcombine.low %v9275_v61, %v7796_v14 }
  0xff   : > { %v5754_v28 = vpack.c.bf16 %v1872_v8, %v1872_v8  ;;  %v4632_v54 = vmul.f32 %v1872_v8, %v1872_v8  ;;  %v6119_v45 = vpop.f32.mrb[2].mxu0  ;;  %6366 = vmatprep.mubr.msk.bf16.mxu1 %vm1785_vm5, %v5367_v40  ;;  %v4353_v57 = vsel %vm1785_vm5, %v1872_v8, 0.0  ;;  %v8018_v43 = vpop.f32.mrb[1].mxu1  ;;  %v5374_v8 = vcombine.low %v7820_v46, %v7837_v49 }
 0x100   : > { %3840 = vst.msk [vmem:[%s8005_s13 + $0x8] sm:$0xf] %vm737_vm4, %v5756_v20  ;;  %v5757_v10 = vpack.c.bf16 %v6119_v45, %v6119_v45  ;;  %v1875_v26 = vpop.f32.mrb[3].mxu0  ;;  %v8027_v23 = vpop.f32.mrb[2].mxu1  ;;  %v4635_v55 = vmul.f32 %v6119_v45, %v6119_v45  ;;  %v4667_v32 = vsel %vm1785_vm5, %v4634_v47, 0.0  ;;  %v4358_v29 = vsel %vm1785_vm5, %v6119_v45, 0.0 }
 0x101   : > { %3838 = vst.msk [vmem:[%s8005_s13] sm:$0xf] %vm737_vm4, %v5754_v28  ;;  %v5755_v59 = vpack.c.bf16 %v1875_v26, %v1875_v26  ;;  %v4354_v25 = vsel %vm1785_vm5, %v1875_v26, 0.0  ;;  %v4633_v51 = vmul.f32 %v1875_v26, %v1875_v26  ;;  %v4664_v63 = vsel %vm1785_vm5, %v4632_v54, 0.0  ;;  %v8034_v3 = vpop.f32.mrb[3].mxu1 }
 0x102   : > { %3841 = vst.msk [vmem:[%s8005_s13 + $0xc] sm:$0xf] %vm737_vm4, %v5757_v10  ;;  %v4355_v56 = vadd.f32 %v4354_v25, %v4353_v57  ;;  %v4669_v1 = vsel %vm1785_vm5, %v4635_v55, 0.0  ;;  %v5375_v45 = vcombine.low %v7852_v31, %v7875_v15 }
 0x103   : > { %3839 = vst.msk [vmem:[%s8005_s13 + $0x4] sm:$0xf] %vm737_vm4, %v5755_v59  ;;  %v4665_v35 = vsel %vm1785_vm5, %v4633_v51, 0.0 }
 0x104   : > { %v4357_v21 = vadd.f32 %v4356_v36, %v4355_v56  ;;  %v4666_v22 = vadd.f32 %v4665_v35, %v4664_v63  ;;  %v1371_v36 = vshll.u32 %v7950_v11, 16 }
 0x105   : > { %6235 = vmatmul.mubr.msk.bf16.gmra.mrb[80].mxu0 %vm1785_vm5, %v5370_v16 }
 0x106   : > { %v4668_v13 = vadd.f32 %v4667_v32, %v4666_v22  ;;  %v4359_v40 = vadd.f32 %v4358_v29, %v4357_v21  ;;  %6367 = vmatmul.mubr.msk.bf16.gmra.mrb[28].mxu1 %vm1785_vm5, %v5368_v19  ;;  %6238 = vmatprep.mubr.msk.bf16.mxu0 %vm1785_vm5, %v5371_v38  ;;  %v1377_v21 = vshll.u32 %v7952_v60, 16  ;;  %v1381_v22 = vshrl.u32 %v7952_v60, 16  ;;  %v1305_v60 = vld [vmem:[#allocation2 + $0x2c] sm:$0x1] }
 0x107   : > { %6370 = vmatprep.mubr.msk.bf16.mxu1 %vm1785_vm5, %v5369_v30 }
 0x108   : > { %v4670_v62 = vadd.f32 %v4669_v1, %v4668_v13 }
 0x10d   : > { %6239 = vmatmul.mubr.msk.bf16.gmra.mrb[84].mxu0 %vm1785_vm5, %v5372_v52 }
 0x10e   : > { %6371 = vmatmul.mubr.msk.bf16.gmra.mrb[32].mxu1 %vm1785_vm5, %v5370_v16  ;;  %6242 = vmatprep.mubr.msk.bf16.mxu0 %vm1785_vm5, %v5373_v44  ;;  %v6122_v19 = vpop.f32.mrb[4].mxu0 }
 0x10f   : > { %6374 = vmatprep.mubr.msk.bf16.mxu1 %vm1785_vm5, %v5371_v38  ;;  %v5760_v20 = vpack.c.bf16 %v6122_v19, %v6122_v19  ;;  %v1888_v30 = vpop.f32.mrb[5].mxu0  ;;  %v4638_v51 = vmul.f32 %v6122_v19, %v6122_v19  ;;  %v1368_v38 = vshrl.u32 %v7950_v11, 16  ;;  %v4364_v56 = vsel %vm1785_vm5, %v6122_v19, 0.0 }
 0x110   : > { %v8053_v12 = vpop.f32.mrb[4].mxu1  ;;  %v5758_v5 = vpack.c.bf16 %v1888_v30, %v1888_v30  ;;  %v4360_v14 = vsel %vm1785_vm5, %v1888_v30, 0.0  ;;  %v4636_v28 = vmul.f32 %v1888_v30, %v1888_v30  ;;  %v6123_v54 = vpop.f32.mrb[6].mxu0  ;;  %v1379_v19 = vrot.slane %v1377_v21, 5 }
 0x111   : > { %3844 = vst.msk [vmem:[%s8005_s13 + $0x18] sm:$0xf] %vm737_vm4, %v5760_v20  ;;  %v4361_v47 = vadd.f32 %v4360_v14, %v4359_v40  ;;  %v8060_v10 = vpop.f32.mrb[5].mxu1  ;;  %v5761_v26 = vpack.c.bf16 %v6123_v54, %v6123_v54  ;;  %v1891_v57 = vpop.f32.mrb[7].mxu0  ;;  %v4639_v63 = vmul.f32 %v6123_v54, %v6123_v54  ;;  %v4366_v32 = vsel %vm1785_vm5, %v6123_v54, 0.0 }
 0x112   : > { %3842 = vst.msk [vmem:[%s8005_s13 + $0x10] sm:$0xf] %vm737_vm4, %v5758_v5  ;;  %v4671_v46 = vsel %vm1785_vm5, %v4636_v28, 0.0  ;;  %v8065_v49 = vpop.f32.mrb[6].mxu1  ;;  %v5759_v59 = vpack.c.bf16 %v1891_v57, %v1891_v57  ;;  %v4362_v25 = vsel %vm1785_vm5, %v1891_v57, 0.0  ;;  %v4637_v15 = vmul.f32 %v1891_v57, %v1891_v57 }
 0x113   : > { %v4672_v9 = vadd.f32 %v4671_v46, %v4670_v62  ;;  %3845 = vst.msk [vmem:[%s8005_s13 + $0x1c] sm:$0xf] %vm737_vm4, %v5761_v26  ;;  %v4363_v31 = vadd.f32 %v4362_v25, %v4361_v47  ;;  %v8070_v16 = vpop.f32.mrb[7].mxu1  ;;  %v4675_v13 = vsel %vm1785_vm5, %v4638_v51, 0.0  ;;  %v5376_v40 = vcombine.low %v7889_v24, %v7899_v17  ;;  %v9277_v46 = vld [vmem:[#allocation6_spill] sm:$0xff] }
 0x114   : > { %3843 = vst.msk [vmem:[%s8005_s13 + $0x14] sm:$0xf] %vm737_vm4, %v5759_v59  ;;  %v4673_v35 = vsel %vm1785_vm5, %v4637_v15, 0.0  ;;  %v1370_v62 = vrot.slane %v1368_v38, 4  ;;  %v4677_v61 = vsel %vm1785_vm5, %v4639_v63, 0.0  ;;  %v1383_v20 = vrot.slane %v1381_v22, 4 }
 0x115   : > { %6243 = vmatmul.mubr.msk.bf16.gmra.mrb[88].mxu0 %vm1785_vm5, %v5374_v8  ;;  %v4365_v55 = vadd.f32 %v4364_v56, %v4363_v31  ;;  %v4674_v29 = vadd.f32 %v4673_v35, %v4672_v9  ;;  %v1387_v17 = vshll.u32 %v1305_v60, 16  ;;  %v9278_v38 = vld [vmem:[#allocation8_spill] sm:$0xff] }
 0x116   : > { %6375 = vmatmul.mubr.msk.bf16.gmra.mrb[36].mxu1 %vm1785_vm5, %v5372_v52  ;;  %6246 = vmatprep.mubr.msk.bf16.mxu0 %vm1785_vm5, %v5375_v45  ;;  %v1373_v52 = vrot.slane %v1371_v36, 5  ;;  %v1384_v24 = vor.u32 %v1383_v20, %v1379_v19  ;;  %v9279_v36 = vld [vmem:[#allocation23_spill] sm:$0xff] }
 0x117   : > { %6378 = vmatprep.mubr.msk.bf16.mxu1 %vm1785_vm5, %v5373_v44  ;;  %v4367_v11 = vadd.f32 %v4366_v32, %v4365_v55  ;;  %v4676_v1 = vadd.f32 %v4675_v13, %v4674_v29  ;;  %v9276_v44 = vld [vmem:[#allocation4_spill] sm:$0xff]  ;;  %v1389_v47 = vrot.slane %v1387_v17, 5 }
 0x118   : > { %v1374_v5 = vor.u32 %v1373_v52, %v1370_v62  ;;  %v1385_v54 = vrot.slane %v1384_v24, 4  ;;  %v9280_v24 = vld [vmem:[#allocation18_spill] sm:$0xff] }
 0x119   : > { %v4678_v30 = vadd.f32 %v4677_v61, %v4676_v1 }
 0x11a   : > { %v1375_v14 = vrot.slane %v1374_v5, 4  ;;  %v1390_v22 = vsel %vm7128_vm8, %v1385_v54, %v1389_v47 }
 0x11c   : > { %v1380_v56 = vsel %vm7128_vm8, %v1375_v14, %v1379_v19 }
 0x11d   : > { %6247 = vmatmul.mubr.msk.bf16.gmra.mrb[92].mxu0 %vm1785_vm5, %v5376_v40 }
 0x11e   : > { %6379 = vmatmul.mubr.msk.bf16.gmra.mrb[40].mxu1 %vm1785_vm5, %v5374_v8  ;;  %6252 = vmatprep.mubr.msk.bf16.mxu0 %vm1785_vm5, %v9276_v44 }
 0x11f   : > { %6382 = vmatprep.mubr.msk.bf16.mxu1 %vm1785_vm5, %v5375_v45 }
 0x121   : > { %v6126_v28 = vpop.f32.mrb[8].mxu0 }
 0x122   : > { %v5764_v26 = vpack.c.bf16 %v6126_v28, %v6126_v28  ;;  %v1904_v57 = vpop.f32.mrb[9].mxu0  ;;  %v4642_v32 = vmul.f32 %v6126_v28, %v6126_v28  ;;  %v4372_v1 = vsel %vm1785_vm5, %v6126_v28, 0.0 }
 0x123   : > { %v5762_v8 = vpack.c.bf16 %v1904_v57, %v1904_v57  ;;  %v4368_v59 = vsel %vm1785_vm5, %v1904_v57, 0.0  ;;  %v4640_v25 = vmul.f32 %v1904_v57, %v1904_v57  ;;  %v6127_v51 = vpop.f32.mrb[10].mxu0 }
 0x124   : > { %3848 = vst.msk [vmem:[%s8005_s13 + $0x28] sm:$0xf] %vm737_vm4, %v5764_v26  ;;  %v4369_v9 = vadd.f32 %v4368_v59, %v4367_v11  ;;  %v5765_v31 = vpack.c.bf16 %v6127_v51, %v6127_v51  ;;  %v1907_v15 = vpop.f32.mrb[11].mxu0  ;;  %v4643_v52 = vmul.f32 %v6127_v51, %v6127_v51  ;;  %v4374_v39 = vsel %vm1785_vm5, %v6127_v51, 0.0 }
 0x125   : > { %6253 = vmatmul.mubr.msk.bf16.vlgmr.msra.gmra.mrb[64].mxu0 %vm1785_vm5, %v9277_v46  ;;  %v8100_v45 = vpop.f32.mrb[8].mxu1  ;;  %3846 = vst.msk [vmem:[%s8005_s13 + $0x20] sm:$0xf] %vm737_vm4, %v5762_v8  ;;  %v4679_v63 = vsel %vm1785_vm5, %v4640_v25, 0.0  ;;  %v5763_v35 = vpack.c.bf16 %v1907_v15, %v1907_v15  ;;  %v4370_v21 = vsel %vm1785_vm5, %v1907_v15, 0.0  ;;  %v4683_v60 = vsel %vm1785_vm5, %v4642_v32, 0.0 }
 0x126   : > { %6383 = vmatmul.mubr.msk.bf16.gmra.mrb[44].mxu1 %vm1785_vm5, %v5376_v40  ;;  %6256 = vmatprep.mubr.msk.bf16.mxu0 %vm1785_vm5, %v9278_v38  ;;  %v8111_v55 = vpop.f32.mrb[9].mxu1  ;;  %v4680_v29 = vadd.f32 %v4679_v63, %v4678_v30  ;;  %3849 = vst.msk [vmem:[%s8005_s13 + $0x2c] sm:$0xf] %vm737_vm4, %v5765_v31  ;;  %v4371_v11 = vadd.f32 %v4370_v21, %v4369_v9  ;;  %v4685_v17 = vsel %vm1785_vm5, %v4643_v52, 0.0  ;;  %v9282_v32 = vld [vmem:[#allocation30_spill] sm:$0xff] }
 0x127   : > { %6388 = vmatprep.mubr.msk.bf16.mxu1 %vm1785_vm5, %v9279_v36  ;;  %v8118_v13 = vpop.f32.mrb[10].mxu1  ;;  %v4641_v40 = vmul.f32 %v1907_v15, %v1907_v15  ;;  %3847 = vst.msk [vmem:[%s8005_s13 + $0x24] sm:$0xf] %vm737_vm4, %v5763_v35  ;;  %v5462_v30 = vcombine.low %v1380_v56, %v1390_v22  ;;  %v9281_v36 = vld [vmem:[#allocation29_spill] sm:$0xff] }
 0x128   : > { %v8123_v62 = vpop.f32.mrb[11].mxu1  ;;  %v4373_v61 = vadd.f32 %v4372_v1, %v4371_v11 }
 0x129   : > { %v4681_v19 = vsel %vm1785_vm5, %v4641_v40, 0.0 }
 0x12a   : > { %v4682_v20 = vadd.f32 %v4681_v19, %v4680_v29  ;;  %v4375_v44 = vadd.f32 %v4374_v39, %v4373_v61 }
 0x12c   : > { %v4684_v5 = vadd.f32 %v4683_v60, %v4682_v20 }
 0x12d   : > { %6257 = vmatmul.mubr.msk.bf16.gmra.mrb[68].mxu0 %vm1785_vm5, %v9250_v4 }
 0x12e   : > { %6389 = vmatmul.mubr.msk.bf16.vlgmr.msra.gmra.mrb[16].mxu1 %vm1785_vm5, %v9280_v24  ;;  %6260 = vmatprep.mubr.msk.bf16.mxu0 %vm1785_vm5, %v9251_v58  ;;  %v4686_v14 = vadd.f32 %v4685_v17, %v4684_v5 }
 0x12f   : > { %6392 = vmatprep.mubr.msk.bf16.mxu1 %vm1785_vm5, %v5462_v30 }
 0x130   : > { %v6130_v28 = vpop.f32.mrb[12].mxu0 }
 0x131   : > { %v5768_v54 = vpack.c.bf16 %v6130_v28, %v6130_v28  ;;  %v1920_v47 = vpop.f32.mrb[13].mxu0  ;;  %v4646_v31 = vmul.f32 %v6130_v28, %v6130_v28  ;;  %v4380_v63 = vsel %vm1785_vm5, %v6130_v28, 0.0 }
 0x132   : > { %v5766_v26 = vpack.c.bf16 %v1920_v47, %v1920_v47  ;;  %v4376_v57 = vsel %vm1785_vm5, %v1920_v47, 0.0  ;;  %v4644_v4 = vmul.f32 %v1920_v47, %v1920_v47  ;;  %v6131_v46 = vpop.f32.mrb[14].mxu0 }
 0x133   : > { %3852 = vst.msk [vmem:[%s8005_s13 + $0x38] sm:$0xf] %vm737_vm4, %v5768_v54  ;;  %v4377_v8 = vadd.f32 %v4376_v57, %v4375_v44  ;;  %v5769_v59 = vpack.c.bf16 %v6131_v46, %v6131_v46  ;;  %v1923_v25 = vpop.f32.mrb[15].mxu0  ;;  %v4647_v35 = vmul.f32 %v6131_v46, %v6131_v46  ;;  %v4382_v29 = vsel %vm1785_vm5, %v6131_v46, 0.0 }
 0x134   : > { %3850 = vst.msk [vmem:[%s8005_s13 + $0x30] sm:$0xf] %vm737_vm4, %v5766_v26  ;;  %v4687_v58 = vsel %vm1785_vm5, %v4644_v4, 0.0  ;;  %v5767_v51 = vpack.c.bf16 %v1923_v25, %v1923_v25  ;;  %v4378_v9 = vsel %vm1785_vm5, %v1923_v25, 0.0  ;;  %v4645_v56 = vmul.f32 %v1923_v25, %v1923_v25 }
 0x135   : > { %v4688_v15 = vadd.f32 %v4687_v58, %v4686_v14  ;;  %3853 = vst.msk [vmem:[%s8005_s13 + $0x3c] sm:$0xf] %vm737_vm4, %v5769_v59  ;;  %v4379_v38 = vadd.f32 %v4378_v9, %v4377_v8  ;;  %6261 = vmatmul.mubr.msk.bf16.gmra.mrb[72].mxu0 %vm1785_vm5, %v9255_v0  ;;  %v4691_v40 = vsel %vm1785_vm5, %v4646_v31, 0.0  ;;  %v4693_v5 = vsel %vm1785_vm5, %v4647_v35, 0.0  ;;  %v9283_v59 = vld [vmem:[#allocation3_spill] sm:$0xff] }
 0x136   : > { %6393 = vmatmul.mubr.msk.bf16.gmra.mrb[20].mxu1 %vm1785_vm5, %v9281_v36  ;;  %3851 = vst.msk [vmem:[%s8005_s13 + $0x34] sm:$0xf] %vm737_vm4, %v5767_v51  ;;  %6264 = vmatprep.mubr.msk.bf16.mxu0 %vm1785_vm5, %v9256_v2  ;;  %v4689_v22 = vsel %vm1785_vm5, %v4645_v56, 0.0  ;;  %v9284_v51 = vld [vmem:[#allocation5_spill] sm:$0xff] }
 0x137   : > { %v4381_v21 = vadd.f32 %v4380_v63, %v4379_v38  ;;  %6396 = vmatprep.mubr.msk.bf16.mxu1 %vm1785_vm5, %v9282_v32  ;;  %v4690_v0 = vadd.f32 %v4689_v22, %v4688_v15  ;;  %v9285_v38 = vld [vmem:[#allocation22_spill] sm:$0xff] }
 0x138   : > { %v6134_v11 = vpop.f32.mrb[16].mxu0 }
 0x139   : > { %v8159_v1 = vpop.f32.mrb[12].mxu1  ;;  %v5772_v52 = vpack.c.bf16 %v6134_v11, %v6134_v11  ;;  %v1936_v61 = vpop.f32.mrb[17].mxu0  ;;  %v4383_v2 = vadd.f32 %v4382_v29, %v4381_v21  ;;  %v4692_v39 = vadd.f32 %v4691_v40, %v4690_v0  ;;  %v4650_v4 = vmul.f32 %v6134_v11, %v6134_v11 }
 0x13a   : > { %v8161_v19 = vpop.f32.mrb[13].mxu1  ;;  %v5770_v20 = vpack.c.bf16 %v1936_v61, %v1936_v61  ;;  %v4384_v30 = vsel %vm1785_vm5, %v1936_v61, 0.0  ;;  %v4648_v60 = vmul.f32 %v1936_v61, %v1936_v61  ;;  %v6135_v44 = vpop.f32.mrb[18].mxu0  ;;  %v4388_v9 = vsel %vm1785_vm5, %v6134_v11, 0.0 }
 0x13b   : > { %v8165_v24 = vpop.f32.mrb[14].mxu1  ;;  %3856 = vst.msk [vmem:[%s8005_s13 + $0x48] sm:$0xf] %vm737_vm4, %v5772_v52  ;;  %v4385_v17 = vadd.f32 %v4384_v30, %v4383_v2  ;;  %v5773_v14 = vpack.c.bf16 %v6135_v44, %v6135_v44  ;;  %v1939_v28 = vpop.f32.mrb[19].mxu0  ;;  %v4694_v47 = vadd.f32 %v4693_v5, %v4692_v39  ;;  %v4651_v31 = vmul.f32 %v6135_v44, %v6135_v44 }
 0x13c   : > { %v8169_v54 = vpop.f32.mrb[15].mxu1  ;;  %3854 = vst.msk [vmem:[%s8005_s13 + $0x40] sm:$0xf] %vm737_vm4, %v5770_v20  ;;  %v4695_v26 = vsel %vm1785_vm5, %v4648_v60, 0.0  ;;  %v5771_v57 = vpack.c.bf16 %v1939_v28, %v1939_v28  ;;  %v4386_v46 = vsel %vm1785_vm5, %v1939_v28, 0.0  ;;  %v4649_v8 = vmul.f32 %v1939_v28, %v1939_v28  ;;  %v9286_v28 = vld [vmem:[#allocation7_spill] sm:$0xff] }
 0x13d   : > { %3857 = vst.msk [vmem:[%s8005_s13 + $0x4c] sm:$0xf] %vm737_vm4, %v5773_v14  ;;  %6265 = vmatmul.mubr.msk.bf16.gmra.mrb[76].mxu0 %vm1785_vm5, %v9260_v18  ;;  %v4696_v25 = vadd.f32 %v4695_v26, %v4694_v47  ;;  %v4387_v58 = vadd.f32 %v4386_v46, %v4385_v17  ;;  %v4699_v63 = vsel %vm1785_vm5, %v4650_v4, 0.0  ;;  %v4390_v35 = vsel %vm1785_vm5, %v6135_v44, 0.0  ;;  %v9287_v47 = vld [vmem:[#allocation10_spill] sm:$0xff]  ;;  %v9288_v4 = vld [vmem:[#allocation9_spill] sm:$0xff] }
 0x13e   : > { %6397 = vmatmul.mubr.msk.bf16.gmra.mrb[24].mxu1 %vm1785_vm5, %v9283_v59  ;;  %3855 = vst.msk [vmem:[%s8005_s13 + $0x44] sm:$0xf] %vm737_vm4, %v5771_v57  ;;  %6268 = vmatprep.mubr.msk.bf16.mxu0 %vm1785_vm5, %v9284_v51  ;;  %v4697_v15 = vsel %vm1785_vm5, %v4649_v8, 0.0  ;;  %v4701_v52 = vsel %vm1785_vm5, %v4651_v31, 0.0 }
 0x13f   : > { %6400 = vmatprep.mubr.msk.bf16.mxu1 %vm1785_vm5, %v9285_v38  ;;  %v4389_v18 = vadd.f32 %v4388_v9, %v4387_v58  ;;  %v4698_v56 = vadd.f32 %v4697_v15, %v4696_v25  ;;  %v9289_v25 = vld [vmem:[#allocation11_spill] sm:$0xff] }
 0x140   : > { %v6138_v36 = vpop.f32.mrb[20].mxu0 }
 0x141   : > { %v5776_v21 = vpack.c.bf16 %v6138_v36, %v6138_v36  ;;  %v1952_v22 = vpop.f32.mrb[21].mxu0  ;;  %v4700_v32 = vadd.f32 %v4699_v63, %v4698_v56  ;;  %v4391_v0 = vadd.f32 %v4390_v35, %v4389_v18  ;;  %v4654_v44 = vmul.f32 %v6138_v36, %v6138_v36 }
 0x142   : > { %v5774_v29 = vpack.c.bf16 %v1952_v22, %v1952_v22  ;;  %v4392_v11 = vsel %vm1785_vm5, %v1952_v22, 0.0  ;;  %v6139_v40 = vpop.f32.mrb[22].mxu0  ;;  %v4652_v61 = vmul.f32 %v1952_v22, %v1952_v22  ;;  %v4396_v46 = vsel %vm1785_vm5, %v6138_v36, 0.0 }
 0x143   : > { %3860 = vst.msk [vmem:[%s8005_s13 + $0x58] sm:$0xf] %vm737_vm4, %v5776_v21  ;;  %v5777_v2 = vpack.c.bf16 %v6139_v40, %v6139_v40  ;;  %v1955_v39 = vpop.f32.mrb[23].mxu0  ;;  %v4393_v20 = vadd.f32 %v4392_v11, %v4391_v0  ;;  %v4702_v30 = vadd.f32 %v4701_v52, %v4700_v32  ;;  %v4655_v8 = vmul.f32 %v6139_v40, %v6139_v40 }
 0x144   : > { %3858 = vst.msk [vmem:[%s8005_s13 + $0x50] sm:$0xf] %vm737_vm4, %v5774_v29  ;;  %v5775_v60 = vpack.c.bf16 %v1955_v39, %v1955_v39  ;;  %v4703_v5 = vsel %vm1785_vm5, %v4652_v61, 0.0  ;;  %v4394_v17 = vsel %vm1785_vm5, %v1955_v39, 0.0  ;;  %v4653_v14 = vmul.f32 %v1955_v39, %v1955_v39 }
 0x145   : > { %3861 = vst.msk [vmem:[%s8005_s13 + $0x5c] sm:$0xf] %vm737_vm4, %v5777_v2  ;;  %6269 = vmatmul.mubr.msk.bf16.gmra.mrb[80].mxu0 %vm1785_vm5, %v9286_v28  ;;  %v4704_v26 = vadd.f32 %v4703_v5, %v4702_v30  ;;  %v4395_v57 = vadd.f32 %v4394_v17, %v4393_v20  ;;  %v4707_v31 = vsel %vm1785_vm5, %v4654_v44, 0.0  ;;  %v4398_v15 = vsel %vm1785_vm5, %v6139_v40, 0.0  ;;  %v9290_v30 = vld [vmem:[#allocation14_spill] sm:$0xff] }
 0x146   : > { %6401 = vmatmul.mubr.msk.bf16.gmra.mrb[28].mxu1 %vm1785_vm5, %v9287_v47  ;;  %3859 = vst.msk [vmem:[%s8005_s13 + $0x54] sm:$0xf] %vm737_vm4, %v5775_v60  ;;  %6272 = vmatprep.mubr.msk.bf16.mxu0 %vm1785_vm5, %v9288_v4  ;;  %v4705_v59 = vsel %vm1785_vm5, %v4653_v14, 0.0  ;;  %v4709_v22 = vsel %vm1785_vm5, %v4655_v8, 0.0 }
 0x147   : > { %6404 = vmatprep.mubr.msk.bf16.mxu1 %vm1785_vm5, %v9289_v25  ;;  %v4397_v58 = vadd.f32 %v4396_v46, %v4395_v57  ;;  %v4706_v51 = vadd.f32 %v4705_v59, %v4704_v26 }
 0x148   : > { %v6142_v9 = vpop.f32.mrb[24].mxu0 }
 0x149   : > { %v5780_v38 = vpack.c.bf16 %v6142_v9, %v6142_v9  ;;  %v1968_v18 = vpop.f32.mrb[25].mxu0  ;;  %v4708_v56 = vadd.f32 %v4707_v31, %v4706_v51  ;;  %v4399_v63 = vadd.f32 %v4398_v15, %v4397_v58  ;;  %v4658_v61 = vmul.f32 %v6142_v9, %v6142_v9 }
 0x14a   : > { %v5778_v36 = vpack.c.bf16 %v1968_v18, %v1968_v18  ;;  %v4400_v35 = vsel %vm1785_vm5, %v1968_v18, 0.0  ;;  %v6143_v21 = vpop.f32.mrb[26].mxu0  ;;  %v4656_v32 = vmul.f32 %v1968_v18, %v1968_v18  ;;  %v4404_v5 = vsel %vm1785_vm5, %v6142_v9, 0.0 }
 0x14b   : > { %3864 = vst.msk [vmem:[%s8005_s13 + $0x68] sm:$0xf] %vm737_vm4, %v5780_v38  ;;  %v5781_v29 = vpack.c.bf16 %v6143_v21, %v6143_v21  ;;  %v1971_v0 = vpop.f32.mrb[27].mxu0  ;;  %v4401_v11 = vadd.f32 %v4400_v35, %v4399_v63  ;;  %v4710_v40 = vadd.f32 %v4709_v22, %v4708_v56  ;;  %v4659_v17 = vmul.f32 %v6143_v21, %v6143_v21 }
 0x14c   : > { %3862 = vst.msk [vmem:[%s8005_s13 + $0x60] sm:$0xf] %vm737_vm4, %v5778_v36  ;;  %v5779_v52 = vpack.c.bf16 %v1971_v0, %v1971_v0  ;;  %v4711_v2 = vsel %vm1785_vm5, %v4656_v32, 0.0  ;;  %v4402_v39 = vsel %vm1785_vm5, %v1971_v0, 0.0  ;;  %v4657_v20 = vmul.f32 %v1971_v0, %v1971_v0 }
 0x14d   : > { %3865 = vst.msk [vmem:[%s8005_s13 + $0x6c] sm:$0xf] %vm737_vm4, %v5781_v29  ;;  %6273 = vmatmul.mubr.msk.bf16.gmra.mrb[84].mxu0 %vm1785_vm5, %v6995_v33  ;;  %v4712_v60 = vadd.f32 %v4711_v2, %v4710_v40  ;;  %v4403_v44 = vadd.f32 %v4402_v39, %v4401_v11  ;;  %v4715_v26 = vsel %vm1785_vm5, %v4658_v61, 0.0  ;;  %v4406_v57 = vsel %vm1785_vm5, %v6143_v21, 0.0  ;;  %v9291_v21 = vld [vmem:[#allocation20_spill] sm:$0xff] }
 0x14e   : > { %6405 = vmatmul.mubr.msk.bf16.gmra.mrb[32].mxu1 %vm1785_vm5, %v9290_v30  ;;  %3863 = vst.msk [vmem:[%s8005_s13 + $0x64] sm:$0xf] %vm737_vm4, %v5779_v52  ;;  %6276 = vmatprep.mubr.msk.bf16.mxu0 %vm1785_vm5, %v7067_v53  ;;  %v4713_v14 = vsel %vm1785_vm5, %v4657_v20, 0.0  ;;  %v4717_v51 = vsel %vm1785_vm5, %v4659_v17, 0.0 }
 0x14f   : > { %6408 = vmatprep.mubr.msk.bf16.mxu1 %vm1785_vm5, %v7891_v6  ;;  %v4405_v33 = vadd.f32 %v4404_v5, %v4403_v44  ;;  %v4714_v28 = vadd.f32 %v4713_v14, %v4712_v60 }
 0x150   : > { %v6146_v47 = vpop.f32.mrb[28].mxu0 }
 0x151   : > { %v5784_v4 = vpack.c.bf16 %v6146_v47, %v6146_v47  ;;  %v1984_v46 = vpop.f32.mrb[29].mxu0  ;;  %v4716_v53 = vadd.f32 %v4715_v26, %v4714_v28  ;;  %v4407_v59 = vadd.f32 %v4406_v57, %v4405_v33  ;;  %v4662_v56 = vmul.f32 %v6146_v47, %v6146_v47 }
 0x152   : > { %v5782_v8 = vpack.c.bf16 %v1984_v46, %v1984_v46  ;;  %v4408_v25 = vsel %vm1785_vm5, %v1984_v46, 0.0  ;;  %v6147_v58 = vpop.f32.mrb[30].mxu0  ;;  %v4660_v6 = vmul.f32 %v1984_v46, %v1984_v46  ;;  %v4412_v29 = vsel %vm1785_vm5, %v6146_v47, 0.0 }
 0x153   : > { %3868 = vst.msk [vmem:[%s8005_s13 + $0x78] sm:$0xf] %vm737_vm4, %v5784_v4  ;;  %v5785_v9 = vpack.c.bf16 %v6147_v58, %v6147_v58  ;;  %v1987_v31 = vpop.f32.mrb[31].mxu0  ;;  %v4409_v15 = vadd.f32 %v4408_v25, %v4407_v59  ;;  %v4718_v38 = vadd.f32 %v4717_v51, %v4716_v53  ;;  %v4663_v0 = vmul.f32 %v6147_v58, %v6147_v58 }
 0x154   : > { %3866 = vst.msk [vmem:[%s8005_s13 + $0x70] sm:$0xf] %vm737_vm4, %v5782_v8  ;;  %v5783_v18 = vpack.c.bf16 %v1987_v31, %v1987_v31  ;;  %v4719_v36 = vsel %vm1785_vm5, %v4660_v6, 0.0  ;;  %v4410_v63 = vsel %vm1785_vm5, %v1987_v31, 0.0  ;;  %v4661_v35 = vmul.f32 %v1987_v31, %v1987_v31 }
 0x155   : > { %3869 = vst.msk [vmem:[%s8005_s13 + $0x7c] sm:$0xf] %vm737_vm4, %v5785_v9  ;;  %6277 = vmatmul.mubr.msk.bf16.gmra.mrb[88].mxu0 %vm1785_vm5, %v9219_v34  ;;  %v4720_v22 = vadd.f32 %v4719_v36, %v4718_v38  ;;  %v4411_v32 = vadd.f32 %v4410_v63, %v4409_v15  ;;  %v4723_v52 = vsel %vm1785_vm5, %v4662_v56, 0.0  ;;  %v4414_v61 = vsel %vm1785_vm5, %v6147_v58, 0.0 }
 0x156   : > { %6409 = vmatmul.mubr.msk.bf16.gmra.mrb[36].mxu1 %vm1785_vm5, %v9291_v21  ;;  %3867 = vst.msk [vmem:[%s8005_s13 + $0x74] sm:$0xf] %vm737_vm4, %v5783_v18  ;;  %6280 = vmatprep.mubr.msk.bf16.mxu0 %vm1785_vm5, %v9222_v27  ;;  %v4721_v11 = vsel %vm1785_vm5, %v4661_v35, 0.0  ;;  %v4725_v20 = vsel %vm1785_vm5, %v4663_v0, 0.0 }
 0x157   : > { %6412 = vmatprep.mubr.msk.bf16.mxu1 %vm1785_vm5, %v7932_v42  ;;  %v4413_v40 = vadd.f32 %v4412_v29, %v4411_v32  ;;  %v4722_v34 = vadd.f32 %v4721_v11, %v4720_v22 }
 0x159   : > { %v8263_v2 = vadd.f32 %v4414_v61, %v4413_v40  ;;  %v4724_v39 = vadd.f32 %v4723_v52, %v4722_v34 }
 0x15b   : > { %v8266_v27 = vadd.f32 %v4725_v20, %v4724_v39 }
 0x15d   : > { %6281 = vmatmul.mubr.msk.bf16.gmra.mrb[92].mxu0 %vm1785_vm5, %v7260_v37 }
 0x15e   : > { %6413 = vmatmul.mubr.msk.bf16.gmra.mrb[40].mxu1 %vm1785_vm5, %v7938_v48 }
 0x15f   : > { %6416 = vmatprep.mubr.msk.bf16.mxu1 %vm1785_vm5, %v7965_v50 }
 0x166   : > { %6417 = vmatmul.mubr.msk.bf16.gmra.mrb[44].mxu1 %vm1785_vm5, %v7971_v7 }
 0x178   : > { %v6168_v42 = vpop.f32.mrb[48].mxu0 }
 0x179   : > { %v8277_v30 = vadd.f32 %v8013_v41, %v6168_v42  ;;  %v2200_v60 = vpop.f32.mrb[49].mxu0 }
 0x17a   : > { %v8280_v44 = vadd.f32 %v8018_v43, %v2200_v60  ;;  %v6169_v37 = vpop.f32.mrb[50].mxu0 }
 0x17b   : > { %v5804_v48 = vpack.c.bf16 %v8277_v30, %v8277_v30  ;;  %v8285_v5 = vadd.f32 %v8027_v23, %v6169_v37  ;;  %v2203_v50 = vpop.f32.mrb[51].mxu0 }
 0x17c   : > { %v5802_v7 = vpack.c.bf16 %v8280_v44, %v8280_v44  ;;  %v8290_v17 = vadd.f32 %v8034_v3, %v2203_v50 }
 0x17d   : > { %5574 = vst.msk [vmem:[%s8005_s13 + $0xc8] sm:$0xf] %vm737_vm4, %v5804_v48  ;;  %v5805_v41 = vpack.c.bf16 %v8285_v5, %v8285_v5 }
 0x17e   : > { %5572 = vst.msk [vmem:[%s8005_s13 + $0xc0] sm:$0xf] %vm737_vm4, %v5802_v7  ;;  %v5803_v43 = vpack.c.bf16 %v8290_v17, %v8290_v17 }
 0x17f   : > { %5575 = vst.msk [vmem:[%s8005_s13 + $0xcc] sm:$0xf] %vm737_vm4, %v5805_v41 }
 0x180   : > { %5573 = vst.msk [vmem:[%s8005_s13 + $0xc4] sm:$0xf] %vm737_vm4, %v5803_v43  ;;  %v6172_v23 = vpop.f32.mrb[52].mxu0 }
 0x181   : > { %v8305_v3 = vadd.f32 %v8053_v12, %v6172_v23  ;;  %v2216_v14 = vpop.f32.mrb[53].mxu0 }
 0x182   : > { %v8308_v33 = vadd.f32 %v8060_v10, %v2216_v14  ;;  %v6173_v28 = vpop.f32.mrb[54].mxu0 }
 0x183   : > { %v5808_v47 = vpack.c.bf16 %v8305_v3, %v8305_v3  ;;  %v8313_v26 = vadd.f32 %v8065_v49, %v6173_v28  ;;  %v2219_v57 = vpop.f32.mrb[55].mxu0 }
 0x184   : > { %v5806_v4 = vpack.c.bf16 %v8308_v33, %v8308_v33  ;;  %v8318_v46 = vadd.f32 %v8070_v16, %v2219_v57 }
 0x185   : > { %5578 = vst.msk [vmem:[%s8005_s13 + $0xd8] sm:$0xf] %vm737_vm4, %v5808_v47  ;;  %v5809_v12 = vpack.c.bf16 %v8313_v26, %v8313_v26 }
 0x186   : > { %5576 = vst.msk [vmem:[%s8005_s13 + $0xd0] sm:$0xf] %vm737_vm4, %v5806_v4  ;;  %v5807_v10 = vpack.c.bf16 %v8318_v46, %v8318_v46 }
 0x187   : > { %5579 = vst.msk [vmem:[%s8005_s13 + $0xdc] sm:$0xf] %vm737_vm4, %v5809_v12 }
 0x188   : > { %5577 = vst.msk [vmem:[%s8005_s13 + $0xd4] sm:$0xf] %vm737_vm4, %v5807_v10  ;;  %v6176_v49 = vpop.f32.mrb[56].mxu0 }
 0x189   : > { %v8333_v16 = vadd.f32 %v8100_v45, %v6176_v49  ;;  %v2232_v53 = vpop.f32.mrb[57].mxu0 }
 0x18a   : > { %v8336_v8 = vadd.f32 %v8111_v55, %v2232_v53  ;;  %v6177_v59 = vpop.f32.mrb[58].mxu0 }
 0x18b   : > { %v5812_v25 = vpack.c.bf16 %v8333_v16, %v8333_v16  ;;  %v8341_v58 = vadd.f32 %v8118_v13, %v6177_v59  ;;  %v2235_v51 = vpop.f32.mrb[59].mxu0 }
 0x18c   : > { %v5810_v6 = vpack.c.bf16 %v8336_v8, %v8336_v8  ;;  %v8346_v9 = vadd.f32 %v8123_v62, %v2235_v51 }
 0x18d   : > { %5582 = vst.msk [vmem:[%s8005_s13 + $0xe8] sm:$0xf] %vm737_vm4, %v5812_v25  ;;  %v5813_v45 = vpack.c.bf16 %v8341_v58, %v8341_v58 }
 0x18e   : > { %5580 = vst.msk [vmem:[%s8005_s13 + $0xe0] sm:$0xf] %vm737_vm4, %v5810_v6  ;;  %v5811_v55 = vpack.c.bf16 %v8346_v9, %v8346_v9 }
 0x18f   : > { %5583 = vst.msk [vmem:[%s8005_s13 + $0xec] sm:$0xf] %vm737_vm4, %v5813_v45 }
 0x190   : > { %5581 = vst.msk [vmem:[%s8005_s13 + $0xe4] sm:$0xf] %vm737_vm4, %v5811_v55  ;;  %v6180_v13 = vpop.f32.mrb[60].mxu0 }
 0x191   : > { %v8361_v62 = vadd.f32 %v8159_v1, %v6180_v13  ;;  %v2248_v31 = vpop.f32.mrb[61].mxu0 }
 0x192   : > { %v8364_v15 = vadd.f32 %v8161_v19, %v2248_v31  ;;  %v6181_v38 = vpop.f32.mrb[62].mxu0 }
 0x193   : > { %v5816_v18 = vpack.c.bf16 %v8361_v62, %v8361_v62  ;;  %v8369_v56 = vadd.f32 %v8165_v24, %v6181_v38  ;;  %v2251_v36 = vpop.f32.mrb[63].mxu0 }
 0x194   : > { %v5814_v63 = vpack.c.bf16 %v8364_v15, %v8364_v15  ;;  %v8374_v35 = vadd.f32 %v8169_v54, %v2251_v36 }
 0x195   : > { %5586 = vst.msk [vmem:[%s8005_s13 + $0xf8] sm:$0xf] %vm737_vm4, %v5816_v18  ;;  %v5817_v1 = vpack.c.bf16 %v8369_v56, %v8369_v56 }
 0x196   : > { %5584 = vst.msk [vmem:[%s8005_s13 + $0xf0] sm:$0xf] %vm737_vm4, %v5814_v63  ;;  %v5815_v19 = vpack.c.bf16 %v8374_v35, %v8374_v35 }
 0x197   : > { %5587 = vst.msk [vmem:[%s8005_s13 + $0xfc] sm:$0xf] %vm737_vm4, %v5817_v1 }
 0x198   : > { %5585 = vst.msk [vmem:[%s8005_s13 + $0xf4] sm:$0xf] %vm737_vm4, %v5815_v19  ;;  %v6186_v24 = vpop.f32.mrb[32].mxu0 }
 0x199   : > { %v5788_v21 = vpack.c.bf16 %v6186_v24, %v6186_v24  ;;  %v2300_v54 = vpop.f32.mrb[33].mxu0  ;;  %v4735_v0 = vmul.f32 %v6186_v24, %v6186_v24  ;;  %v4425_v60 = vsel %vm1785_vm5, %v6186_v24, 0.0 }
 0x19a   : > { %v5786_v22 = vpack.c.bf16 %v2300_v54, %v2300_v54  ;;  %v4733_v32 = vmul.f32 %v2300_v54, %v2300_v54  ;;  %v6187_v29 = vpop.f32.mrb[34].mxu0  ;;  %v4422_v34 = vsel %vm1785_vm5, %v2300_v54, 0.0 }
 0x19b   : > { %5558 = vst.msk [vmem:[%s8005_s13 + $0x88] sm:$0xf] %vm737_vm4, %v5788_v21  ;;  %v5789_v11 = vpack.c.bf16 %v6187_v29, %v6187_v29  ;;  %v2303_v40 = vpop.f32.mrb[35].mxu0  ;;  %v4736_v20 = vmul.f32 %v6187_v29, %v6187_v29  ;;  %v4768_v41 = vsel %vm1785_vm5, %v4735_v0, 0.0  ;;  %v4427_v23 = vsel %vm1785_vm5, %v6187_v29, 0.0 }
 0x19c   : > { %5556 = vst.msk [vmem:[%s8005_s13 + $0x80] sm:$0xf] %vm737_vm4, %v5786_v22  ;;  %v5787_v52 = vpack.c.bf16 %v2303_v40, %v2303_v40  ;;  %v4423_v61 = vsel %vm1785_vm5, %v2303_v40, 0.0  ;;  %v4734_v39 = vmul.f32 %v2303_v40, %v2303_v40  ;;  %v4765_v37 = vsel %vm1785_vm5, %v4733_v32, 0.0 }
 0x19d   : > { %5559 = vst.msk [vmem:[%s8005_s13 + $0x8c] sm:$0xf] %vm737_vm4, %v5789_v11  ;;  %v4424_v42 = vadd.f32 %v4423_v61, %v4422_v34  ;;  %v4770_v14 = vsel %vm1785_vm5, %v4736_v20, 0.0 }
 0x19e   : > { %5557 = vst.msk [vmem:[%s8005_s13 + $0x84] sm:$0xf] %vm737_vm4, %v5787_v52  ;;  %v4766_v48 = vsel %vm1785_vm5, %v4734_v39, 0.0 }
 0x19f   : > { %v4426_v50 = vadd.f32 %v4425_v60, %v4424_v42  ;;  %v4767_v7 = vadd.f32 %v4766_v48, %v4765_v37 }
 0x1a0   : > { %v6190_v43 = vpop.f32.mrb[36].mxu0 }
 0x1a1   : > { %v4769_v28 = vadd.f32 %v4768_v41, %v4767_v7  ;;  %v5792_v47 = vpack.c.bf16 %v6190_v43, %v6190_v43  ;;  %v2316_v57 = vpop.f32.mrb[37].mxu0  ;;  %v4428_v12 = vadd.f32 %v4427_v23, %v4426_v50  ;;  %v4739_v13 = vmul.f32 %v6190_v43, %v6190_v43 }
 0x1a2   : > { %v5790_v4 = vpack.c.bf16 %v2316_v57, %v2316_v57  ;;  %v4429_v10 = vsel %vm1785_vm5, %v2316_v57, 0.0  ;;  %v4737_v49 = vmul.f32 %v2316_v57, %v2316_v57  ;;  %v6191_v53 = vpop.f32.mrb[38].mxu0  ;;  %v4433_v63 = vsel %vm1785_vm5, %v6190_v43, 0.0 }
 0x1a3   : > { %5562 = vst.msk [vmem:[%s8005_s13 + $0x98] sm:$0xf] %vm737_vm4, %v5792_v47  ;;  %v4771_v59 = vadd.f32 %v4770_v14, %v4769_v28  ;;  %v5793_v25 = vpack.c.bf16 %v6191_v53, %v6191_v53  ;;  %v2319_v51 = vpop.f32.mrb[39].mxu0  ;;  %v4430_v6 = vadd.f32 %v4429_v10, %v4428_v12  ;;  %v4740_v1 = vmul.f32 %v6191_v53, %v6191_v53 }
 0x1a4   : > { %5560 = vst.msk [vmem:[%s8005_s13 + $0x90] sm:$0xf] %vm737_vm4, %v5790_v4  ;;  %v4772_v45 = vsel %vm1785_vm5, %v4737_v49, 0.0  ;;  %v5791_v55 = vpack.c.bf16 %v2319_v51, %v2319_v51  ;;  %v4431_v38 = vsel %vm1785_vm5, %v2319_v51, 0.0  ;;  %v4738_v18 = vmul.f32 %v2319_v51, %v2319_v51 }
 0x1a5   : > { %v4773_v31 = vadd.f32 %v4772_v45, %v4771_v59  ;;  %5563 = vst.msk [vmem:[%s8005_s13 + $0x9c] sm:$0xf] %vm737_vm4, %v5793_v25  ;;  %v4432_v36 = vadd.f32 %v4431_v38, %v4430_v6  ;;  %v4776_v22 = vsel %vm1785_vm5, %v4739_v13, 0.0  ;;  %v4435_v32 = vsel %vm1785_vm5, %v6191_v53, 0.0 }
 0x1a6   : > { %5561 = vst.msk [vmem:[%s8005_s13 + $0x94] sm:$0xf] %vm737_vm4, %v5791_v55  ;;  %v4774_v19 = vsel %vm1785_vm5, %v4738_v18, 0.0  ;;  %v4778_v39 = vsel %vm1785_vm5, %v4740_v1, 0.0 }
 0x1a7   : > { %v4434_v24 = vadd.f32 %v4433_v63, %v4432_v36  ;;  %v4775_v21 = vadd.f32 %v4774_v19, %v4773_v31 }
 0x1a8   : > { %v6194_v54 = vpop.f32.mrb[40].mxu0 }
 0x1a9   : > { %v5796_v29 = vpack.c.bf16 %v6194_v54, %v6194_v54  ;;  %v2332_v0 = vpop.f32.mrb[41].mxu0  ;;  %v4777_v11 = vadd.f32 %v4776_v22, %v4775_v21  ;;  %v4436_v34 = vadd.f32 %v4435_v32, %v4434_v24  ;;  %v4743_v7 = vmul.f32 %v6194_v54, %v6194_v54 }
 0x1aa   : > { %v5794_v40 = vpack.c.bf16 %v2332_v0, %v2332_v0  ;;  %v4437_v52 = vsel %vm1785_vm5, %v2332_v0, 0.0  ;;  %v6195_v61 = vpop.f32.mrb[42].mxu0  ;;  %v4741_v20 = vmul.f32 %v2332_v0, %v2332_v0  ;;  %v4441_v47 = vsel %vm1785_vm5, %v6194_v54, 0.0 }
 0x1ab   : > { %5566 = vst.msk [vmem:[%s8005_s13 + $0xa8] sm:$0xf] %vm737_vm4, %v5796_v29  ;;  %v5797_v42 = vpack.c.bf16 %v6195_v61, %v6195_v61  ;;  %v2335_v60 = vpop.f32.mrb[43].mxu0  ;;  %v4438_v37 = vadd.f32 %v4437_v52, %v4436_v34  ;;  %v4779_v48 = vadd.f32 %v4778_v39, %v4777_v11  ;;  %v4744_v57 = vmul.f32 %v6195_v61, %v6195_v61 }
 0x1ac   : > { %5564 = vst.msk [vmem:[%s8005_s13 + $0xa0] sm:$0xf] %vm737_vm4, %v5794_v40  ;;  %v5795_v50 = vpack.c.bf16 %v2335_v60, %v2335_v60  ;;  %v4780_v41 = vsel %vm1785_vm5, %v4741_v20, 0.0  ;;  %v4439_v43 = vsel %vm1785_vm5, %v2335_v60, 0.0  ;;  %v4742_v23 = vmul.f32 %v2335_v60, %v2335_v60 }
 0x1ad   : > { %5567 = vst.msk [vmem:[%s8005_s13 + $0xac] sm:$0xf] %vm737_vm4, %v5797_v42  ;;  %v4781_v14 = vadd.f32 %v4780_v41, %v4779_v48  ;;  %v4440_v28 = vadd.f32 %v4439_v43, %v4438_v37  ;;  %v4784_v53 = vsel %vm1785_vm5, %v4743_v7, 0.0  ;;  %v4443_v59 = vsel %vm1785_vm5, %v6195_v61, 0.0 }
 0x1ae   : > { %5565 = vst.msk [vmem:[%s8005_s13 + $0xa4] sm:$0xf] %vm737_vm4, %v5795_v50  ;;  %v4782_v4 = vsel %vm1785_vm5, %v4742_v23, 0.0  ;;  %v4786_v38 = vsel %vm1785_vm5, %v4744_v57, 0.0  ;;  %v4749_v39 = vmul.f32 %v8280_v44, %v8280_v44  ;;  %v4453_v48 = vsel %vm1785_vm5, %v8280_v44, 0.0 }
 0x1af   : > { %v4442_v12 = vadd.f32 %v4441_v47, %v4440_v28  ;;  %v4783_v10 = vadd.f32 %v4782_v4, %v4781_v14  ;;  %v4750_v50 = vmul.f32 %v8290_v17, %v8290_v17  ;;  %v4751_v23 = vmul.f32 %v8277_v30, %v8277_v30 }
 0x1b0   : > { %v6198_v49 = vpop.f32.mrb[44].mxu0  ;;  %v4796_v14 = vsel %vm1785_vm5, %v4749_v39, 0.0  ;;  %v4455_v28 = vsel %vm1785_vm5, %v8290_v17, 0.0  ;;  %v4457_v44 = vsel %vm1785_vm5, %v8277_v30, 0.0  ;;  %v4752_v4 = vmul.f32 %v8285_v5, %v8285_v5 }
 0x1b1   : > { %v5800_v25 = vpack.c.bf16 %v6198_v49, %v6198_v49  ;;  %v2348_v51 = vpop.f32.mrb[45].mxu0  ;;  %v4785_v6 = vadd.f32 %v4784_v53, %v4783_v10  ;;  %v4444_v55 = vadd.f32 %v4443_v59, %v4442_v12  ;;  %v4747_v21 = vmul.f32 %v6198_v49, %v6198_v49 }
 0x1b2   : > { %v5798_v45 = vpack.c.bf16 %v2348_v51, %v2348_v51  ;;  %v4445_v13 = vsel %vm1785_vm5, %v2348_v51, 0.0  ;;  %v6199_v31 = vpop.f32.mrb[46].mxu0  ;;  %v4745_v18 = vmul.f32 %v2348_v51, %v2348_v51  ;;  %v4449_v11 = vsel %vm1785_vm5, %v6198_v49, 0.0 }
 0x1b3   : > { %5570 = vst.msk [vmem:[%s8005_s13 + $0xb8] sm:$0xf] %vm737_vm4, %v5800_v25  ;;  %v5801_v36 = vpack.c.bf16 %v6199_v31, %v6199_v31  ;;  %v2351_v63 = vpop.f32.mrb[47].mxu0  ;;  %v4446_v1 = vadd.f32 %v4445_v13, %v4444_v55  ;;  %v4787_v19 = vadd.f32 %v4786_v38, %v4785_v6  ;;  %v4748_v40 = vmul.f32 %v6199_v31, %v6199_v31 }
 0x1b4   : > { %5568 = vst.msk [vmem:[%s8005_s13 + $0xb0] sm:$0xf] %vm737_vm4, %v5798_v45  ;;  %v5799_v24 = vpack.c.bf16 %v2351_v63, %v2351_v63  ;;  %v4788_v54 = vsel %vm1785_vm5, %v4745_v18, 0.0  ;;  %v4447_v22 = vsel %vm1785_vm5, %v2351_v63, 0.0  ;;  %v4746_v32 = vmul.f32 %v2351_v63, %v2351_v63 }
 0x1b5   : > { %5571 = vst.msk [vmem:[%s8005_s13 + $0xbc] sm:$0xf] %vm737_vm4, %v5801_v36  ;;  %v4789_v29 = vadd.f32 %v4788_v54, %v4787_v19  ;;  %v4448_v0 = vadd.f32 %v4447_v22, %v4446_v1  ;;  %v4792_v20 = vsel %vm1785_vm5, %v4747_v21, 0.0  ;;  %v4451_v42 = vsel %vm1785_vm5, %v6199_v31, 0.0 }
 0x1b6   : > { %5569 = vst.msk [vmem:[%s8005_s13 + $0xb4] sm:$0xf] %vm737_vm4, %v5799_v24  ;;  %v4790_v34 = vsel %vm1785_vm5, %v4746_v32, 0.0  ;;  %v4794_v7 = vsel %vm1785_vm5, %v4748_v40, 0.0  ;;  %v4798_v12 = vsel %vm1785_vm5, %v4750_v50, 0.0  ;;  %v4800_v53 = vsel %vm1785_vm5, %v4751_v23, 0.0 }
 0x1b7   : > { %v4450_v52 = vadd.f32 %v4449_v11, %v4448_v0  ;;  %v4791_v61 = vadd.f32 %v4790_v34, %v4789_v29  ;;  %v4459_v59 = vsel %vm1785_vm5, %v8285_v5, 0.0  ;;  %v4753_v17 = vmul.f32 %v8308_v33, %v8308_v33 }
 0x1b8   : > { %v4802_v6 = vsel %vm1785_vm5, %v4752_v4, 0.0  ;;  %v4461_v30 = vsel %vm1785_vm5, %v8308_v33, 0.0  ;;  %v4754_v45 = vmul.f32 %v8318_v46, %v8318_v46  ;;  %v4755_v31 = vmul.f32 %v8305_v3, %v8305_v3 }
 0x1b9   : > { %v4452_v60 = vadd.f32 %v4451_v42, %v4450_v52  ;;  %v4793_v37 = vadd.f32 %v4792_v20, %v4791_v61  ;;  %v4804_v5 = vsel %vm1785_vm5, %v4753_v17, 0.0  ;;  %v4463_v38 = vsel %vm1785_vm5, %v8318_v46, 0.0 }
 0x1ba   : > { %v4465_v63 = vsel %vm1785_vm5, %v8305_v3, 0.0  ;;  %v4756_v33 = vmul.f32 %v8313_v26, %v8313_v26  ;;  %v4806_v1 = vsel %vm1785_vm5, %v4754_v45, 0.0  ;;  %v4808_v21 = vsel %vm1785_vm5, %v4755_v31, 0.0 }
 0x1bb   : > { %v4454_v41 = vadd.f32 %v4453_v48, %v4452_v60  ;;  %v4795_v43 = vadd.f32 %v4794_v7, %v4793_v37  ;;  %v4467_v54 = vsel %vm1785_vm5, %v8313_v26, 0.0  ;;  %v4757_v46 = vmul.f32 %v8336_v8, %v8336_v8 }
 0x1bc   : > { %v4810_v29 = vsel %vm1785_vm5, %v4756_v33, 0.0  ;;  %v4469_v3 = vsel %vm1785_vm5, %v8336_v8, 0.0  ;;  %v4758_v0 = vmul.f32 %v8346_v9, %v8346_v9  ;;  %v4759_v34 = vmul.f32 %v8333_v16, %v8333_v16 }
 0x1bd   : > { %v4456_v47 = vadd.f32 %v4455_v28, %v4454_v41  ;;  %v4797_v57 = vadd.f32 %v4796_v14, %v4795_v43  ;;  %v4812_v26 = vsel %vm1785_vm5, %v4757_v46, 0.0  ;;  %v4471_v52 = vsel %vm1785_vm5, %v8346_v9, 0.0 }
 0x1be   : > { %v4473_v20 = vsel %vm1785_vm5, %v8333_v16, 0.0  ;;  %v4760_v8 = vmul.f32 %v8341_v58, %v8341_v58  ;;  %v4814_v42 = vsel %vm1785_vm5, %v4758_v0, 0.0  ;;  %v4816_v48 = vsel %vm1785_vm5, %v4759_v34, 0.0 }
 0x1bf   : > { %v4458_v10 = vadd.f32 %v4457_v44, %v4456_v47  ;;  %v4799_v49 = vadd.f32 %v4798_v12, %v4797_v57  ;;  %v4475_v50 = vsel %vm1785_vm5, %v8341_v58, 0.0  ;;  %v4761_v9 = vmul.f32 %v8364_v15, %v8364_v15 }
 0x1c0   : > { %v4416_v7 = vrot.slane %v8263_v2, 4  ;;  %v4818_v16 = vsel %vm1785_vm5, %v4760_v8, 0.0  ;;  %v4477_v23 = vsel %vm1785_vm5, %v8364_v15, 0.0  ;;  %v4762_v14 = vmul.f32 %v8374_v35, %v8374_v35 }
 0x1c1   : > { %v4460_v25 = vadd.f32 %v4459_v59, %v4458_v10  ;;  %v4801_v51 = vadd.f32 %v4800_v53, %v4799_v49  ;;  %v4727_v28 = vrot.slane %v8266_v27, 4  ;;  %v4763_v58 = vmul.f32 %v8361_v62, %v8361_v62 }
 0x1c2   : > { %v4820_v44 = vsel %vm1785_vm5, %v4761_v9, 0.0  ;;  %v4479_v4 = vsel %vm1785_vm5, %v8374_v35, 0.0  ;;  %v4417_v12 = vadd.f32 %v4416_v7, %v8263_v2  ;;  %v4481_v15 = vsel %vm1785_vm5, %v8361_v62, 0.0 }
 0x1c3   : > { %v4462_v55 = vadd.f32 %v4461_v30, %v4460_v25  ;;  %v4803_v13 = vadd.f32 %v4802_v6, %v4801_v51  ;;  %v4764_v53 = vmul.f32 %v8369_v56, %v8369_v56  ;;  %v4822_v59 = vsel %vm1785_vm5, %v4762_v14, 0.0 }
 0x1c4   : > { %v4728_v17 = vadd.f32 %v4727_v28, %v8266_v27  ;;  %v4824_v6 = vsel %vm1785_vm5, %v4763_v58, 0.0  ;;  %v4483_v35 = vsel %vm1785_vm5, %v8369_v56, 0.0  ;;  %v4418_v2 = vrot.slane %v4417_v12, 2 }
 0x1c5   : > { %v4464_v18 = vadd.f32 %v4463_v38, %v4462_v55  ;;  %v4805_v36 = vadd.f32 %v4804_v5, %v4803_v13  ;;  %v4826_v55 = vsel %vm1785_vm5, %v4764_v53, 0.0 }
 0x1c6   : > { %v4729_v62 = vrot.slane %v4728_v17, 2  ;;  %v4419_v5 = vadd.f32 %v4418_v2, %v4417_v12 }
 0x1c7   : > { %v4466_v19 = vadd.f32 %v4465_v63, %v4464_v18  ;;  %v4807_v24 = vadd.f32 %v4806_v1, %v4805_v36 }
 0x1c8   : > { %v4730_v36 = vadd.f32 %v4729_v62, %v4728_v17  ;;  %v4420_v33 = vrot.slane %v4419_v5, 1 }
 0x1c9   : > { %v4468_v22 = vadd.f32 %v4467_v54, %v4466_v19  ;;  %v4809_v32 = vadd.f32 %v4808_v21, %v4807_v24 }
 0x1ca   : > { %v4731_v24 = vrot.slane %v4730_v36, 1  ;;  %v4421_v54 = vadd.f32 %v4420_v33, %v4419_v5 }
 0x1cb   : > { %v4470_v11 = vadd.f32 %v4469_v3, %v4468_v22  ;;  %v4811_v40 = vadd.f32 %v4810_v29, %v4809_v32 }
 0x1cc   : > { %v4732_v32 = vadd.f32 %v4731_v24, %v4730_v36 }
 0x1cd   : > { %v4472_v61 = vadd.f32 %v4471_v52, %v4470_v11  ;;  %v4813_v39 = vadd.f32 %v4812_v26, %v4811_v40 }
 0x1cf   : > { %v4474_v60 = vadd.f32 %v4473_v20, %v4472_v61  ;;  %v4815_v37 = vadd.f32 %v4814_v42, %v4813_v39 }
 0x1d1   : > { %v4476_v41 = vadd.f32 %v4475_v50, %v4474_v60  ;;  %v4817_v43 = vadd.f32 %v4816_v48, %v4815_v37 }
 0x1d3   : > { %v4819_v47 = vadd.f32 %v4818_v16, %v4817_v43  ;;  %v4478_v57 = vadd.f32 %v4477_v23, %v4476_v41 }
 0x1d5   : > { %v4480_v10 = vadd.f32 %v4479_v4, %v4478_v57  ;;  %v4821_v49 = vadd.f32 %v4820_v44, %v4819_v47 }
 0x1d7   : > { %v4482_v25 = vadd.f32 %v4481_v15, %v4480_v10  ;;  %v4823_v51 = vadd.f32 %v4822_v59, %v4821_v49 }
 0x1d9   : > { %v4484_v30 = vadd.f32 %v4483_v35, %v4482_v25  ;;  %v4825_v45 = vadd.f32 %v4824_v6, %v4823_v51 }
 0x1db   : > { %v4485_v13 = vrot.slane %v4484_v30, 4  ;;  %v4827_v31 = vadd.f32 %v4826_v55, %v4825_v45 }
 0x1dd   : > { %v4486_v38 = vadd.f32 %v4485_v13, %v4484_v30  ;;  %v4828_v18 = vrot.slane %v4827_v31, 4 }
 0x1df   : > { %v4487_v27 = vrot.slane %v4486_v38, 2  ;;  %v4829_v63 = vadd.f32 %v4828_v18, %v4827_v31 }
 0x1e1   : > { %v4488_v1 = vadd.f32 %v4487_v27, %v4486_v38  ;;  %v4830_v19 = vrot.slane %v4829_v63, 2 }
 0x1e3   : > { %v4489_v56 = vrot.slane %v4488_v1, 1  ;;  %v4831_v21 = vadd.f32 %v4830_v19, %v4829_v63 }
 0x1e5   : > { %v4490_v46 = vadd.f32 %v4489_v56, %v4488_v1  ;;  %v4832_v22 = vrot.slane %v4831_v21, 1 }
 0x1e7   : > { %v8536_v29 = vadd.f32 %v4490_v46, %v4421_v54  ;;  %v4833_v3 = vadd.f32 %v4832_v22, %v4831_v21 }
 0x1e9   : > { %v8538_v0 = vadd.f32 %v4833_v3, %v4732_v32 }
 0x1f8   : > { %v6254_v11 = vpop.f32.mrb[64].mxu0 }
 0x1f9   : > { %v5820_v40 = vpack.c.bf16 %v6254_v11, %v6254_v11  ;;  %v2760_v34 = vpop.f32.mrb[65].mxu0  ;;  %v4837_v39 = vmul.f32 %v6254_v11, %v6254_v11  ;;  %v4495_v9 = vsel %vm1785_vm5, %v6254_v11, 0.0 }
 0x1fa   : > { %v5818_v26 = vpack.c.bf16 %v2760_v34, %v2760_v34  ;;  %v4835_v52 = vmul.f32 %v2760_v34, %v2760_v34  ;;  %v6255_v61 = vpop.f32.mrb[66].mxu0  ;;  %v4492_v42 = vsel %vm1785_vm5, %v2760_v34, 0.0 }
 0x1fb   : > { %5622 = vst.msk [vmem:[%s8005_s13 + $0x108] sm:$0xf] %vm737_vm4, %v5820_v40  ;;  %v5821_v20 = vpack.c.bf16 %v6255_v61, %v6255_v61  ;;  %v2763_v8 = vpop.f32.mrb[67].mxu0  ;;  %v4838_v43 = vmul.f32 %v6255_v61, %v6255_v61  ;;  %v4870_v14 = vsel %vm1785_vm5, %v4837_v39, 0.0  ;;  %v4497_v10 = vsel %vm1785_vm5, %v6255_v61, 0.0 }
 0x1fc   : > { %5620 = vst.msk [vmem:[%s8005_s13 + $0x100] sm:$0xf] %vm737_vm4, %v5818_v26  ;;  %v5819_v60 = vpack.c.bf16 %v2763_v8, %v2763_v8  ;;  %v4493_v37 = vsel %vm1785_vm5, %v2763_v8, 0.0  ;;  %v4836_v48 = vmul.f32 %v2763_v8, %v2763_v8  ;;  %v4867_v7 = vsel %vm1785_vm5, %v4835_v52, 0.0 }
 0x1fd   : > { %5623 = vst.msk [vmem:[%s8005_s13 + $0x10c] sm:$0xf] %vm737_vm4, %v5821_v20  ;;  %v4494_v50 = vadd.f32 %v4493_v37, %v4492_v42  ;;  %v4872_v17 = vsel %vm1785_vm5, %v4838_v43, 0.0 }
 0x1fe   : > { %5621 = vst.msk [vmem:[%s8005_s13 + $0x104] sm:$0xf] %vm737_vm4, %v5819_v60  ;;  %v4868_v41 = vsel %vm1785_vm5, %v4836_v48, 0.0 }
 0x1ff   : > { %v4496_v16 = vadd.f32 %v4495_v9, %v4494_v50  ;;  %v4869_v23 = vadd.f32 %v4868_v41, %v4867_v7 }
 0x200   : > { %v6258_v28 = vpop.f32.mrb[68].mxu0 }
 0x201   : > { %v6390_v47 = vpop.f32.mrb[16].mxu1  ;;  %v4871_v57 = vadd.f32 %v4870_v14, %v4869_v23  ;;  %v5824_v58 = vpack.c.bf16 %v6258_v28, %v6258_v28  ;;  %v2776_v44 = vpop.f32.mrb[69].mxu0  ;;  %v8561_v51 = vsel %vm1785_vm5, %v6258_v28, 0.0  ;;  %v4498_v36 = vadd.f32 %v4497_v10, %v4496_v16 }
 0x202   : > { %v5852_v4 = vpack.c.bf16 %v6390_v47, %v6390_v47  ;;  %v3551_v12 = vpop.f32.mrb[17].mxu1  ;;  %v5822_v49 = vpack.c.bf16 %v2776_v44, %v2776_v44  ;;  %v8555_v15 = vpop.f32.mrb[70].mxu0  ;;  %v4565_v35 = vsel %vm1785_vm5, %v6390_v47, 0.0  ;;  %v4939_v2 = vmul.f32 %v6390_v47, %v6390_v47 }
 0x203   : > { %v5850_v53 = vpack.c.bf16 %v3551_v12, %v3551_v12  ;;  %v4937_v59 = vmul.f32 %v3551_v12, %v3551_v12  ;;  %v6391_v25 = vpop.f32.mrb[18].mxu1  ;;  %5626 = vst.msk [vmem:[%s8005_s13 + $0x118] sm:$0xf] %vm737_vm4, %v5824_v58  ;;  %v2779_v6 = vpop.f32.mrb[71].mxu0  ;;  %v4562_v30 = vsel %vm1785_vm5, %v3551_v12, 0.0  ;;  %v4499_v27 = vsel %vm1785_vm5, %v2776_v44, 0.0 }
 0x204   : > { %5686 = vst.msk [vmem:[%s8005_s13 + $0x188] sm:$0xf] %vm737_vm4, %v5852_v4  ;;  %v5853_v45 = vpack.c.bf16 %v6391_v25, %v6391_v25  ;;  %v3554_v55 = vpop.f32.mrb[19].mxu1  ;;  %5624 = vst.msk [vmem:[%s8005_s13 + $0x110] sm:$0xf] %vm737_vm4, %v5822_v49  ;;  %v4940_v62 = vmul.f32 %v6391_v25, %v6391_v25  ;;  %v4839_v33 = vmul.f32 %v2776_v44, %v2776_v44  ;;  %v4972_v22 = vsel %vm1785_vm5, %v4939_v2, 0.0 }
 0x205   : > { %5684 = vst.msk [vmem:[%s8005_s13 + $0x180] sm:$0xf] %vm737_vm4, %v5850_v53  ;;  %v5851_v13 = vpack.c.bf16 %v3554_v55, %v3554_v55  ;;  %v4563_v31 = vsel %vm1785_vm5, %v3554_v55, 0.0  ;;  %v4938_v5 = vmul.f32 %v3554_v55, %v3554_v55  ;;  %v4969_v38 = vsel %vm1785_vm5, %v4937_v59, 0.0 }
 0x206   : > { %5687 = vst.msk [vmem:[%s8005_s13 + $0x18c] sm:$0xf] %vm737_vm4, %v5853_v45  ;;  %v4564_v18 = vadd.f32 %v4563_v31, %v4562_v30  ;;  %v4873_v1 = vadd.f32 %v4872_v17, %v4871_v57  ;;  %v5825_v19 = vpack.c.bf16 %v8555_v15, %v8555_v15  ;;  %v4841_v21 = vmul.f32 %v6258_v28, %v6258_v28 }
 0x207   : > { %5685 = vst.msk [vmem:[%s8005_s13 + $0x184] sm:$0xf] %vm737_vm4, %v5851_v13  ;;  %v4970_v63 = vsel %vm1785_vm5, %v4938_v5, 0.0  ;;  %v4500_v54 = vadd.f32 %v4499_v27, %v4498_v36  ;;  %v4567_v32 = vsel %vm1785_vm5, %v6391_v25, 0.0  ;;  %v4874_v11 = vsel %vm1785_vm5, %v4839_v33, 0.0 }
 0x208   : > { %v4566_v24 = vadd.f32 %v4565_v35, %v4564_v18  ;;  %v4971_v56 = vadd.f32 %v4970_v63, %v4969_v38  ;;  %v8581_v46 = vpop.f32.mrb[72].mxu0  ;;  %5627 = vst.msk [vmem:[%s8005_s13 + $0x11c] sm:$0xf] %vm737_vm4, %v5825_v19  ;;  %v5823_v40 = vpack.c.bf16 %v2779_v6, %v2779_v6  ;;  %v4974_v26 = vsel %vm1785_vm5, %v4940_v62, 0.0 }
 0x209   : > { %v6394_v3 = vpop.f32.mrb[20].mxu1  ;;  %v8588_v34 = vpop.f32.mrb[73].mxu0  ;;  %v4501_v20 = vsel %vm1785_vm5, %v2779_v6, 0.0  ;;  %v4875_v42 = vadd.f32 %v4874_v11, %v4873_v1  ;;  %v4878_v7 = vsel %vm1785_vm5, %v4841_v21, 0.0  ;;  %v4505_v16 = vsel %vm1785_vm5, %v8555_v15, 0.0 }
 0x20a   : > { %v4973_v52 = vadd.f32 %v4972_v22, %v4971_v56  ;;  %v5856_v61 = vpack.c.bf16 %v6394_v3, %v6394_v3  ;;  %v3567_v39 = vpop.f32.mrb[21].mxu1  ;;  %v8592_v8 = vpop.f32.mrb[74].mxu0  ;;  %v4568_v37 = vadd.f32 %v4567_v32, %v4566_v24  ;;  %5625 = vst.msk [vmem:[%s8005_s13 + $0x114] sm:$0xf] %vm737_vm4, %v5823_v40  ;;  %v4943_v14 = vmul.f32 %v6394_v3, %v6394_v3 }
 0x20b   : > { %v5854_v60 = vpack.c.bf16 %v3567_v39, %v3567_v39  ;;  %v4569_v48 = vsel %vm1785_vm5, %v3567_v39, 0.0  ;;  %v6395_v50 = vpop.f32.mrb[22].mxu1  ;;  %v8597_v9 = vpop.f32.mrb[75].mxu0  ;;  %v4941_v41 = vmul.f32 %v3567_v39, %v3567_v39  ;;  %v4842_v47 = vmul.f32 %v8555_v15, %v8555_v15 }
 0x20c   : > { %5690 = vst.msk [vmem:[%s8005_s13 + $0x198] sm:$0xf] %vm737_vm4, %v5856_v61  ;;  %v4975_v43 = vadd.f32 %v4974_v26, %v4973_v52  ;;  %v3570_v23 = vpop.f32.mrb[23].mxu1  ;;  %v4570_v28 = vadd.f32 %v4569_v48, %v4568_v37  ;;  %v5857_v57 = vpack.c.bf16 %v6395_v50, %v6395_v50  ;;  %v4502_v44 = vadd.f32 %v4501_v20, %v4500_v54 }
 0x20d   : > { %5688 = vst.msk [vmem:[%s8005_s13 + $0x190] sm:$0xf] %vm737_vm4, %v5854_v60  ;;  %v4976_v58 = vsel %vm1785_vm5, %v4941_v41, 0.0  ;;  %v4840_v4 = vmul.f32 %v2779_v6, %v2779_v6  ;;  %v5855_v12 = vpack.c.bf16 %v3570_v23, %v3570_v23  ;;  %v4944_v49 = vmul.f32 %v6395_v50, %v6395_v50 }
 0x20e   : > { %v4977_v10 = vadd.f32 %v4976_v58, %v4975_v43  ;;  %5691 = vst.msk [vmem:[%s8005_s13 + $0x19c] sm:$0xf] %vm737_vm4, %v5857_v57  ;;  %v4571_v53 = vsel %vm1785_vm5, %v3570_v23, 0.0  ;;  %v4942_v59 = vmul.f32 %v3570_v23, %v3570_v23  ;;  %v4504_v17 = vadd.f32 %v8561_v51, %v4502_v44 }
 0x20f   : > { %v4876_v25 = vsel %vm1785_vm5, %v4840_v4, 0.0  ;;  %5689 = vst.msk [vmem:[%s8005_s13 + $0x194] sm:$0xf] %vm737_vm4, %v5855_v12  ;;  %v4572_v15 = vadd.f32 %v4571_v53, %v4570_v28  ;;  %v5828_v35 = vpack.c.bf16 %v8581_v46, %v8581_v46  ;;  %v4573_v2 = vsel %vm1785_vm5, %v6394_v3, 0.0 }
 0x210   : > { %v8618_v6 = vpop.f32.mrb[76].mxu0  ;;  %v4980_v30 = vsel %vm1785_vm5, %v4943_v14, 0.0  ;;  %v4877_v45 = vadd.f32 %v4876_v25, %v4875_v42  ;;  %v4978_v55 = vsel %vm1785_vm5, %v4942_v59, 0.0  ;;  %v4880_v13 = vsel %vm1785_vm5, %v4842_v47, 0.0 }
 0x211   : > { %v6398_v62 = vpop.f32.mrb[24].mxu1  ;;  %v8623_v51 = vpop.f32.mrb[77].mxu0  ;;  %v4574_v31 = vadd.f32 %v4573_v2, %v4572_v15  ;;  %v4979_v5 = vadd.f32 %v4978_v55, %v4977_v10  ;;  %5630 = vst.msk [vmem:[%s8005_s13 + $0x128] sm:$0xf] %vm737_vm4, %v5828_v35  ;;  %v4575_v27 = vsel %vm1785_vm5, %v6395_v50, 0.0  ;;  %v4982_v63 = vsel %vm1785_vm5, %v4944_v49, 0.0 }
 0x212   : > { %v5860_v38 = vpack.c.bf16 %v6398_v62, %v6398_v62  ;;  %v3583_v18 = vpop.f32.mrb[25].mxu1  ;;  %v8628_v36 = vpop.f32.mrb[78].mxu0  ;;  %v4879_v33 = vadd.f32 %v4878_v7, %v4877_v45  ;;  %v5826_v1 = vpack.c.bf16 %v8588_v34, %v8588_v34  ;;  %v4506_v21 = vadd.f32 %v4505_v16, %v4504_v17 }
 0x213   : > { %v6399_v19 = vpop.f32.mrb[26].mxu1  ;;  %v8634_v24 = vpop.f32.mrb[79].mxu0  ;;  %v4981_v56 = vadd.f32 %v4980_v30, %v4979_v5  ;;  %v4507_v54 = vsel %vm1785_vm5, %v8588_v34, 0.0  ;;  %v4843_v22 = vmul.f32 %v8588_v34, %v8588_v34  ;;  %v4845_v3 = vmul.f32 %v8581_v46, %v8581_v46 }
 0x214   : > { %5694 = vst.msk [vmem:[%s8005_s13 + $0x1a8] sm:$0xf] %vm737_vm4, %v5860_v38  ;;  %v3586_v32 = vpop.f32.mrb[27].mxu1  ;;  %5628 = vst.msk [vmem:[%s8005_s13 + $0x120] sm:$0xf] %vm737_vm4, %v5826_v1  ;;  %v4881_v11 = vadd.f32 %v4880_v13, %v4879_v33  ;;  %v5858_v40 = vpack.c.bf16 %v3583_v18, %v3583_v18  ;;  %v4576_v26 = vadd.f32 %v4575_v27, %v4574_v31  ;;  %v4577_v39 = vsel %vm1785_vm5, %v3583_v18, 0.0 }
 0x215   : > { %v4508_v52 = vadd.f32 %v4507_v54, %v4506_v21  ;;  %v4882_v61 = vsel %vm1785_vm5, %v4843_v22, 0.0  ;;  %v4945_v20 = vmul.f32 %v3583_v18, %v3583_v18  ;;  %v4983_v60 = vadd.f32 %v4982_v63, %v4981_v56 }
 0x216   : > { %v4883_v42 = vadd.f32 %v4882_v61, %v4881_v11  ;;  %5692 = vst.msk [vmem:[%s8005_s13 + $0x1a0] sm:$0xf] %vm737_vm4, %v5858_v40  ;;  %v4578_v34 = vadd.f32 %v4577_v39, %v4576_v26  ;;  %v5829_v37 = vpack.c.bf16 %v8592_v8, %v8592_v8  ;;  %v4511_v48 = vsel %vm1785_vm5, %v8581_v46, 0.0 }
 0x217   : > { %v4947_v50 = vmul.f32 %v6398_v62, %v6398_v62  ;;  %v4984_v7 = vsel %vm1785_vm5, %v4945_v20, 0.0  ;;  %v5861_v41 = vpack.c.bf16 %v6399_v19, %v6399_v19  ;;  %v4886_v16 = vsel %vm1785_vm5, %v4845_v3, 0.0 }
 0x218   : > { %v8655_v43 = vpop.f32.mrb[80].mxu0  ;;  %v4581_v23 = vsel %vm1785_vm5, %v6398_v62, 0.0  ;;  %v4985_v14 = vadd.f32 %v4984_v7, %v4983_v60  ;;  %5631 = vst.msk [vmem:[%s8005_s13 + $0x12c] sm:$0xf] %vm737_vm4, %v5829_v37  ;;  %v5827_v28 = vpack.c.bf16 %v8597_v9, %v8597_v9  ;;  %v4846_v57 = vmul.f32 %v8592_v8, %v8592_v8 }
 0x219   : > { %v8663_v47 = vpop.f32.mrb[28].mxu1  ;;  %v8665_v46 = vpop.f32.mrb[81].mxu0  ;;  %5695 = vst.msk [vmem:[%s8005_s13 + $0x1ac] sm:$0xf] %vm737_vm4, %v5861_v41  ;;  %v4509_v58 = vsel %vm1785_vm5, %v8597_v9, 0.0  ;;  %v4844_v44 = vmul.f32 %v8597_v9, %v8597_v9  ;;  %v5859_v4 = vpack.c.bf16 %v3586_v32, %v3586_v32  ;;  %v4948_v49 = vmul.f32 %v6399_v19, %v6399_v19 }
 0x21a   : > { %v3599_v12 = vpop.f32.mrb[29].mxu1  ;;  %v8675_v10 = vpop.f32.mrb[82].mxu0  ;;  %5629 = vst.msk [vmem:[%s8005_s13 + $0x124] sm:$0xf] %vm737_vm4, %v5827_v28  ;;  %v4510_v53 = vadd.f32 %v4509_v58, %v4508_v52  ;;  %v4579_v59 = vsel %vm1785_vm5, %v3586_v32, 0.0  ;;  %v4946_v17 = vmul.f32 %v3586_v32, %v3586_v32  ;;  %v4988_v35 = vsel %vm1785_vm5, %v4947_v50, 0.0 }
 0x21b   : > { %v8680_v25 = vpop.f32.mrb[30].mxu1  ;;  %v8682_v15 = vpop.f32.mrb[83].mxu0  ;;  %v4884_v9 = vsel %vm1785_vm5, %v4844_v44, 0.0  ;;  %5693 = vst.msk [vmem:[%s8005_s13 + $0x1a4] sm:$0xf] %vm737_vm4, %v5859_v4  ;;  %v4580_v2 = vadd.f32 %v4579_v59, %v4578_v34  ;;  %v5832_v30 = vpack.c.bf16 %v8618_v6, %v8618_v6  ;;  %v4513_v55 = vsel %vm1785_vm5, %v8592_v8, 0.0 }
 0x21c   : > { %v8690_v45 = vpop.f32.mrb[31].mxu1  ;;  %v4512_v62 = vadd.f32 %v4511_v48, %v4510_v53  ;;  %v4885_v13 = vadd.f32 %v4884_v9, %v4883_v42  ;;  %v4986_v31 = vsel %vm1785_vm5, %v4946_v17, 0.0  ;;  %v4583_v5 = vsel %vm1785_vm5, %v6399_v19, 0.0 }
 0x21d   : > { %v4582_v38 = vadd.f32 %v4581_v23, %v4580_v2  ;;  %v4987_v18 = vadd.f32 %v4986_v31, %v4985_v14  ;;  %5634 = vst.msk [vmem:[%s8005_s13 + $0x138] sm:$0xf] %vm737_vm4, %v5832_v30  ;;  %v5864_v27 = vpack.c.bf16 %v8663_v47, %v8663_v47  ;;  %v4888_v63 = vsel %vm1785_vm5, %v4846_v57, 0.0 }
 0x21e   : > { %v4990_v33 = vsel %vm1785_vm5, %v4948_v49, 0.0  ;;  %v4887_v1 = vadd.f32 %v4886_v16, %v4885_v13  ;;  %v5830_v8 = vpack.c.bf16 %v8623_v51, %v8623_v51  ;;  %v4514_v19 = vadd.f32 %v4513_v55, %v4512_v62 }
 0x21f   : > { %v4989_v56 = vadd.f32 %v4988_v35, %v4987_v18  ;;  %5698 = vst.msk [vmem:[%s8005_s13 + $0x1b8] sm:$0xf] %vm737_vm4, %v5864_v27  ;;  %v4515_v21 = vsel %vm1785_vm5, %v8623_v51, 0.0  ;;  %v4847_v54 = vmul.f32 %v8623_v51, %v8623_v51  ;;  %v4849_v32 = vmul.f32 %v8618_v6, %v8618_v6 }
 0x220   : > { %v8710_v22 = vpop.f32.mrb[84].mxu0  ;;  %5632 = vst.msk [vmem:[%s8005_s13 + $0x130] sm:$0xf] %vm737_vm4, %v5830_v8  ;;  %v4889_v3 = vadd.f32 %v4888_v63, %v4887_v1  ;;  %v5862_v11 = vpack.c.bf16 %v3599_v12, %v3599_v12  ;;  %v4584_v40 = vadd.f32 %v4583_v5, %v4582_v38  ;;  %v4516_v61 = vadd.f32 %v4515_v21, %v4514_v19 }
 0x221   : > { %v8716_v26 = vpop.f32.mrb[32].mxu1  ;;  %v8718_v52 = vpop.f32.mrb[85].mxu0  ;;  %v4890_v39 = vsel %vm1785_vm5, %v4847_v54, 0.0  ;;  %v4585_v51 = vsel %vm1785_vm5, %v3599_v12, 0.0  ;;  %v4949_v20 = vmul.f32 %v3599_v12, %v3599_v12  ;;  %v4991_v48 = vadd.f32 %v4990_v33, %v4989_v56 }
 0x222   : > { %v8722_v42 = vpop.f32.mrb[33].mxu1  ;;  %v8724_v34 = vpop.f32.mrb[86].mxu0  ;;  %v4891_v60 = vadd.f32 %v4890_v39, %v4889_v3  ;;  %5696 = vst.msk [vmem:[%s8005_s13 + $0x1b0] sm:$0xf] %vm737_vm4, %v5862_v11  ;;  %v4586_v37 = vadd.f32 %v4585_v51, %v4584_v40  ;;  %v5833_v50 = vpack.c.bf16 %v8628_v36, %v8628_v36  ;;  %v4519_v16 = vsel %vm1785_vm5, %v8618_v6, 0.0 }
 0x223   : > { %v8730_v7 = vpop.f32.mrb[34].mxu1  ;;  %v8732_v41 = vpop.f32.mrb[87].mxu0  ;;  %v4951_v23 = vmul.f32 %v8663_v47, %v8663_v47  ;;  %v4992_v14 = vsel %vm1785_vm5, %v4949_v20, 0.0  ;;  %v5865_v28 = vpack.c.bf16 %v8680_v25, %v8680_v25  ;;  %v4894_v58 = vsel %vm1785_vm5, %v4849_v32, 0.0 }
 0x224   : > { %v8741_v57 = vpop.f32.mrb[35].mxu1  ;;  %v4589_v44 = vsel %vm1785_vm5, %v8663_v47, 0.0  ;;  %v4993_v4 = vadd.f32 %v4992_v14, %v4991_v48  ;;  %5635 = vst.msk [vmem:[%s8005_s13 + $0x13c] sm:$0xf] %vm737_vm4, %v5833_v50  ;;  %v5831_v6 = vpack.c.bf16 %v8634_v24, %v8634_v24  ;;  %v4850_v12 = vmul.f32 %v8628_v36, %v8628_v36 }
 0x225   : > { %5699 = vst.msk [vmem:[%s8005_s13 + $0x1bc] sm:$0xf] %vm737_vm4, %v5865_v28  ;;  %v4517_v49 = vsel %vm1785_vm5, %v8634_v24, 0.0  ;;  %v4848_v53 = vmul.f32 %v8634_v24, %v8634_v24  ;;  %v5863_v47 = vpack.c.bf16 %v8690_v45, %v8690_v45  ;;  %v4952_v59 = vmul.f32 %v8680_v25, %v8680_v25 }
 0x226   : > { %5633 = vst.msk [vmem:[%s8005_s13 + $0x134] sm:$0xf] %vm737_vm4, %v5831_v6  ;;  %v4518_v17 = vadd.f32 %v4517_v49, %v4516_v61  ;;  %v4587_v35 = vsel %vm1785_vm5, %v8690_v45, 0.0  ;;  %v4950_v9 = vmul.f32 %v8690_v45, %v8690_v45  ;;  %v4996_v2 = vsel %vm1785_vm5, %v4951_v23, 0.0 }
 0x227   : > { %v4892_v24 = vsel %vm1785_vm5, %v4848_v53, 0.0  ;;  %5697 = vst.msk [vmem:[%s8005_s13 + $0x1b4] sm:$0xf] %vm737_vm4, %v5863_v47  ;;  %v4588_v30 = vadd.f32 %v4587_v35, %v4586_v37  ;;  %v5836_v55 = vpack.c.bf16 %v8655_v43, %v8655_v43  ;;  %v4521_v13 = vsel %vm1785_vm5, %v8628_v36, 0.0 }
 0x228   : > { %v8774_v62 = vpop.f32.mrb[88].mxu0  ;;  %v4520_v31 = vadd.f32 %v4519_v16, %v4518_v17  ;;  %v4893_v5 = vadd.f32 %v4892_v24, %v4891_v60  ;;  %v4994_v45 = vsel %vm1785_vm5, %v4950_v9, 0.0  ;;  %v4591_v27 = vsel %vm1785_vm5, %v8680_v25, 0.0 }
 0x229   : > { %v8779_v38 = vpop.f32.mrb[36].mxu1  ;;  %v8781_v18 = vpop.f32.mrb[89].mxu0  ;;  %v4590_v63 = vadd.f32 %v4589_v44, %v4588_v30  ;;  %v4995_v33 = vadd.f32 %v4994_v45, %v4993_v4  ;;  %5638 = vst.msk [vmem:[%s8005_s13 + $0x148] sm:$0xf] %vm737_vm4, %v5836_v55  ;;  %v5868_v1 = vpack.c.bf16 %v8716_v26, %v8716_v26  ;;  %v4896_v56 = vsel %vm1785_vm5, %v4850_v12, 0.0 }
 0x22a   : > { %v8789_v36 = vpop.f32.mrb[37].mxu1  ;;  %v8791_v8 = vpop.f32.mrb[90].mxu0  ;;  %v4998_v19 = vsel %vm1785_vm5, %v4952_v59, 0.0  ;;  %v4895_v21 = vadd.f32 %v4894_v58, %v4893_v5  ;;  %v5834_v25 = vpack.c.bf16 %v8665_v46, %v8665_v46  ;;  %v4522_v11 = vadd.f32 %v4521_v13, %v4520_v31 }
 0x22b   : > { %v8797_v54 = vpop.f32.mrb[38].mxu1  ;;  %v8799_v32 = vpop.f32.mrb[91].mxu0  ;;  %v4997_v3 = vadd.f32 %v4996_v2, %v4995_v33  ;;  %5702 = vst.msk [vmem:[%s8005_s13 + $0x1c8] sm:$0xf] %vm737_vm4, %v5868_v1  ;;  %v4523_v40 = vsel %vm1785_vm5, %v8665_v46, 0.0  ;;  %v4851_v61 = vmul.f32 %v8665_v46, %v8665_v46  ;;  %v4853_v51 = vmul.f32 %v8655_v43, %v8655_v43 }
 0x22c   : > { %v8807_v39 = vpop.f32.mrb[39].mxu1  ;;  %5636 = vst.msk [vmem:[%s8005_s13 + $0x140] sm:$0xf] %vm737_vm4, %v5834_v25  ;;  %v4897_v20 = vadd.f32 %v4896_v56, %v4895_v21  ;;  %v5866_v60 = vpack.c.bf16 %v8722_v42, %v8722_v42  ;;  %v4592_v37 = vadd.f32 %v4591_v27, %v4590_v63  ;;  %v4524_v48 = vadd.f32 %v4523_v40, %v4522_v11 }
 0x22d   : > { %v4898_v50 = vsel %vm1785_vm5, %v4851_v61, 0.0  ;;  %v4593_v16 = vsel %vm1785_vm5, %v8722_v42, 0.0  ;;  %v4953_v46 = vmul.f32 %v8722_v42, %v8722_v42  ;;  %v4999_v28 = vadd.f32 %v4998_v19, %v4997_v3 }
 0x22e   : > { %v4899_v23 = vadd.f32 %v4898_v50, %v4897_v20  ;;  %5700 = vst.msk [vmem:[%s8005_s13 + $0x1c0] sm:$0xf] %vm737_vm4, %v5866_v60  ;;  %v4594_v14 = vadd.f32 %v4593_v16, %v4592_v37  ;;  %v5837_v58 = vpack.c.bf16 %v8675_v10, %v8675_v10  ;;  %v4527_v44 = vsel %vm1785_vm5, %v8655_v43, 0.0 }
 0x22f   : > { %v4955_v4 = vmul.f32 %v8716_v26, %v8716_v26  ;;  %v5000_v6 = vsel %vm1785_vm5, %v4953_v46, 0.0  ;;  %v5869_v42 = vpack.c.bf16 %v8730_v7, %v8730_v7  ;;  %v4902_v49 = vsel %vm1785_vm5, %v4853_v51, 0.0 }
 0x230   : > { %v8831_v12 = vpop.f32.mrb[92].mxu0  ;;  %v4597_v53 = vsel %vm1785_vm5, %v8716_v26, 0.0  ;;  %v5001_v47 = vadd.f32 %v5000_v6, %v4999_v28  ;;  %5639 = vst.msk [vmem:[%s8005_s13 + $0x14c] sm:$0xf] %vm737_vm4, %v5837_v58  ;;  %v5835_v43 = vpack.c.bf16 %v8682_v15, %v8682_v15  ;;  %v4854_v35 = vmul.f32 %v8675_v10, %v8675_v10 }
 0x231   : > { %v8840_v59 = vpop.f32.mrb[40].mxu1  ;;  %v8842_v17 = vpop.f32.mrb[93].mxu0  ;;  %5703 = vst.msk [vmem:[%s8005_s13 + $0x1cc] sm:$0xf] %vm737_vm4, %v5869_v42  ;;  %v4525_v9 = vsel %vm1785_vm5, %v8682_v15, 0.0  ;;  %v4852_v26 = vmul.f32 %v8682_v15, %v8682_v15  ;;  %v5867_v2 = vpack.c.bf16 %v8741_v57, %v8741_v57  ;;  %v4956_v55 = vmul.f32 %v8730_v7, %v8730_v7 }
 0x232   : > { %v8854_v24 = vpop.f32.mrb[41].mxu1  ;;  %v8856_v30 = vpop.f32.mrb[94].mxu0  ;;  %5637 = vst.msk [vmem:[%s8005_s13 + $0x144] sm:$0xf] %vm737_vm4, %v5835_v43  ;;  %v4526_v13 = vadd.f32 %v4525_v9, %v4524_v48  ;;  %v4595_v31 = vsel %vm1785_vm5, %v8741_v57, 0.0  ;;  %v4954_v5 = vmul.f32 %v8741_v57, %v8741_v57  ;;  %v5004_v27 = vsel %vm1785_vm5, %v4955_v4, 0.0 }
 0x233   : > { %v8866_v15 = vpop.f32.mrb[42].mxu1  ;;  %v8868_v45 = vpop.f32.mrb[95].mxu0  ;;  %v4900_v63 = vsel %vm1785_vm5, %v4852_v26, 0.0  ;;  %5701 = vst.msk [vmem:[%s8005_s13 + $0x1c4] sm:$0xf] %vm737_vm4, %v5867_v2  ;;  %v4596_v33 = vadd.f32 %v4595_v31, %v4594_v14  ;;  %v5840_v1 = vpack.c.bf16 %v8710_v22, %v8710_v22  ;;  %v4529_v57 = vsel %vm1785_vm5, %v8675_v10, 0.0 }
 0x234   : > { %v8876_v56 = vpop.f32.mrb[43].mxu1  ;;  %v4528_v19 = vadd.f32 %v4527_v44, %v4526_v13  ;;  %v4901_v21 = vadd.f32 %v4900_v63, %v4899_v23  ;;  %v5002_v25 = vsel %vm1785_vm5, %v4954_v5, 0.0  ;;  %v4599_v3 = vsel %vm1785_vm5, %v8730_v7, 0.0 }
 0x235   : > { %v4598_v11 = vadd.f32 %v4597_v53, %v4596_v33  ;;  %v5003_v40 = vadd.f32 %v5002_v25, %v5001_v47  ;;  %5642 = vst.msk [vmem:[%s8005_s13 + $0x158] sm:$0xf] %vm737_vm4, %v5840_v1  ;;  %v5872_v61 = vpack.c.bf16 %v8779_v38, %v8779_v38  ;;  %v4904_v51 = vsel %vm1785_vm5, %v4854_v35, 0.0 }
 0x236   : > { %v5006_v20 = vsel %vm1785_vm5, %v4956_v55, 0.0  ;;  %v4903_v10 = vadd.f32 %v4902_v49, %v4901_v21  ;;  %v5838_v60 = vpack.c.bf16 %v8718_v52, %v8718_v52  ;;  %v4530_v7 = vadd.f32 %v4529_v57, %v4528_v19 }
 0x237   : > { %v5005_v37 = vadd.f32 %v5004_v27, %v5003_v40  ;;  %5706 = vst.msk [vmem:[%s8005_s13 + $0x1d8] sm:$0xf] %vm737_vm4, %v5872_v61  ;;  %v4531_v48 = vsel %vm1785_vm5, %v8718_v52, 0.0  ;;  %v4855_v50 = vmul.f32 %v8718_v52, %v8718_v52  ;;  %v4857_v16 = vmul.f32 %v8710_v22, %v8710_v22 }
 0x238   : > { %5640 = vst.msk [vmem:[%s8005_s13 + $0x150] sm:$0xf] %vm737_vm4, %v5838_v60  ;;  %v4905_v46 = vadd.f32 %v4904_v51, %v4903_v10  ;;  %v5870_v23 = vpack.c.bf16 %v8789_v36, %v8789_v36  ;;  %v4600_v14 = vadd.f32 %v4599_v3, %v4598_v11  ;;  %v4532_v58 = vadd.f32 %v4531_v48, %v4530_v7 }
 0x239   : > { %v8903_v28 = vpop.f32.mrb[44].mxu1  ;;  %v4906_v44 = vsel %vm1785_vm5, %v4855_v50, 0.0  ;;  %v4601_v4 = vsel %vm1785_vm5, %v8789_v36, 0.0  ;;  %v4957_v52 = vmul.f32 %v8789_v36, %v8789_v36  ;;  %v5007_v53 = vadd.f32 %v5006_v20, %v5005_v37 }
 0x23a   : > { %v8910_v6 = vpop.f32.mrb[45].mxu1  ;;  %v4907_v42 = vadd.f32 %v4906_v44, %v4905_v46  ;;  %5704 = vst.msk [vmem:[%s8005_s13 + $0x1d0] sm:$0xf] %vm737_vm4, %v5870_v23  ;;  %v4602_v49 = vadd.f32 %v4601_v4, %v4600_v14  ;;  %v5841_v47 = vpack.c.bf16 %v8724_v34, %v8724_v34  ;;  %v4535_v35 = vsel %vm1785_vm5, %v8710_v22, 0.0 }
 0x23b   : > { %v8916_v43 = vpop.f32.mrb[46].mxu1  ;;  %v4959_v36 = vmul.f32 %v8779_v38, %v8779_v38  ;;  %v5008_v9 = vsel %vm1785_vm5, %v4957_v52, 0.0  ;;  %v5873_v26 = vpack.c.bf16 %v8797_v54, %v8797_v54  ;;  %v4910_v55 = vsel %vm1785_vm5, %v4857_v16, 0.0 }
 0x23c   : > { %v8925_v2 = vpop.f32.mrb[47].mxu1  ;;  %v4605_v13 = vsel %vm1785_vm5, %v8779_v38, 0.0  ;;  %v5009_v31 = vadd.f32 %v5008_v9, %v5007_v53  ;;  %5643 = vst.msk [vmem:[%s8005_s13 + $0x15c] sm:$0xf] %vm737_vm4, %v5841_v47  ;;  %v5839_v22 = vpack.c.bf16 %v8732_v41, %v8732_v41  ;;  %v4858_v5 = vmul.f32 %v8724_v34, %v8724_v34 }
 0x23d   : > { %5707 = vst.msk [vmem:[%s8005_s13 + $0x1dc] sm:$0xf] %vm737_vm4, %v5873_v26  ;;  %v4533_v27 = vsel %vm1785_vm5, %v8732_v41, 0.0  ;;  %v4856_v63 = vmul.f32 %v8732_v41, %v8732_v41  ;;  %v5871_v38 = vpack.c.bf16 %v8807_v39, %v8807_v39  ;;  %v4960_v33 = vmul.f32 %v8797_v54, %v8797_v54 }
 0x23e   : > { %5641 = vst.msk [vmem:[%s8005_s13 + $0x154] sm:$0xf] %vm737_vm4, %v5839_v22  ;;  %v4534_v1 = vadd.f32 %v4533_v27, %v4532_v58  ;;  %v4603_v57 = vsel %vm1785_vm5, %v8807_v39, 0.0  ;;  %v4958_v19 = vmul.f32 %v8807_v39, %v8807_v39  ;;  %v5012_v21 = vsel %vm1785_vm5, %v4959_v36, 0.0 }
 0x23f   : > { %v4908_v41 = vsel %vm1785_vm5, %v4856_v63, 0.0  ;;  %5705 = vst.msk [vmem:[%s8005_s13 + $0x1d4] sm:$0xf] %vm737_vm4, %v5871_v38  ;;  %v4604_v25 = vadd.f32 %v4603_v57, %v4602_v49  ;;  %v5844_v3 = vpack.c.bf16 %v8774_v62, %v8774_v62  ;;  %v4537_v11 = vsel %vm1785_vm5, %v8724_v34, 0.0 }
 0x240   : > { %v4536_v40 = vadd.f32 %v4535_v35, %v4534_v1  ;;  %v4909_v61 = vadd.f32 %v4908_v41, %v4907_v42  ;;  %v5010_v51 = vsel %vm1785_vm5, %v4958_v19, 0.0  ;;  %v4607_v39 = vsel %vm1785_vm5, %v8797_v54, 0.0 }
 0x241   : > { %v4606_v20 = vadd.f32 %v4605_v13, %v4604_v25  ;;  %v5011_v10 = vadd.f32 %v5010_v51, %v5009_v31  ;;  %5646 = vst.msk [vmem:[%s8005_s13 + $0x168] sm:$0xf] %vm737_vm4, %v5844_v3  ;;  %v5876_v60 = vpack.c.bf16 %v8840_v59, %v8840_v59  ;;  %v4912_v37 = vsel %vm1785_vm5, %v4858_v5, 0.0 }
 0x242   : > { %v5014_v7 = vsel %vm1785_vm5, %v4960_v33, 0.0  ;;  %v4911_v34 = vadd.f32 %v4910_v55, %v4909_v61  ;;  %v5842_v48 = vpack.c.bf16 %v8781_v18, %v8781_v18  ;;  %v4538_v54 = vadd.f32 %v4537_v11, %v4536_v40 }
 0x243   : > { %v5013_v50 = vadd.f32 %v5012_v21, %v5011_v10  ;;  %5710 = vst.msk [vmem:[%s8005_s13 + $0x1e8] sm:$0xf] %vm737_vm4, %v5876_v60  ;;  %v4539_v16 = vsel %vm1785_vm5, %v8781_v18, 0.0  ;;  %v4859_v46 = vmul.f32 %v8781_v18, %v8781_v18  ;;  %v4861_v23 = vmul.f32 %v8774_v62, %v8774_v62 }
 0x244   : > { %5644 = vst.msk [vmem:[%s8005_s13 + $0x160] sm:$0xf] %vm737_vm4, %v5842_v48  ;;  %v4913_v14 = vadd.f32 %v4912_v37, %v4911_v34  ;;  %v5874_v58 = vpack.c.bf16 %v8854_v24, %v8854_v24  ;;  %v4608_v44 = vadd.f32 %v4607_v39, %v4606_v20  ;;  %v4540_v4 = vadd.f32 %v4539_v16, %v4538_v54 }
 0x245   : > { %v4914_v52 = vsel %vm1785_vm5, %v4859_v46, 0.0  ;;  %v4609_v42 = vsel %vm1785_vm5, %v8854_v24, 0.0  ;;  %v4961_v18 = vmul.f32 %v8854_v24, %v8854_v24  ;;  %v5015_v47 = vadd.f32 %v5014_v7, %v5013_v50 }
 0x246   : > { %v4915_v49 = vadd.f32 %v4914_v52, %v4913_v14  ;;  %5708 = vst.msk [vmem:[%s8005_s13 + $0x1e0] sm:$0xf] %vm737_vm4, %v5874_v58  ;;  %v4610_v53 = vadd.f32 %v4609_v42, %v4608_v44  ;;  %v5845_v35 = vpack.c.bf16 %v8791_v8, %v8791_v8  ;;  %v4963_v36 = vmul.f32 %v8840_v59, %v8840_v59 }
 0x247   : > { %v5016_v9 = vsel %vm1785_vm5, %v4961_v18, 0.0  ;;  %v5877_v26 = vpack.c.bf16 %v8866_v15, %v8866_v15  ;;  %v4543_v24 = vsel %vm1785_vm5, %v8774_v62, 0.0  ;;  %v4613_v55 = vsel %vm1785_vm5, %v8840_v59, 0.0 }
 0x248   : > { %v5017_v13 = vadd.f32 %v5016_v9, %v5015_v47  ;;  %5647 = vst.msk [vmem:[%s8005_s13 + $0x16c] sm:$0xf] %vm737_vm4, %v5845_v35  ;;  %v5843_v31 = vpack.c.bf16 %v8799_v32, %v8799_v32  ;;  %v4918_v22 = vsel %vm1785_vm5, %v4861_v23, 0.0  ;;  %v4541_v5 = vsel %vm1785_vm5, %v8799_v32, 0.0 }
 0x249   : > { %5711 = vst.msk [vmem:[%s8005_s13 + $0x1ec] sm:$0xf] %vm737_vm4, %v5877_v26  ;;  %v4860_v62 = vmul.f32 %v8799_v32, %v8799_v32  ;;  %v5875_v59 = vpack.c.bf16 %v8876_v56, %v8876_v56  ;;  %v4862_v27 = vmul.f32 %v8791_v8, %v8791_v8  ;;  %v4542_v63 = vadd.f32 %v4541_v5, %v4540_v4 }
 0x24a   : > { %5645 = vst.msk [vmem:[%s8005_s13 + $0x164] sm:$0xf] %vm737_vm4, %v5843_v31  ;;  %v4611_v38 = vsel %vm1785_vm5, %v8876_v56, 0.0  ;;  %v4962_v33 = vmul.f32 %v8876_v56, %v8876_v56  ;;  %v5020_v1 = vsel %vm1785_vm5, %v4963_v36, 0.0  ;;  %v5848_v19 = vpack.c.bf16 %v8831_v12, %v8831_v12 }
 0x24b   : > { %v4916_v32 = vsel %vm1785_vm5, %v4860_v62, 0.0  ;;  %5709 = vst.msk [vmem:[%s8005_s13 + $0x1e4] sm:$0xf] %vm737_vm4, %v5875_v59  ;;  %v4612_v57 = vadd.f32 %v4611_v38, %v4610_v53  ;;  %v4964_v21 = vmul.f32 %v8866_v15, %v8866_v15  ;;  %v4544_v41 = vadd.f32 %v4543_v24, %v4542_v63 }
 0x24c   : > { %v4917_v25 = vadd.f32 %v4916_v32, %v4915_v49  ;;  %v5018_v3 = vsel %vm1785_vm5, %v4962_v33, 0.0  ;;  %v4545_v56 = vsel %vm1785_vm5, %v8791_v8, 0.0  ;;  %5650 = vst.msk [vmem:[%s8005_s13 + $0x178] sm:$0xf] %vm737_vm4, %v5848_v19  ;;  %v5880_v61 = vpack.c.bf16 %v8903_v28, %v8903_v28 }
 0x24d   : > { %v4614_v11 = vadd.f32 %v4613_v55, %v4612_v57  ;;  %v5019_v40 = vadd.f32 %v5018_v3, %v5017_v13  ;;  %v4920_v51 = vsel %vm1785_vm5, %v4862_v27, 0.0  ;;  %v4615_v39 = vsel %vm1785_vm5, %v8866_v15, 0.0 }
 0x24e   : > { %v4919_v20 = vadd.f32 %v4918_v22, %v4917_v25  ;;  %v5846_v10 = vpack.c.bf16 %v8842_v17, %v8842_v17  ;;  %5714 = vst.msk [vmem:[%s8005_s13 + $0x1f8] sm:$0xf] %vm737_vm4, %v5880_v61  ;;  %v4546_v8 = vadd.f32 %v4545_v56, %v4544_v41  ;;  %v4547_v37 = vsel %vm1785_vm5, %v8842_v17, 0.0 }
 0x24f   : > { %v5021_v60 = vadd.f32 %v5020_v1, %v5019_v40  ;;  %v4863_v7 = vmul.f32 %v8842_v17, %v8842_v17  ;;  %v5022_v34 = vsel %vm1785_vm5, %v4964_v21, 0.0  ;;  %v5878_v48 = vpack.c.bf16 %v8910_v6, %v8910_v6 }
 0x250   : > { %5648 = vst.msk [vmem:[%s8005_s13 + $0x170] sm:$0xf] %vm737_vm4, %v5846_v10  ;;  %v4921_v15 = vadd.f32 %v4920_v51, %v4919_v20  ;;  %v4616_v50 = vadd.f32 %v4615_v39, %v4614_v11  ;;  %v4548_v54 = vadd.f32 %v4547_v37, %v4546_v8  ;;  %v4617_v46 = vsel %vm1785_vm5, %v8910_v6, 0.0 }
 0x251   : > { %v4922_v16 = vsel %vm1785_vm5, %v4863_v7, 0.0  ;;  %v4965_v17 = vmul.f32 %v8910_v6, %v8910_v6  ;;  %5712 = vst.msk [vmem:[%s8005_s13 + $0x1f0] sm:$0xf] %vm737_vm4, %v5878_v48  ;;  %v5023_v58 = vadd.f32 %v5022_v34, %v5021_v60  ;;  %v5849_v44 = vpack.c.bf16 %v8856_v30, %v8856_v30 }
 0x252   : > { %v4923_v23 = vadd.f32 %v4922_v16, %v4921_v15  ;;  %v4618_v14 = vadd.f32 %v4617_v46, %v4616_v50  ;;  %v5881_v52 = vpack.c.bf16 %v8916_v43, %v8916_v43  ;;  %v4551_v42 = vsel %vm1785_vm5, %v8831_v12, 0.0 }
 0x253   : > { %v5024_v4 = vsel %vm1785_vm5, %v4965_v17, 0.0  ;;  %5651 = vst.msk [vmem:[%s8005_s13 + $0x17c] sm:$0xf] %vm737_vm4, %v5849_v44  ;;  %v5847_v6 = vpack.c.bf16 %v8868_v45, %v8868_v45  ;;  %v4865_v49 = vmul.f32 %v8831_v12, %v8831_v12  ;;  %v4549_v53 = vsel %vm1785_vm5, %v8868_v45, 0.0 }
 0x254   : > { %v5025_v18 = vadd.f32 %v5024_v4, %v5023_v58  ;;  %5715 = vst.msk [vmem:[%s8005_s13 + $0x1fc] sm:$0xf] %vm737_vm4, %v5881_v52  ;;  %v4864_v47 = vmul.f32 %v8868_v45, %v8868_v45  ;;  %v5879_v35 = vpack.c.bf16 %v8925_v2, %v8925_v2  ;;  %v4967_v36 = vmul.f32 %v8903_v28, %v8903_v28 }
 0x255   : > { %5649 = vst.msk [vmem:[%s8005_s13 + $0x174] sm:$0xf] %vm737_vm4, %v5847_v6  ;;  %v4550_v9 = vadd.f32 %v4549_v53, %v4548_v54  ;;  %v4619_v12 = vsel %vm1785_vm5, %v8925_v2, 0.0  ;;  %v4966_v26 = vmul.f32 %v8925_v2, %v8925_v2  ;;  %v4621_v24 = vsel %vm1785_vm5, %v8903_v28, 0.0 }
 0x256   : > { %v4866_v45 = vmul.f32 %v8856_v30, %v8856_v30  ;;  %v4924_v55 = vsel %vm1785_vm5, %v4864_v47, 0.0  ;;  %5713 = vst.msk [vmem:[%s8005_s13 + $0x1f4] sm:$0xf] %vm737_vm4, %v5879_v35  ;;  %v4620_v13 = vadd.f32 %v4619_v12, %v4618_v14  ;;  %v4968_v31 = vmul.f32 %v8916_v43, %v8916_v43 }
 0x257   : > { %v4552_v22 = vadd.f32 %v4551_v42, %v4550_v9  ;;  %v4925_v5 = vadd.f32 %v4924_v55, %v4923_v23  ;;  %v5026_v62 = vsel %vm1785_vm5, %v4966_v26, 0.0  ;;  %v4926_v2 = vsel %vm1785_vm5, %v4865_v49, 0.0 }
 0x258   : > { %v4553_v28 = vsel %vm1785_vm5, %v8856_v30, 0.0  ;;  %v4622_v59 = vadd.f32 %v4621_v24, %v4620_v13  ;;  %v5027_v27 = vadd.f32 %v5026_v62, %v5025_v18  ;;  %v5028_v63 = vsel %vm1785_vm5, %v4967_v36, 0.0 }
 0x259   : > { %v4623_v38 = vsel %vm1785_vm5, %v8916_v43, 0.0  ;;  %v4554_v33 = vadd.f32 %v4553_v28, %v4552_v22  ;;  %v4927_v1 = vadd.f32 %v4926_v2, %v4925_v5  ;;  %v4928_v32 = vsel %vm1785_vm5, %v4866_v45, 0.0 }
 0x25a   : > { %v4624_v57 = vadd.f32 %v4623_v38, %v4622_v59  ;;  %v5029_v19 = vadd.f32 %v5028_v63, %v5027_v27  ;;  %v5030_v21 = vsel %vm1785_vm5, %v4968_v31, 0.0 }
 0x25b   : > { %v4555_v41 = vrot.slane %v4554_v33, 4  ;;  %v4929_v25 = vadd.f32 %v4928_v32, %v4927_v1 }
 0x25c   : > { %v4625_v3 = vrot.slane %v4624_v57, 4  ;;  %v5031_v56 = vadd.f32 %v5030_v21, %v5029_v19 }
 0x25d   : > { %v4556_v30 = vadd.f32 %v4555_v41, %v4554_v33  ;;  %v4930_v11 = vrot.slane %v4929_v25, 4 }
 0x25e   : > { %v4626_v40 = vadd.f32 %v4625_v3, %v4624_v57  ;;  %v5032_v61 = vrot.slane %v5031_v56, 4 }
 0x25f   : > { %v4557_v51 = vrot.slane %v4556_v30, 2  ;;  %v4931_v39 = vadd.f32 %v4930_v11, %v4929_v25 }
 0x260   : > { %v4627_v20 = vrot.slane %v4626_v40, 2  ;;  %v5033_v43 = vadd.f32 %v5032_v61, %v5031_v56 }
 0x261   : > { %v4558_v10 = vadd.f32 %v4557_v51, %v4556_v30  ;;  %v4932_v60 = vrot.slane %v4931_v39, 2 }
 0x262   : > { %v4628_v8 = vadd.f32 %v4627_v20, %v4626_v40  ;;  %v5034_v37 = vrot.slane %v5033_v43, 2 }
 0x263   : > { %v4559_v7 = vrot.slane %v4558_v10, 1  ;;  %v4933_v34 = vadd.f32 %v4932_v60, %v4931_v39 }
 0x264   : > { %v4629_v15 = vrot.slane %v4628_v8, 1  ;;  %v5035_v48 = vadd.f32 %v5034_v37, %v5033_v43 }
 0x265   : > { %v4560_v50 = vadd.f32 %v4559_v7, %v4558_v10  ;;  %v4934_v54 = vrot.slane %v4933_v34, 1 }
 0x266   : > { %v5036_v16 = vrot.slane %v5035_v48, 1  ;;  %v4630_v23 = vadd.f32 %v4629_v15, %v4628_v8 }
 0x267   : > { %v4561_v46 = vadd.f32 %v4560_v50, %v8536_v29  ;;  %v4935_v17 = vadd.f32 %v4934_v54, %v4933_v34 }
 0x268   : > { %v5037_v44 = vadd.f32 %v5036_v16, %v5035_v48 }
 0x269   : > { %v4936_v14 = vadd.f32 %v4935_v17, %v8538_v0  ;;  %v4631_v58 = vadd.f32 %v4630_v23, %v4561_v46 }
 0x26b   : > { %v5038_v4 = vadd.f32 %v5037_v44, %v4936_v14  ;;  %5040 = vst.msk [vmem:[%s411_s16] sm:$0x1] %vm781_vm1, %v4631_v58 }
 0x26d   : > { %5041 = vst.msk [vmem:[%s417_s19] sm:$0x1] %vm781_vm1, %v5038_v4 }
 0x26e PF: > { %s18_s25 = sadd.s32 1, %s6671_s25   ;;  %s9292_s24 = smov %s6667_s1 }
 0x26f   : > { %p15_p5 = scmp.ge.s32.totalorder %s18_s25, 4   ;;  %s9293_s1 = smov %s9295_s26 }
 0x271   :  { %17 = sbr.rel (!%p15_p5) target bundleno = 2 (0x2), region = 110 }

</bundles_post_ra>
